<compile_context>
chip_gen: v6e
topology: v6e:2x2x1
jax: 0.10.0
libtpu: 0.0.40
codegen_flags: <defaults>
</compile_context>

<pallas_src>
import functools

import jax
import jax.numpy as jnp
from jax.experimental import pallas as pl
from jax.experimental.pallas import tpu as pltpu

LANE = 128


def _round_up(x, m):
    return (x + m - 1) // m * m


def _pick_row_tile(m, target=128):
    """Largest multiple-of-8 divisor of m that is <= target (fallback: m)."""
    best = None
    for t in range(8, min(m, target) + 1, 8):
        if m % t == 0:
            best = t
    return best if best is not None else m


def _pad_and_flatten(x_nhwc, r_rows):
    """(B,H,W,C) -> zero-pad spatial by 1 -> flatten rows -> (B, r_rows, C)."""
    b, h, w, c = x_nhwc.shape
    xp = jnp.pad(x_nhwc, ((0, 0), (1, 1), (1, 1), (0, 0)))
    xf = xp.reshape(b, (h + 2) * (w + 2), c)
    return jnp.pad(xf, ((0, 0), (0, r_rows - (h + 2) * (w + 2)), (0, 0)))


# ----------------------------------------------------------------------------
# Fused Pallas kernel: one grid step per batch image
# ----------------------------------------------------------------------------
def _distiller_fused_kernel(x_ref, w1_ref, b1_ref, w2_ref, b2_ref,
                            out_ref, sse_ref, feat_ref, *,
                            H, W, Wp, TM, CH, CH_PAD, COUT, S0):
    """conv1(student||teacher) + ReLU + fused MSE + conv2(student), one image per call.

    x_ref:    (1, R, Cin)        f32   zero-padded, row-flattened input image
    w1_ref:   (9, Cin, 2*CH_PAD) bf16  conv1 weights: student in [:CH_PAD], teacher in [CH_PAD:]
    b1_ref:   (1, 2*CH_PAD)      f32
    w2_ref:   (9, CH, COUT)      bf16  conv2 weights (student only, true channel counts)
    b2_ref:   (1, COUT)          f32
    out_ref:  (1, M, COUT)       f32   student conv2 output, flattened (H, Wp) row space
    sse_ref:  (1, 1, CH_PAD)     f32   per-batch sum of (s - t)^2 over valid positions
    feat_ref: (RF, CH)           f32   VMEM scratch: zero-bordered flattened student feature
    """
    M = H * Wp
    n_chunks = M // TM
    offs = tuple((t // 3) * Wp + (t % 3) for t in range(9))   # 3x3 taps in flat-row space
    off2 = S0 - (Wp + 1)                                      # conv2 read offset into scratch

    # Zero the feature scratch once per image: this provides both the spatial zero border
    # and zeroed padding columns conv2 relies on (feedback: zero garbage cols in-kernel).
    feat_ref[...] = jnp.zeros_like(feat_ref)
    sse_ref[...] = jnp.zeros_like(sse_ref)

    # ---- Phase 1: conv1 student||teacher (shared input reads) + ReLU + fused MSE ------
    # Hooked student feature goes straight to the VMEM scratch -- never touches HBM.
    for c in range(n_chunks):          # static in-kernel chunking (no per-grid-step cost)
        r0 = c * TM
        acc = jnp.zeros((TM, 2 * CH_PAD), jnp.float32)
        for t in range(9):             # TODO(synk): fold into one K=9*Cin matmul (v6e/v7x)
            win = x_ref[0, r0 + offs[t]:r0 + offs[t] + TM, :]
            acc = acc + jnp.dot(win.astype(jnp.bfloat16), w1_ref[t],
                                preferred_element_type=jnp.float32)
        acc = jnp.maximum(acc + b1_ref[...], 0.0)              # bias + ReLU (hooked feature)
        s_feat = acc[:, :CH_PAD]                               # lane-aligned halves
        t_feat = acc[:, CH_PAD:]

        row = r0 + jax.lax.broadcasted_iota(jnp.int32, (TM, 1), 0)
        valid = (row % Wp) < W                                  # flattened-padding columns
        s_feat = jnp.where(valid, s_feat, 0.0)                  # zero garbage columns
        diff = jnp.where(valid, s_feat - t_feat, 0.0)
        sse_ref[...] += jnp.sum(diff * diff, axis=0, keepdims=True)[None]

        # Place the feature in zero-bordered flattened layout: flat row r -> scratch S0+r.
        feat_ref[S0 + r0:S0 + r0 + TM, :] = s_feat[:, :CH]

    # ---- Phase 2: conv2 (student) directly from the VMEM feature scratch --------------
    for c in range(n_chunks):
        r0 = c * TM
        acc = jnp.zeros((TM, COUT), jnp.float32)
        for t in range(9):
            win = feat_ref[r0 + offs[t] + off2:r0 + offs[t] + off2 + TM, :]
            acc = acc + jnp.dot(win.astype(jnp.bfloat16), w2_ref[t],
                                preferred_element_type=jnp.float32)
        out_ref[0, r0:r0 + TM, :] = acc + b2_ref[...]


# ----------------------------------------------------------------------------
# BaseDistiller forward
# ----------------------------------------------------------------------------
def _init_cnn_params(key, c_in, c_hidden, c_out, scale=0.1):
    k1, k2, k3, k4 = jax.random.split(key, 4)
    return {
        "w1": scale * jax.random.normal(k1, (3, 3, c_in, c_hidden), jnp.float32),
        "b1": scale * jax.random.normal(k2, (c_hidden,), jnp.float32),
        "w2": scale * jax.random.normal(k3, (3, 3, c_hidden, c_out), jnp.float32),
        "b2": scale * jax.random.normal(k4, (c_out,), jnp.float32),
    }


def base_distiller_forward(x_nchw, student_params, teacher_params):
    """Mirrors BaseDistiller.forward(x, MSE) -> (student_out [NCHW], loss)."""
    x_nhwc = jnp.transpose(x_nchw, (0, 2, 3, 1)).astype(jnp.float32)
    B, H, W, Cin = x_nhwc.shape
    Wp, Hp = W + 2, H + 2
    M = H * Wp                                   # flattened output rows per image
    HALO = _round_up(2 * Wp + 2, 8)
    R = M + HALO                                 # padded flattened input rows (>= Hp*Wp+2)
    TM = _pick_row_tile(M)                       # in-kernel chunk size (multiple of 8)
    S0 = _round_up(Wp + 1, 8)                    # aligned feature start row in scratch
    RF = _round_up(S0 + M + Wp + 2, 8)           # feature-scratch rows (covers conv2 halo)

    CH = student_params["w1"].shape[-1]
    COUT = student_params["w2"].shape[-1]
    CH_PAD = _round_up(CH, LANE)                 # lane-aligned student/teacher halves (VMEM only)

    # teacher params are detached, like PyTorch .detach() in the hook / forward
    tp = jax.tree_util.tree_map(jax.lax.stop_gradient, teacher_params)

    # --- conv1 weights: [student || teacher], each half padded to 128 output channels so
    #     the halves slice on vreg-aligned lane boundaries inside the kernel (VMEM-only).
    def _pad_out(w, b, n):
        co = w.shape[-1]
        return (jnp.pad(w, ((0, 0), (0, 0), (0, 0), (0, n - co))),
                jnp.pad(b, ((0, n - co),)))

    ws1, bs1 = _pad_out(student_params["w1"], student_params["b1"], CH_PAD)
    wt1, bt1 = _pad_out(tp["w1"], tp["b1"], CH_PAD)
    w1c = jnp.concatenate([ws1, wt1], axis=-1).reshape(9, Cin, 2 * CH_PAD)
    w1c = w1c.astype(jnp.bfloat16)
    b1c = jnp.concatenate([bs1, bt1]).reshape(1, 2 * CH_PAD).astype(jnp.float32)

    # --- conv2 weights at TRUE channel counts (no zero-padded K, no inflated output slab)
    w2 = student_params["w2"].reshape(9, CH, COUT).astype(jnp.bfloat16)
    b2 = student_params["b2"].reshape(1, COUT).astype(jnp.float32)

    xf = _pad_and_flatten(x_nhwc, R)

    kernel = functools.partial(
        _distiller_fused_kernel,
        H=H, W=W, Wp=Wp, TM=TM, CH=CH, CH_PAD=CH_PAD, COUT=COUT, S0=S0)

    out, sse = pl.pallas_call(
        kernel,
        grid=(B,),
        in_specs=[
            pl.BlockSpec((1, R, Cin), lambda b: (b, 0, 0)),
            pl.BlockSpec(w1c.shape, lambda b: (0, 0, 0)),
            pl.BlockSpec(b1c.shape, lambda b: (0, 0)),
            pl.BlockSpec(w2.shape, lambda b: (0, 0, 0)),
            pl.BlockSpec(b2.shape, lambda b: (0, 0)),
        ],
        out_specs=(
            pl.BlockSpec((1, M, COUT), lambda b: (b, 0, 0)),
            pl.BlockSpec((1, 1, CH_PAD), lambda b: (b, 0, 0)),
        ),
        out_shape=(
            jax.ShapeDtypeStruct((B, M, COUT), jnp.float32),
            jax.ShapeDtypeStruct((B, 1, CH_PAD), jnp.float32),
        ),
        scratch_shapes=[pltpu.VMEM((RF, CH), jnp.float32)],
        compiler_params=pltpu.CompilerParams(
            dimension_semantics=("parallel",),               # batch across TensorCores
            vmem_limit_bytes=32 * 1024 * 1024,
        ),
    )(xf, w1c, b1c, w2, b2)

    # loss over the true element count (padded channels contribute exactly zero)
    loss = jnp.sum(sse) / jnp.float32(B * H * W * CH)

    # conv2 output is already in flattened (H, Wp, COUT) space at true COUT: cheap host slice
    student_out = out.reshape(B, H, Wp, COUT)[:, :, :W, :]
    return jnp.transpose(student_out, (0, 3, 1, 2)), loss


# ----------------------------------------------------------------------------
# Pure-JAX reference (correctness check)
# ----------------------------------------------------------------------------
def _ref_forward(x_nchw, sp, tp):
    x = jnp.transpose(x_nchw, (0, 2, 3, 1))

    def conv(v, w, b):
        return jax.lax.conv_general_dilated(
            v, w, window_strides=(1, 1), padding="SAME",
            dimension_numbers=("NHWC", "HWIO", "NHWC")) + b

    s1 = jnp.maximum(conv(x, sp["w1"], sp["b1"]), 0.0)
    t1 = jnp.maximum(conv(x, tp["w1"], tp["b1"]), 0.0)
    out = conv(s1, sp["w2"], sp["b2"])
    loss = jnp.mean((s1 - t1) ** 2)
    return jnp.transpose(out, (0, 3, 1, 2)), loss


# ----------------------------------------------------------------------------
# Main
# ----------------------------------------------------------------------------
if __name__ == "__main__":
    key = jax.random.PRNGKey(0)
    kx, ks, kt = jax.random.split(key, 3)

    B, C, H, W = 2, 4, 16, 16
    C_HIDDEN, C_OUT = 8, 4

    x = jax.random.normal(kx, (B, C, H, W), jnp.float32)   # NCHW, like PyTorch
    student_params = _init_cnn_params(ks, C, C_HIDDEN, C_OUT)
    teacher_params = _init_cnn_params(kt, C, C_HIDDEN, C_OUT)

    fwd = jax.jit(base_distiller_forward)
    student_out, loss = fwd(x, student_params, teacher_params)
    jax.block_until_ready((student_out, loss))

    assert student_out.shape == (B, C_OUT, H, W)
    assert loss.shape == ()

    # loose tolerance: Pallas path uses bf16 MXU weights with f32 accumulation
    ref_out, ref_loss = _ref_forward(x, student_params, teacher_params)
    assert float(jnp.max(jnp.abs(student_out - ref_out))) < 5e-2
    assert abs(float(loss) - float(ref_loss)) < 5e-2

    print("KERNEL_OK")
</pallas_src>

<mosaic_0001>
module attributes {stable_mosaic.version = 11 : i64} {
  func.func @_distiller_fused_kernel(%arg0: i32, %arg1: memref<1x328x4xf32, #tpu.memory_space<vmem>>, %arg2: memref<9x4x256xbf16, #tpu.memory_space<vmem>>, %arg3: memref<1x256xf32, #tpu.memory_space<vmem>>, %arg4: memref<9x8x4xbf16, #tpu.memory_space<vmem>>, %arg5: memref<1x4xf32, #tpu.memory_space<vmem>>, %arg6: memref<1x288x4xf32, #tpu.memory_space<vmem>>, %arg7: memref<1x1x128xf32, #tpu.memory_space<vmem>>, %arg8: memref<336x8xf32, #tpu.memory_space<vmem>>) attributes {dimension_semantics = [#tpu.dimension_semantics<parallel>], iteration_bounds = array<i64: 2>, scalar_prefetch = 0 : i64, scratch_operands = 1 : i64, tpu.core_type = #tpu.core_type<tc>, window_params = [{transform_indices = @transform_0, window_bounds = array<i64: 1, 328, 4>}, {pipeline_mode = #tpu.pipeline_mode<synchronous>, transform_indices = @transform_1, window_bounds = array<i64: 9, 4, 256>}, {pipeline_mode = #tpu.pipeline_mode<synchronous>, transform_indices = @transform_2, window_bounds = array<i64: 1, 256>}, {pipeline_mode = #tpu.pipeline_mode<synchronous>, transform_indices = @transform_3, window_bounds = array<i64: 9, 8, 4>}, {pipeline_mode = #tpu.pipeline_mode<synchronous>, transform_indices = @transform_4, window_bounds = array<i64: 1, 4>}, {transform_indices = @transform_5, window_bounds = array<i64: 1, 288, 4>}, {transform_indices = @transform_6, window_bounds = array<i64: 1, 1, 128>}]} {
    %cst = arith.constant 0.000000e+00 : f32
    %0 = vector.broadcast %cst : f32 to vector<336x8xf32>
    %c0 = arith.constant 0 : index
    %c0_0 = arith.constant 0 : index
    %1 = vector.load %arg8[%c0, %c0_0] : memref<336x8xf32, #tpu.memory_space<vmem>>, vector<336x8xf32>
    tpu.vector_store %arg8[%c0, %c0_0], %0 {strides = array<i32>} : memref<336x8xf32, #tpu.memory_space<vmem>>, vector<336x8xf32>,
    %cst_1 = arith.constant 0.000000e+00 : f32
    %2 = vector.broadcast %cst_1 : f32 to vector<1x1x128xf32>
    %c0_2 = arith.constant 0 : index
    %c0_3 = arith.constant 0 : index
    %c0_4 = arith.constant 0 : index
    %3 = vector.load %arg7[%c0_2, %c0_3, %c0_4] : memref<1x1x128xf32, #tpu.memory_space<vmem>>, vector<1x1x128xf32>
    tpu.vector_store %arg7[%c0_2, %c0_3, %c0_4], %2 {strides = array<i32>} : memref<1x1x128xf32, #tpu.memory_space<vmem>>, vector<1x1x128xf32>,
    %cst_5 = arith.constant 0.000000e+00 : f32
    %4 = vector.broadcast %cst_5 : f32 to vector<96x256xf32>
    %c0_6 = arith.constant 0 : index
    %c0_7 = arith.constant 0 : index
    %c0_8 = arith.constant 0 : index
    %5 = vector.load %arg1[%c0_6, %c0_7, %c0_8] : memref<1x328x4xf32, #tpu.memory_space<vmem>>, vector<1x96x4xf32>
    %6 = vector.shape_cast %5 : vector<1x96x4xf32> to vector<96x4xf32>
    %7 = arith.truncf %6 : vector<96x4xf32> to vector<96x4xbf16>
    %c0_9 = arith.constant 0 : index
    %c0_10 = arith.constant 0 : index
    %c0_11 = arith.constant 0 : index
    %8 = vector.load %arg2[%c0_9, %c0_10, %c0_11] : memref<9x4x256xbf16, #tpu.memory_space<vmem>>, vector<1x4x256xbf16>
    %9 = vector.shape_cast %8 : vector<1x4x256xbf16> to vector<4x256xbf16>
    %cst_12 = arith.constant dense<0.000000e+00> : vector<96x256xf32>
    %10 = tpu.matmul %7, %9, %cst_12 {dimension_numbers = #tpu.dot_dimension_numbers<[1], [0], [0], [1], [0, 0, 1, 1], [], []>} : vector<96x4xbf16>, vector<4x256xbf16>, vector<96x256xf32> -> vector<96x256xf32>
    %11 = arith.addf %4, %10 : vector<96x256xf32>
    %c0_13 = arith.constant 0 : index
    %c1 = arith.constant 1 : index
    %c0_14 = arith.constant 0 : index
    %12 = vector.load %arg1[%c0_13, %c1, %c0_14] : memref<1x328x4xf32, #tpu.memory_space<vmem>>, vector<1x96x4xf32>
    %13 = vector.shape_cast %12 : vector<1x96x4xf32> to vector<96x4xf32>
    %14 = arith.truncf %13 : vector<96x4xf32> to vector<96x4xbf16>
    %c1_15 = arith.constant 1 : index
    %c0_16 = arith.constant 0 : index
    %c0_17 = arith.constant 0 : index
    %15 = vector.load %arg2[%c1_15, %c0_16, %c0_17] : memref<9x4x256xbf16, #tpu.memory_space<vmem>>, vector<1x4x256xbf16>
    %16 = vector.shape_cast %15 : vector<1x4x256xbf16> to vector<4x256xbf16>
    %cst_18 = arith.constant dense<0.000000e+00> : vector<96x256xf32>
    %17 = tpu.matmul %14, %16, %cst_18 {dimension_numbers = #tpu.dot_dimension_numbers<[1], [0], [0], [1], [0, 0, 1, 1], [], []>} : vector<96x4xbf16>, vector<4x256xbf16>, vector<96x256xf32> -> vector<96x256xf32>
    %18 = arith.addf %11, %17 : vector<96x256xf32>
    %c0_19 = arith.constant 0 : index
    %c2 = arith.constant 2 : index
    %c0_20 = arith.constant 0 : index
    %19 = vector.load %arg1[%c0_19, %c2, %c0_20] : memref<1x328x4xf32, #tpu.memory_space<vmem>>, vector<1x96x4xf32>
    %20 = vector.shape_cast %19 : vector<1x96x4xf32> to vector<96x4xf32>
    %21 = arith.truncf %20 : vector<96x4xf32> to vector<96x4xbf16>
    %c2_21 = arith.constant 2 : index
    %c0_22 = arith.constant 0 : index
    %c0_23 = arith.constant 0 : index
    %22 = vector.load %arg2[%c2_21, %c0_22, %c0_23] : memref<9x4x256xbf16, #tpu.memory_space<vmem>>, vector<1x4x256xbf16>
    %23 = vector.shape_cast %22 : vector<1x4x256xbf16> to vector<4x256xbf16>
    %cst_24 = arith.constant dense<0.000000e+00> : vector<96x256xf32>
    %24 = tpu.matmul %21, %23, %cst_24 {dimension_numbers = #tpu.dot_dimension_numbers<[1], [0], [0], [1], [0, 0, 1, 1], [], []>} : vector<96x4xbf16>, vector<4x256xbf16>, vector<96x256xf32> -> vector<96x256xf32>
    %25 = arith.addf %18, %24 : vector<96x256xf32>
    %c0_25 = arith.constant 0 : index
    %c18 = arith.constant 18 : index
    %c0_26 = arith.constant 0 : index
    %26 = vector.load %arg1[%c0_25, %c18, %c0_26] : memref<1x328x4xf32, #tpu.memory_space<vmem>>, vector<1x96x4xf32>
    %27 = vector.shape_cast %26 : vector<1x96x4xf32> to vector<96x4xf32>
    %28 = arith.truncf %27 : vector<96x4xf32> to vector<96x4xbf16>
    %c3 = arith.constant 3 : index
    %c0_27 = arith.constant 0 : index
    %c0_28 = arith.constant 0 : index
    %29 = vector.load %arg2[%c3, %c0_27, %c0_28] : memref<9x4x256xbf16, #tpu.memory_space<vmem>>, vector<1x4x256xbf16>
    %30 = vector.shape_cast %29 : vector<1x4x256xbf16> to vector<4x256xbf16>
    %cst_29 = arith.constant dense<0.000000e+00> : vector<96x256xf32>
    %31 = tpu.matmul %28, %30, %cst_29 {dimension_numbers = #tpu.dot_dimension_numbers<[1], [0], [0], [1], [0, 0, 1, 1], [], []>} : vector<96x4xbf16>, vector<4x256xbf16>, vector<96x256xf32> -> vector<96x256xf32>
    %32 = arith.addf %25, %31 : vector<96x256xf32>
    %c0_30 = arith.constant 0 : index
    %c19 = arith.constant 19 : index
    %c0_31 = arith.constant 0 : index
    %33 = vector.load %arg1[%c0_30, %c19, %c0_31] : memref<1x328x4xf32, #tpu.memory_space<vmem>>, vector<1x96x4xf32>
    %34 = vector.shape_cast %33 : vector<1x96x4xf32> to vector<96x4xf32>
    %35 = arith.truncf %34 : vector<96x4xf32> to vector<96x4xbf16>
    %c4 = arith.constant 4 : index
    %c0_32 = arith.constant 0 : index
    %c0_33 = arith.constant 0 : index
    %36 = vector.load %arg2[%c4, %c0_32, %c0_33] : memref<9x4x256xbf16, #tpu.memory_space<vmem>>, vector<1x4x256xbf16>
    %37 = vector.shape_cast %36 : vector<1x4x256xbf16> to vector<4x256xbf16>
    %cst_34 = arith.constant dense<0.000000e+00> : vector<96x256xf32>
    %38 = tpu.matmul %35, %37, %cst_34 {dimension_numbers = #tpu.dot_dimension_numbers<[1], [0], [0], [1], [0, 0, 1, 1], [], []>} : vector<96x4xbf16>, vector<4x256xbf16>, vector<96x256xf32> -> vector<96x256xf32>
    %39 = arith.addf %32, %38 : vector<96x256xf32>
    %c0_35 = arith.constant 0 : index
    %c20 = arith.constant 20 : index
    %c0_36 = arith.constant 0 : index
    %40 = vector.load %arg1[%c0_35, %c20, %c0_36] : memref<1x328x4xf32, #tpu.memory_space<vmem>>, vector<1x96x4xf32>
    %41 = vector.shape_cast %40 : vector<1x96x4xf32> to vector<96x4xf32>
    %42 = arith.truncf %41 : vector<96x4xf32> to vector<96x4xbf16>
    %c5 = arith.constant 5 : index
    %c0_37 = arith.constant 0 : index
    %c0_38 = arith.constant 0 : index
    %43 = vector.load %arg2[%c5, %c0_37, %c0_38] : memref<9x4x256xbf16, #tpu.memory_space<vmem>>, vector<1x4x256xbf16>
    %44 = vector.shape_cast %43 : vector<1x4x256xbf16> to vector<4x256xbf16>
    %cst_39 = arith.constant dense<0.000000e+00> : vector<96x256xf32>
    %45 = tpu.matmul %42, %44, %cst_39 {dimension_numbers = #tpu.dot_dimension_numbers<[1], [0], [0], [1], [0, 0, 1, 1], [], []>} : vector<96x4xbf16>, vector<4x256xbf16>, vector<96x256xf32> -> vector<96x256xf32>
    %46 = arith.addf %39, %45 : vector<96x256xf32>
    %c0_40 = arith.constant 0 : index
    %c36 = arith.constant 36 : index
    %c0_41 = arith.constant 0 : index
    %47 = vector.load %arg1[%c0_40, %c36, %c0_41] : memref<1x328x4xf32, #tpu.memory_space<vmem>>, vector<1x96x4xf32>
    %48 = vector.shape_cast %47 : vector<1x96x4xf32> to vector<96x4xf32>
    %49 = arith.truncf %48 : vector<96x4xf32> to vector<96x4xbf16>
    %c6 = arith.constant 6 : index
    %c0_42 = arith.constant 0 : index
    %c0_43 = arith.constant 0 : index
    %50 = vector.load %arg2[%c6, %c0_42, %c0_43] : memref<9x4x256xbf16, #tpu.memory_space<vmem>>, vector<1x4x256xbf16>
    %51 = vector.shape_cast %50 : vector<1x4x256xbf16> to vector<4x256xbf16>
    %cst_44 = arith.constant dense<0.000000e+00> : vector<96x256xf32>
    %52 = tpu.matmul %49, %51, %cst_44 {dimension_numbers = #tpu.dot_dimension_numbers<[1], [0], [0], [1], [0, 0, 1, 1], [], []>} : vector<96x4xbf16>, vector<4x256xbf16>, vector<96x256xf32> -> vector<96x256xf32>
    %53 = arith.addf %46, %52 : vector<96x256xf32>
    %c0_45 = arith.constant 0 : index
    %c37 = arith.constant 37 : index
    %c0_46 = arith.constant 0 : index
    %54 = vector.load %arg1[%c0_45, %c37, %c0_46] : memref<1x328x4xf32, #tpu.memory_space<vmem>>, vector<1x96x4xf32>
    %55 = vector.shape_cast %54 : vector<1x96x4xf32> to vector<96x4xf32>
    %56 = arith.truncf %55 : vector<96x4xf32> to vector<96x4xbf16>
    %c7 = arith.constant 7 : index
    %c0_47 = arith.constant 0 : index
    %c0_48 = arith.constant 0 : index
    %57 = vector.load %arg2[%c7, %c0_47, %c0_48] : memref<9x4x256xbf16, #tpu.memory_space<vmem>>, vector<1x4x256xbf16>
    %58 = vector.shape_cast %57 : vector<1x4x256xbf16> to vector<4x256xbf16>
    %cst_49 = arith.constant dense<0.000000e+00> : vector<96x256xf32>
    %59 = tpu.matmul %56, %58, %cst_49 {dimension_numbers = #tpu.dot_dimension_numbers<[1], [0], [0], [1], [0, 0, 1, 1], [], []>} : vector<96x4xbf16>, vector<4x256xbf16>, vector<96x256xf32> -> vector<96x256xf32>
    %60 = arith.addf %53, %59 : vector<96x256xf32>
    %c0_50 = arith.constant 0 : index
    %c38 = arith.constant 38 : index
    %c0_51 = arith.constant 0 : index
    %61 = vector.load %arg1[%c0_50, %c38, %c0_51] : memref<1x328x4xf32, #tpu.memory_space<vmem>>, vector<1x96x4xf32>
    %62 = vector.shape_cast %61 : vector<1x96x4xf32> to vector<96x4xf32>
    %63 = arith.truncf %62 : vector<96x4xf32> to vector<96x4xbf16>
    %c8 = arith.constant 8 : index
    %c0_52 = arith.constant 0 : index
    %c0_53 = arith.constant 0 : index
    %64 = vector.load %arg2[%c8, %c0_52, %c0_53] : memref<9x4x256xbf16, #tpu.memory_space<vmem>>, vector<1x4x256xbf16>
    %65 = vector.shape_cast %64 : vector<1x4x256xbf16> to vector<4x256xbf16>
    %cst_54 = arith.constant dense<0.000000e+00> : vector<96x256xf32>
    %66 = tpu.matmul %63, %65, %cst_54 {dimension_numbers = #tpu.dot_dimension_numbers<[1], [0], [0], [1], [0, 0, 1, 1], [], []>} : vector<96x4xbf16>, vector<4x256xbf16>, vector<96x256xf32> -> vector<96x256xf32>
    %67 = arith.addf %60, %66 : vector<96x256xf32>
    %c0_55 = arith.constant 0 : index
    %c0_56 = arith.constant 0 : index
    %68 = vector.load %arg3[%c0_55, %c0_56] : memref<1x256xf32, #tpu.memory_space<vmem>>, vector<1x256xf32>
    %69 = vector.broadcast %68 : vector<1x256xf32> to vector<96x256xf32>
    %70 = arith.addf %67, %69 : vector<96x256xf32>
    %cst_57 = arith.constant 0.000000e+00 : f32
    %71 = vector.broadcast %cst_57 : f32 to vector<96x256xf32>
    %72 = arith.maximumf %70, %71 : vector<96x256xf32>
    %73 = vector.extract_strided_slice %72 {offsets = [0, 0], sizes = [96, 128], strides = [1, 1]} : vector<96x256xf32> to vector<96x128xf32>
    %74 = vector.extract_strided_slice %72 {offsets = [0, 128], sizes = [96, 128], strides = [1, 1]} : vector<96x256xf32> to vector<96x128xf32>
    %75 = tpu.iota {dimensions = array<i32: 0>} : vector<96x1xi32>
    %c0_i32 = arith.constant 0 : i32
    %76 = vector.broadcast %c0_i32 : i32 to vector<96x1xi32>
    %77 = arith.addi %76, %75 : vector<96x1xi32>
    %c18_i32 = arith.constant 18 : i32
    %c0_i32_58 = arith.constant 0 : i32
    %78 = arith.cmpi eq, %c18_i32, %c0_i32_58 : i32
    %c1_i32 = arith.constant 1 : i32
    %79 = arith.select %78, %c1_i32, %c18_i32 : i32
    %80 = vector.broadcast %79 : i32 to vector<96x1xi32>
    %81 = arith.remsi %77, %80 : vector<96x1xi32>
    %c0_i32_59 = arith.constant 0 : i32
    %82 = vector.broadcast %c0_i32_59 : i32 to vector<96x1xi32>
    %83 = arith.cmpi ne, %81, %82 : vector<96x1xi32>
    %c0_i32_60 = arith.constant 0 : i32
    %84 = vector.broadcast %c0_i32_60 : i32 to vector<96x1xi32>
    %85 = arith.cmpi slt, %81, %84 : vector<96x1xi32>
    %c0_i32_61 = arith.constant 0 : i32
    %86 = arith.cmpi slt, %79, %c0_i32_61 : i32
    %87 = vector.broadcast %86 : i1 to vector<96x1xi1>
    %88 = vector.broadcast %87 : vector<96x1xi1> to vector<96x1xi1>
    %89 = arith.xori %85, %88 : vector<96x1xi1>
    %90 = arith.andi %89, %83 : vector<96x1xi1>
    %91 = vector.broadcast %79 : i32 to vector<96x1xi32>
    %92 = arith.addi %81, %91 : vector<96x1xi32>
    %93 = arith.select %90, %92, %81 : vector<96x1xi1>, vector<96x1xi32>
    %c16_i32 = arith.constant 16 : i32
    %94 = vector.broadcast %c16_i32 : i32 to vector<96x1xi32>
    %95 = arith.cmpi slt, %93, %94 : vector<96x1xi32>
    %cst_62 = arith.constant 0.000000e+00 : f32
    %96 = vector.shape_cast %95 : vector<96x1xi1> to vector<96x1xi1>
    %97 = vector.broadcast %96 : vector<96x1xi1> to vector<96x128xi1>
    %98 = vector.broadcast %cst_62 : f32 to vector<96x128xf32>
    %99 = arith.select %97, %73, %98 : vector<96x128xi1>, vector<96x128xf32>
    %100 = arith.subf %99, %74 : vector<96x128xf32>
    %cst_63 = arith.constant 0.000000e+00 : f32
    %101 = vector.shape_cast %95 : vector<96x1xi1> to vector<96x1xi1>
    %102 = vector.broadcast %101 : vector<96x1xi1> to vector<96x128xi1>
    %103 = vector.broadcast %cst_63 : f32 to vector<96x128xf32>
    %104 = arith.select %102, %100, %103 : vector<96x128xi1>, vector<96x128xf32>
    %c0_64 = arith.constant 0 : index
    %c0_65 = arith.constant 0 : index
    %c0_66 = arith.constant 0 : index
    %105 = vector.load %arg7[%c0_64, %c0_65, %c0_66] : memref<1x1x128xf32, #tpu.memory_space<vmem>>, vector<1x1x128xf32>
    %106 = arith.mulf %104, %104 : vector<96x128xf32>
    %cst_67 = arith.constant dense<0.000000e+00> : vector<128xf32>
    %107 = vector.multi_reduction <add>, %106, %cst_67 [0] : vector<96x128xf32> to vector<128xf32>
    %108 = vector.shape_cast %107 : vector<128xf32> to vector<1x128xf32>
    %109 = vector.shape_cast %108 : vector<1x128xf32> to vector<1x1x128xf32>
    %110 = arith.addf %105, %109 : vector<1x1x128xf32>
    %c0_68 = arith.constant 0 : index
    %c0_69 = arith.constant 0 : index
    %c0_70 = arith.constant 0 : index
    %111 = vector.load %arg7[%c0_68, %c0_69, %c0_70] : memref<1x1x128xf32, #tpu.memory_space<vmem>>, vector<1x1x128xf32>
    tpu.vector_store %arg7[%c0_68, %c0_69, %c0_70], %110 {strides = array<i32>} : memref<1x1x128xf32, #tpu.memory_space<vmem>>, vector<1x1x128xf32>,
    %112 = vector.extract_strided_slice %99 {offsets = [0, 0], sizes = [96, 8], strides = [1, 1]} : vector<96x128xf32> to vector<96x8xf32>
    %c24 = arith.constant 24 : index
    %c0_71 = arith.constant 0 : index
    %113 = vector.load %arg8[%c24, %c0_71] : memref<336x8xf32, #tpu.memory_space<vmem>>, vector<96x8xf32>
    tpu.vector_store %arg8[%c24, %c0_71], %112 {strides = array<i32>} : memref<336x8xf32, #tpu.memory_space<vmem>>, vector<96x8xf32>,
    %cst_72 = arith.constant 0.000000e+00 : f32
    %114 = vector.broadcast %cst_72 : f32 to vector<96x256xf32>
    %c0_73 = arith.constant 0 : index
    %c96 = arith.constant 96 : index
    %c0_74 = arith.constant 0 : index
    %115 = vector.load %arg1[%c0_73, %c96, %c0_74] : memref<1x328x4xf32, #tpu.memory_space<vmem>>, vector<1x96x4xf32>
    %116 = vector.shape_cast %115 : vector<1x96x4xf32> to vector<96x4xf32>
    %117 = arith.truncf %116 : vector<96x4xf32> to vector<96x4xbf16>
    %c0_75 = arith.constant 0 : index
    %c0_76 = arith.constant 0 : index
    %c0_77 = arith.constant 0 : index
    %118 = vector.load %arg2[%c0_75, %c0_76, %c0_77] : memref<9x4x256xbf16, #tpu.memory_space<vmem>>, vector<1x4x256xbf16>
    %119 = vector.shape_cast %118 : vector<1x4x256xbf16> to vector<4x256xbf16>
    %cst_78 = arith.constant dense<0.000000e+00> : vector<96x256xf32>
    %120 = tpu.matmul %117, %119, %cst_78 {dimension_numbers = #tpu.dot_dimension_numbers<[1], [0], [0], [1], [0, 0, 1, 1], [], []>} : vector<96x4xbf16>, vector<4x256xbf16>, vector<96x256xf32> -> vector<96x256xf32>
    %121 = arith.addf %114, %120 : vector<96x256xf32>
    %c0_79 = arith.constant 0 : index
    %c97 = arith.constant 97 : index
    %c0_80 = arith.constant 0 : index
    %122 = vector.load %arg1[%c0_79, %c97, %c0_80] : memref<1x328x4xf32, #tpu.memory_space<vmem>>, vector<1x96x4xf32>
    %123 = vector.shape_cast %122 : vector<1x96x4xf32> to vector<96x4xf32>
    %124 = arith.truncf %123 : vector<96x4xf32> to vector<96x4xbf16>
    %c1_81 = arith.constant 1 : index
    %c0_82 = arith.constant 0 : index
    %c0_83 = arith.constant 0 : index
    %125 = vector.load %arg2[%c1_81, %c0_82, %c0_83] : memref<9x4x256xbf16, #tpu.memory_space<vmem>>, vector<1x4x256xbf16>
    %126 = vector.shape_cast %125 : vector<1x4x256xbf16> to vector<4x256xbf16>
    %cst_84 = arith.constant dense<0.000000e+00> : vector<96x256xf32>
    %127 = tpu.matmul %124, %126, %cst_84 {dimension_numbers = #tpu.dot_dimension_numbers<[1], [0], [0], [1], [0, 0, 1, 1], [], []>} : vector<96x4xbf16>, vector<4x256xbf16>, vector<96x256xf32> -> vector<96x256xf32>
    %128 = arith.addf %121, %127 : vector<96x256xf32>
    %c0_85 = arith.constant 0 : index
    %c98 = arith.constant 98 : index
    %c0_86 = arith.constant 0 : index
    %129 = vector.load %arg1[%c0_85, %c98, %c0_86] : memref<1x328x4xf32, #tpu.memory_space<vmem>>, vector<1x96x4xf32>
    %130 = vector.shape_cast %129 : vector<1x96x4xf32> to vector<96x4xf32>
    %131 = arith.truncf %130 : vector<96x4xf32> to vector<96x4xbf16>
    %c2_87 = arith.constant 2 : index
    %c0_88 = arith.constant 0 : index
    %c0_89 = arith.constant 0 : index
    %132 = vector.load %arg2[%c2_87, %c0_88, %c0_89] : memref<9x4x256xbf16, #tpu.memory_space<vmem>>, vector<1x4x256xbf16>
    %133 = vector.shape_cast %132 : vector<1x4x256xbf16> to vector<4x256xbf16>
    %cst_90 = arith.constant dense<0.000000e+00> : vector<96x256xf32>
    %134 = tpu.matmul %131, %133, %cst_90 {dimension_numbers = #tpu.dot_dimension_numbers<[1], [0], [0], [1], [0, 0, 1, 1], [], []>} : vector<96x4xbf16>, vector<4x256xbf16>, vector<96x256xf32> -> vector<96x256xf32>
    %135 = arith.addf %128, %134 : vector<96x256xf32>
    %c0_91 = arith.constant 0 : index
    %c114 = arith.constant 114 : index
    %c0_92 = arith.constant 0 : index
    %136 = vector.load %arg1[%c0_91, %c114, %c0_92] : memref<1x328x4xf32, #tpu.memory_space<vmem>>, vector<1x96x4xf32>
    %137 = vector.shape_cast %136 : vector<1x96x4xf32> to vector<96x4xf32>
    %138 = arith.truncf %137 : vector<96x4xf32> to vector<96x4xbf16>
    %c3_93 = arith.constant 3 : index
    %c0_94 = arith.constant 0 : index
    %c0_95 = arith.constant 0 : index
    %139 = vector.load %arg2[%c3_93, %c0_94, %c0_95] : memref<9x4x256xbf16, #tpu.memory_space<vmem>>, vector<1x4x256xbf16>
    %140 = vector.shape_cast %139 : vector<1x4x256xbf16> to vector<4x256xbf16>
    %cst_96 = arith.constant dense<0.000000e+00> : vector<96x256xf32>
    %141 = tpu.matmul %138, %140, %cst_96 {dimension_numbers = #tpu.dot_dimension_numbers<[1], [0], [0], [1], [0, 0, 1, 1], [], []>} : vector<96x4xbf16>, vector<4x256xbf16>, vector<96x256xf32> -> vector<96x256xf32>
    %142 = arith.addf %135, %141 : vector<96x256xf32>
    %c0_97 = arith.constant 0 : index
    %c115 = arith.constant 115 : index
    %c0_98 = arith.constant 0 : index
    %143 = vector.load %arg1[%c0_97, %c115, %c0_98] : memref<1x328x4xf32, #tpu.memory_space<vmem>>, vector<1x96x4xf32>
    %144 = vector.shape_cast %143 : vector<1x96x4xf32> to vector<96x4xf32>
    %145 = arith.truncf %144 : vector<96x4xf32> to vector<96x4xbf16>
    %c4_99 = arith.constant 4 : index
    %c0_100 = arith.constant 0 : index
    %c0_101 = arith.constant 0 : index
    %146 = vector.load %arg2[%c4_99, %c0_100, %c0_101] : memref<9x4x256xbf16, #tpu.memory_space<vmem>>, vector<1x4x256xbf16>
    %147 = vector.shape_cast %146 : vector<1x4x256xbf16> to vector<4x256xbf16>
    %cst_102 = arith.constant dense<0.000000e+00> : vector<96x256xf32>
    %148 = tpu.matmul %145, %147, %cst_102 {dimension_numbers = #tpu.dot_dimension_numbers<[1], [0], [0], [1], [0, 0, 1, 1], [], []>} : vector<96x4xbf16>, vector<4x256xbf16>, vector<96x256xf32> -> vector<96x256xf32>
    %149 = arith.addf %142, %148 : vector<96x256xf32>
    %c0_103 = arith.constant 0 : index
    %c116 = arith.constant 116 : index
    %c0_104 = arith.constant 0 : index
    %150 = vector.load %arg1[%c0_103, %c116, %c0_104] : memref<1x328x4xf32, #tpu.memory_space<vmem>>, vector<1x96x4xf32>
    %151 = vector.shape_cast %150 : vector<1x96x4xf32> to vector<96x4xf32>
    %152 = arith.truncf %151 : vector<96x4xf32> to vector<96x4xbf16>
    %c5_105 = arith.constant 5 : index
    %c0_106 = arith.constant 0 : index
    %c0_107 = arith.constant 0 : index
    %153 = vector.load %arg2[%c5_105, %c0_106, %c0_107] : memref<9x4x256xbf16, #tpu.memory_space<vmem>>, vector<1x4x256xbf16>
    %154 = vector.shape_cast %153 : vector<1x4x256xbf16> to vector<4x256xbf16>
    %cst_108 = arith.constant dense<0.000000e+00> : vector<96x256xf32>
    %155 = tpu.matmul %152, %154, %cst_108 {dimension_numbers = #tpu.dot_dimension_numbers<[1], [0], [0], [1], [0, 0, 1, 1], [], []>} : vector<96x4xbf16>, vector<4x256xbf16>, vector<96x256xf32> -> vector<96x256xf32>
    %156 = arith.addf %149, %155 : vector<96x256xf32>
    %c0_109 = arith.constant 0 : index
    %c132 = arith.constant 132 : index
    %c0_110 = arith.constant 0 : index
    %157 = vector.load %arg1[%c0_109, %c132, %c0_110] : memref<1x328x4xf32, #tpu.memory_space<vmem>>, vector<1x96x4xf32>
    %158 = vector.shape_cast %157 : vector<1x96x4xf32> to vector<96x4xf32>
    %159 = arith.truncf %158 : vector<96x4xf32> to vector<96x4xbf16>
    %c6_111 = arith.constant 6 : index
    %c0_112 = arith.constant 0 : index
    %c0_113 = arith.constant 0 : index
    %160 = vector.load %arg2[%c6_111, %c0_112, %c0_113] : memref<9x4x256xbf16, #tpu.memory_space<vmem>>, vector<1x4x256xbf16>
    %161 = vector.shape_cast %160 : vector<1x4x256xbf16> to vector<4x256xbf16>
    %cst_114 = arith.constant dense<0.000000e+00> : vector<96x256xf32>
    %162 = tpu.matmul %159, %161, %cst_114 {dimension_numbers = #tpu.dot_dimension_numbers<[1], [0], [0], [1], [0, 0, 1, 1], [], []>} : vector<96x4xbf16>, vector<4x256xbf16>, vector<96x256xf32> -> vector<96x256xf32>
    %163 = arith.addf %156, %162 : vector<96x256xf32>
    %c0_115 = arith.constant 0 : index
    %c133 = arith.constant 133 : index
    %c0_116 = arith.constant 0 : index
    %164 = vector.load %arg1[%c0_115, %c133, %c0_116] : memref<1x328x4xf32, #tpu.memory_space<vmem>>, vector<1x96x4xf32>
    %165 = vector.shape_cast %164 : vector<1x96x4xf32> to vector<96x4xf32>
    %166 = arith.truncf %165 : vector<96x4xf32> to vector<96x4xbf16>
    %c7_117 = arith.constant 7 : index
    %c0_118 = arith.constant 0 : index
    %c0_119 = arith.constant 0 : index
    %167 = vector.load %arg2[%c7_117, %c0_118, %c0_119] : memref<9x4x256xbf16, #tpu.memory_space<vmem>>, vector<1x4x256xbf16>
    %168 = vector.shape_cast %167 : vector<1x4x256xbf16> to vector<4x256xbf16>
    %cst_120 = arith.constant dense<0.000000e+00> : vector<96x256xf32>
    %169 = tpu.matmul %166, %168, %cst_120 {dimension_numbers = #tpu.dot_dimension_numbers<[1], [0], [0], [1], [0, 0, 1, 1], [], []>} : vector<96x4xbf16>, vector<4x256xbf16>, vector<96x256xf32> -> vector<96x256xf32>
    %170 = arith.addf %163, %169 : vector<96x256xf32>
    %c0_121 = arith.constant 0 : index
    %c134 = arith.constant 134 : index
    %c0_122 = arith.constant 0 : index
    %171 = vector.load %arg1[%c0_121, %c134, %c0_122] : memref<1x328x4xf32, #tpu.memory_space<vmem>>, vector<1x96x4xf32>
    %172 = vector.shape_cast %171 : vector<1x96x4xf32> to vector<96x4xf32>
    %173 = arith.truncf %172 : vector<96x4xf32> to vector<96x4xbf16>
    %c8_123 = arith.constant 8 : index
    %c0_124 = arith.constant 0 : index
    %c0_125 = arith.constant 0 : index
    %174 = vector.load %arg2[%c8_123, %c0_124, %c0_125] : memref<9x4x256xbf16, #tpu.memory_space<vmem>>, vector<1x4x256xbf16>
    %175 = vector.shape_cast %174 : vector<1x4x256xbf16> to vector<4x256xbf16>
    %cst_126 = arith.constant dense<0.000000e+00> : vector<96x256xf32>
    %176 = tpu.matmul %173, %175, %cst_126 {dimension_numbers = #tpu.dot_dimension_numbers<[1], [0], [0], [1], [0, 0, 1, 1], [], []>} : vector<96x4xbf16>, vector<4x256xbf16>, vector<96x256xf32> -> vector<96x256xf32>
    %177 = arith.addf %170, %176 : vector<96x256xf32>
    %c0_127 = arith.constant 0 : index
    %c0_128 = arith.constant 0 : index
    %178 = vector.load %arg3[%c0_127, %c0_128] : memref<1x256xf32, #tpu.memory_space<vmem>>, vector<1x256xf32>
    %179 = vector.broadcast %178 : vector<1x256xf32> to vector<96x256xf32>
    %180 = arith.addf %177, %179 : vector<96x256xf32>
    %cst_129 = arith.constant 0.000000e+00 : f32
    %181 = vector.broadcast %cst_129 : f32 to vector<96x256xf32>
    %182 = arith.maximumf %180, %181 : vector<96x256xf32>
    %183 = vector.extract_strided_slice %182 {offsets = [0, 0], sizes = [96, 128], strides = [1, 1]} : vector<96x256xf32> to vector<96x128xf32>
    %184 = vector.extract_strided_slice %182 {offsets = [0, 128], sizes = [96, 128], strides = [1, 1]} : vector<96x256xf32> to vector<96x128xf32>
    %185 = tpu.iota {dimensions = array<i32: 0>} : vector<96x1xi32>
    %c96_i32 = arith.constant 96 : i32
    %186 = vector.broadcast %c96_i32 : i32 to vector<96x1xi32>
    %187 = arith.addi %186, %185 : vector<96x1xi32>
    %c18_i32_130 = arith.constant 18 : i32
    %c0_i32_131 = arith.constant 0 : i32
    %188 = arith.cmpi eq, %c18_i32_130, %c0_i32_131 : i32
    %c1_i32_132 = arith.constant 1 : i32
    %189 = arith.select %188, %c1_i32_132, %c18_i32_130 : i32
    %190 = vector.broadcast %189 : i32 to vector<96x1xi32>
    %191 = arith.remsi %187, %190 : vector<96x1xi32>
    %c0_i32_133 = arith.constant 0 : i32
    %192 = vector.broadcast %c0_i32_133 : i32 to vector<96x1xi32>
    %193 = arith.cmpi ne, %191, %192 : vector<96x1xi32>
    %c0_i32_134 = arith.constant 0 : i32
    %194 = vector.broadcast %c0_i32_134 : i32 to vector<96x1xi32>
    %195 = arith.cmpi slt, %191, %194 : vector<96x1xi32>
    %c0_i32_135 = arith.constant 0 : i32
    %196 = arith.cmpi slt, %189, %c0_i32_135 : i32
    %197 = vector.broadcast %196 : i1 to vector<96x1xi1>
    %198 = vector.broadcast %197 : vector<96x1xi1> to vector<96x1xi1>
    %199 = arith.xori %195, %198 : vector<96x1xi1>
    %200 = arith.andi %199, %193 : vector<96x1xi1>
    %201 = vector.broadcast %189 : i32 to vector<96x1xi32>
    %202 = arith.addi %191, %201 : vector<96x1xi32>
    %203 = arith.select %200, %202, %191 : vector<96x1xi1>, vector<96x1xi32>
    %c16_i32_136 = arith.constant 16 : i32
    %204 = vector.broadcast %c16_i32_136 : i32 to vector<96x1xi32>
    %205 = arith.cmpi slt, %203, %204 : vector<96x1xi32>
    %cst_137 = arith.constant 0.000000e+00 : f32
    %206 = vector.shape_cast %205 : vector<96x1xi1> to vector<96x1xi1>
    %207 = vector.broadcast %206 : vector<96x1xi1> to vector<96x128xi1>
    %208 = vector.broadcast %cst_137 : f32 to vector<96x128xf32>
    %209 = arith.select %207, %183, %208 : vector<96x128xi1>, vector<96x128xf32>
    %210 = arith.subf %209, %184 : vector<96x128xf32>
    %cst_138 = arith.constant 0.000000e+00 : f32
    %211 = vector.shape_cast %205 : vector<96x1xi1> to vector<96x1xi1>
    %212 = vector.broadcast %211 : vector<96x1xi1> to vector<96x128xi1>
    %213 = vector.broadcast %cst_138 : f32 to vector<96x128xf32>
    %214 = arith.select %212, %210, %213 : vector<96x128xi1>, vector<96x128xf32>
    %c0_139 = arith.constant 0 : index
    %c0_140 = arith.constant 0 : index
    %c0_141 = arith.constant 0 : index
    %215 = vector.load %arg7[%c0_139, %c0_140, %c0_141] : memref<1x1x128xf32, #tpu.memory_space<vmem>>, vector<1x1x128xf32>
    %216 = arith.mulf %214, %214 : vector<96x128xf32>
    %cst_142 = arith.constant dense<0.000000e+00> : vector<128xf32>
    %217 = vector.multi_reduction <add>, %216, %cst_142 [0] : vector<96x128xf32> to vector<128xf32>
    %218 = vector.shape_cast %217 : vector<128xf32> to vector<1x128xf32>
    %219 = vector.shape_cast %218 : vector<1x128xf32> to vector<1x1x128xf32>
    %220 = arith.addf %215, %219 : vector<1x1x128xf32>
    %c0_143 = arith.constant 0 : index
    %c0_144 = arith.constant 0 : index
    %c0_145 = arith.constant 0 : index
    %221 = vector.load %arg7[%c0_143, %c0_144, %c0_145] : memref<1x1x128xf32, #tpu.memory_space<vmem>>, vector<1x1x128xf32>
    tpu.vector_store %arg7[%c0_143, %c0_144, %c0_145], %220 {strides = array<i32>} : memref<1x1x128xf32, #tpu.memory_space<vmem>>, vector<1x1x128xf32>,
    %222 = vector.extract_strided_slice %209 {offsets = [0, 0], sizes = [96, 8], strides = [1, 1]} : vector<96x128xf32> to vector<96x8xf32>
    %c120 = arith.constant 120 : index
    %c0_146 = arith.constant 0 : index
    %223 = vector.load %arg8[%c120, %c0_146] : memref<336x8xf32, #tpu.memory_space<vmem>>, vector<96x8xf32>
    tpu.vector_store %arg8[%c120, %c0_146], %222 {strides = array<i32>} : memref<336x8xf32, #tpu.memory_space<vmem>>, vector<96x8xf32>,
    %cst_147 = arith.constant 0.000000e+00 : f32
    %224 = vector.broadcast %cst_147 : f32 to vector<96x256xf32>
    %c0_148 = arith.constant 0 : index
    %c192 = arith.constant 192 : index
    %c0_149 = arith.constant 0 : index
    %225 = vector.load %arg1[%c0_148, %c192, %c0_149] : memref<1x328x4xf32, #tpu.memory_space<vmem>>, vector<1x96x4xf32>
    %226 = vector.shape_cast %225 : vector<1x96x4xf32> to vector<96x4xf32>
    %227 = arith.truncf %226 : vector<96x4xf32> to vector<96x4xbf16>
    %c0_150 = arith.constant 0 : index
    %c0_151 = arith.constant 0 : index
    %c0_152 = arith.constant 0 : index
    %228 = vector.load %arg2[%c0_150, %c0_151, %c0_152] : memref<9x4x256xbf16, #tpu.memory_space<vmem>>, vector<1x4x256xbf16>
    %229 = vector.shape_cast %228 : vector<1x4x256xbf16> to vector<4x256xbf16>
    %cst_153 = arith.constant dense<0.000000e+00> : vector<96x256xf32>
    %230 = tpu.matmul %227, %229, %cst_153 {dimension_numbers = #tpu.dot_dimension_numbers<[1], [0], [0], [1], [0, 0, 1, 1], [], []>} : vector<96x4xbf16>, vector<4x256xbf16>, vector<96x256xf32> -> vector<96x256xf32>
    %231 = arith.addf %224, %230 : vector<96x256xf32>
    %c0_154 = arith.constant 0 : index
    %c193 = arith.constant 193 : index
    %c0_155 = arith.constant 0 : index
    %232 = vector.load %arg1[%c0_154, %c193, %c0_155] : memref<1x328x4xf32, #tpu.memory_space<vmem>>, vector<1x96x4xf32>
    %233 = vector.shape_cast %232 : vector<1x96x4xf32> to vector<96x4xf32>
    %234 = arith.truncf %233 : vector<96x4xf32> to vector<96x4xbf16>
    %c1_156 = arith.constant 1 : index
    %c0_157 = arith.constant 0 : index
    %c0_158 = arith.constant 0 : index
    %235 = vector.load %arg2[%c1_156, %c0_157, %c0_158] : memref<9x4x256xbf16, #tpu.memory_space<vmem>>, vector<1x4x256xbf16>
    %236 = vector.shape_cast %235 : vector<1x4x256xbf16> to vector<4x256xbf16>
    %cst_159 = arith.constant dense<0.000000e+00> : vector<96x256xf32>
    %237 = tpu.matmul %234, %236, %cst_159 {dimension_numbers = #tpu.dot_dimension_numbers<[1], [0], [0], [1], [0, 0, 1, 1], [], []>} : vector<96x4xbf16>, vector<4x256xbf16>, vector<96x256xf32> -> vector<96x256xf32>
    %238 = arith.addf %231, %237 : vector<96x256xf32>
    %c0_160 = arith.constant 0 : index
    %c194 = arith.constant 194 : index
    %c0_161 = arith.constant 0 : index
    %239 = vector.load %arg1[%c0_160, %c194, %c0_161] : memref<1x328x4xf32, #tpu.memory_space<vmem>>, vector<1x96x4xf32>
    %240 = vector.shape_cast %239 : vector<1x96x4xf32> to vector<96x4xf32>
    %241 = arith.truncf %240 : vector<96x4xf32> to vector<96x4xbf16>
    %c2_162 = arith.constant 2 : index
    %c0_163 = arith.constant 0 : index
    %c0_164 = arith.constant 0 : index
    %242 = vector.load %arg2[%c2_162, %c0_163, %c0_164] : memref<9x4x256xbf16, #tpu.memory_space<vmem>>, vector<1x4x256xbf16>
    %243 = vector.shape_cast %242 : vector<1x4x256xbf16> to vector<4x256xbf16>
    %cst_165 = arith.constant dense<0.000000e+00> : vector<96x256xf32>
    %244 = tpu.matmul %241, %243, %cst_165 {dimension_numbers = #tpu.dot_dimension_numbers<[1], [0], [0], [1], [0, 0, 1, 1], [], []>} : vector<96x4xbf16>, vector<4x256xbf16>, vector<96x256xf32> -> vector<96x256xf32>
    %245 = arith.addf %238, %244 : vector<96x256xf32>
    %c0_166 = arith.constant 0 : index
    %c210 = arith.constant 210 : index
    %c0_167 = arith.constant 0 : index
    %246 = vector.load %arg1[%c0_166, %c210, %c0_167] : memref<1x328x4xf32, #tpu.memory_space<vmem>>, vector<1x96x4xf32>
    %247 = vector.shape_cast %246 : vector<1x96x4xf32> to vector<96x4xf32>
    %248 = arith.truncf %247 : vector<96x4xf32> to vector<96x4xbf16>
    %c3_168 = arith.constant 3 : index
    %c0_169 = arith.constant 0 : index
    %c0_170 = arith.constant 0 : index
    %249 = vector.load %arg2[%c3_168, %c0_169, %c0_170] : memref<9x4x256xbf16, #tpu.memory_space<vmem>>, vector<1x4x256xbf16>
    %250 = vector.shape_cast %249 : vector<1x4x256xbf16> to vector<4x256xbf16>
    %cst_171 = arith.constant dense<0.000000e+00> : vector<96x256xf32>
    %251 = tpu.matmul %248, %250, %cst_171 {dimension_numbers = #tpu.dot_dimension_numbers<[1], [0], [0], [1], [0, 0, 1, 1], [], []>} : vector<96x4xbf16>, vector<4x256xbf16>, vector<96x256xf32> -> vector<96x256xf32>
    %252 = arith.addf %245, %251 : vector<96x256xf32>
    %c0_172 = arith.constant 0 : index
    %c211 = arith.constant 211 : index
    %c0_173 = arith.constant 0 : index
    %253 = vector.load %arg1[%c0_172, %c211, %c0_173] : memref<1x328x4xf32, #tpu.memory_space<vmem>>, vector<1x96x4xf32>
    %254 = vector.shape_cast %253 : vector<1x96x4xf32> to vector<96x4xf32>
    %255 = arith.truncf %254 : vector<96x4xf32> to vector<96x4xbf16>
    %c4_174 = arith.constant 4 : index
    %c0_175 = arith.constant 0 : index
    %c0_176 = arith.constant 0 : index
    %256 = vector.load %arg2[%c4_174, %c0_175, %c0_176] : memref<9x4x256xbf16, #tpu.memory_space<vmem>>, vector<1x4x256xbf16>
    %257 = vector.shape_cast %256 : vector<1x4x256xbf16> to vector<4x256xbf16>
    %cst_177 = arith.constant dense<0.000000e+00> : vector<96x256xf32>
    %258 = tpu.matmul %255, %257, %cst_177 {dimension_numbers = #tpu.dot_dimension_numbers<[1], [0], [0], [1], [0, 0, 1, 1], [], []>} : vector<96x4xbf16>, vector<4x256xbf16>, vector<96x256xf32> -> vector<96x256xf32>
    %259 = arith.addf %252, %258 : vector<96x256xf32>
    %c0_178 = arith.constant 0 : index
    %c212 = arith.constant 212 : index
    %c0_179 = arith.constant 0 : index
    %260 = vector.load %arg1[%c0_178, %c212, %c0_179] : memref<1x328x4xf32, #tpu.memory_space<vmem>>, vector<1x96x4xf32>
    %261 = vector.shape_cast %260 : vector<1x96x4xf32> to vector<96x4xf32>
    %262 = arith.truncf %261 : vector<96x4xf32> to vector<96x4xbf16>
    %c5_180 = arith.constant 5 : index
    %c0_181 = arith.constant 0 : index
    %c0_182 = arith.constant 0 : index
    %263 = vector.load %arg2[%c5_180, %c0_181, %c0_182] : memref<9x4x256xbf16, #tpu.memory_space<vmem>>, vector<1x4x256xbf16>
    %264 = vector.shape_cast %263 : vector<1x4x256xbf16> to vector<4x256xbf16>
    %cst_183 = arith.constant dense<0.000000e+00> : vector<96x256xf32>
    %265 = tpu.matmul %262, %264, %cst_183 {dimension_numbers = #tpu.dot_dimension_numbers<[1], [0], [0], [1], [0, 0, 1, 1], [], []>} : vector<96x4xbf16>, vector<4x256xbf16>, vector<96x256xf32> -> vector<96x256xf32>
    %266 = arith.addf %259, %265 : vector<96x256xf32>
    %c0_184 = arith.constant 0 : index
    %c228 = arith.constant 228 : index
    %c0_185 = arith.constant 0 : index
    %267 = vector.load %arg1[%c0_184, %c228, %c0_185] : memref<1x328x4xf32, #tpu.memory_space<vmem>>, vector<1x96x4xf32>
    %268 = vector.shape_cast %267 : vector<1x96x4xf32> to vector<96x4xf32>
    %269 = arith.truncf %268 : vector<96x4xf32> to vector<96x4xbf16>
    %c6_186 = arith.constant 6 : index
    %c0_187 = arith.constant 0 : index
    %c0_188 = arith.constant 0 : index
    %270 = vector.load %arg2[%c6_186, %c0_187, %c0_188] : memref<9x4x256xbf16, #tpu.memory_space<vmem>>, vector<1x4x256xbf16>
    %271 = vector.shape_cast %270 : vector<1x4x256xbf16> to vector<4x256xbf16>
    %cst_189 = arith.constant dense<0.000000e+00> : vector<96x256xf32>
    %272 = tpu.matmul %269, %271, %cst_189 {dimension_numbers = #tpu.dot_dimension_numbers<[1], [0], [0], [1], [0, 0, 1, 1], [], []>} : vector<96x4xbf16>, vector<4x256xbf16>, vector<96x256xf32> -> vector<96x256xf32>
    %273 = arith.addf %266, %272 : vector<96x256xf32>
    %c0_190 = arith.constant 0 : index
    %c229 = arith.constant 229 : index
    %c0_191 = arith.constant 0 : index
    %274 = vector.load %arg1[%c0_190, %c229, %c0_191] : memref<1x328x4xf32, #tpu.memory_space<vmem>>, vector<1x96x4xf32>
    %275 = vector.shape_cast %274 : vector<1x96x4xf32> to vector<96x4xf32>
    %276 = arith.truncf %275 : vector<96x4xf32> to vector<96x4xbf16>
    %c7_192 = arith.constant 7 : index
    %c0_193 = arith.constant 0 : index
    %c0_194 = arith.constant 0 : index
    %277 = vector.load %arg2[%c7_192, %c0_193, %c0_194] : memref<9x4x256xbf16, #tpu.memory_space<vmem>>, vector<1x4x256xbf16>
    %278 = vector.shape_cast %277 : vector<1x4x256xbf16> to vector<4x256xbf16>
    %cst_195 = arith.constant dense<0.000000e+00> : vector<96x256xf32>
    %279 = tpu.matmul %276, %278, %cst_195 {dimension_numbers = #tpu.dot_dimension_numbers<[1], [0], [0], [1], [0, 0, 1, 1], [], []>} : vector<96x4xbf16>, vector<4x256xbf16>, vector<96x256xf32> -> vector<96x256xf32>
    %280 = arith.addf %273, %279 : vector<96x256xf32>
    %c0_196 = arith.constant 0 : index
    %c230 = arith.constant 230 : index
    %c0_197 = arith.constant 0 : index
    %281 = vector.load %arg1[%c0_196, %c230, %c0_197] : memref<1x328x4xf32, #tpu.memory_space<vmem>>, vector<1x96x4xf32>
    %282 = vector.shape_cast %281 : vector<1x96x4xf32> to vector<96x4xf32>
    %283 = arith.truncf %282 : vector<96x4xf32> to vector<96x4xbf16>
    %c8_198 = arith.constant 8 : index
    %c0_199 = arith.constant 0 : index
    %c0_200 = arith.constant 0 : index
    %284 = vector.load %arg2[%c8_198, %c0_199, %c0_200] : memref<9x4x256xbf16, #tpu.memory_space<vmem>>, vector<1x4x256xbf16>
    %285 = vector.shape_cast %284 : vector<1x4x256xbf16> to vector<4x256xbf16>
    %cst_201 = arith.constant dense<0.000000e+00> : vector<96x256xf32>
    %286 = tpu.matmul %283, %285, %cst_201 {dimension_numbers = #tpu.dot_dimension_numbers<[1], [0], [0], [1], [0, 0, 1, 1], [], []>} : vector<96x4xbf16>, vector<4x256xbf16>, vector<96x256xf32> -> vector<96x256xf32>
    %287 = arith.addf %280, %286 : vector<96x256xf32>
    %c0_202 = arith.constant 0 : index
    %c0_203 = arith.constant 0 : index
    %288 = vector.load %arg3[%c0_202, %c0_203] : memref<1x256xf32, #tpu.memory_space<vmem>>, vector<1x256xf32>
    %289 = vector.broadcast %288 : vector<1x256xf32> to vector<96x256xf32>
    %290 = arith.addf %287, %289 : vector<96x256xf32>
    %cst_204 = arith.constant 0.000000e+00 : f32
    %291 = vector.broadcast %cst_204 : f32 to vector<96x256xf32>
    %292 = arith.maximumf %290, %291 : vector<96x256xf32>
    %293 = vector.extract_strided_slice %292 {offsets = [0, 0], sizes = [96, 128], strides = [1, 1]} : vector<96x256xf32> to vector<96x128xf32>
    %294 = vector.extract_strided_slice %292 {offsets = [0, 128], sizes = [96, 128], strides = [1, 1]} : vector<96x256xf32> to vector<96x128xf32>
    %295 = tpu.iota {dimensions = array<i32: 0>} : vector<96x1xi32>
    %c192_i32 = arith.constant 192 : i32
    %296 = vector.broadcast %c192_i32 : i32 to vector<96x1xi32>
    %297 = arith.addi %296, %295 : vector<96x1xi32>
    %c18_i32_205 = arith.constant 18 : i32
    %c0_i32_206 = arith.constant 0 : i32
    %298 = arith.cmpi eq, %c18_i32_205, %c0_i32_206 : i32
    %c1_i32_207 = arith.constant 1 : i32
    %299 = arith.select %298, %c1_i32_207, %c18_i32_205 : i32
    %300 = vector.broadcast %299 : i32 to vector<96x1xi32>
    %301 = arith.remsi %297, %300 : vector<96x1xi32>
    %c0_i32_208 = arith.constant 0 : i32
    %302 = vector.broadcast %c0_i32_208 : i32 to vector<96x1xi32>
    %303 = arith.cmpi ne, %301, %302 : vector<96x1xi32>
    %c0_i32_209 = arith.constant 0 : i32
    %304 = vector.broadcast %c0_i32_209 : i32 to vector<96x1xi32>
    %305 = arith.cmpi slt, %301, %304 : vector<96x1xi32>
    %c0_i32_210 = arith.constant 0 : i32
    %306 = arith.cmpi slt, %299, %c0_i32_210 : i32
    %307 = vector.broadcast %306 : i1 to vector<96x1xi1>
    %308 = vector.broadcast %307 : vector<96x1xi1> to vector<96x1xi1>
    %309 = arith.xori %305, %308 : vector<96x1xi1>
    %310 = arith.andi %309, %303 : vector<96x1xi1>
    %311 = vector.broadcast %299 : i32 to vector<96x1xi32>
    %312 = arith.addi %301, %311 : vector<96x1xi32>
    %313 = arith.select %310, %312, %301 : vector<96x1xi1>, vector<96x1xi32>
    %c16_i32_211 = arith.constant 16 : i32
    %314 = vector.broadcast %c16_i32_211 : i32 to vector<96x1xi32>
    %315 = arith.cmpi slt, %313, %314 : vector<96x1xi32>
    %cst_212 = arith.constant 0.000000e+00 : f32
    %316 = vector.shape_cast %315 : vector<96x1xi1> to vector<96x1xi1>
    %317 = vector.broadcast %316 : vector<96x1xi1> to vector<96x128xi1>
    %318 = vector.broadcast %cst_212 : f32 to vector<96x128xf32>
    %319 = arith.select %317, %293, %318 : vector<96x128xi1>, vector<96x128xf32>
    %320 = arith.subf %319, %294 : vector<96x128xf32>
    %cst_213 = arith.constant 0.000000e+00 : f32
    %321 = vector.shape_cast %315 : vector<96x1xi1> to vector<96x1xi1>
    %322 = vector.broadcast %321 : vector<96x1xi1> to vector<96x128xi1>
    %323 = vector.broadcast %cst_213 : f32 to vector<96x128xf32>
    %324 = arith.select %322, %320, %323 : vector<96x128xi1>, vector<96x128xf32>
    %c0_214 = arith.constant 0 : index
    %c0_215 = arith.constant 0 : index
    %c0_216 = arith.constant 0 : index
    %325 = vector.load %arg7[%c0_214, %c0_215, %c0_216] : memref<1x1x128xf32, #tpu.memory_space<vmem>>, vector<1x1x128xf32>
    %326 = arith.mulf %324, %324 : vector<96x128xf32>
    %cst_217 = arith.constant dense<0.000000e+00> : vector<128xf32>
    %327 = vector.multi_reduction <add>, %326, %cst_217 [0] : vector<96x128xf32> to vector<128xf32>
    %328 = vector.shape_cast %327 : vector<128xf32> to vector<1x128xf32>
    %329 = vector.shape_cast %328 : vector<1x128xf32> to vector<1x1x128xf32>
    %330 = arith.addf %325, %329 : vector<1x1x128xf32>
    %c0_218 = arith.constant 0 : index
    %c0_219 = arith.constant 0 : index
    %c0_220 = arith.constant 0 : index
    %331 = vector.load %arg7[%c0_218, %c0_219, %c0_220] : memref<1x1x128xf32, #tpu.memory_space<vmem>>, vector<1x1x128xf32>
    tpu.vector_store %arg7[%c0_218, %c0_219, %c0_220], %330 {strides = array<i32>} : memref<1x1x128xf32, #tpu.memory_space<vmem>>, vector<1x1x128xf32>,
    %332 = vector.extract_strided_slice %319 {offsets = [0, 0], sizes = [96, 8], strides = [1, 1]} : vector<96x128xf32> to vector<96x8xf32>
    %c216 = arith.constant 216 : index
    %c0_221 = arith.constant 0 : index
    %333 = vector.load %arg8[%c216, %c0_221] : memref<336x8xf32, #tpu.memory_space<vmem>>, vector<96x8xf32>
    tpu.vector_store %arg8[%c216, %c0_221], %332 {strides = array<i32>} : memref<336x8xf32, #tpu.memory_space<vmem>>, vector<96x8xf32>,
    %cst_222 = arith.constant 0.000000e+00 : f32
    %334 = vector.broadcast %cst_222 : f32 to vector<96x4xf32>
    %c5_223 = arith.constant 5 : index
    %c0_224 = arith.constant 0 : index
    %335 = vector.load %arg8[%c5_223, %c0_224] : memref<336x8xf32, #tpu.memory_space<vmem>>, vector<96x8xf32>
    %336 = arith.truncf %335 : vector<96x8xf32> to vector<96x8xbf16>
    %c0_225 = arith.constant 0 : index
    %c0_226 = arith.constant 0 : index
    %c0_227 = arith.constant 0 : index
    %337 = vector.load %arg4[%c0_225, %c0_226, %c0_227] : memref<9x8x4xbf16, #tpu.memory_space<vmem>>, vector<1x8x4xbf16>
    %338 = vector.shape_cast %337 : vector<1x8x4xbf16> to vector<8x4xbf16>
    %cst_228 = arith.constant dense<0.000000e+00> : vector<96x4xf32>
    %339 = tpu.matmul %336, %338, %cst_228 {dimension_numbers = #tpu.dot_dimension_numbers<[1], [0], [0], [1], [0, 0, 1, 1], [], []>} : vector<96x8xbf16>, vector<8x4xbf16>, vector<96x4xf32> -> vector<96x4xf32>
    %340 = arith.addf %334, %339 : vector<96x4xf32>
    %c6_229 = arith.constant 6 : index
    %c0_230 = arith.constant 0 : index
    %341 = vector.load %arg8[%c6_229, %c0_230] : memref<336x8xf32, #tpu.memory_space<vmem>>, vector<96x8xf32>
    %342 = arith.truncf %341 : vector<96x8xf32> to vector<96x8xbf16>
    %c1_231 = arith.constant 1 : index
    %c0_232 = arith.constant 0 : index
    %c0_233 = arith.constant 0 : index
    %343 = vector.load %arg4[%c1_231, %c0_232, %c0_233] : memref<9x8x4xbf16, #tpu.memory_space<vmem>>, vector<1x8x4xbf16>
    %344 = vector.shape_cast %343 : vector<1x8x4xbf16> to vector<8x4xbf16>
    %cst_234 = arith.constant dense<0.000000e+00> : vector<96x4xf32>
    %345 = tpu.matmul %342, %344, %cst_234 {dimension_numbers = #tpu.dot_dimension_numbers<[1], [0], [0], [1], [0, 0, 1, 1], [], []>} : vector<96x8xbf16>, vector<8x4xbf16>, vector<96x4xf32> -> vector<96x4xf32>
    %346 = arith.addf %340, %345 : vector<96x4xf32>
    %c7_235 = arith.constant 7 : index
    %c0_236 = arith.constant 0 : index
    %347 = vector.load %arg8[%c7_235, %c0_236] : memref<336x8xf32, #tpu.memory_space<vmem>>, vector<96x8xf32>
    %348 = arith.truncf %347 : vector<96x8xf32> to vector<96x8xbf16>
    %c2_237 = arith.constant 2 : index
    %c0_238 = arith.constant 0 : index
    %c0_239 = arith.constant 0 : index
    %349 = vector.load %arg4[%c2_237, %c0_238, %c0_239] : memref<9x8x4xbf16, #tpu.memory_space<vmem>>, vector<1x8x4xbf16>
    %350 = vector.shape_cast %349 : vector<1x8x4xbf16> to vector<8x4xbf16>
    %cst_240 = arith.constant dense<0.000000e+00> : vector<96x4xf32>
    %351 = tpu.matmul %348, %350, %cst_240 {dimension_numbers = #tpu.dot_dimension_numbers<[1], [0], [0], [1], [0, 0, 1, 1], [], []>} : vector<96x8xbf16>, vector<8x4xbf16>, vector<96x4xf32> -> vector<96x4xf32>
    %352 = arith.addf %346, %351 : vector<96x4xf32>
    %c23 = arith.constant 23 : index
    %c0_241 = arith.constant 0 : index
    %353 = vector.load %arg8[%c23, %c0_241] : memref<336x8xf32, #tpu.memory_space<vmem>>, vector<96x8xf32>
    %354 = arith.truncf %353 : vector<96x8xf32> to vector<96x8xbf16>
    %c3_242 = arith.constant 3 : index
    %c0_243 = arith.constant 0 : index
    %c0_244 = arith.constant 0 : index
    %355 = vector.load %arg4[%c3_242, %c0_243, %c0_244] : memref<9x8x4xbf16, #tpu.memory_space<vmem>>, vector<1x8x4xbf16>
    %356 = vector.shape_cast %355 : vector<1x8x4xbf16> to vector<8x4xbf16>
    %cst_245 = arith.constant dense<0.000000e+00> : vector<96x4xf32>
    %357 = tpu.matmul %354, %356, %cst_245 {dimension_numbers = #tpu.dot_dimension_numbers<[1], [0], [0], [1], [0, 0, 1, 1], [], []>} : vector<96x8xbf16>, vector<8x4xbf16>, vector<96x4xf32> -> vector<96x4xf32>
    %358 = arith.addf %352, %357 : vector<96x4xf32>
    %c24_246 = arith.constant 24 : index
    %c0_247 = arith.constant 0 : index
    %359 = vector.load %arg8[%c24_246, %c0_247] : memref<336x8xf32, #tpu.memory_space<vmem>>, vector<96x8xf32>
    %360 = arith.truncf %359 : vector<96x8xf32> to vector<96x8xbf16>
    %c4_248 = arith.constant 4 : index
    %c0_249 = arith.constant 0 : index
    %c0_250 = arith.constant 0 : index
    %361 = vector.load %arg4[%c4_248, %c0_249, %c0_250] : memref<9x8x4xbf16, #tpu.memory_space<vmem>>, vector<1x8x4xbf16>
    %362 = vector.shape_cast %361 : vector<1x8x4xbf16> to vector<8x4xbf16>
    %cst_251 = arith.constant dense<0.000000e+00> : vector<96x4xf32>
    %363 = tpu.matmul %360, %362, %cst_251 {dimension_numbers = #tpu.dot_dimension_numbers<[1], [0], [0], [1], [0, 0, 1, 1], [], []>} : vector<96x8xbf16>, vector<8x4xbf16>, vector<96x4xf32> -> vector<96x4xf32>
    %364 = arith.addf %358, %363 : vector<96x4xf32>
    %c25 = arith.constant 25 : index
    %c0_252 = arith.constant 0 : index
    %365 = vector.load %arg8[%c25, %c0_252] : memref<336x8xf32, #tpu.memory_space<vmem>>, vector<96x8xf32>
    %366 = arith.truncf %365 : vector<96x8xf32> to vector<96x8xbf16>
    %c5_253 = arith.constant 5 : index
    %c0_254 = arith.constant 0 : index
    %c0_255 = arith.constant 0 : index
    %367 = vector.load %arg4[%c5_253, %c0_254, %c0_255] : memref<9x8x4xbf16, #tpu.memory_space<vmem>>, vector<1x8x4xbf16>
    %368 = vector.shape_cast %367 : vector<1x8x4xbf16> to vector<8x4xbf16>
    %cst_256 = arith.constant dense<0.000000e+00> : vector<96x4xf32>
    %369 = tpu.matmul %366, %368, %cst_256 {dimension_numbers = #tpu.dot_dimension_numbers<[1], [0], [0], [1], [0, 0, 1, 1], [], []>} : vector<96x8xbf16>, vector<8x4xbf16>, vector<96x4xf32> -> vector<96x4xf32>
    %370 = arith.addf %364, %369 : vector<96x4xf32>
    %c41 = arith.constant 41 : index
    %c0_257 = arith.constant 0 : index
    %371 = vector.load %arg8[%c41, %c0_257] : memref<336x8xf32, #tpu.memory_space<vmem>>, vector<96x8xf32>
    %372 = arith.truncf %371 : vector<96x8xf32> to vector<96x8xbf16>
    %c6_258 = arith.constant 6 : index
    %c0_259 = arith.constant 0 : index
    %c0_260 = arith.constant 0 : index
    %373 = vector.load %arg4[%c6_258, %c0_259, %c0_260] : memref<9x8x4xbf16, #tpu.memory_space<vmem>>, vector<1x8x4xbf16>
    %374 = vector.shape_cast %373 : vector<1x8x4xbf16> to vector<8x4xbf16>
    %cst_261 = arith.constant dense<0.000000e+00> : vector<96x4xf32>
    %375 = tpu.matmul %372, %374, %cst_261 {dimension_numbers = #tpu.dot_dimension_numbers<[1], [0], [0], [1], [0, 0, 1, 1], [], []>} : vector<96x8xbf16>, vector<8x4xbf16>, vector<96x4xf32> -> vector<96x4xf32>
    %376 = arith.addf %370, %375 : vector<96x4xf32>
    %c42 = arith.constant 42 : index
    %c0_262 = arith.constant 0 : index
    %377 = vector.load %arg8[%c42, %c0_262] : memref<336x8xf32, #tpu.memory_space<vmem>>, vector<96x8xf32>
    %378 = arith.truncf %377 : vector<96x8xf32> to vector<96x8xbf16>
    %c7_263 = arith.constant 7 : index
    %c0_264 = arith.constant 0 : index
    %c0_265 = arith.constant 0 : index
    %379 = vector.load %arg4[%c7_263, %c0_264, %c0_265] : memref<9x8x4xbf16, #tpu.memory_space<vmem>>, vector<1x8x4xbf16>
    %380 = vector.shape_cast %379 : vector<1x8x4xbf16> to vector<8x4xbf16>
    %cst_266 = arith.constant dense<0.000000e+00> : vector<96x4xf32>
    %381 = tpu.matmul %378, %380, %cst_266 {dimension_numbers = #tpu.dot_dimension_numbers<[1], [0], [0], [1], [0, 0, 1, 1], [], []>} : vector<96x8xbf16>, vector<8x4xbf16>, vector<96x4xf32> -> vector<96x4xf32>
    %382 = arith.addf %376, %381 : vector<96x4xf32>
    %c43 = arith.constant 43 : index
    %c0_267 = arith.constant 0 : index
    %383 = vector.load %arg8[%c43, %c0_267] : memref<336x8xf32, #tpu.memory_space<vmem>>, vector<96x8xf32>
    %384 = arith.truncf %383 : vector<96x8xf32> to vector<96x8xbf16>
    %c8_268 = arith.constant 8 : index
    %c0_269 = arith.constant 0 : index
    %c0_270 = arith.constant 0 : index
    %385 = vector.load %arg4[%c8_268, %c0_269, %c0_270] : memref<9x8x4xbf16, #tpu.memory_space<vmem>>, vector<1x8x4xbf16>
    %386 = vector.shape_cast %385 : vector<1x8x4xbf16> to vector<8x4xbf16>
    %cst_271 = arith.constant dense<0.000000e+00> : vector<96x4xf32>
    %387 = tpu.matmul %384, %386, %cst_271 {dimension_numbers = #tpu.dot_dimension_numbers<[1], [0], [0], [1], [0, 0, 1, 1], [], []>} : vector<96x8xbf16>, vector<8x4xbf16>, vector<96x4xf32> -> vector<96x4xf32>
    %388 = arith.addf %382, %387 : vector<96x4xf32>
    %c0_272 = arith.constant 0 : index
    %c0_273 = arith.constant 0 : index
    %389 = vector.load %arg5[%c0_272, %c0_273] : memref<1x4xf32, #tpu.memory_space<vmem>>, vector<1x4xf32>
    %390 = vector.broadcast %389 : vector<1x4xf32> to vector<96x4xf32>
    %391 = arith.addf %388, %390 : vector<96x4xf32>
    %c0_274 = arith.constant 0 : index
    %c0_275 = arith.constant 0 : index
    %c0_276 = arith.constant 0 : index
    %392 = vector.load %arg6[%c0_274, %c0_275, %c0_276] : memref<1x288x4xf32, #tpu.memory_space<vmem>>, vector<1x96x4xf32>
    %393 = vector.shape_cast %392 : vector<1x96x4xf32> to vector<96x4xf32>
    %394 = vector.shape_cast %391 : vector<96x4xf32> to vector<1x96x4xf32>
    tpu.vector_store %arg6[%c0_274, %c0_275, %c0_276], %394 {strides = array<i32>} : memref<1x288x4xf32, #tpu.memory_space<vmem>>, vector<1x96x4xf32>,
    %cst_277 = arith.constant 0.000000e+00 : f32
    %395 = vector.broadcast %cst_277 : f32 to vector<96x4xf32>
    %c101 = arith.constant 101 : index
    %c0_278 = arith.constant 0 : index
    %396 = vector.load %arg8[%c101, %c0_278] : memref<336x8xf32, #tpu.memory_space<vmem>>, vector<96x8xf32>
    %397 = arith.truncf %396 : vector<96x8xf32> to vector<96x8xbf16>
    %c0_279 = arith.constant 0 : index
    %c0_280 = arith.constant 0 : index
    %c0_281 = arith.constant 0 : index
    %398 = vector.load %arg4[%c0_279, %c0_280, %c0_281] : memref<9x8x4xbf16, #tpu.memory_space<vmem>>, vector<1x8x4xbf16>
    %399 = vector.shape_cast %398 : vector<1x8x4xbf16> to vector<8x4xbf16>
    %cst_282 = arith.constant dense<0.000000e+00> : vector<96x4xf32>
    %400 = tpu.matmul %397, %399, %cst_282 {dimension_numbers = #tpu.dot_dimension_numbers<[1], [0], [0], [1], [0, 0, 1, 1], [], []>} : vector<96x8xbf16>, vector<8x4xbf16>, vector<96x4xf32> -> vector<96x4xf32>
    %401 = arith.addf %395, %400 : vector<96x4xf32>
    %c102 = arith.constant 102 : index
    %c0_283 = arith.constant 0 : index
    %402 = vector.load %arg8[%c102, %c0_283] : memref<336x8xf32, #tpu.memory_space<vmem>>, vector<96x8xf32>
    %403 = arith.truncf %402 : vector<96x8xf32> to vector<96x8xbf16>
    %c1_284 = arith.constant 1 : index
    %c0_285 = arith.constant 0 : index
    %c0_286 = arith.constant 0 : index
    %404 = vector.load %arg4[%c1_284, %c0_285, %c0_286] : memref<9x8x4xbf16, #tpu.memory_space<vmem>>, vector<1x8x4xbf16>
    %405 = vector.shape_cast %404 : vector<1x8x4xbf16> to vector<8x4xbf16>
    %cst_287 = arith.constant dense<0.000000e+00> : vector<96x4xf32>
    %406 = tpu.matmul %403, %405, %cst_287 {dimension_numbers = #tpu.dot_dimension_numbers<[1], [0], [0], [1], [0, 0, 1, 1], [], []>} : vector<96x8xbf16>, vector<8x4xbf16>, vector<96x4xf32> -> vector<96x4xf32>
    %407 = arith.addf %401, %406 : vector<96x4xf32>
    %c103 = arith.constant 103 : index
    %c0_288 = arith.constant 0 : index
    %408 = vector.load %arg8[%c103, %c0_288] : memref<336x8xf32, #tpu.memory_space<vmem>>, vector<96x8xf32>
    %409 = arith.truncf %408 : vector<96x8xf32> to vector<96x8xbf16>
    %c2_289 = arith.constant 2 : index
    %c0_290 = arith.constant 0 : index
    %c0_291 = arith.constant 0 : index
    %410 = vector.load %arg4[%c2_289, %c0_290, %c0_291] : memref<9x8x4xbf16, #tpu.memory_space<vmem>>, vector<1x8x4xbf16>
    %411 = vector.shape_cast %410 : vector<1x8x4xbf16> to vector<8x4xbf16>
    %cst_292 = arith.constant dense<0.000000e+00> : vector<96x4xf32>
    %412 = tpu.matmul %409, %411, %cst_292 {dimension_numbers = #tpu.dot_dimension_numbers<[1], [0], [0], [1], [0, 0, 1, 1], [], []>} : vector<96x8xbf16>, vector<8x4xbf16>, vector<96x4xf32> -> vector<96x4xf32>
    %413 = arith.addf %407, %412 : vector<96x4xf32>
    %c119 = arith.constant 119 : index
    %c0_293 = arith.constant 0 : index
    %414 = vector.load %arg8[%c119, %c0_293] : memref<336x8xf32, #tpu.memory_space<vmem>>, vector<96x8xf32>
    %415 = arith.truncf %414 : vector<96x8xf32> to vector<96x8xbf16>
    %c3_294 = arith.constant 3 : index
    %c0_295 = arith.constant 0 : index
    %c0_296 = arith.constant 0 : index
    %416 = vector.load %arg4[%c3_294, %c0_295, %c0_296] : memref<9x8x4xbf16, #tpu.memory_space<vmem>>, vector<1x8x4xbf16>
    %417 = vector.shape_cast %416 : vector<1x8x4xbf16> to vector<8x4xbf16>
    %cst_297 = arith.constant dense<0.000000e+00> : vector<96x4xf32>
    %418 = tpu.matmul %415, %417, %cst_297 {dimension_numbers = #tpu.dot_dimension_numbers<[1], [0], [0], [1], [0, 0, 1, 1], [], []>} : vector<96x8xbf16>, vector<8x4xbf16>, vector<96x4xf32> -> vector<96x4xf32>
    %419 = arith.addf %413, %418 : vector<96x4xf32>
    %c120_298 = arith.constant 120 : index
    %c0_299 = arith.constant 0 : index
    %420 = vector.load %arg8[%c120_298, %c0_299] : memref<336x8xf32, #tpu.memory_space<vmem>>, vector<96x8xf32>
    %421 = arith.truncf %420 : vector<96x8xf32> to vector<96x8xbf16>
    %c4_300 = arith.constant 4 : index
    %c0_301 = arith.constant 0 : index
    %c0_302 = arith.constant 0 : index
    %422 = vector.load %arg4[%c4_300, %c0_301, %c0_302] : memref<9x8x4xbf16, #tpu.memory_space<vmem>>, vector<1x8x4xbf16>
    %423 = vector.shape_cast %422 : vector<1x8x4xbf16> to vector<8x4xbf16>
    %cst_303 = arith.constant dense<0.000000e+00> : vector<96x4xf32>
    %424 = tpu.matmul %421, %423, %cst_303 {dimension_numbers = #tpu.dot_dimension_numbers<[1], [0], [0], [1], [0, 0, 1, 1], [], []>} : vector<96x8xbf16>, vector<8x4xbf16>, vector<96x4xf32> -> vector<96x4xf32>
    %425 = arith.addf %419, %424 : vector<96x4xf32>
    %c121 = arith.constant 121 : index
    %c0_304 = arith.constant 0 : index
    %426 = vector.load %arg8[%c121, %c0_304] : memref<336x8xf32, #tpu.memory_space<vmem>>, vector<96x8xf32>
    %427 = arith.truncf %426 : vector<96x8xf32> to vector<96x8xbf16>
    %c5_305 = arith.constant 5 : index
    %c0_306 = arith.constant 0 : index
    %c0_307 = arith.constant 0 : index
    %428 = vector.load %arg4[%c5_305, %c0_306, %c0_307] : memref<9x8x4xbf16, #tpu.memory_space<vmem>>, vector<1x8x4xbf16>
    %429 = vector.shape_cast %428 : vector<1x8x4xbf16> to vector<8x4xbf16>
    %cst_308 = arith.constant dense<0.000000e+00> : vector<96x4xf32>
    %430 = tpu.matmul %427, %429, %cst_308 {dimension_numbers = #tpu.dot_dimension_numbers<[1], [0], [0], [1], [0, 0, 1, 1], [], []>} : vector<96x8xbf16>, vector<8x4xbf16>, vector<96x4xf32> -> vector<96x4xf32>
    %431 = arith.addf %425, %430 : vector<96x4xf32>
    %c137 = arith.constant 137 : index
    %c0_309 = arith.constant 0 : index
    %432 = vector.load %arg8[%c137, %c0_309] : memref<336x8xf32, #tpu.memory_space<vmem>>, vector<96x8xf32>
    %433 = arith.truncf %432 : vector<96x8xf32> to vector<96x8xbf16>
    %c6_310 = arith.constant 6 : index
    %c0_311 = arith.constant 0 : index
    %c0_312 = arith.constant 0 : index
    %434 = vector.load %arg4[%c6_310, %c0_311, %c0_312] : memref<9x8x4xbf16, #tpu.memory_space<vmem>>, vector<1x8x4xbf16>
    %435 = vector.shape_cast %434 : vector<1x8x4xbf16> to vector<8x4xbf16>
    %cst_313 = arith.constant dense<0.000000e+00> : vector<96x4xf32>
    %436 = tpu.matmul %433, %435, %cst_313 {dimension_numbers = #tpu.dot_dimension_numbers<[1], [0], [0], [1], [0, 0, 1, 1], [], []>} : vector<96x8xbf16>, vector<8x4xbf16>, vector<96x4xf32> -> vector<96x4xf32>
    %437 = arith.addf %431, %436 : vector<96x4xf32>
    %c138 = arith.constant 138 : index
    %c0_314 = arith.constant 0 : index
    %438 = vector.load %arg8[%c138, %c0_314] : memref<336x8xf32, #tpu.memory_space<vmem>>, vector<96x8xf32>
    %439 = arith.truncf %438 : vector<96x8xf32> to vector<96x8xbf16>
    %c7_315 = arith.constant 7 : index
    %c0_316 = arith.constant 0 : index
    %c0_317 = arith.constant 0 : index
    %440 = vector.load %arg4[%c7_315, %c0_316, %c0_317] : memref<9x8x4xbf16, #tpu.memory_space<vmem>>, vector<1x8x4xbf16>
    %441 = vector.shape_cast %440 : vector<1x8x4xbf16> to vector<8x4xbf16>
    %cst_318 = arith.constant dense<0.000000e+00> : vector<96x4xf32>
    %442 = tpu.matmul %439, %441, %cst_318 {dimension_numbers = #tpu.dot_dimension_numbers<[1], [0], [0], [1], [0, 0, 1, 1], [], []>} : vector<96x8xbf16>, vector<8x4xbf16>, vector<96x4xf32> -> vector<96x4xf32>
    %443 = arith.addf %437, %442 : vector<96x4xf32>
    %c139 = arith.constant 139 : index
    %c0_319 = arith.constant 0 : index
    %444 = vector.load %arg8[%c139, %c0_319] : memref<336x8xf32, #tpu.memory_space<vmem>>, vector<96x8xf32>
    %445 = arith.truncf %444 : vector<96x8xf32> to vector<96x8xbf16>
    %c8_320 = arith.constant 8 : index
    %c0_321 = arith.constant 0 : index
    %c0_322 = arith.constant 0 : index
    %446 = vector.load %arg4[%c8_320, %c0_321, %c0_322] : memref<9x8x4xbf16, #tpu.memory_space<vmem>>, vector<1x8x4xbf16>
    %447 = vector.shape_cast %446 : vector<1x8x4xbf16> to vector<8x4xbf16>
    %cst_323 = arith.constant dense<0.000000e+00> : vector<96x4xf32>
    %448 = tpu.matmul %445, %447, %cst_323 {dimension_numbers = #tpu.dot_dimension_numbers<[1], [0], [0], [1], [0, 0, 1, 1], [], []>} : vector<96x8xbf16>, vector<8x4xbf16>, vector<96x4xf32> -> vector<96x4xf32>
    %449 = arith.addf %443, %448 : vector<96x4xf32>
    %c0_324 = arith.constant 0 : index
    %c0_325 = arith.constant 0 : index
    %450 = vector.load %arg5[%c0_324, %c0_325] : memref<1x4xf32, #tpu.memory_space<vmem>>, vector<1x4xf32>
    %451 = vector.broadcast %450 : vector<1x4xf32> to vector<96x4xf32>
    %452 = arith.addf %449, %451 : vector<96x4xf32>
    %c0_326 = arith.constant 0 : index
    %c96_327 = arith.constant 96 : index
    %c0_328 = arith.constant 0 : index
    %453 = vector.load %arg6[%c0_326, %c96_327, %c0_328] : memref<1x288x4xf32, #tpu.memory_space<vmem>>, vector<1x96x4xf32>
    %454 = vector.shape_cast %453 : vector<1x96x4xf32> to vector<96x4xf32>
    %455 = vector.shape_cast %452 : vector<96x4xf32> to vector<1x96x4xf32>
    tpu.vector_store %arg6[%c0_326, %c96_327, %c0_328], %455 {strides = array<i32>} : memref<1x288x4xf32, #tpu.memory_space<vmem>>, vector<1x96x4xf32>,
    %cst_329 = arith.constant 0.000000e+00 : f32
    %456 = vector.broadcast %cst_329 : f32 to vector<96x4xf32>
    %c197 = arith.constant 197 : index
    %c0_330 = arith.constant 0 : index
    %457 = vector.load %arg8[%c197, %c0_330] : memref<336x8xf32, #tpu.memory_space<vmem>>, vector<96x8xf32>
    %458 = arith.truncf %457 : vector<96x8xf32> to vector<96x8xbf16>
    %c0_331 = arith.constant 0 : index
    %c0_332 = arith.constant 0 : index
    %c0_333 = arith.constant 0 : index
    %459 = vector.load %arg4[%c0_331, %c0_332, %c0_333] : memref<9x8x4xbf16, #tpu.memory_space<vmem>>, vector<1x8x4xbf16>
    %460 = vector.shape_cast %459 : vector<1x8x4xbf16> to vector<8x4xbf16>
    %cst_334 = arith.constant dense<0.000000e+00> : vector<96x4xf32>
    %461 = tpu.matmul %458, %460, %cst_334 {dimension_numbers = #tpu.dot_dimension_numbers<[1], [0], [0], [1], [0, 0, 1, 1], [], []>} : vector<96x8xbf16>, vector<8x4xbf16>, vector<96x4xf32> -> vector<96x4xf32>
    %462 = arith.addf %456, %461 : vector<96x4xf32>
    %c198 = arith.constant 198 : index
    %c0_335 = arith.constant 0 : index
    %463 = vector.load %arg8[%c198, %c0_335] : memref<336x8xf32, #tpu.memory_space<vmem>>, vector<96x8xf32>
    %464 = arith.truncf %463 : vector<96x8xf32> to vector<96x8xbf16>
    %c1_336 = arith.constant 1 : index
    %c0_337 = arith.constant 0 : index
    %c0_338 = arith.constant 0 : index
    %465 = vector.load %arg4[%c1_336, %c0_337, %c0_338] : memref<9x8x4xbf16, #tpu.memory_space<vmem>>, vector<1x8x4xbf16>
    %466 = vector.shape_cast %465 : vector<1x8x4xbf16> to vector<8x4xbf16>
    %cst_339 = arith.constant dense<0.000000e+00> : vector<96x4xf32>
    %467 = tpu.matmul %464, %466, %cst_339 {dimension_numbers = #tpu.dot_dimension_numbers<[1], [0], [0], [1], [0, 0, 1, 1], [], []>} : vector<96x8xbf16>, vector<8x4xbf16>, vector<96x4xf32> -> vector<96x4xf32>
    %468 = arith.addf %462, %467 : vector<96x4xf32>
    %c199 = arith.constant 199 : index
    %c0_340 = arith.constant 0 : index
    %469 = vector.load %arg8[%c199, %c0_340] : memref<336x8xf32, #tpu.memory_space<vmem>>, vector<96x8xf32>
    %470 = arith.truncf %469 : vector<96x8xf32> to vector<96x8xbf16>
    %c2_341 = arith.constant 2 : index
    %c0_342 = arith.constant 0 : index
    %c0_343 = arith.constant 0 : index
    %471 = vector.load %arg4[%c2_341, %c0_342, %c0_343] : memref<9x8x4xbf16, #tpu.memory_space<vmem>>, vector<1x8x4xbf16>
    %472 = vector.shape_cast %471 : vector<1x8x4xbf16> to vector<8x4xbf16>
    %cst_344 = arith.constant dense<0.000000e+00> : vector<96x4xf32>
    %473 = tpu.matmul %470, %472, %cst_344 {dimension_numbers = #tpu.dot_dimension_numbers<[1], [0], [0], [1], [0, 0, 1, 1], [], []>} : vector<96x8xbf16>, vector<8x4xbf16>, vector<96x4xf32> -> vector<96x4xf32>
    %474 = arith.addf %468, %473 : vector<96x4xf32>
    %c215 = arith.constant 215 : index
    %c0_345 = arith.constant 0 : index
    %475 = vector.load %arg8[%c215, %c0_345] : memref<336x8xf32, #tpu.memory_space<vmem>>, vector<96x8xf32>
    %476 = arith.truncf %475 : vector<96x8xf32> to vector<96x8xbf16>
    %c3_346 = arith.constant 3 : index
    %c0_347 = arith.constant 0 : index
    %c0_348 = arith.constant 0 : index
    %477 = vector.load %arg4[%c3_346, %c0_347, %c0_348] : memref<9x8x4xbf16, #tpu.memory_space<vmem>>, vector<1x8x4xbf16>
    %478 = vector.shape_cast %477 : vector<1x8x4xbf16> to vector<8x4xbf16>
    %cst_349 = arith.constant dense<0.000000e+00> : vector<96x4xf32>
    %479 = tpu.matmul %476, %478, %cst_349 {dimension_numbers = #tpu.dot_dimension_numbers<[1], [0], [0], [1], [0, 0, 1, 1], [], []>} : vector<96x8xbf16>, vector<8x4xbf16>, vector<96x4xf32> -> vector<96x4xf32>
    %480 = arith.addf %474, %479 : vector<96x4xf32>
    %c216_350 = arith.constant 216 : index
    %c0_351 = arith.constant 0 : index
    %481 = vector.load %arg8[%c216_350, %c0_351] : memref<336x8xf32, #tpu.memory_space<vmem>>, vector<96x8xf32>
    %482 = arith.truncf %481 : vector<96x8xf32> to vector<96x8xbf16>
    %c4_352 = arith.constant 4 : index
    %c0_353 = arith.constant 0 : index
    %c0_354 = arith.constant 0 : index
    %483 = vector.load %arg4[%c4_352, %c0_353, %c0_354] : memref<9x8x4xbf16, #tpu.memory_space<vmem>>, vector<1x8x4xbf16>
    %484 = vector.shape_cast %483 : vector<1x8x4xbf16> to vector<8x4xbf16>
    %cst_355 = arith.constant dense<0.000000e+00> : vector<96x4xf32>
    %485 = tpu.matmul %482, %484, %cst_355 {dimension_numbers = #tpu.dot_dimension_numbers<[1], [0], [0], [1], [0, 0, 1, 1], [], []>} : vector<96x8xbf16>, vector<8x4xbf16>, vector<96x4xf32> -> vector<96x4xf32>
    %486 = arith.addf %480, %485 : vector<96x4xf32>
    %c217 = arith.constant 217 : index
    %c0_356 = arith.constant 0 : index
    %487 = vector.load %arg8[%c217, %c0_356] : memref<336x8xf32, #tpu.memory_space<vmem>>, vector<96x8xf32>
    %488 = arith.truncf %487 : vector<96x8xf32> to vector<96x8xbf16>
    %c5_357 = arith.constant 5 : index
    %c0_358 = arith.constant 0 : index
    %c0_359 = arith.constant 0 : index
    %489 = vector.load %arg4[%c5_357, %c0_358, %c0_359] : memref<9x8x4xbf16, #tpu.memory_space<vmem>>, vector<1x8x4xbf16>
    %490 = vector.shape_cast %489 : vector<1x8x4xbf16> to vector<8x4xbf16>
    %cst_360 = arith.constant dense<0.000000e+00> : vector<96x4xf32>
    %491 = tpu.matmul %488, %490, %cst_360 {dimension_numbers = #tpu.dot_dimension_numbers<[1], [0], [0], [1], [0, 0, 1, 1], [], []>} : vector<96x8xbf16>, vector<8x4xbf16>, vector<96x4xf32> -> vector<96x4xf32>
    %492 = arith.addf %486, %491 : vector<96x4xf32>
    %c233 = arith.constant 233 : index
    %c0_361 = arith.constant 0 : index
    %493 = vector.load %arg8[%c233, %c0_361] : memref<336x8xf32, #tpu.memory_space<vmem>>, vector<96x8xf32>
    %494 = arith.truncf %493 : vector<96x8xf32> to vector<96x8xbf16>
    %c6_362 = arith.constant 6 : index
    %c0_363 = arith.constant 0 : index
    %c0_364 = arith.constant 0 : index
    %495 = vector.load %arg4[%c6_362, %c0_363, %c0_364] : memref<9x8x4xbf16, #tpu.memory_space<vmem>>, vector<1x8x4xbf16>
    %496 = vector.shape_cast %495 : vector<1x8x4xbf16> to vector<8x4xbf16>
    %cst_365 = arith.constant dense<0.000000e+00> : vector<96x4xf32>
    %497 = tpu.matmul %494, %496, %cst_365 {dimension_numbers = #tpu.dot_dimension_numbers<[1], [0], [0], [1], [0, 0, 1, 1], [], []>} : vector<96x8xbf16>, vector<8x4xbf16>, vector<96x4xf32> -> vector<96x4xf32>
    %498 = arith.addf %492, %497 : vector<96x4xf32>
    %c234 = arith.constant 234 : index
    %c0_366 = arith.constant 0 : index
    %499 = vector.load %arg8[%c234, %c0_366] : memref<336x8xf32, #tpu.memory_space<vmem>>, vector<96x8xf32>
    %500 = arith.truncf %499 : vector<96x8xf32> to vector<96x8xbf16>
    %c7_367 = arith.constant 7 : index
    %c0_368 = arith.constant 0 : index
    %c0_369 = arith.constant 0 : index
    %501 = vector.load %arg4[%c7_367, %c0_368, %c0_369] : memref<9x8x4xbf16, #tpu.memory_space<vmem>>, vector<1x8x4xbf16>
    %502 = vector.shape_cast %501 : vector<1x8x4xbf16> to vector<8x4xbf16>
    %cst_370 = arith.constant dense<0.000000e+00> : vector<96x4xf32>
    %503 = tpu.matmul %500, %502, %cst_370 {dimension_numbers = #tpu.dot_dimension_numbers<[1], [0], [0], [1], [0, 0, 1, 1], [], []>} : vector<96x8xbf16>, vector<8x4xbf16>, vector<96x4xf32> -> vector<96x4xf32>
    %504 = arith.addf %498, %503 : vector<96x4xf32>
    %c235 = arith.constant 235 : index
    %c0_371 = arith.constant 0 : index
    %505 = vector.load %arg8[%c235, %c0_371] : memref<336x8xf32, #tpu.memory_space<vmem>>, vector<96x8xf32>
    %506 = arith.truncf %505 : vector<96x8xf32> to vector<96x8xbf16>
    %c8_372 = arith.constant 8 : index
    %c0_373 = arith.constant 0 : index
    %c0_374 = arith.constant 0 : index
    %507 = vector.load %arg4[%c8_372, %c0_373, %c0_374] : memref<9x8x4xbf16, #tpu.memory_space<vmem>>, vector<1x8x4xbf16>
    %508 = vector.shape_cast %507 : vector<1x8x4xbf16> to vector<8x4xbf16>
    %cst_375 = arith.constant dense<0.000000e+00> : vector<96x4xf32>
    %509 = tpu.matmul %506, %508, %cst_375 {dimension_numbers = #tpu.dot_dimension_numbers<[1], [0], [0], [1], [0, 0, 1, 1], [], []>} : vector<96x8xbf16>, vector<8x4xbf16>, vector<96x4xf32> -> vector<96x4xf32>
    %510 = arith.addf %504, %509 : vector<96x4xf32>
    %c0_376 = arith.constant 0 : index
    %c0_377 = arith.constant 0 : index
    %511 = vector.load %arg5[%c0_376, %c0_377] : memref<1x4xf32, #tpu.memory_space<vmem>>, vector<1x4xf32>
    %512 = vector.broadcast %511 : vector<1x4xf32> to vector<96x4xf32>
    %513 = arith.addf %510, %512 : vector<96x4xf32>
    %c0_378 = arith.constant 0 : index
    %c192_379 = arith.constant 192 : index
    %c0_380 = arith.constant 0 : index
    %514 = vector.load %arg6[%c0_378, %c192_379, %c0_380] : memref<1x288x4xf32, #tpu.memory_space<vmem>>, vector<1x96x4xf32>
    %515 = vector.shape_cast %514 : vector<1x96x4xf32> to vector<96x4xf32>
    %516 = vector.shape_cast %513 : vector<96x4xf32> to vector<1x96x4xf32>
    tpu.vector_store %arg6[%c0_378, %c192_379, %c0_380], %516 {strides = array<i32>} : memref<1x288x4xf32, #tpu.memory_space<vmem>>, vector<1x96x4xf32>,
    return
  }
  func.func @transform_0(%arg0: i32) -> (i32, i32, i32) {
    %c0_i32 = arith.constant 0 : i32
    %c0_i32_0 = arith.constant 0 : i32
    %c0_i32_1 = arith.constant 0 : i32
    return %arg0, %c0_i32, %c0_i32_0 : i32, i32, i32
  }
  func.func @transform_1(%arg0: i32) -> (i32, i32, i32) {
    %c0_i32 = arith.constant 0 : i32
    %c0_i32_0 = arith.constant 0 : i32
    %c0_i32_1 = arith.constant 0 : i32
    %c0_i32_2 = arith.constant 0 : i32
    return %c0_i32, %c0_i32_0, %c0_i32_1 : i32, i32, i32
  }
  func.func @transform_2(%arg0: i32) -> (i32, i32) {
    %c0_i32 = arith.constant 0 : i32
    %c0_i32_0 = arith.constant 0 : i32
    %c0_i32_1 = arith.constant 0 : i32
    return %c0_i32, %c0_i32_0 : i32, i32
  }
  func.func @transform_3(%arg0: i32) -> (i32, i32, i32) {
    %c0_i32 = arith.constant 0 : i32
    %c0_i32_0 = arith.constant 0 : i32
    %c0_i32_1 = arith.constant 0 : i32
    %c0_i32_2 = arith.constant 0 : i32
    return %c0_i32, %c0_i32_0, %c0_i32_1 : i32, i32, i32
  }
  func.func @transform_4(%arg0: i32) -> (i32, i32) {
    %c0_i32 = arith.constant 0 : i32
    %c0_i32_0 = arith.constant 0 : i32
    %c0_i32_1 = arith.constant 0 : i32
    return %c0_i32, %c0_i32_0 : i32, i32
  }
  func.func @transform_5(%arg0: i32) -> (i32, i32, i32) {
    %c0_i32 = arith.constant 0 : i32
    %c0_i32_0 = arith.constant 0 : i32
    %c0_i32_1 = arith.constant 0 : i32
    return %arg0, %c0_i32, %c0_i32_0 : i32, i32, i32
  }
  func.func @transform_6(%arg0: i32) -> (i32, i32, i32) {
    %c0_i32 = arith.constant 0 : i32
    %c0_i32_0 = arith.constant 0 : i32
    %c0_i32_1 = arith.constant 0 : i32
    return %arg0, %c0_i32, %c0_i32_0 : i32, i32, i32
  }
}

</mosaic_0001>

<bundles_post_ra>
// kernel: base_distiller_forward.1
= control target key start
LH: loop header
LB: loop body
LE: loop exit
PB: predicated region body
PF: predicated region fallthrough
CT: control target
= control target key end

     0   :  { %s10740_s21 = smov 0   ;;  %s16352_s0 = inlined_call_operand.vmem [shape: f32[2,328,4], index: 0, kind: input, shape index: {}]   ;;  %s16353_s1 = inlined_call_operand.vmem [shape: bf16[9,4,256], index: 1, kind: input, shape index: {}]   ;;  %s16354_s2 = inlined_call_operand.vmem [shape: f32[1,256], index: 2, kind: input, shape index: {}]   ;;  %s16355_s3 = inlined_call_operand.vmem [shape: bf16[9,8,4], index: 3, kind: input, shape index: {}]   ;;  %s16356_s4 = inlined_call_operand.vmem [shape: f32[1,4], index: 4, kind: input, shape index: {}]   ;;  %s16357_s5 = inlined_call_operand.vmem [shape: f32[2,288,4], index: 5, kind: output, shape index: {0}]   ;;  %s16358_s6 = inlined_call_operand.vmem [shape: f32[2,1,128], index: 6, kind: output, shape index: {1}]  }
   0x1 LB: > { %s9577_s22 = sadd.s32 4294967295, %s10701_s21   ;;  %p9581_p0 = scmp.ge.s32.totalorder %s10701_s21, 1  ;;  %s10701_s21 = sphi %s10740_s21, %s17_s21  }
   0x2   : > { %p215_p1 = scmp.lt.s32.totalorder %s10701_s21, 3 }
   0x4   : > { %p216_p2 = pnand %p9581_p0, %p215_p1 }
   0x6   : > { %219 = sbr.rel (%p216_p2) target bundleno = 1214 (0x4be), region = 40 }
   0xb   : > { %v9585_v0 = vld.sshfl [vmem:[%s16353_s1 + $0x4] sm:$0x33 pattern:$0x76325410]  ;;  %vm373_vm0 = vcmask 1041408   ;;  %v16359_v3 = vmov 0  }
   0xc   : > { %v10751_v1 = vcombine.high %v9585_v0, %v9585_v0  ;;  %v10754_v2 = vsel %vm373_vm0, %v9585_v0, 0  ;;  %412 = vmatprep.mubr.bf16.mxu0 %v16359_v3  ;;  %462 = vmatprep.mubr.bf16.mxu1 %v16359_v3  ;;  %v9602_v4 = vld.sshfl [vmem:[%s16353_s1 + $0x8] sm:$0x33 pattern:$0x76325410]  ;;  %p248_p3 = scmp.lt.s32.totalorder %s9577_s22, 1 }
   0xd   : > { %v10761_v5 = vcombine.high %v9602_v4, %v9602_v4  ;;  %v9593_v6 = vld.sshfl [vmem:[%s16353_s1] sm:$0x33 pattern:$0x76325410]  ;;  %vm16454_vm1 = vcmask 31744   ;;  %v10799_v15 = vsel %vm373_vm0, %v9602_v4, 0 }
   0xe   : > { %9586 = vmatprep.subr.msk.bf16.mxu0 %vm373_vm0, %v10751_v1  ;;  %10582 = vmatprep.subr.msk.bf16.mxu1 %vm373_vm0, %v10751_v1  ;;  %s17485_s22 = smov (!%p248_p3, %s9577_s22), 1  ;;  %v10772_v7 = vcombine.high %v9593_v6, %v9593_v6  ;;  %v9611_v8 = vld.sshfl [vmem:[%s16353_s1 + $0xc] sm:$0x33 pattern:$0x76325410]  ;;  %v10802_v17 = vsel %vm373_vm0, %v9593_v6, 0 }
   0xf   : > { %395 = vmatpush1.bf16.msra.mxu0 %v10754_v2  ;;  %10583 = vmatpush1.bf16.msra.mxu1 %v10754_v2  ;;  %s10611_s29 = smul.u32 328, %s17485_s22  ;;  %v10792_v9 = vld.sshfl [vmem:[%s16353_s1 + $0x10] sm:$0x33 pattern:$0x76325410]  ;;  %v10804_v18 = vcombine.high %v9611_v8, %v9611_v8  ;;  %v10830_v27 = vsel %vm373_vm0, %v9611_v8, 0  ;;  %s11474_s7 = scalar_lea.vmem %s16358_s6, %s17485_s22 }
  0x10   : > { %9603 = vmatprep.subr.msk.bf16.mxu0 %vm373_vm0, %v10761_v5  ;;  %9594 = vmatprep.subr.msk.bf16.mxu1 %vm373_vm0, %v10772_v7  ;;  %v10809_v19 = vcombine.high %v10792_v9, %v10792_v9  ;;  %v10827_v25 = vld.sshfl [vmem:[%s16353_s1 + $0x14] sm:$0x33 pattern:$0x76325410]  ;;  %v10876_v54 = vsel %vm373_vm0, %v10792_v9, 0  ;;  %vm16427_vm2 = vcmask 64512  }
  0x11   : > { %s10787_s10 = scalar_lea.vmem %s16352_s0, %s10611_s29  ;;  %v10834_v28 = vcombine.high %v10827_v25, %v10827_v25  ;;  %v9638_v52 = vld.sshfl [vmem:[%s16353_s1 + $0x18] sm:$0x33 pattern:$0x76325410]  ;;  %v10899_v6 = vsel %vm373_vm0, %v10827_v25, 0  ;;  %s10612_s25 = smul.u32 288, %s17485_s22 }
  0x12   : > { %v325_v10 = vld [vmem:[%s10787_s10 + $0x1] sm:$0xff]  ;;  %v326_v11 = vld [vmem:[%s10787_s10 + $0x9] sm:$0xff]  ;;  %v335_v12 = vld [vmem:[%s10787_s10 + $0x51] sm:$0xff]  ;;  %v1307_v55 = vcombine.high %v9638_v52, %v9638_v52 }
  0x13   : > { %v337_v13 = vpack.c.bf16 %v326_v11, %v325_v10  ;;  %v336_v14 = vld [vmem:[%s10787_s10 + $0x59] sm:$0xff]  ;;  %v327_v20 = vld [vmem:[%s10787_s10 + $0x11] sm:$0xff]  ;;  %v307_v23 = vld [vmem:[%s10787_s10 + $0x8] sm:$0xff]  ;;  %s15776_s29 = scalar_lea.vmem %s16357_s5, %s10612_s25 }
  0x14   : > { %v342_v16 = vpack.c.bf16 %v336_v14, %v335_v12  ;;  %v328_v21 = vld [vmem:[%s10787_s10 + $0x19] sm:$0xff]  ;;  %v329_v29 = vld [vmem:[%s10787_s10 + $0x21] sm:$0xff]  ;;  %v330_v30 = vld [vmem:[%s10787_s10 + $0x29] sm:$0xff] }
  0x15   : > { %9587 = vmatmul.mubr.msk.bf16.vlgmr.msra.gmra.mxu0 %vm16454_vm1, %v337_v13  ;;  %v306_v22 = vld [vmem:[%s10787_s10] sm:$0xff]  ;;  %v338_v24 = vpack.c.bf16 %v328_v21, %v327_v20  ;;  %v308_v31 = vld [vmem:[%s10787_s10 + $0x10] sm:$0xff]  ;;  %v309_v32 = vld [vmem:[%s10787_s10 + $0x18] sm:$0xff]  ;;  %v339_v33 = vpack.c.bf16 %v330_v30, %v329_v29 }
  0x16   : > { %9592 = vmatmul.mubr.msk.bf16.vlgmr.msra.gmra.mxu1 %vm16454_vm1, %v342_v16  ;;  %667 = vmatpush1.bf16.msra.mxu0 %v10799_v15  ;;  %v318_v26 = vpack.c.bf16 %v307_v23, %v306_v22  ;;  %v319_v34 = vpack.c.bf16 %v309_v32, %v308_v31  ;;  %v331_v35 = vld [vmem:[%s10787_s10 + $0x31] sm:$0xff]  ;;  %v332_v36 = vld [vmem:[%s10787_s10 + $0x39] sm:$0xff]  ;;  %v311_v38 = vld [vmem:[%s10787_s10 + $0x28] sm:$0xff] }
  0x17   : > { %521 = vmatpush1.bf16.msra.mxu1 %v10802_v17  ;;  %422 = vmatprep.mubr.bf16.mxu0 %v16359_v3  ;;  %v310_v37 = vld [vmem:[%s10787_s10 + $0x20] sm:$0xff]  ;;  %v340_v39 = vpack.c.bf16 %v332_v36, %v331_v35  ;;  %v334_v42 = vld [vmem:[%s10787_s10 + $0x49] sm:$0xff]  ;;  %v313_v44 = vld [vmem:[%s10787_s10 + $0x38] sm:$0xff] }
  0x18   : > { %538 = vmatprep.mubr.bf16.mxu1 %v16359_v3  ;;  %9612 = vmatprep.subr.msk.bf16.mxu1 %vm373_vm0, %v10804_v18  ;;  %v320_v40 = vpack.c.bf16 %v311_v38, %v310_v37  ;;  %v333_v41 = vld [vmem:[%s10787_s10 + $0x41] sm:$0xff]  ;;  %v312_v43 = vld [vmem:[%s10787_s10 + $0x30] sm:$0xff]  ;;  %v317_v59 = vld [vmem:[%s10787_s10 + $0x58] sm:$0xff] }
  0x19   : > { %9621 = vmatprep.subr.msk.bf16.mxu0 %vm373_vm0, %v10809_v19  ;;  %v341_v45 = vpack.c.bf16 %v334_v42, %v333_v41  ;;  %v321_v46 = vpack.c.bf16 %v313_v44, %v312_v43  ;;  %v599_v47 = vld [vmem:[%s10787_s10 + $0x2] sm:$0xff]  ;;  %v600_v48 = vld [vmem:[%s10787_s10 + $0xa] sm:$0xff]  ;;  %v601_v56 = vld [vmem:[%s10787_s10 + $0x12] sm:$0xff] }
  0x1a   : > { %v314_v49 = vld [vmem:[%s10787_s10 + $0x40] sm:$0xff]  ;;  %v315_v50 = vld [vmem:[%s10787_s10 + $0x48] sm:$0xff]  ;;  %v611_v51 = vpack.c.bf16 %v600_v48, %v599_v47  ;;  %v316_v58 = vld [vmem:[%s10787_s10 + $0x50] sm:$0xff] }
  0x1b   : > { %v322_v53 = vpack.c.bf16 %v315_v50, %v314_v49  ;;  %v602_v57 = vld [vmem:[%s10787_s10 + $0x1a] sm:$0xff]  ;;  %v323_v61 = vpack.c.bf16 %v317_v59, %v316_v58  ;;  %v603_v62 = vld [vmem:[%s10787_s10 + $0x22] sm:$0xff]  ;;  %v604_v63 = vld [vmem:[%s10787_s10 + $0x2a] sm:$0xff] }
  0x1c   : > { %v612_v60 = vpack.c.bf16 %v602_v57, %v601_v56  ;;  %v613_v0 = vpack.c.bf16 %v604_v63, %v603_v62  ;;  %v9647_v4 = vld.sshfl [vmem:[%s16353_s1 + $0x1c] sm:$0x33 pattern:$0x76325410]  ;;  %v605_v9 = vld [vmem:[%s10787_s10 + $0x32] sm:$0xff]  ;;  %v607_v12 = vld [vmem:[%s10787_s10 + $0x42] sm:$0xff] }
  0x1d   : > { %9588 = vmatmul.mubr.msk.bf16.gmra.mxu0 %vm16454_vm1, %v338_v24  ;;  %v1477_v8 = vcombine.high %v9647_v4, %v9647_v4  ;;  %v606_v10 = vld [vmem:[%s10787_s10 + $0x3a] sm:$0xff]  ;;  %v608_v13 = vld [vmem:[%s10787_s10 + $0x4a] sm:$0xff]  ;;  %v609_v16 = vld [vmem:[%s10787_s10 + $0x52] sm:$0xff]  ;;  %v1497_v42 = vsel %vm373_vm0, %v9647_v4, 0 }
  0x1e   : > { %9595 = vmatmul.mubr.msk.bf16.vlgmr.msra.gmra.mxu1 %vm16454_vm1, %v318_v26  ;;  %432 = vmatprep.mubr.bf16.mxu0 %v16359_v3  ;;  %v614_v11 = vpack.c.bf16 %v606_v10, %v605_v9  ;;  %v615_v14 = vpack.c.bf16 %v608_v13, %v607_v12  ;;  %v610_v20 = vld [vmem:[%s10787_s10 + $0x5a] sm:$0xff]  ;;  %v1327_v26 = vsel %vm373_vm0, %v9638_v52, 0  ;;  %v941_v30 = vld [vmem:[%s10787_s10 + $0x23] sm:$0xff]  ;;  %v942_v31 = vld [vmem:[%s10787_s10 + $0x2b] sm:$0xff] }
  0x1f   : > { %548 = vmatprep.mubr.bf16.mxu1 %v16359_v3  ;;  %837 = vmatpush1.bf16.msra.mxu1 %v10830_v27  ;;  %v616_v21 = vpack.c.bf16 %v610_v20, %v609_v16  ;;  %v939_v22 = vld [vmem:[%s10787_s10 + $0x13] sm:$0xff]  ;;  %v940_v23 = vld [vmem:[%s10787_s10 + $0x1b] sm:$0xff]  ;;  %v945_v43 = vld [vmem:[%s10787_s10 + $0x43] sm:$0xff] }
  0x20   : > { %9630 = vmatprep.subr.msk.bf16.mxu1 %vm373_vm0, %v10834_v28  ;;  %v951_v24 = vpack.c.bf16 %v940_v23, %v939_v22  ;;  %v10930_v25 = vld.sshfl [vmem:[%s16353_s1 + $0x20] sm:$0x33 pattern:$0x76325410]  ;;  %v943_v36 = vld [vmem:[%s10787_s10 + $0x33] sm:$0xff]  ;;  %v946_v44 = vld [vmem:[%s10787_s10 + $0x4b] sm:$0xff] }
  0x21   : > { %v1647_v29 = vcombine.high %v10930_v25, %v10930_v25  ;;  %v779_v32 = vld [vmem:[%s10787_s10 + $0x62] sm:$0xff]  ;;  %v1109_v38 = vld [vmem:[%s10787_s10 + $0x14] sm:$0xff]  ;;  %v954_v47 = vpack.c.bf16 %v946_v44, %v945_v43  ;;  %v950_v56 = vld [vmem:[%s10787_s10 + $0x6b] sm:$0xff] }
  0x22   : > { %v944_v37 = vld [vmem:[%s10787_s10 + $0x3b] sm:$0xff]  ;;  %v947_v49 = vld [vmem:[%s10787_s10 + $0x53] sm:$0xff]  ;;  %v1115_v57 = vld [vmem:[%s10787_s10 + $0x44] sm:$0xff] }
  0x23   : > { %v948_v50 = vld [vmem:[%s10787_s10 + $0x5b] sm:$0xff]  ;;  %v1116_v58 = vld [vmem:[%s10787_s10 + $0x4c] sm:$0xff]  ;;  %v1119_v4 = vld [vmem:[%s10787_s10 + $0x64] sm:$0xff] }
  0x24   : > { %v1114_v52 = vld [vmem:[%s10787_s10 + $0x3c] sm:$0xff]  ;;  %v1449_v10 = vld [vmem:[%s10787_s10 + $0x25] sm:$0xff]  ;;  %v1454_v20 = vld [vmem:[%s10787_s10 + $0x4d] sm:$0xff] }
  0x25   : > { %9589 = vmatmul.mubr.msk.bf16.gmra.mxu0 %vm16454_vm1, %v339_v33  ;;  %v780_v33 = vld [vmem:[%s10787_s10 + $0x6a] sm:$0xff]  ;;  %v1118_v62 = vld [vmem:[%s10787_s10 + $0x5c] sm:$0xff] }
  0x26   : > { %9596 = vmatmul.mubr.msk.bf16.gmra.mxu1 %vm16454_vm1, %v319_v34  ;;  %442 = vmatprep.mubr.bf16.mxu0 %v16359_v3  ;;  %v952_v34 = vpack.c.bf16 %v942_v31, %v941_v30  ;;  %v10944_v35 = vpack.c.bf16 %v780_v33, %v779_v32  ;;  %v1452_v13 = vld [vmem:[%s10787_s10 + $0x3d] sm:$0xff]  ;;  %v1453_v16 = vld [vmem:[%s10787_s10 + $0x45] sm:$0xff]  ;;  %v1455_v22 = vld [vmem:[%s10787_s10 + $0x55] sm:$0xff] }
  0x27   : > { %558 = vmatprep.mubr.bf16.mxu1 %v16359_v3  ;;  %v1456_v23 = vld [vmem:[%s10787_s10 + $0x5d] sm:$0xff]  ;;  %v1457_v30 = vld [vmem:[%s10787_s10 + $0x65] sm:$0xff]  ;;  %v1458_v31 = vld [vmem:[%s10787_s10 + $0x6d] sm:$0xff] }
  0x28   : > { %v1465_v33 = vpack.c.bf16 %v1458_v31, %v1457_v30  ;;  %v1624_v43 = vld [vmem:[%s10787_s10 + $0x4e] sm:$0xff] }
  0x2d   : > { %9590 = vmatmul.mubr.msk.bf16.gmra.mxu0 %vm16454_vm1, %v340_v39  ;;  %v1110_v39 = vld [vmem:[%s10787_s10 + $0x1c] sm:$0xff] }
  0x2e   : > { %9597 = vmatmul.mubr.msk.bf16.gmra.mxu1 %vm16454_vm1, %v320_v40  ;;  %452 = vmatprep.mubr.bf16.mxu0 %v16359_v3  ;;  %v953_v40 = vpack.c.bf16 %v944_v37, %v943_v36  ;;  %v1121_v41 = vpack.c.bf16 %v1110_v39, %v1109_v38  ;;  %v1622_v36 = vld [vmem:[%s10787_s10 + $0x3e] sm:$0xff]  ;;  %v1459_v37 = vld [vmem:[%s10787_s10 + $0x75] sm:$0xff] }
  0x2f   : > { %568 = vmatprep.mubr.bf16.mxu1 %v16359_v3  ;;  %v1460_v38 = vld [vmem:[%s10787_s10 + $0x7d] sm:$0xff] }
  0x35   : > { %9591 = vmatmul.mubr.msk.bf16.gmra.mxu0 %vm16454_vm1, %v341_v45  ;;  %v1111_v45 = vld [vmem:[%s10787_s10 + $0x24] sm:$0xff] }
  0x36   : > { %9598 = vmatmul.mubr.msk.bf16.gmra.mxu1 %vm16454_vm1, %v321_v46  ;;  %684 = vmatprep.mubr.bf16.mxu0 %v16359_v3  ;;  %v1112_v46 = vld [vmem:[%s10787_s10 + $0x2c] sm:$0xff] }
  0x37   : > { %578 = vmatprep.mubr.bf16.mxu1 %v16359_v3  ;;  %v1122_v48 = vpack.c.bf16 %v1112_v46, %v1111_v45  ;;  %v2189_v45 = vld [vmem:[%s10787_s10 + $0x61] sm:$0xff] }
  0x3d   : > { %9604 = vmatmul.mubr.msk.bf16.vlgmr.msra.gmra.mxu0 %vm16454_vm1, %v611_v51  ;;  %v1113_v51 = vld [vmem:[%s10787_s10 + $0x34] sm:$0xff] }
  0x3e   : > { %9599 = vmatmul.mubr.msk.bf16.gmra.mxu1 %vm16454_vm1, %v322_v53  ;;  %1007 = vmatpush1.bf16.msra.mxu0 %v10876_v54  ;;  %v955_v53 = vpack.c.bf16 %v948_v50, %v947_v49 }
  0x3f   : > { %588 = vmatprep.mubr.bf16.mxu1 %v16359_v3  ;;  %694 = vmatprep.mubr.bf16.mxu0 %v16359_v3 }
  0x40   : > { %9639 = vmatprep.subr.msk.bf16.mxu0 %vm373_vm0, %v1307_v55  ;;  %v949_v55 = vld [vmem:[%s10787_s10 + $0x63] sm:$0xff] }
  0x41   : > { %v956_v59 = vpack.c.bf16 %v950_v56, %v949_v55  ;;  %v1625_v55 = vld [vmem:[%s10787_s10 + $0x56] sm:$0xff]  ;;  %v1626_v56 = vld [vmem:[%s10787_s10 + $0x5e] sm:$0xff] }
  0x45   : > { %9605 = vmatmul.mubr.msk.bf16.gmra.mxu0 %vm16454_vm1, %v612_v60 }
  0x46   : > { %9600 = vmatmul.mubr.msk.bf16.gmra.mxu1 %vm16454_vm1, %v323_v61  ;;  %704 = vmatprep.mubr.bf16.mxu0 %v16359_v3  ;;  %v1117_v61 = vld [vmem:[%s10787_s10 + $0x54] sm:$0xff] }
  0x47   : > { %854 = vmatprep.mubr.bf16.mxu1 %v16359_v3  ;;  %v1125_v63 = vpack.c.bf16 %v1118_v62, %v1117_v61 }
  0x4d   : > { %9606 = vmatmul.mubr.msk.bf16.gmra.mxu0 %vm16454_vm1, %v613_v0 }
  0x4e   : > { %9613 = vmatmul.mubr.msk.bf16.vlgmr.msra.gmra.mxu1 %vm16454_vm1, %v612_v60  ;;  %714 = vmatprep.mubr.bf16.mxu0 %v16359_v3  ;;  %v1124_v60 = vpack.c.bf16 %v1116_v58, %v1115_v57 }
  0x4f   : > { %864 = vmatprep.mubr.bf16.mxu1 %v16359_v3  ;;  %1177 = vmatpush1.bf16.msra.mxu1 %v10899_v6 }
  0x50   : > { %9648 = vmatprep.subr.msk.bf16.mxu1 %vm373_vm0, %v1477_v8  ;;  %v1120_v8 = vld [vmem:[%s10787_s10 + $0x6c] sm:$0xff] }
  0x51   : > { %v1126_v9 = vpack.c.bf16 %v1120_v8, %v1119_v4 }
  0x55   : > { %9607 = vmatmul.mubr.msk.bf16.gmra.mxu0 %vm16454_vm1, %v614_v11 }
  0x56   : > { %9614 = vmatmul.mubr.msk.bf16.gmra.mxu1 %vm16454_vm1, %v613_v0  ;;  %724 = vmatprep.mubr.bf16.mxu0 %v16359_v3  ;;  %v1667_v0 = vsel %vm373_vm0, %v10930_v25, 0  ;;  %v1464_v25 = vpack.c.bf16 %v1456_v23, %v1455_v22 }
  0x57   : > { %874 = vmatprep.mubr.bf16.mxu1 %v16359_v3 }
  0x5d   : > { %9608 = vmatmul.mubr.msk.bf16.gmra.mxu0 %vm16454_vm1, %v615_v14 }
  0x5e   : > { %9615 = vmatmul.mubr.msk.bf16.gmra.mxu1 %vm16454_vm1, %v614_v11  ;;  %734 = vmatprep.mubr.bf16.mxu0 %v16359_v3  ;;  %v1450_v11 = vld [vmem:[%s10787_s10 + $0x2d] sm:$0xff] }
  0x5f   : > { %884 = vmatprep.mubr.bf16.mxu1 %v16359_v3  ;;  %v1461_v12 = vpack.c.bf16 %v1450_v11, %v1449_v10 }
  0x65   : > { %9609 = vmatmul.mubr.msk.bf16.gmra.mxu0 %vm16454_vm1, %v616_v21 }
  0x66   : > { %9616 = vmatmul.mubr.msk.bf16.gmra.mxu1 %vm16454_vm1, %v615_v14  ;;  %1024 = vmatprep.mubr.bf16.mxu0 %v16359_v3 }
  0x67   : > { %894 = vmatprep.mubr.bf16.mxu1 %v16359_v3 }
  0x6d   : > { %9622 = vmatmul.mubr.msk.bf16.vlgmr.msra.gmra.mxu0 %vm16454_vm1, %v951_v24 }
  0x6e   : > { %9617 = vmatmul.mubr.msk.bf16.gmra.mxu1 %vm16454_vm1, %v616_v21  ;;  %1347 = vmatpush1.bf16.msra.mxu0 %v1327_v26  ;;  %v1463_v21 = vpack.c.bf16 %v1454_v20, %v1453_v16  ;;  %v1619_v26 = vld [vmem:[%s10787_s10 + $0x26] sm:$0xff] }
  0x6f   : > { %904 = vmatprep.mubr.bf16.mxu1 %v16359_v3  ;;  %1034 = vmatprep.mubr.bf16.mxu0 %v16359_v3  ;;  %v2193_v20 = vld [vmem:[%s10787_s10 + $0x81] sm:$0xff] }
  0x70   : > { %9657 = vmatprep.subr.msk.bf16.mxu0 %vm373_vm0, %v1647_v29  ;;  %v1620_v29 = vld [vmem:[%s10787_s10 + $0x2e] sm:$0xff] }
  0x71   : > { %v1631_v32 = vpack.c.bf16 %v1620_v29, %v1619_v26 }
  0x75   : > { %9623 = vmatmul.mubr.msk.bf16.gmra.mxu0 %vm16454_vm1, %v952_v34  ;;  %v1621_v34 = vld [vmem:[%s10787_s10 + $0x36] sm:$0xff] }
  0x76   : > { %9618 = vmatmul.mubr.msk.bf16.gmra.mxu1 %vm16454_vm1, %v10944_v35  ;;  %1044 = vmatprep.mubr.bf16.mxu0 %v16359_v3  ;;  %v1632_v39 = vpack.c.bf16 %v1622_v36, %v1621_v34  ;;  %v1629_v36 = vld [vmem:[%s10787_s10 + $0x76] sm:$0xff] }
  0x77   : > { %1194 = vmatprep.mubr.bf16.mxu1 %v16359_v3 }
  0x7d   : > { %9624 = vmatmul.mubr.msk.bf16.gmra.mxu0 %vm16454_vm1, %v953_v40  ;;  %v1466_v40 = vpack.c.bf16 %v1460_v38, %v1459_v37  ;;  %v1630_v37 = vld [vmem:[%s10787_s10 + $0x7e] sm:$0xff] }
  0x7e   : > { %9631 = vmatmul.mubr.msk.bf16.vlgmr.msra.gmra.mxu1 %vm16454_vm1, %v1121_v41  ;;  %1054 = vmatprep.mubr.bf16.mxu0 %v16359_v3 }
  0x7f   : > { %1204 = vmatprep.mubr.bf16.mxu1 %v16359_v3  ;;  %1517 = vmatpush1.bf16.msra.mxu1 %v1497_v42  ;;  %v1623_v42 = vld [vmem:[%s10787_s10 + $0x46] sm:$0xff] }
  0x80   : > { %9666 = vmatprep.subr.msk.bf16.mxu1 %vm373_vm0, %v10751_v1  ;;  %v1123_v1 = vpack.c.bf16 %v1114_v52, %v1113_v51 }
  0x85   : > { %9625 = vmatmul.mubr.msk.bf16.gmra.mxu0 %vm16454_vm1, %v954_v47 }
  0x86   : > { %9632 = vmatmul.mubr.msk.bf16.gmra.mxu1 %vm16454_vm1, %v1122_v48  ;;  %1064 = vmatprep.mubr.bf16.mxu0 %v16359_v3 }
  0x87   : > { %1214 = vmatprep.mubr.bf16.mxu1 %v16359_v3 }
  0x8d   : > { %9626 = vmatmul.mubr.msk.bf16.gmra.mxu0 %vm16454_vm1, %v955_v53 }
  0x8e   : > { %9633 = vmatmul.mubr.msk.bf16.gmra.mxu1 %vm16454_vm1, %v1123_v1  ;;  %1074 = vmatprep.mubr.bf16.mxu0 %v16359_v3 }
  0x8f   : > { %1224 = vmatprep.mubr.bf16.mxu1 %v16359_v3 }
  0x95   : > { %9627 = vmatmul.mubr.msk.bf16.gmra.mxu0 %vm16454_vm1, %v956_v59  ;;  %v2191_v59 = vld [vmem:[%s10787_s10 + $0x71] sm:$0xff] }
  0x96   : > { %9634 = vmatmul.mubr.msk.bf16.gmra.mxu1 %vm16454_vm1, %v1124_v60  ;;  %1364 = vmatprep.mubr.bf16.mxu0 %v16359_v3 }
  0x97   : > { %1234 = vmatprep.mubr.bf16.mxu1 %v16359_v3 }
  0x9d   : > { %9640 = vmatmul.mubr.msk.bf16.vlgmr.msra.gmra.mxu0 %vm16454_vm1, %v1122_v48  ;;  %v1633_v48 = vpack.c.bf16 %v1624_v43, %v1623_v42 }
  0x9e   : > { %9635 = vmatmul.mubr.msk.bf16.gmra.mxu1 %vm16454_vm1, %v1125_v63  ;;  %1687 = vmatpush1.bf16.msra.mxu0 %v1667_v0  ;;  %v1634_v0 = vpack.c.bf16 %v1626_v56, %v1625_v55  ;;  %v2170_v56 = vld [vmem:[%s10787_s10 + $0x60] sm:$0xff] }
  0x9f   : > { %1244 = vmatprep.mubr.bf16.mxu1 %v16359_v3  ;;  %1374 = vmatprep.mubr.bf16.mxu0 %v16359_v3 }
  0xa0   : > { %9674 = vmatprep.subr.msk.bf16.mxu0 %vm373_vm0, %v10772_v7  ;;  %v1451_v7 = vld [vmem:[%s10787_s10 + $0x35] sm:$0xff] }
  0xa1   : > { %v1462_v14 = vpack.c.bf16 %v1452_v13, %v1451_v7  ;;  %v1628_v13 = vld [vmem:[%s10787_s10 + $0x6e] sm:$0xff] }
  0xa5   : > { %9641 = vmatmul.mubr.msk.bf16.gmra.mxu0 %vm16454_vm1, %v1123_v1 }
  0xa6   : > { %9636 = vmatmul.mubr.msk.bf16.gmra.mxu1 %vm16454_vm1, %v1126_v9  ;;  %1384 = vmatprep.mubr.bf16.mxu0 %v16359_v3 }
  0xa7   : > { %1534 = vmatprep.mubr.bf16.mxu1 %v16359_v3 }
  0xad   : > { %9642 = vmatmul.mubr.msk.bf16.gmra.mxu0 %vm16454_vm1, %v1124_v60  ;;  %v2192_v60 = vld [vmem:[%s10787_s10 + $0x79] sm:$0xff] }
  0xae   : > { %9649 = vmatmul.mubr.msk.bf16.vlgmr.msra.gmra.mxu1 %vm16454_vm1, %v1461_v12  ;;  %1394 = vmatprep.mubr.bf16.mxu0 %v16359_v3  ;;  %v2202_v8 = vpack.c.bf16 %v2192_v60, %v2191_v59 }
  0xaf   : > { %1544 = vmatprep.mubr.bf16.mxu1 %v16359_v3  ;;  %2256 = vmatpush1.bf16.msra.mxu1 %v10754_v2  ;;  %v1289_v2 = vld [vmem:[%s10787_s10 + $0x74] sm:$0xff] }
  0xb0   : > { %9683 = vmatprep.subr.msk.bf16.mxu1 %vm373_vm0, %v10761_v5  ;;  %v1290_v5 = vld [vmem:[%s10787_s10 + $0x7c] sm:$0xff] }
  0xb1   : > { %v11027_v24 = vpack.c.bf16 %v1290_v5, %v1289_v2 }
  0xb5   : > { %9643 = vmatmul.mubr.msk.bf16.gmra.mxu0 %vm16454_vm1, %v1125_v63 }
  0xb6   : > { %9650 = vmatmul.mubr.msk.bf16.gmra.mxu1 %vm16454_vm1, %v1462_v14  ;;  %1404 = vmatprep.mubr.bf16.mxu0 %v16359_v3 }
  0xb7   : > { %1554 = vmatprep.mubr.bf16.mxu1 %v16359_v3 }
  0xbd   : > { %9644 = vmatmul.mubr.msk.bf16.gmra.mxu0 %vm16454_vm1, %v1126_v9 }
  0xbe   : > { %9651 = vmatmul.mubr.msk.bf16.gmra.mxu1 %vm16454_vm1, %v1463_v21  ;;  %1414 = vmatprep.mubr.bf16.mxu0 %v16359_v3  ;;  %v2194_v21 = vld [vmem:[%s10787_s10 + $0x89] sm:$0xff] }
  0xbf   : > { %1564 = vmatprep.mubr.bf16.mxu1 %v16359_v3  ;;  %v2203_v26 = vpack.c.bf16 %v2194_v21, %v2193_v20 }
  0xc5   : > { %9645 = vmatmul.mubr.msk.bf16.gmra.mxu0 %vm16454_vm1, %v11027_v24 }
  0xc6   : > { %9652 = vmatmul.mubr.msk.bf16.gmra.mxu1 %vm16454_vm1, %v1464_v25  ;;  %1704 = vmatprep.mubr.bf16.mxu0 %v16359_v3 }
  0xc7   : > { %1574 = vmatprep.mubr.bf16.mxu1 %v16359_v3 }
  0xcd   : > { %9658 = vmatmul.mubr.msk.bf16.vlgmr.msra.gmra.mxu0 %vm16454_vm1, %v1631_v32 }
  0xce   : > { %9653 = vmatmul.mubr.msk.bf16.gmra.mxu1 %vm16454_vm1, %v1465_v33  ;;  %2382 = vmatpush1.bf16.msra.mxu0 %v10802_v17 }
  0xcf   : > { %1584 = vmatprep.mubr.bf16.mxu1 %v16359_v3  ;;  %1714 = vmatprep.mubr.bf16.mxu0 %v16359_v3 }
  0xd0   : > { %9692 = vmatprep.subr.msk.bf16.mxu0 %vm373_vm0, %v10804_v18  ;;  %v2190_v18 = vld [vmem:[%s10787_s10 + $0x69] sm:$0xff] }
  0xd1   : > { %v2201_v50 = vpack.c.bf16 %v2190_v18, %v2189_v45  ;;  %v1636_v45 = vpack.c.bf16 %v1630_v37, %v1629_v36 }
  0xd5   : > { %v414_v41 = vpop.f32.mrf.mxu0  ;;  %9659 = vmatmul.mubr.msk.bf16.gmra.mxu0 %vm16454_vm1, %v1632_v39 }
  0xd6   : > { %v11050_v17 = vpop.f32.mrf.mxu1  ;;  %9654 = vmatmul.mubr.msk.bf16.gmra.mxu1 %vm16454_vm1, %v1466_v40  ;;  %1724 = vmatprep.mubr.bf16.mxu0 %v16359_v3  ;;  %v2195_v40 = vld [vmem:[%s10787_s10 + $0x91] sm:$0xff] }
  0xd7   : > { %v416_v44 = vpop.f32.mrf.mxu0  ;;  %2273 = vmatprep.mubr.bf16.mxu1 %v16359_v3 }
  0xd8   : > { %v11059_v46 = vpop.f32.mrf.mxu1 }
  0xd9   : > { %v418_v47 = vpop.f32.mrf.mxu0 }
  0xda   : > { %v11061_v49 = vpop.f32.mrf.mxu1 }
  0xdb   : > { %v420_v51 = vpop.f32.mrf.mxu0 }
  0xdc   : > { %v11063_v52 = vpop.f32.mrf.mxu1 }
  0xdd   : > { %v424_v53 = vpop.f32.mrf.mxu0  ;;  %9660 = vmatmul.mubr.msk.bf16.gmra.mxu0 %vm16454_vm1, %v1633_v48 }
  0xde   : > { %v540_v1 = vpop.f32.mrf.mxu1  ;;  %9667 = vmatmul.mubr.msk.bf16.vlgmr.msra.gmra.mxu1 %vm16454_vm1, %v2201_v50  ;;  %1734 = vmatprep.mubr.bf16.mxu0 %v16359_v3 }
  0xdf   : > { %v11070_v57 = vadd.f32 %v540_v1, %v414_v41  ;;  %v426_v58 = vpop.f32.mrf.mxu0  ;;  %2283 = vmatprep.mubr.bf16.mxu1 %v16359_v3  ;;  %2527 = vmatpush1.bf16.msra.mxu1 %v10799_v15  ;;  %v2196_v41 = vld [vmem:[%s10787_s10 + $0x99] sm:$0xff] }
  0xe0   : > { %v542_v61 = vpop.f32.mrf.mxu1  ;;  %9701 = vmatprep.subr.msk.bf16.mxu1 %vm373_vm0, %v10809_v19  ;;  %v1627_v19 = vld [vmem:[%s10787_s10 + $0x66] sm:$0xff] }
  0xe1   : > { %v11078_v62 = vadd.f32 %v542_v61, %v416_v44  ;;  %v428_v63 = vpop.f32.mrf.mxu0  ;;  %v1635_v23 = vpack.c.bf16 %v1628_v13, %v1627_v19  ;;  %v2197_v61 = vld [vmem:[%s10787_s10 + $0xa1] sm:$0xff] }
  0xe2   : > { %v544_v4 = vpop.f32.mrf.mxu1 }
  0xe3   : > { %v11080_v9 = vadd.f32 %v544_v4, %v418_v47  ;;  %v430_v10 = vpop.f32.mrf.mxu0  ;;  %v2204_v47 = vpack.c.bf16 %v2196_v41, %v2195_v40 }
  0xe4   : > { %v546_v11 = vpop.f32.mrf.mxu1 }
  0xe5   : > { %v11082_v12 = vadd.f32 %v546_v11, %v420_v51  ;;  %v434_v15 = vpop.f32.mrf.mxu0  ;;  %9661 = vmatmul.mubr.msk.bf16.gmra.mxu0 %vm16454_vm1, %v1634_v0 }
  0xe6   : > { %v550_v7 = vpop.f32.mrf.mxu1  ;;  %9668 = vmatmul.mubr.msk.bf16.gmra.mxu1 %vm16454_vm1, %v2202_v8  ;;  %1744 = vmatprep.mubr.bf16.mxu0 %v16359_v3 }
  0xe7   : > { %v11089_v14 = vadd.f32 %v550_v7, %v424_v53  ;;  %v436_v16 = vpop.f32.mrf.mxu0  ;;  %2293 = vmatprep.mubr.bf16.mxu1 %v16359_v3 }
  0xe8   : > { %v552_v2 = vpop.f32.mrf.mxu1 }
  0xe9   : > { %v11094_v5 = vadd.f32 %v552_v2, %v426_v58  ;;  %v438_v22 = vpop.f32.mrf.mxu0  ;;  %v2171_v58 = vld [vmem:[%s10787_s10 + $0x68] sm:$0xff] }
  0xea   : > { %v554_v25 = vpop.f32.mrf.mxu1 }
  0xeb   : > { %v11096_v29 = vadd.f32 %v554_v25, %v428_v63  ;;  %v440_v30 = vpop.f32.mrf.mxu0  ;;  %v2198_v63 = vld [vmem:[%s10787_s10 + $0xa9] sm:$0xff] }
  0xec   : > { %v556_v31 = vpop.f32.mrf.mxu1 }
  0xed   : > { %v11098_v32 = vadd.f32 %v556_v31, %v430_v10  ;;  %v444_v33 = vpop.f32.mrf.mxu0  ;;  %9662 = vmatmul.mubr.msk.bf16.gmra.mxu0 %vm16454_vm1, %v1635_v23  ;;  %v2182_v10 = vpack.c.bf16 %v2171_v58, %v2170_v56  ;;  %v2173_v23 = vld [vmem:[%s10787_s10 + $0x78] sm:$0xff] }
  0xee   : > { %v560_v34 = vpop.f32.mrf.mxu1  ;;  %9669 = vmatmul.mubr.msk.bf16.gmra.mxu1 %vm16454_vm1, %v2203_v26  ;;  %1754 = vmatprep.mubr.bf16.mxu0 %v16359_v3  ;;  %v2200_v31 = vld [vmem:[%s10787_s10 + $0xb9] sm:$0xff] }
  0xef   : > { %v11105_v38 = vadd.f32 %v560_v34, %v434_v15  ;;  %v446_v39 = vpop.f32.mrf.mxu0  ;;  %2303 = vmatprep.mubr.bf16.mxu1 %v16359_v3  ;;  %v2205_v15 = vpack.c.bf16 %v2198_v63, %v2197_v61 }
  0xf0   : > { %v562_v42 = vpop.f32.mrf.mxu1 }
  0xf1   : > { %v11110_v43 = vadd.f32 %v562_v42, %v436_v16  ;;  %v448_v44 = vpop.f32.mrf.mxu0 }
  0xf2   : > { %v564_v18 = vpop.f32.mrf.mxu1 }
  0xf3   : > { %v11112_v48 = vadd.f32 %v564_v18, %v438_v22  ;;  %v450_v50 = vpop.f32.mrf.mxu0  ;;  %v2172_v22 = vld [vmem:[%s10787_s10 + $0x70] sm:$0xff] }
  0xf4   : > { %v566_v51 = vpop.f32.mrf.mxu1  ;;  %v2183_v36 = vpack.c.bf16 %v2173_v23, %v2172_v22 }
  0xf5   : > { %v11114_v53 = vadd.f32 %v566_v51, %v440_v30  ;;  %v454_v1 = vpop.f32.mrf.mxu0  ;;  %9663 = vmatmul.mubr.msk.bf16.gmra.mxu0 %vm16454_vm1, %v1636_v45  ;;  %v2199_v30 = vld [vmem:[%s10787_s10 + $0xb1] sm:$0xff] }
  0xf6   : > { %v570_v55 = vpop.f32.mrf.mxu1  ;;  %9670 = vmatmul.mubr.msk.bf16.gmra.mxu1 %vm16454_vm1, %v2204_v47  ;;  %2399 = vmatprep.mubr.bf16.mxu0 %v16359_v3  ;;  %v2206_v40 = vpack.c.bf16 %v2200_v31, %v2199_v30 }
  0xf7   : > { %v11121_v59 = vadd.f32 %v570_v55, %v444_v33  ;;  %v456_v60 = vpop.f32.mrf.mxu0  ;;  %2313 = vmatprep.mubr.bf16.mxu1 %v16359_v3 }
  0xf8   : > { %v572_v0 = vpop.f32.mrf.mxu1 }
  0xf9   : > { %v11126_v4 = vadd.f32 %v572_v0, %v446_v39  ;;  %v458_v8 = vpop.f32.mrf.mxu0 }
  0xfa   : > { %v574_v11 = vpop.f32.mrf.mxu1 }
  0xfb   : > { %v11128_v7 = vadd.f32 %v574_v11, %v448_v44  ;;  %v460_v19 = vpop.f32.mrf.mxu0 }
  0xfc   : > { %v576_v13 = vpop.f32.mrf.mxu1 }
  0xfd   : > { %v11130_v16 = vadd.f32 %v576_v13, %v450_v50  ;;  %v686_v20 = vpop.f32.mrf.mxu0  ;;  %9675 = vmatmul.mubr.msk.bf16.vlgmr.msra.gmra.mxu0 %vm16454_vm1, %v2182_v10  ;;  %v2175_v50 = vld [vmem:[%s10787_s10 + $0x88] sm:$0xff]  ;;  %v2462_v13 = vld [vmem:[%s10787_s10 + $0x72] sm:$0xff] }
  0xfe   : > { %v580_v21 = vpop.f32.mrf.mxu1  ;;  %v745_v2 = vadd.f32 %v686_v20, %v11070_v57  ;;  %9671 = vmatmul.mubr.msk.bf16.gmra.mxu1 %vm16454_vm1, %v2205_v15  ;;  %2696 = vmatpush1.bf16.msra.mxu0 %v10830_v27  ;;  %v11209_v15 = vld [vmem:[%s10787_s10 + $0x98] sm:$0xff] }
  0xff   : > { %v11138_v25 = vadd.f32 %v580_v21, %v454_v1  ;;  %v688_v26 = vpop.f32.mrf.mxu0  ;;  %2323 = vmatprep.mubr.bf16.mxu1 %v16359_v3  ;;  %2409 = vmatprep.mubr.bf16.mxu0 %v16359_v3  ;;  %v2463_v20 = vld [vmem:[%s10787_s10 + $0x7a] sm:$0xff]  ;;  %v10704_v21 = vmov 0.0  }
 0x100   : > { %v582_v33 = vpop.f32.mrf.mxu1  ;;  %v11145_v34 = vadd.f32 %v688_v26, %v11078_v62  ;;  %9710 = vmatprep.subr.msk.bf16.mxu0 %vm373_vm0, %v10834_v28  ;;  %266 = vst.msk [vmem:[#allocation2 + $0x18] sm:$0xff] %vm16427_vm2, %v10704_v21  ;;  %263 = vst.msk [vmem:[#allocation2] sm:$0xff] %vm16427_vm2, %v10704_v21  ;;  %v11311_v26 = vpack.c.bf16 %v2463_v20, %v2462_v13 }
 0x101   : > { %v11149_v57 = vadd.f32 %v582_v33, %v456_v60  ;;  %v690_v27 = vpop.f32.mrf.mxu0  ;;  %v11182_v60 = vld.sshfl [vmem:[%s16353_s1 + $0x18] sm:$0x33 pattern:$0x76325410]  ;;  %264 = vst.msk [vmem:[#allocation2 + $0x8] sm:$0xff] %vm16427_vm2, %v10704_v21  ;;  %265 = vst.msk [vmem:[#allocation2 + $0x10] sm:$0xff] %vm16427_vm2, %v10704_v21 }
 0x102   : > { %v584_v37 = vpop.f32.mrf.mxu1  ;;  %v11152_v39 = vadd.f32 %v690_v27, %v11080_v9  ;;  %v2174_v9 = vld [vmem:[%s10787_s10 + $0x80] sm:$0xff]  ;;  %267 = vst.msk [vmem:[#allocation2 + $0x20] sm:$0xff] %vm16427_vm2, %v10704_v21  ;;  %268 = vst.msk [vmem:[#allocation2 + $0x28] sm:$0xff] %vm16427_vm2, %v10704_v21 }
 0x103   : > { %v11154_v41 = vadd.f32 %v584_v37, %v458_v8  ;;  %v692_v42 = vpop.f32.mrf.mxu0  ;;  %v2184_v58 = vpack.c.bf16 %v2175_v50, %v2174_v9  ;;  %v3163_v8 = vcombine.high %v11182_v60, %v11182_v60  ;;  %269 = vst.msk [vmem:[#allocation2 + $0x30] sm:$0xff] %vm16427_vm2, %v10704_v21  ;;  %270 = vst.msk [vmem:[#allocation2 + $0x38] sm:$0xff] %vm16427_vm2, %v10704_v21 }
 0x104   : > { %v586_v44 = vpop.f32.mrf.mxu1  ;;  %v11157_v62 = vadd.f32 %v692_v42, %v11082_v12  ;;  %271 = vst.msk [vmem:[#allocation2 + $0x40] sm:$0xff] %vm16427_vm2, %v10704_v21  ;;  %272 = vst.msk [vmem:[#allocation2 + $0x48] sm:$0xff] %vm16427_vm2, %v10704_v21 }
 0x105   : > { %v11159_v45 = vadd.f32 %v586_v44, %v460_v19  ;;  %v696_v28 = vpop.f32.mrf.mxu0  ;;  %9676 = vmatmul.mubr.msk.bf16.gmra.mxu0 %vm16454_vm1, %v2183_v36  ;;  %273 = vst.msk [vmem:[#allocation2 + $0x50] sm:$0xff] %vm16427_vm2, %v10704_v21  ;;  %274 = vst.msk [vmem:[#allocation2 + $0x58] sm:$0xff] %vm16427_vm2, %v10704_v21  ;;  %v2464_v44 = vld [vmem:[%s10787_s10 + $0x82] sm:$0xff] }
 0x106   : > { %v590_v18 = vpop.f32.mrf.mxu1  ;;  %v11163_v47 = vadd.f32 %v696_v28, %v11089_v14  ;;  %9672 = vmatmul.mubr.msk.bf16.gmra.mxu1 %vm16454_vm1, %v2206_v40  ;;  %2419 = vmatprep.mubr.bf16.mxu0 %v16359_v3  ;;  %275 = vst.msk [vmem:[#allocation2 + $0x60] sm:$0xff] %vm16427_vm2, %v10704_v21  ;;  %276 = vst.msk [vmem:[#allocation2 + $0x68] sm:$0xff] %vm16427_vm2, %v10704_v21  ;;  %v2179_v40 = vld [vmem:[%s10787_s10 + $0xa8] sm:$0xff] }
 0x107   : > { %v11170_v51 = vadd.f32 %v590_v18, %v11050_v17  ;;  %v698_v12 = vpop.f32.mrf.mxu0  ;;  %2544 = vmatprep.mubr.bf16.mxu1 %v16359_v3  ;;  %277 = vst.msk [vmem:[#allocation2 + $0x70] sm:$0xff] %vm16427_vm2, %v10704_v21  ;;  %278 = vst.msk [vmem:[#allocation2 + $0x78] sm:$0xff] %vm16427_vm2, %v10704_v21 }
 0x108   : > { %v592_v1 = vpop.f32.mrf.mxu1  ;;  %v11174_v55 = vadd.f32 %v698_v12, %v11094_v5  ;;  %279 = vst.msk [vmem:[#allocation2 + $0x80] sm:$0xff] %vm16427_vm2, %v10704_v21  ;;  %280 = vst.msk [vmem:[#allocation2 + $0x88] sm:$0xff] %vm16427_vm2, %v10704_v21 }
 0x109   : > { %v11177_v56 = vadd.f32 %v592_v1, %v11059_v46  ;;  %v700_v14 = vpop.f32.mrf.mxu0  ;;  %281 = vst.msk [vmem:[#allocation2 + $0x90] sm:$0xff] %vm16427_vm2, %v10704_v21  ;;  %282 = vst.msk [vmem:[#allocation2 + $0x98] sm:$0xff] %vm16427_vm2, %v10704_v21 }
 0x10a   : > { %v594_v17 = vpop.f32.mrf.mxu1  ;;  %v11185_v61 = vadd.f32 %v700_v14, %v11096_v29  ;;  %283 = vst.msk [vmem:[#allocation2 + $0xa0] sm:$0xff] %vm16427_vm2, %v10704_v21  ;;  %284 = vst.msk [vmem:[#allocation2 + $0xa8] sm:$0xff] %vm16427_vm2, %v10704_v21 }
 0x10b   : > { %v11188_v63 = vadd.f32 %v594_v17, %v11061_v49  ;;  %v702_v5 = vpop.f32.mrf.mxu0  ;;  %285 = vst.msk [vmem:[#allocation2 + $0xb0] sm:$0xff] %vm16427_vm2, %v10704_v21  ;;  %286 = vst.msk [vmem:[#allocation2 + $0xb8] sm:$0xff] %vm16427_vm2, %v10704_v21 }
 0x10c   : > { %v596_v46 = vpop.f32.mrf.mxu1  ;;  %v11191_v0 = vadd.f32 %v702_v5, %v11098_v32  ;;  %v11206_v32 = vld [vmem:[%s10787_s10 + $0x90] sm:$0xff]  ;;  %287 = vst.msk [vmem:[#allocation2 + $0xc0] sm:$0xff] %vm16427_vm2, %v10704_v21  ;;  %288 = vst.msk [vmem:[#allocation2 + $0xc8] sm:$0xff] %vm16427_vm2, %v10704_v21 }
 0x10d   : > { %v11196_v10 = vadd.f32 %v596_v46, %v11063_v52  ;;  %v706_v11 = vpop.f32.mrf.mxu0  ;;  %9677 = vmatmul.mubr.msk.bf16.gmra.mxu0 %vm16454_vm1, %v2184_v58  ;;  %289 = vst.msk [vmem:[#allocation2 + $0xd0] sm:$0xff] %vm16427_vm2, %v10704_v21  ;;  %290 = vst.msk [vmem:[#allocation2 + $0xd8] sm:$0xff] %vm16427_vm2, %v10704_v21 }
 0x10e   : > { %v11200_v29 = vadd.f32 %v706_v11, %v11105_v38  ;;  %v856_v49 = vpop.f32.mrf.mxu1  ;;  %9684 = vmatmul.mubr.msk.bf16.vlgmr.msra.gmra.mxu1 %vm16454_vm1, %v10944_v35  ;;  %2429 = vmatprep.mubr.bf16.mxu0 %v16359_v3  ;;  %291 = vst.msk [vmem:[#allocation2 + $0xe0] sm:$0xff] %vm16427_vm2, %v10704_v21  ;;  %292 = vst.msk [vmem:[#allocation2 + $0xe8] sm:$0xff] %vm16427_vm2, %v10704_v21 }
 0x10f   : > { %v11211_v19 = vadd.f32 %v856_v49, %v745_v2  ;;  %v708_v52 = vpop.f32.mrf.mxu0  ;;  %2554 = vmatprep.mubr.bf16.mxu1 %v16359_v3  ;;  %2865 = vmatpush1.bf16.msra.mxu1 %v10876_v54  ;;  %293 = vst.msk [vmem:[#allocation2 + $0xf0] sm:$0xff] %vm16427_vm2, %v10704_v21  ;;  %294 = vst.msk [vmem:[#allocation2 + $0xf8] sm:$0xff] %vm16427_vm2, %v10704_v21  ;;  %v2185_v2 = vpack.c.bf16 %v11209_v15, %v11206_v32  ;;  %v2467_v49 = vld [vmem:[%s10787_s10 + $0x9a] sm:$0xff] }
 0x110   : > { %v11218_v38 = vadd.f32 %v708_v52, %v11110_v43  ;;  %v858_v35 = vpop.f32.mrf.mxu1  ;;  %9719 = vmatprep.subr.msk.bf16.mxu1 %vm373_vm0, %v3163_v8  ;;  %295 = vst.msk [vmem:[#allocation2 + $0x100] sm:$0xff] %vm16427_vm2, %v10704_v21  ;;  %296 = vst.msk [vmem:[#allocation2 + $0x108] sm:$0xff] %vm16427_vm2, %v10704_v21  ;;  %v2181_v8 = vld [vmem:[%s10787_s10 + $0xb8] sm:$0xff] }
 0x111   : > { %297 = vst.msk [vmem:[#allocation2 + $0x110] sm:$0xff] %vm16427_vm2, %v10704_v21  ;;  %298 = vst.msk [vmem:[#allocation2 + $0x118] sm:$0xff] %vm16427_vm2, %v10704_v21  ;;  %v11306_v54 = vadd.f32 %v858_v35, %v11145_v34  ;;  %v710_v43 = vpop.f32.mrf.mxu0 }
 0x112   : > { %299 = vst.msk [vmem:[#allocation2 + $0x120] sm:$0xff] %vm16427_vm2, %v10704_v21  ;;  %300 = vst.msk [vmem:[#allocation2 + $0x128] sm:$0xff] %vm16427_vm2, %v10704_v21  ;;  %v755_v22 = vadd.f32 %v710_v43, %v11112_v48  ;;  %v860_v23 = vpop.f32.mrf.mxu1 }
 0x113   : > { %301 = vst.msk [vmem:[#allocation2 + $0x130] sm:$0xff] %vm16427_vm2, %v10704_v21  ;;  %302 = vst.msk [vmem:[#allocation2 + $0x138] sm:$0xff] %vm16427_vm2, %v10704_v21  ;;  %v11314_v30 = vadd.f32 %v860_v23, %v11152_v39  ;;  %v712_v31 = vpop.f32.mrf.mxu0  ;;  %v2178_v39 = vld [vmem:[%s10787_s10 + $0xa0] sm:$0xff] }
 0x114   : > { %303 = vst.msk [vmem:[#allocation2 + $0x140] sm:$0xff] %vm16427_vm2, %v10704_v21  ;;  %304 = vst.msk [vmem:[#allocation2 + $0x148] sm:$0xff] %vm16427_vm2, %v10704_v21  ;;  %v756_v33 = vadd.f32 %v712_v31, %v11114_v53  ;;  %v862_v34 = vpop.f32.mrf.mxu1  ;;  %v2186_v50 = vpack.c.bf16 %v2179_v40, %v2178_v39 }
 0x115   : > { %v11318_v27 = vadd.f32 %v862_v34, %v11157_v62  ;;  %v716_v36 = vpop.f32.mrf.mxu0  ;;  %9678 = vmatmul.mubr.msk.bf16.gmra.mxu0 %vm16454_vm1, %v2185_v2  ;;  %v2465_v62 = vld [vmem:[%s10787_s10 + $0x8a] sm:$0xff]  ;;  %305 = vst [vmem:[%s11474_s7] sm:$0x1] %v10704_v21  ;;  %v2803_v21 = vld [vmem:[%s10787_s10 + $0x9b] sm:$0xff] }
 0x116   : > { %v757_v48 = vadd.f32 %v716_v36, %v11121_v59  ;;  %v866_v37 = vpop.f32.mrf.mxu1  ;;  %9685 = vmatmul.mubr.msk.bf16.gmra.mxu1 %vm16454_vm1, %v11311_v26  ;;  %2439 = vmatprep.mubr.bf16.mxu0 %v16359_v3 }
 0x117   : > { %v11328_v42 = vadd.f32 %v866_v37, %v11163_v47  ;;  %v718_v53 = vpop.f32.mrf.mxu0  ;;  %2564 = vmatprep.mubr.bf16.mxu1 %v16359_v3  ;;  %v11338_v47 = vpack.c.bf16 %v2465_v62, %v2464_v44  ;;  %v2469_v37 = vld [vmem:[%s10787_s10 + $0xaa] sm:$0xff] }
 0x118   : > { %v758_v28 = vadd.f32 %v718_v53, %v11126_v4  ;;  %v868_v18 = vpop.f32.mrf.mxu1 }
 0x119   : > { %v11335_v59 = vadd.f32 %v868_v18, %v11174_v55  ;;  %v720_v9 = vpop.f32.mrf.mxu0 }
 0x11a   : > { %v759_v12 = vadd.f32 %v720_v9, %v11128_v7  ;;  %v870_v1 = vpop.f32.mrf.mxu1 }
 0x11b   : > { %v11341_v14 = vadd.f32 %v870_v1, %v11185_v61  ;;  %v722_v58 = vpop.f32.mrf.mxu0  ;;  %v2180_v61 = vld [vmem:[%s10787_s10 + $0xb0] sm:$0xff] }
 0x11c   : > { %v760_v4 = vadd.f32 %v722_v58, %v11130_v16  ;;  %v872_v17 = vpop.f32.mrf.mxu1  ;;  %v2187_v13 = vpack.c.bf16 %v2181_v8, %v2180_v61 }
 0x11d   : > { %v11345_v55 = vadd.f32 %v872_v17, %v11191_v0  ;;  %v726_v5 = vpop.f32.mrf.mxu0  ;;  %9679 = vmatmul.mubr.msk.bf16.gmra.mxu0 %vm16454_vm1, %v2186_v50  ;;  %v2466_v0 = vld [vmem:[%s10787_s10 + $0x92] sm:$0xff] }
 0x11e   : > { %v761_v7 = vadd.f32 %v726_v5, %v11138_v25  ;;  %v876_v46 = vpop.f32.mrf.mxu1  ;;  %9686 = vmatmul.mubr.msk.bf16.gmra.mxu1 %vm16454_vm1, %v11338_v47  ;;  %2449 = vmatprep.mubr.bf16.mxu0 %v16359_v3  ;;  %v11365_v43 = vpack.c.bf16 %v2467_v49, %v2466_v0  ;;  %v2471_v5 = vld [vmem:[%s10787_s10 + $0xba] sm:$0xff] }
 0x11f   : > { %v11355_v11 = vadd.f32 %v876_v46, %v11200_v29  ;;  %v728_v16 = vpop.f32.mrf.mxu0  ;;  %2574 = vmatprep.mubr.bf16.mxu1 %v16359_v3 }
 0x120   : > { %v762_v32 = vadd.f32 %v728_v16, %v11149_v57  ;;  %v878_v15 = vpop.f32.mrf.mxu1 }
 0x121   : > { %v11362_v25 = vadd.f32 %v878_v15, %v11218_v38  ;;  %v730_v52 = vpop.f32.mrf.mxu0 }
 0x122   : > { %v763_v20 = vadd.f32 %v730_v52, %v11154_v41  ;;  %v880_v35 = vpop.f32.mrf.mxu1 }
 0x123   : > { %v11367_v29 = vadd.f32 %v880_v35, %v755_v22  ;;  %v732_v2 = vpop.f32.mrf.mxu0  ;;  %v2799_v35 = vld [vmem:[%s10787_s10 + $0x7b] sm:$0xff] }
 0x124   : > { %v764_v23 = vadd.f32 %v732_v2, %v11159_v45  ;;  %v882_v31 = vpop.f32.mrf.mxu1  ;;  %v2468_v45 = vld [vmem:[%s10787_s10 + $0xa2] sm:$0xff] }
 0x125   : > { %v11370_v57 = vadd.f32 %v882_v31, %v756_v33  ;;  %v736_v34 = vpop.f32.mrf.mxu0  ;;  %9680 = vmatmul.mubr.msk.bf16.gmra.mxu0 %vm16454_vm1, %v2187_v13  ;;  %v11391_v62 = vpack.c.bf16 %v2469_v37, %v2468_v45 }
 0x126   : > { %v765_v38 = vadd.f32 %v736_v34, %v11170_v51  ;;  %v886_v36 = vpop.f32.mrf.mxu1  ;;  %9687 = vmatmul.mubr.msk.bf16.gmra.mxu1 %vm16454_vm1, %v11365_v43  ;;  %2713 = vmatprep.mubr.bf16.mxu0 %v16359_v3  ;;  %v11388_v51 = vld.sshfl [vmem:[%s16353_s1 + $0x1c] sm:$0x33 pattern:$0x76325410] }
 0x127   : > { %v11377_v41 = vadd.f32 %v886_v36, %v757_v48  ;;  %v738_v22 = vpop.f32.mrf.mxu0  ;;  %2584 = vmatprep.mubr.bf16.mxu1 %v16359_v3  ;;  %v3332_v50 = vcombine.high %v11388_v51, %v11388_v51 }
 0x128   : > { %v766_v33 = vadd.f32 %v738_v22, %v11177_v56  ;;  %v888_v39 = vpop.f32.mrf.mxu1 }
 0x129   : > { %v11383_v40 = vadd.f32 %v888_v39, %v758_v28  ;;  %v740_v53 = vpop.f32.mrf.mxu0 }
 0x12a   : > { %v767_v44 = vadd.f32 %v740_v53, %v11188_v63  ;;  %v890_v48 = vpop.f32.mrf.mxu1 }
 0x12b   : > { %v11393_v18 = vadd.f32 %v890_v48, %v759_v12  ;;  %v742_v9 = vpop.f32.mrf.mxu0 }
 0x12c   : > { %v768_v56 = vadd.f32 %v742_v9, %v11196_v10  ;;  %v892_v28 = vpop.f32.mrf.mxu1  ;;  %v2800_v9 = vld [vmem:[%s10787_s10 + $0x83] sm:$0xff] }
 0x12d   : > { %v11398_v1 = vadd.f32 %v892_v28, %v760_v4  ;;  %v1026_v58 = vpop.f32.mrf.mxu0  ;;  %9693 = vmatmul.mubr.msk.bf16.vlgmr.msra.gmra.mxu0 %vm16454_vm1, %v11311_v26  ;;  %v2470_v4 = vld [vmem:[%s10787_s10 + $0xb2] sm:$0xff] }
 0x12e   : > { %v896_v63 = vpop.f32.mrf.mxu1  ;;  %v1085_v17 = vadd.f32 %v1026_v58, %v11211_v19  ;;  %9688 = vmatmul.mubr.msk.bf16.gmra.mxu1 %vm16454_vm1, %v11391_v62  ;;  %3034 = vmatpush1.bf16.msra.mxu0 %v10899_v6 }
 0x12f   : > { %v11406_v12 = vadd.f32 %v896_v63, %v761_v7  ;;  %v1028_v10 = vpop.f32.mrf.mxu0  ;;  %2594 = vmatprep.mubr.bf16.mxu1 %v16359_v3  ;;  %2723 = vmatprep.mubr.bf16.mxu0 %v16359_v3  ;;  %v11417_v7 = vpack.c.bf16 %v2471_v5, %v2470_v4 }
 0x130   : > { %v898_v46 = vpop.f32.mrf.mxu1  ;;  %v1086_v26 = vadd.f32 %v1028_v10, %v11306_v54  ;;  %9728 = vmatprep.subr.msk.bf16.mxu0 %vm373_vm0, %v3332_v50 }
 0x131   : > { %v11414_v19 = vadd.f32 %v898_v46, %v762_v32  ;;  %v1030_v61 = vpop.f32.mrf.mxu0 }
 0x132   : > { %v900_v8 = vpop.f32.mrf.mxu1  ;;  %v1087_v6 = vadd.f32 %v1030_v61, %v11314_v30 }
 0x133   : > { %v11419_v16 = vadd.f32 %v900_v8, %v763_v20  ;;  %v1032_v0 = vpop.f32.mrf.mxu0 }
 0x134   : > { %v902_v49 = vpop.f32.mrf.mxu1  ;;  %v1088_v15 = vadd.f32 %v1032_v0, %v11318_v27  ;;  %v2798_v27 = vld [vmem:[%s10787_s10 + $0x73] sm:$0xff] }
 0x135   : > { %v11422_v52 = vadd.f32 %v902_v49, %v764_v23  ;;  %v1036_v54 = vpop.f32.mrf.mxu0  ;;  %9694 = vmatmul.mubr.msk.bf16.gmra.mxu0 %vm16454_vm1, %v11338_v47  ;;  %v2810_v36 = vpack.c.bf16 %v2799_v35, %v2798_v27 }
 0x136   : > { %v906_v32 = vpop.f32.mrf.mxu1  ;;  %v1089_v13 = vadd.f32 %v1036_v54, %v11328_v42  ;;  %9689 = vmatmul.mubr.msk.bf16.gmra.mxu1 %vm16454_vm1, %v11417_v7  ;;  %2733 = vmatprep.mubr.bf16.mxu0 %v16359_v3  ;;  %v11441_v42 = vld.sshfl [vmem:[%s16353_s1 + $0x20] sm:$0x33 pattern:$0x76325410] }
 0x137   : > { %v11430_v30 = vadd.f32 %v906_v32, %v765_v38  ;;  %v1038_v20 = vpop.f32.mrf.mxu0  ;;  %2882 = vmatprep.mubr.bf16.mxu1 %v16359_v3  ;;  %v3501_v39 = vcombine.high %v11441_v42, %v11441_v42 }
 0x138   : > { %v908_v2 = vpop.f32.mrf.mxu1  ;;  %v1090_v23 = vadd.f32 %v1038_v20, %v11335_v59 }
 0x139   : > { %v11436_v31 = vadd.f32 %v908_v2, %v766_v33  ;;  %v1040_v47 = vpop.f32.mrf.mxu0  ;;  %v3183_v33 = vsel %vm373_vm0, %v11182_v60, 0 }
 0x13a   : > { %v910_v34 = vpop.f32.mrf.mxu1  ;;  %v1091_v38 = vadd.f32 %v1040_v47, %v11341_v14 }
 0x13b   : > { %v11444_v22 = vadd.f32 %v910_v34, %v767_v44  ;;  %v1042_v45 = vpop.f32.mrf.mxu0  ;;  %v2640_v34 = vld [vmem:[%s10787_s10 + $0xca] sm:$0xff] }
 0x13c   : > { %v912_v37 = vpop.f32.mrf.mxu1  ;;  %v1092_v59 = vadd.f32 %v1042_v45, %v11345_v55  ;;  %v2805_v45 = vld [vmem:[%s10787_s10 + $0xab] sm:$0xff] }
 0x13d   : > { %v11451_v53 = vadd.f32 %v912_v37, %v768_v56  ;;  %v1046_v48 = vpop.f32.mrf.mxu0  ;;  %9695 = vmatmul.mubr.msk.bf16.gmra.mxu0 %vm16454_vm1, %v11365_v43  ;;  %v2801_v56 = vld [vmem:[%s10787_s10 + $0x8b] sm:$0xff] }
 0x13e   : > { %v1093_v14 = vadd.f32 %v1046_v48, %v11355_v11  ;;  %v1196_v44 = vpop.f32.mrf.mxu1  ;;  %9702 = vmatmul.mubr.msk.bf16.vlgmr.msra.gmra.mxu1 %vm16454_vm1, %v2810_v36  ;;  %2743 = vmatprep.mubr.bf16.mxu0 %v16359_v3 }
 0x13f   : > { %v11458_v55 = vadd.f32 %v1196_v44, %v1085_v17  ;;  %v1048_v60 = vpop.f32.mrf.mxu0  ;;  %2892 = vmatprep.mubr.bf16.mxu1 %v16359_v3  ;;  %3203 = vmatpush1.bf16.msra.mxu1 %v3183_v33  ;;  %v2811_v17 = vpack.c.bf16 %v2801_v56, %v2800_v9 }
 0x140   : > { %v1094_v28 = vadd.f32 %v1048_v60, %v11362_v25  ;;  %v1198_v50 = vpop.f32.mrf.mxu1  ;;  %9737 = vmatprep.subr.msk.bf16.mxu1 %vm373_vm0, %v3501_v39 }
 0x141   : > { %v11465_v11 = vadd.f32 %v1198_v50, %v1086_v26  ;;  %v1050_v43 = vpop.f32.mrf.mxu0 }
 0x142   : > { %v1095_v58 = vadd.f32 %v1050_v43, %v11367_v29  ;;  %v1200_v63 = vpop.f32.mrf.mxu1 }
 0x143   : > { %v11468_v10 = vadd.f32 %v1200_v63, %v1087_v6  ;;  %v1052_v4 = vpop.f32.mrf.mxu0  ;;  %v2806_v63 = vld [vmem:[%s10787_s10 + $0xb3] sm:$0xff] }
 0x144   : > { %v1096_v25 = vadd.f32 %v1052_v4, %v11370_v57  ;;  %v1202_v5 = vpop.f32.mrf.mxu1  ;;  %v2802_v57 = vld [vmem:[%s10787_s10 + $0x93] sm:$0xff] }
 0x145   : > { %v11479_v46 = vadd.f32 %v1202_v5, %v1088_v15  ;;  %v1056_v29 = vpop.f32.mrf.mxu0  ;;  %9696 = vmatmul.mubr.msk.bf16.gmra.mxu0 %vm16454_vm1, %v11391_v62  ;;  %v2812_v32 = vpack.c.bf16 %v2803_v21, %v2802_v57 }
 0x146   : > { %v1097_v26 = vadd.f32 %v1056_v29, %v11377_v41  ;;  %v1206_v61 = vpop.f32.mrf.mxu1  ;;  %9703 = vmatmul.mubr.msk.bf16.gmra.mxu1 %vm16454_vm1, %v2811_v17  ;;  %2753 = vmatprep.mubr.bf16.mxu0 %v16359_v3 }
 0x147   : > { %v11486_v8 = vadd.f32 %v1206_v61, %v1089_v13  ;;  %v1058_v6 = vpop.f32.mrf.mxu0  ;;  %2902 = vmatprep.mubr.bf16.mxu1 %v16359_v3 }
 0x148   : > { %v1098_v0 = vadd.f32 %v1058_v6, %v11383_v40  ;;  %v1208_v49 = vpop.f32.mrf.mxu1 }
 0x149   : > { %v11492_v15 = vadd.f32 %v1208_v49, %v1090_v23  ;;  %v1060_v62 = vpop.f32.mrf.mxu0 }
 0x14a   : > { %v1099_v41 = vadd.f32 %v1060_v62, %v11393_v18  ;;  %v1210_v54 = vpop.f32.mrf.mxu1  ;;  %v2639_v18 = vld [vmem:[%s10787_s10 + $0xc2] sm:$0xff] }
 0x14b   : > { %v11495_v20 = vadd.f32 %v1210_v54, %v1091_v38  ;;  %v1062_v13 = vpop.f32.mrf.mxu0  ;;  %v2646_v33 = vpack.c.bf16 %v2640_v34, %v2639_v18 }
 0x14c   : > { %v1100_v27 = vadd.f32 %v1062_v13, %v11398_v1  ;;  %v1212_v35 = vpop.f32.mrf.mxu1  ;;  %v2804_v1 = vld [vmem:[%s10787_s10 + $0xa3] sm:$0xff] }
 0x14d   : > { %v11498_v2 = vadd.f32 %v1212_v35, %v1092_v59  ;;  %v1066_v40 = vpop.f32.mrf.mxu0  ;;  %9697 = vmatmul.mubr.msk.bf16.gmra.mxu0 %vm16454_vm1, %v11417_v7  ;;  %v2813_v44 = vpack.c.bf16 %v2805_v45, %v2804_v1  ;;  %v2809_v35 = vld [vmem:[%s10787_s10 + $0xcb] sm:$0xff] }
 0x14e   : > { %v1101_v23 = vadd.f32 %v1066_v40, %v11406_v12  ;;  %v1216_v47 = vpop.f32.mrf.mxu1  ;;  %9704 = vmatmul.mubr.msk.bf16.gmra.mxu1 %vm16454_vm1, %v2812_v32  ;;  %2763 = vmatprep.mubr.bf16.mxu0 %v16359_v3 }
 0x14f   : > { %16459 = vst [vmem:[#allocation3_spill] sm:$0xff] %v11498_v2  ;;  %v11507_v38 = vadd.f32 %v1216_v47, %v1093_v14  ;;  %v1068_v36 = vpop.f32.mrf.mxu0  ;;  %2912 = vmatprep.mubr.bf16.mxu1 %v16359_v3  ;;  %v11972_v2 = vld [vmem:[%s10787_s10 + $0xc5] sm:$0xff] }
 0x150   : > { %v1102_v37 = vadd.f32 %v1068_v36, %v11414_v19  ;;  %v1218_v59 = vpop.f32.mrf.mxu1  ;;  %16536 = vst [vmem:[#allocation69_spill] sm:$0xff] %v11972_v2 }
 0x151   : > { %16460 = vst [vmem:[#allocation4_spill] sm:$0xff] %v11507_v38  ;;  %v11513_v7 = vadd.f32 %v1218_v59, %v1094_v28  ;;  %v1070_v12 = vpop.f32.mrf.mxu0 }
 0x152   : > { %v1103_v39 = vadd.f32 %v1070_v12, %v11419_v16  ;;  %v1220_v48 = vpop.f32.mrf.mxu1 }
 0x153   : > { %16461 = vst [vmem:[#allocation5_spill] sm:$0xff] %v11513_v7  ;;  %v11516_v14 = vadd.f32 %v1220_v48, %v1095_v58  ;;  %v1072_v60 = vpop.f32.mrf.mxu0 }
 0x154   : > { %v1104_v9 = vadd.f32 %v1072_v60, %v11422_v52  ;;  %v1222_v56 = vpop.f32.mrf.mxu1  ;;  %v2807_v52 = vld [vmem:[%s10787_s10 + $0xbb] sm:$0xff] }
 0x155   : > { %16462 = vst [vmem:[#allocation6_spill] sm:$0xff] %v11516_v14  ;;  %v11519_v50 = vadd.f32 %v1222_v56, %v1096_v25  ;;  %v1076_v19 = vpop.f32.mrf.mxu0  ;;  %9698 = vmatmul.mubr.msk.bf16.gmra.mxu0 %vm16454_vm1, %v2646_v33  ;;  %v2814_v61 = vpack.c.bf16 %v2807_v52, %v2806_v63  ;;  %v2972_v60 = vld [vmem:[%s10787_s10 + $0x9c] sm:$0xff] }
 0x156   : > { %v1105_v28 = vadd.f32 %v1076_v19, %v11430_v30  ;;  %v1226_v43 = vpop.f32.mrf.mxu1  ;;  %9705 = vmatmul.mubr.msk.bf16.gmra.mxu1 %vm16454_vm1, %v2813_v44  ;;  %3051 = vmatprep.mubr.bf16.mxu0 %v16359_v3  ;;  %v11536_v30 = vld.sshfl [vmem:[%s16353_s1 + $0x4] sm:$0x33 pattern:$0x76325410] }
 0x157   : > { %16463 = vst [vmem:[#allocation7_spill] sm:$0xff] %v11519_v50  ;;  %v11525_v16 = vadd.f32 %v1226_v43, %v1097_v26  ;;  %v1078_v58 = vpop.f32.mrf.mxu0  ;;  %2922 = vmatprep.mubr.bf16.mxu1 %v16359_v3  ;;  %v4069_v49 = vcombine.high %v11536_v30, %v11536_v30  ;;  %v11817_v14 = vld [vmem:[%s10787_s10 + $0x9d] sm:$0xff] }
 0x158   : > { %v1106_v17 = vadd.f32 %v1078_v58, %v11436_v31  ;;  %v1228_v4 = vpop.f32.mrf.mxu1  ;;  %v3352_v31 = vsel %vm373_vm0, %v11388_v51, 0  ;;  %v2969_v51 = vld [vmem:[%s10787_s10 + $0x84] sm:$0xff] }
 0x159   : > { %16464 = vst [vmem:[#allocation8_spill] sm:$0xff] %v11525_v16  ;;  %v11531_v25 = vadd.f32 %v1228_v4, %v1098_v0  ;;  %v1080_v5 = vpop.f32.mrf.mxu0 }
 0x15a   : > { %v1107_v29 = vadd.f32 %v1080_v5, %v11444_v22  ;;  %v1230_v26 = vpop.f32.mrf.mxu1 }
 0x15b   : > { %16465 = vst [vmem:[#allocation9_spill] sm:$0xff] %v11531_v25  ;;  %v11539_v6 = vadd.f32 %v1230_v26, %v1099_v41  ;;  %v1082_v57 = vpop.f32.mrf.mxu0  ;;  %v1791_v41 = vlaneseq }
 0x15c   : > { %v1108_v21 = vadd.f32 %v1082_v57, %v11451_v53  ;;  %v1232_v0 = vpop.f32.mrf.mxu1  ;;  %v2970_v53 = vld [vmem:[%s10787_s10 + $0x8c] sm:$0xff] }
 0x15d   : > { %16466 = vst [vmem:[#allocation10_spill] sm:$0xff] %v11539_v6  ;;  %v11546_v62 = vadd.f32 %v1232_v0, %v1100_v27  ;;  %v11548_v22 = vpop.f32.mrf.mxu0  ;;  %9711 = vmatmul.mubr.msk.bf16.vlgmr.msra.gmra.mxu0 %vm16454_vm1, %v11027_v24  ;;  %v2808_v27 = vld [vmem:[%s10787_s10 + $0xc3] sm:$0xff]  ;;  %v11569_v34 = vshrl.u32 %v1791_v41, 7  ;;  %v2978_v6 = vld [vmem:[%s10787_s10 + $0xcc] sm:$0xff] }
 0x15e   : > { %v1236_v54 = vpop.f32.mrf.mxu1  ;;  %9706 = vmatmul.mubr.msk.bf16.gmra.mxu1 %vm16454_vm1, %v2814_v61  ;;  %3372 = vmatpush1.bf16.msra.mxu0 %v3352_v31  ;;  %v2815_v1 = vpack.c.bf16 %v2809_v35, %v2808_v27  ;;  %v2974_v35 = vld [vmem:[%s10787_s10 + $0xac] sm:$0xff] }
 0x15f   : > { %16467 = vst [vmem:[#allocation11_spill] sm:$0xff] %v11546_v62  ;;  %v11555_v32 = vadd.f32 %v1236_v54, %v1101_v23  ;;  %v1368_v13 = vpop.f32.mrf.mxu0  ;;  %2932 = vmatprep.mubr.bf16.mxu1 %v16359_v3  ;;  %3061 = vmatprep.mubr.bf16.mxu0 %v16359_v3  ;;  %v2980_v23 = vpack.c.bf16 %v2970_v53, %v2969_v51  ;;  %16470 = vst [vmem:[#allocation14_spill] sm:$0xff] %v11569_v34  ;;  %v11574_v12 = vadd.s32 8, %v11569_v34 }
 0x160   : > { %v1238_v40 = vpop.f32.mrf.mxu1  ;;  %v11562_v47 = vadd.f32 %v1368_v13, %v11465_v11  ;;  %9746 = vmatprep.subr.msk.bf16.mxu0 %vm373_vm0, %v4069_v49  ;;  %v11589_v56 = vmul.u32.u64.low 3817748708, %v11569_v34  ;;  %v11590_v19 = vmul.u32.u64.high 3817748708, %v11569_v34, %v11589_v56  ;;  %v11602_v52 = vadd.s32 16, %v11569_v34 }
 0x161   : > { %16468 = vst [vmem:[#allocation12_spill] sm:$0xff] %v11555_v32  ;;  %v11565_v24 = vadd.f32 %v1238_v40, %v1102_v37  ;;  %v11567_v18 = vpop.f32.mrf.mxu0  ;;  %16472 = vst [vmem:[#allocation16_spill] sm:$0xff] %v11574_v12  ;;  %v11614_v57 = vadd.s32 24, %v11569_v34  ;;  %v11627_v51 = vadd.s32 32, %v11569_v34  ;;  %v11665_v56 = vadd.s32 56, %v11569_v34 }
 0x162   : > { %v1240_v36 = vpop.f32.mrf.mxu1  ;;  %16475 = vst [vmem:[#allocation19_spill] sm:$0xff] %v11602_v52  ;;  %v11623_v41 = vmul.u32.u64.low 3817748708, %v11602_v52  ;;  %v11624_v54 = vmul.u32.u64.high 3817748708, %v11602_v52, %v11623_v41  ;;  %v1868_v40 = vshrl.u32 %v11590_v19, 4 }
 0x163   : > { %16469 = vst [vmem:[#allocation13_spill] sm:$0xff] %v11565_v24  ;;  %v11571_v45 = vadd.f32 %v1240_v36, %v1103_v39  ;;  %v1372_v59 = vpop.f32.mrf.mxu0  ;;  %v2971_v39 = vld [vmem:[%s10787_s10 + $0x94] sm:$0xff]  ;;  %16477 = vst [vmem:[#allocation21_spill] sm:$0xff] %v11614_v57  ;;  %v2977_v24 = vld [vmem:[%s10787_s10 + $0xc4] sm:$0xff] }
 0x164   : > { %v1242_v11 = vpop.f32.mrf.mxu1  ;;  %v11577_v33 = vadd.f32 %v1372_v59, %v11479_v46  ;;  %v2981_v26 = vpack.c.bf16 %v2972_v60, %v2971_v39  ;;  %16480 = vst [vmem:[#allocation24_spill] sm:$0xff] %v11627_v51  ;;  %v11660_v39 = vmul.u32.u64.low 3817748708, %v11627_v51  ;;  %v11661_v60 = vmul.u32.u64.high 3817748708, %v11627_v51, %v11660_v39  ;;  %16486 = vst [vmem:[#allocation30_spill] sm:$0xff] %v11665_v56 }
 0x165   : > { %16471 = vst [vmem:[#allocation15_spill] sm:$0xff] %v11571_v45  ;;  %v11579_v37 = vadd.f32 %v1242_v11, %v1104_v9  ;;  %v11581_v48 = vpop.f32.mrf.mxu0  ;;  %9712 = vmatmul.mubr.msk.bf16.gmra.mxu0 %vm16454_vm1, %v2980_v23  ;;  %v11598_v9 = vmul.u32.u64.low 3817748708, %v11574_v12  ;;  %v11599_v58 = vmul.u32.u64.high 3817748708, %v11574_v12, %v11598_v9  ;;  %v11655_v11 = vadd.s32 48, %v11569_v34 }
 0x166   : > { %v1246_v44 = vpop.f32.mrf.mxu1  ;;  %9707 = vmatmul.mubr.msk.bf16.gmra.mxu1 %vm16454_vm1, %v2815_v1  ;;  %3071 = vmatprep.mubr.bf16.mxu0 %v16359_v3  ;;  %v11644_v36 = vmul.u32.u64.low 3817748708, %v11614_v57  ;;  %v11645_v1 = vmul.u32.u64.high 3817748708, %v11614_v57, %v11644_v36  ;;  %v11684_v39 = vadd.s32 64, %v11569_v34 }
 0x167   : > { %16473 = vst [vmem:[#allocation17_spill] sm:$0xff] %v11579_v37  ;;  %v11592_v43 = vadd.f32 %v1246_v44, %v1105_v28  ;;  %v11594_v46 = vpop.f32.mrf.mxu0  ;;  %3220 = vmatprep.mubr.bf16.mxu1 %v16359_v3  ;;  %v11611_v28 = vld.sshfl [vmem:[%s16353_s1] sm:$0x33 pattern:$0x76325410]  ;;  %16485 = vst [vmem:[#allocation29_spill] sm:$0xff] %v11655_v11 }
 0x168   : > { %v1248_v63 = vpop.f32.mrf.mxu1  ;;  %v4195_v53 = vcombine.high %v11611_v28, %v11611_v28  ;;  %16489 = vst [vmem:[#allocation33_spill] sm:$0xff] %v11684_v39 }
 0x169   : > { %16474 = vst [vmem:[#allocation18_spill] sm:$0xff] %v11592_v43  ;;  %v11604_v4 = vadd.f32 %v1248_v63, %v1106_v17  ;;  %v11606_v5 = vpop.f32.mrf.mxu0  ;;  %v3521_v17 = vsel %vm373_vm0, %v11441_v42, 0  ;;  %v2973_v42 = vld [vmem:[%s10787_s10 + $0xa4] sm:$0xff]  ;;  %v1869_v63 = vmul.u32 18, %v1868_v40 }
 0x16a   : > { %v1250_v61 = vpop.f32.mrf.mxu1  ;;  %v11669_v9 = vpack.c.bf16 %v2974_v35, %v2973_v42  ;;  %v1890_v35 = vshrl.u32 %v11624_v54, 4  ;;  %v2976_v54 = vld [vmem:[%s10787_s10 + $0xbc] sm:$0xff] }
 0x16b   : > { %16476 = vst [vmem:[#allocation20_spill] sm:$0xff] %v11604_v4  ;;  %v11616_v31 = vadd.f32 %v1250_v61, %v1107_v29  ;;  %v11618_v0 = vpop.f32.mrf.mxu0 }
 0x16c   : > { %16479 = vst [vmem:[#allocation23_spill] sm:$0xff] %v11618_v0  ;;  %v1252_v49 = vpop.f32.mrf.mxu1  ;;  %v1891_v32 = vmul.u32 18, %v1890_v35  ;;  %v1789_v35 = vld [vmem:[%s16354_s2] sm:$0x3] }
 0x16d   : > { %16478 = vst [vmem:[#allocation22_spill] sm:$0xff] %v11616_v31  ;;  %v11631_v13 = vadd.f32 %v1252_v49, %v1108_v21  ;;  %v11633_v29 = vpop.f32.mrf.mxu0  ;;  %9713 = vmatmul.mubr.msk.bf16.gmra.mxu0 %vm16454_vm1, %v2981_v26  ;;  %v11648_v21 = vadd.s32 40, %v11569_v34  ;;  %v11704_v31 = vsub.s32 %v11569_v34, %v1869_v63  ;;  %v1912_v63 = vshrl.u32 %v11661_v60, 4 }
 0x16e   : > { %16482 = vst [vmem:[#allocation26_spill] sm:$0xff] %v11633_v29  ;;  %v11636_v27 = vpop.f32.mrf.mxu1  ;;  %9720 = vmatmul.mubr.msk.bf16.vlgmr.msra.gmra.mxu1 %vm16454_vm1, %v2980_v23  ;;  %3081 = vmatprep.mubr.bf16.mxu0 %v16359_v3  ;;  %v1879_v23 = vshrl.u32 %v11599_v58, 4  ;;  %v11742_v60 = vsub.s32 1, %v11569_v34  ;;  %v11847_v29 = vld [vmem:[%s10787_s10 + $0xad] sm:$0xff] }
 0x16f   : > { %16481 = vst [vmem:[#allocation25_spill] sm:$0xff] %v11631_v13  ;;  %16483 = vst [vmem:[#allocation27_spill] sm:$0xff] %v11648_v21  ;;  %v11650_v59 = vpop.f32.mrf.mxu0  ;;  %3230 = vmatprep.mubr.bf16.mxu1 %v16359_v3  ;;  %3541 = vmatpush1.bf16.msra.mxu1 %v3521_v17  ;;  %v11674_v61 = vmul.u32.u64.low 3817748708, %v11648_v21  ;;  %v11675_v17 = vmul.u32.u64.high 3817748708, %v11648_v21, %v11674_v61  ;;  %v11690_v40 = vmul.u32.u64.low 3817748708, %v11665_v56  ;;  %v11691_v3 = vmul.u32.u64.high 3817748708, %v11665_v56, %v11690_v40 }
 0x170   : > { %16484 = vst [vmem:[#allocation28_spill] sm:$0xff] %v11650_v59  ;;  %v11657_v44 = vpop.f32.mrf.mxu1  ;;  %9754 = vmatprep.subr.msk.bf16.mxu1 %vm373_vm0, %v4195_v53  ;;  %v1880_v41 = vmul.u32 18, %v1879_v23  ;;  %v11680_v53 = vmul.u32.u64.low 3817748708, %v11655_v11  ;;  %v11681_v36 = vmul.u32.u64.high 3817748708, %v11655_v11, %v11680_v53  ;;  %v2975_v13 = vld [vmem:[%s10787_s10 + $0xb4] sm:$0xff]  ;;  %v1901_v40 = vshrl.u32 %v11645_v1, 4 }
 0x171   : > { %v11667_v19 = vpop.f32.mrf.mxu0  ;;  %v16491_v53 = vmov 0   ;;  %v11723_v1 = vpack.c.bf16 %v2976_v54, %v2975_v13  ;;  %vm1994_vm3 = vcmp.ne.s32.totalorder %v11704_v31, 0  ;;  %16497 = vst [vmem:[#allocation40_spill] sm:$0xff] %v11742_v60  ;;  %v1923_v54 = vshrl.u32 %v11675_v17, 4  ;;  %16514 = vst [vmem:[#allocation53_spill] sm:$0xff] %v11847_v29  ;;  %v11955_v29 = vld [vmem:[%s10787_s10 + $0x9e] sm:$0xff] }
 0x172   : > { %16487 = vst [vmem:[#allocation31_spill] sm:$0xff] %v11667_v19  ;;  %v11671_v58 = vpop.f32.mrf.mxu1  ;;  %v11711_v43 = vsub.s32 %v11574_v12, %v1880_v41  ;;  %v11730_v41 = vld [vmem:[%s10787_s10 + $0x85] sm:$0xff]  ;;  %v11733_v12 = vld [vmem:[%s10787_s10 + $0x8d] sm:$0xff]  ;;  %v1902_v13 = vmul.u32 18, %v1901_v40  ;;  %vm2006_vm4 = vcmp.lt.s32.totalorder %v11704_v31, 0  ;;  %v11757_v40 = vsub.s32 %v11602_v52, %v1891_v32  ;;  %16534 = vst [vmem:[#allocation67_spill] sm:$0xff] %v11955_v29 }
 0x173   : > { %v11677_v49 = vpop.f32.mrf.mxu0  ;;  %v1913_v17 = vmul.u32 18, %v1912_v63  ;;  %v11770_v19 = vadd.s32 18, %v11704_v31  ;;  %vm11783_vm7 = vmand %vm2006_vm4, %vm1994_vm3  ;;  %v11794_v32 = vld [vmem:[%s10787_s10 + $0xd4] sm:$0xff]  ;;  %v1924_v52 = vmul.u32 18, %v1923_v54 }
 0x174   : > { %16488 = vst [vmem:[#allocation32_spill] sm:$0xff] %v11677_v49  ;;  %v11686_v42 = vpop.f32.mrf.mxu1  ;;  %vm1995_vm5 = vcmp.ne.s32.totalorder %v11711_v43, 0  ;;  %vm2007_vm6 = vcmp.lt.s32.totalorder %v11711_v43, 0  ;;  %16505 = vst [vmem:[#allocation46_spill] sm:$0xff] %v11794_v32  ;;  %vm1996_vm9 = vcmp.ne.s32.totalorder %v11757_v40, 0  ;;  %vm2008_vm10 = vcmp.lt.s32.totalorder %v11757_v40, 0 }
 0x175   : > { %v11693_v61 = vpop.f32.mrf.mxu0  ;;  %9714 = vmatmul.mubr.msk.bf16.gmra.mxu0 %vm16454_vm1, %v11669_v9  ;;  %vm11809_vm8 = vmand %vm2007_vm6, %vm1995_vm5  ;;  %v11829_v59 = vsub.s32 %v11627_v51, %v1913_v17  ;;  %v1425_v32 = vadd.f32 %v11548_v22, %v11458_v55  ;;  %v16551_v22 = vpack.c.bf16 %v11733_v12, %v11730_v41  ;;  %v1427_v12 = vadd.f32 %v11567_v18, %v11468_v10 }
 0x176   : > { %16490 = vst [vmem:[#allocation34_spill] sm:$0xff] %v11693_v61  ;;  %v11697_v23 = vpop.f32.mrf.mxu1  ;;  %9721 = vmatmul.mubr.msk.bf16.gmra.mxu1 %vm16454_vm1, %v2981_v26  ;;  %3091 = vmatprep.mubr.bf16.mxu0 %v16491_v53  ;;  %v11714_v26 = vmul.u32.u64.low 3817748708, %v11684_v39  ;;  %v11715_v37 = vmul.u32.u64.high 3817748708, %v11684_v39, %v11714_v26  ;;  %v11751_v61 = vadd.s32 72, %v11569_v34  ;;  %vm11872_vm11 = vmand %vm2008_vm10, %vm1996_vm9  ;;  %v1596_v41 = vadd.f32 %v11657_v44, %v11562_v47 }
 0x177   : > { %v11707_v4 = vpop.f32.mrf.mxu0  ;;  %3240 = vmatprep.mubr.bf16.mxu1 %v16491_v53  ;;  %16511 = vst [vmem:[#allocation50_spill] sm:$0xff] %v11829_v59  ;;  %vm1998_vm14 = vcmp.ne.s32.totalorder %v11829_v59, 0  ;;  %vm2010_vm15 = vcmp.lt.s32.totalorder %v11829_v59, 0  ;;  %v1595_v55 = vadd.f32 %v11636_v27, %v1425_v32  ;;  %v12060_v27 = vld [vmem:[%s10787_s10 + $0xdd] sm:$0xff]  ;;  %v12114_v18 = vsel %vm373_vm0, %v11611_v28, 0 }
 0x178   : > { %16492 = vst [vmem:[#allocation35_spill] sm:$0xff] %v11707_v4  ;;  %v11717_v45 = vpop.f32.mrf.mxu1  ;;  %v11727_v4 = vsub.s32 0, %v11569_v34  ;;  %16499 = vst [vmem:[#allocation42_spill] sm:$0xff] %v11751_v61  ;;  %v1956_v54 = vshrl.u32 %v11715_v37, 4  ;;  %v11839_v37 = vsel %vm373_vm0, %v11536_v30, 0  ;;  %v11859_v30 = vadd.s32 18, %v11757_v40 }
 0x179   : > { %16493 = vst [vmem:[#allocation36_spill] sm:$0xff] %v11717_v45  ;;  %v11721_v62 = vpop.f32.mrf.mxu0  ;;  %vm11945_vm6 = vmand %vm2010_vm15, %vm1998_vm14 }
 0x17a   : > { %16494 = vst [vmem:[#allocation37_spill] sm:$0xff] %v11721_v62  ;;  %16495 = vst [vmem:[#allocation38_spill] sm:$0xff] %v11727_v4  ;;  %v11735_v25 = vpop.f32.mrf.mxu1  ;;  %v1934_v62 = vshrl.u32 %v11681_v36, 4  ;;  %v11764_v36 = vpack.c.bf16 %v2978_v6, %v2977_v24  ;;  %v11767_v50 = vrot.slane %v1789_v35, %v11727_v4  ;;  %v11788_v6 = vrot.slane %v1789_v35, %v11742_v60  ;;  %v11797_v4 = vld [vmem:[%s10787_s10 + $0xdc] sm:$0xff] }
 0x17b   : > { %16496 = vst [vmem:[#allocation39_spill] sm:$0xff] %v11735_v25  ;;  %v11745_v26 = vpop.f32.mrf.mxu0  ;;  %v11791_v24 = vadd.s32 18, %v11711_v43  ;;  %16506 = vst [vmem:[#allocation47_spill] sm:$0xff] %v11797_v4  ;;  %v11814_v60 = vld [vmem:[%s10787_s10 + $0x95] sm:$0xff] }
 0x17c   : > { %16498 = vst [vmem:[#allocation41_spill] sm:$0xff] %v11745_v26  ;;  %v11753_v16 = vpop.f32.mrf.mxu1  ;;  %v1945_v26 = vshrl.u32 %v11691_v3, 4  ;;  %v11864_v3 = vsub.s32 %v11648_v21, %v1924_v52  ;;  %v1957_v52 = vmul.u32 18, %v1956_v54  ;;  %v11898_v54 = vld [vmem:[%s10787_s10 + $0x86] sm:$0xff] }
 0x17d   : > { %16500 = vst [vmem:[#allocation43_spill] sm:$0xff] %v11753_v16  ;;  %v11760_v49 = vpop.f32.mrf.mxu0  ;;  %9715 = vmatmul.mubr.msk.bf16.gmra.mxu0 %vm16454_vm1, %v11723_v1  ;;  %16522 = vst [vmem:[#allocation59_spill] sm:$0xff] %v11898_v54 }
 0x17e   : > { %16501 = vst [vmem:[#allocation44_spill] sm:$0xff] %v11760_v49  ;;  %v11774_v63 = vpop.f32.mrf.mxu1  ;;  %9722 = vmatmul.mubr.msk.bf16.gmra.mxu1 %vm16454_vm1, %v11669_v9  ;;  %3101 = vmatprep.mubr.bf16.mxu0 %v16491_v53  ;;  %v11800_v9 = vsub.s32 %v11614_v57, %v1902_v13  ;;  %v1935_v13 = vmul.u32 18, %v1934_v62  ;;  %v1946_v7 = vmul.u32 18, %v1945_v26  ;;  %v2042_v62 = vsel %vm11783_vm7, %v11770_v19, %v11704_v31 }
 0x17f   : > { %16502 = vst [vmem:[#allocation45_spill] sm:$0xff] %v11774_v63  ;;  %v11802_v49 = vpop.f32.mrf.mxu0  ;;  %3250 = vmatprep.mubr.bf16.mxu1 %v16491_v53  ;;  %v11850_v26 = vadd.s32 80, %v11569_v34  ;;  %vm1999_vm4 = vcmp.ne.s32.totalorder %v11864_v3, 0  ;;  %vm2011_vm5 = vcmp.lt.s32.totalorder %v11864_v3, 0  ;;  %v11964_v45 = vadd.s32 18, %v11864_v3 }
 0x180   : > { %16507 = vst [vmem:[#allocation48_spill] sm:$0xff] %v11802_v49  ;;  %v11821_v57 = vmul.u32.u64.low 3817748708, %v11751_v61  ;;  %v11822_v49 = vmul.u32.u64.high 3817748708, %v11751_v61, %v11821_v57  ;;  %v11824_v63 = vpop.f32.mrf.mxu1  ;;  %vm1997_vm12 = vcmp.ne.s32.totalorder %v11800_v9, 0  ;;  %vm2009_vm13 = vcmp.lt.s32.totalorder %v11800_v9, 0  ;;  %vm11993_vm14 = vmand %vm2011_vm5, %vm1999_vm4 }
 0x181   : > { %16510 = vst [vmem:[#allocation49_spill] sm:$0xff] %v11824_v63  ;;  %v11831_v16 = vpop.f32.mrf.mxu0  ;;  %v11844_v63 = vld [vmem:[%s10787_s10 + $0xa5] sm:$0xff]  ;;  %16515 = vst [vmem:[#allocation54_spill] sm:$0xff] %v11850_v26  ;;  %v11879_v19 = vsub.s32 %v11655_v11, %v1935_v13  ;;  %v11895_v13 = vadd.s32 18, %v11800_v9  ;;  %v11901_v11 = vld [vmem:[%s10787_s10 + $0x8e] sm:$0xff] }
 0x182   : > { %16512 = vst [vmem:[#allocation51_spill] sm:$0xff] %v11831_v16  ;;  %16513 = vst [vmem:[#allocation52_spill] sm:$0xff] %v11844_v63  ;;  %v11852_v17 = vpop.f32.mrf.mxu1  ;;  %v11952_v63 = vld [vmem:[%s10787_s10 + $0x96] sm:$0xff]  ;;  %v1967_v38 = vshrl.u32 %v11822_v49, 4 }
 0x183   : > { %16516 = vst [vmem:[#allocation55_spill] sm:$0xff] %v11852_v17  ;;  %v11866_v57 = vpop.f32.mrf.mxu0  ;;  %16523 = vst [vmem:[#allocation60_spill] sm:$0xff] %v11901_v11  ;;  %vm2000_vm7 = vcmp.ne.s32.totalorder %v11879_v19, 0  ;;  %vm2012_vm9 = vcmp.lt.s32.totalorder %v11879_v19, 0  ;;  %v11967_v0 = vadd.s32 18, %v11879_v19  ;;  %v12030_v11 = vld [vmem:[%s10787_s10 + $0xae] sm:$0xff] }
 0x184   : > { %16517 = vst [vmem:[#allocation56_spill] sm:$0xff] %v11866_v57  ;;  %v11881_v31 = vpop.f32.mrf.mxu1  ;;  %v11888_v57 = vsub.s32 %v11665_v56, %v1946_v7  ;;  %v11908_v7 = vadd.s32 88, %v11569_v34  ;;  %vm11923_vm3 = vmand %vm2009_vm13, %vm1997_vm12  ;;  %v11928_v34 = vadd.s32 18, %v11829_v59  ;;  %vm11979_vm13 = vcmp.lt.s32.totalorder %v2042_v62, 16 }
 0x185   : > { %16520 = vst [vmem:[#allocation57_spill] sm:$0xff] %v11881_v31  ;;  %v11890_v16 = vpop.f32.mrf.mxu0  ;;  %9716 = vmatmul.mubr.msk.bf16.gmra.mxu0 %vm16454_vm1, %v11764_v36  ;;  %v11904_v31 = vmul.u32.u64.low 3817748708, %v11850_v26  ;;  %v11905_v21 = vmul.u32.u64.high 3817748708, %v11850_v26, %v11904_v31  ;;  %16533 = vst [vmem:[#allocation66_spill] sm:$0xff] %v11952_v63  ;;  %v1968_v59 = vmul.u32 18, %v1967_v38  ;;  %v12057_v63 = vld [vmem:[%s10787_s10 + $0xd5] sm:$0xff] }
 0x186   : > { %16521 = vst [vmem:[#allocation58_spill] sm:$0xff] %v11890_v16  ;;  %16524 = vst [vmem:[#allocation61_spill] sm:$0xff] %v11908_v7  ;;  %v11910_v56 = vpop.f32.mrf.mxu1  ;;  %9723 = vmatmul.mubr.msk.bf16.gmra.mxu1 %vm16454_vm1, %v11723_v1  ;;  %3389 = vmatprep.mubr.bf16.mxu0 %v16491_v53  ;;  %v11933_v1 = vld [vmem:[%s10787_s10 + $0xb5] sm:$0xff]  ;;  %vm2001_vm10 = vcmp.ne.s32.totalorder %v11888_v57, 0  ;;  %vm2013_vm12 = vcmp.lt.s32.totalorder %v11888_v57, 0 }
 0x187   : > { %16525 = vst [vmem:[#allocation62_spill] sm:$0xff] %v11910_v56  ;;  %16528 = vst [vmem:[#allocation63_spill] sm:$0xff] %v11933_v1  ;;  %v11936_v56 = vld [vmem:[%s10787_s10 + $0xbd] sm:$0xff]  ;;  %v11938_v16 = vpop.f32.mrf.mxu0  ;;  %3260 = vmatprep.mubr.bf16.mxu1 %v16491_v53  ;;  %v12121_v44 = vsub.s32 %v11751_v61, %v1968_v59  ;;  %v1429_v59 = vadd.f32 %v11581_v48, %v11486_v8  ;;  %v1598_v8 = vadd.f32 %v11686_v42, %v11577_v33 }
 0x188   : > { %16529 = vst [vmem:[#allocation64_spill] sm:$0xff] %v11936_v56  ;;  %16530 = vst [vmem:[#allocation65_spill] sm:$0xff] %v11938_v16  ;;  %v11958_v16 = vsub.s32 %v11684_v39, %v1957_v52  ;;  %v11961_v25 = vpop.f32.mrf.mxu1  ;;  %v11975_v52 = vld [vmem:[%s10787_s10 + $0xcd] sm:$0xff]  ;;  %v12082_v56 = vld [vmem:[%s10787_s10 + $0xbe] sm:$0xff] }
 0x189   : > { %16535 = vst [vmem:[#allocation68_spill] sm:$0xff] %v11961_v25  ;;  %16537 = vst [vmem:[#allocation70_spill] sm:$0xff] %v11975_v52  ;;  %v11977_v39 = vpop.f32.mrf.mxu0  ;;  %v12004_v26 = vld.sshfl [vmem:[%s16353_s1 + $0x8] sm:$0x33 pattern:$0x76325410] }
 0x18a   : > { %16538 = vst [vmem:[#allocation71_spill] sm:$0xff] %v11977_v39  ;;  %v11998_v62 = vmul.u32.u64.low 3817748708, %v11908_v7  ;;  %v11999_v39 = vmul.u32.u64.high 3817748708, %v11908_v7, %v11998_v62  ;;  %16543 = vst [vmem:[#allocation72_spill] sm:$0xff] %v12004_v26  ;;  %v12008_v25 = vpop.f32.mrf.mxu1  ;;  %v12035_v7 = vadd.s32 18, %v11888_v57  ;;  %vm2002_vm4 = vcmp.ne.s32.totalorder %v11958_v16, 0 }
 0x18b   : > { %16544 = vst [vmem:[#allocation73_spill] sm:$0xff] %v12008_v25  ;;  %vm12018_vm15 = vmand %vm2012_vm9, %vm2000_vm7  ;;  %v12027_v25 = vld [vmem:[%s10787_s10 + $0xa6] sm:$0xff]  ;;  %v12032_v54 = vpop.f32.mrf.mxu0  ;;  %vm2014_vm5 = vcmp.lt.s32.totalorder %v11958_v16, 0  ;;  %v4340_v32 = vcombine.high %v12004_v26, %v12004_v26  ;;  %v12073_v38 = vadd.s32 18, %v11958_v16  ;;  %v1978_v52 = vshrl.u32 %v11905_v21, 4  ;;  %v12079_v26 = vld [vmem:[%s10787_s10 + $0xb6] sm:$0xff] }
 0x18c   : > { %16547 = vst [vmem:[#allocation74_spill] sm:$0xff] %v12032_v54  ;;  %v12040_v1 = vpop.f32.mrf.mxu1  ;;  %vm12050_vm7 = vmand %vm2013_vm12, %vm2001_vm10  ;;  %v16552_v21 = vsel %vm11809_vm8, %v11791_v24, %v11711_v43  ;;  %v1597_v24 = vadd.f32 %v11671_v58, %v1427_v12  ;;  %vm2015_vm12 = vcmp.lt.s32.totalorder %v12121_v44, 0  ;;  %v16608_v58 = vld [vmem:[#allocation9_spill] sm:$0xff] }
 0x18d   : > { %16548 = vst [vmem:[#allocation75_spill] sm:$0xff] %v12040_v1  ;;  %v1706_v1 = vpop.f32.mrf.mxu0  ;;  %9729 = vmatmul.mubr.msk.bf16.vlgmr.msra.gmra.mxu0 %vm16454_vm1, %v16551_v22  ;;  %vm12098_vm9 = vcmp.lt.s32.totalorder %v16552_v21, 16  ;;  %vm12106_vm10 = vmand %vm2014_vm5, %vm2002_vm4  ;;  %v12136_v21 = vld [vmem:[%s10787_s10 + $0xce] sm:$0xff]  ;;  %v1979_v12 = vmul.u32 18, %v1978_v52  ;;  %v16590_v2 = vld [vmem:[#allocation61_spill] sm:$0xff] }
 0x18e   : > { %v12088_v22 = vpop.f32.mrf.mxu1  ;;  %v1765_v29 = vadd.f32 %v1706_v1, %v1595_v55  ;;  %9724 = vmatmul.mubr.msk.bf16.gmra.mxu1 %vm16454_vm1, %v11764_v36  ;;  %4109 = vmatpush1.bf16.msra.mxu0 %v11839_v37  ;;  %v12133_v55 = vld [vmem:[%s10787_s10 + $0xc6] sm:$0xff]  ;;  %16558 = vst [vmem:[#allocation77_spill] sm:$0xff] %v12136_v21 }
 0x18f   : > { %v1708_v47 = vpop.f32.mrf.mxu0  ;;  %3270 = vmatprep.mubr.bf16.mxu1 %v16491_v53  ;;  %3399 = vmatprep.mubr.bf16.mxu0 %v16491_v53  ;;  %16557 = vst [vmem:[#allocation76_spill] sm:$0xff] %v12133_v55  ;;  %v16611_v62 = vld [vmem:[#allocation62_spill] sm:$0xff] }
 0x190   : > { %v1801_v35 = vadd.f32 %v11767_v50, %v1765_v29  ;;  %v12127_v37 = vpop.f32.mrf.mxu1  ;;  %v1766_v1 = vadd.f32 %v1708_v47, %v1596_v41  ;;  %9763 = vmatprep.subr.msk.bf16.mxu0 %vm373_vm0, %v4340_v32  ;;  %v16559_v29 = vsel %vm11872_vm11, %v11859_v30, %v11757_v40  ;;  %v1989_v41 = vshrl.u32 %v11999_v39, 4 }
 0x191   : > { %v1710_v36 = vpop.f32.mrf.mxu0  ;;  %vm12145_vm8 = vcmp.lt.s32.totalorder %v16559_v29, 16  ;;  %v1599_v47 = vadd.f32 %v11697_v23, %v1429_v59  ;;  %vm2003_vm11 = vcmp.ne.s32.totalorder %v12121_v44, 0  ;;  %v12173_v23 = vld [vmem:[%s10787_s10 + $0xc9] sm:$0xff]  ;;  %v1431_v59 = vadd.f32 %v11606_v5, %v11495_v20 }
 0x192   : > { %v1825_v48 = vmax.f32 %v1801_v35, 0.0  ;;  %v1802_v51 = vadd.f32 %v11788_v6, %v1766_v1  ;;  %v12157_v40 = vpop.f32.mrf.mxu1  ;;  %v1767_v30 = vadd.f32 %v1710_v36, %v1597_v24  ;;  %v12170_v36 = vld [vmem:[%s10787_s10 + $0xc1] sm:$0xff]  ;;  %v1430_v24 = vadd.f32 %v11594_v46, %v11492_v15 }
 0x193   : > { %v1712_v29 = vpop.f32.mrf.mxu0  ;;  %v12194_v15 = vadd.s32 18, %v12121_v44  ;;  %v16566_v20 = vld [vmem:[#allocation54_spill] sm:$0xff] }
 0x194   : > { %v2090_v33 = vsel %vm11979_vm13, %v1825_v48, 0.0  ;;  %v1826_v42 = vmax.f32 %v1802_v51, 0.0  ;;  %v1803_v52 = vadd.f32 %v11767_v50, %v1767_v30  ;;  %v12167_v35 = vpop.f32.mrf.mxu1  ;;  %v1768_v1 = vadd.f32 %v1712_v29, %v1598_v8  ;;  %v16567_v29 = vld [vmem:[#allocation47_spill] sm:$0xff] }
 0x195   : > { %2158 = vst.msk [vmem:[#allocation2 + $0x18] sm:$0xff] %vm16427_vm2, %v2090_v33  ;;  %v1716_v39 = vpop.f32.mrf.mxu0  ;;  %v16562_v48 = vpack.c.bf16 %v11817_v14, %v11814_v60  ;;  %v16563_v8 = vsel %vm11923_vm3, %v11895_v13, %v11800_v9  ;;  %v12197_v46 = vsub.s32 %v16566_v20, %v1979_v12  ;;  %vm12211_vm3 = vmand %vm2015_vm12, %vm2003_vm11  ;;  %v16572_v12 = vld [vmem:[#allocation3_spill] sm:$0xff]  ;;  %v16585_v20 = vld [vmem:[#allocation28_spill] sm:$0xff] }
 0x196   : > { %vm12189_vm4 = vcmp.lt.s32.totalorder %v16563_v8, 16  ;;  %v2102_v5 = vsub.f32 %v2090_v33, %v1826_v42  ;;  %v1827_v30 = vmax.f32 %v1803_v52, 0.0  ;;  %v1804_v14 = vadd.f32 %v11788_v6, %v1768_v1  ;;  %v12200_v60 = vpop.f32.mrf.mxu1  ;;  %v16573_v33 = vld [vmem:[#allocation23_spill] sm:$0xff]  ;;  %v16574_v52 = vld [vmem:[#allocation36_spill] sm:$0xff]  ;;  %v16646_v13 = vld [vmem:[#allocation17_spill] sm:$0xff] }
 0x197   : > { %9730 = vmatmul.mubr.msk.bf16.gmra.mxu0 %vm16454_vm1, %v16562_v48  ;;  %v1769_v31 = vadd.f32 %v1716_v39, %v1599_v47  ;;  %v16568_v48 = vld [vmem:[#allocation46_spill] sm:$0xff]  ;;  %v1432_v42 = vadd.f32 %v16573_v33, %v16572_v12  ;;  %v1600_v47 = vadd.f32 %v16574_v52, %v1430_v24  ;;  %v1718_v39 = vpop.f32.mrf.mxu0  ;;  %v1990_v1 = vmul.u32 18, %v1989_v41  ;;  %v16577_v12 = vld [vmem:[#allocation4_spill] sm:$0xff]  ;;  %v16579_v52 = vld [vmem:[#allocation43_spill] sm:$0xff] }
 0x198   : > { %v16569_v9 = vpack.c.bf16 %v16567_v29, %v16568_v48  ;;  %3409 = vmatprep.mubr.bf16.mxu0 %v16491_v53  ;;  %v16575_v29 = vld [vmem:[#allocation39_spill] sm:$0xff]  ;;  %v1828_v28 = vmax.f32 %v1804_v14, 0.0  ;;  %v12225_v43 = vpop.f32.mrf.mxu1  ;;  %v12230_v24 = vld.sshfl [vmem:[%s16353_s1 + $0xc] sm:$0x33 pattern:$0x76325410] }
 0x199   : > { %v1601_v48 = vadd.f32 %v16575_v29, %v1431_v59  ;;  %v1805_v32 = vadd.f32 %v11767_v50, %v1769_v31  ;;  %16576 = vst [vmem:[#allocation47_spill] sm:$0xff] %v12230_v24  ;;  %v16578_v41 = vld [vmem:[#allocation26_spill] sm:$0xff]  ;;  %v1602_v8 = vadd.f32 %v16579_v52, %v1432_v42  ;;  %v1770_v59 = vadd.f32 %v1718_v39, %v1600_v47  ;;  %v1720_v29 = vpop.f32.mrf.mxu0  ;;  %v16584_v52 = vld [vmem:[#allocation5_spill] sm:$0xff] }
 0x19a   : > { %9725 = vmatmul.mubr.msk.bf16.gmra.mxu1 %vm16454_vm1, %v16569_v9  ;;  %v2091_v9 = vsel %vm12098_vm9, %v1827_v30, 0.0  ;;  %v1433_v33 = vadd.f32 %v16578_v41, %v16577_v12  ;;  %v16580_v30 = vld [vmem:[#allocation50_spill] sm:$0xff]  ;;  %v2114_v42 = vsel %vm11979_vm13, %v2102_v5, 0.0  ;;  %v12251_v39 = vpop.f32.mrf.mxu1  ;;  %vm2016_vm11 = vcmp.lt.s32.totalorder %v12197_v46, 0 }
 0x19b   : > { %3558 = vmatprep.mubr.bf16.mxu1 %v16491_v53  ;;  %2159 = vst.msk [vmem:[#allocation2 + $0x20] sm:$0xff] %vm16427_vm2, %v2091_v9  ;;  %v16581_v14 = vsel %vm11945_vm6, %v11928_v34, %v16580_v30  ;;  %v2103_v41 = vsub.f32 %v2091_v9, %v1828_v28  ;;  %v1829_v47 = vmax.f32 %v1805_v32, 0.0  ;;  %v1771_v17 = vadd.f32 %v1720_v29, %v1601_v48  ;;  %v16586_v30 = vld [vmem:[#allocation45_spill] sm:$0xff]  ;;  %v1722_v55 = vpop.f32.mrf.mxu0 }
 0x19c   : > { %vm12241_vm5 = vcmp.lt.s32.totalorder %v16581_v14, 16  ;;  %v1434_v34 = vadd.f32 %v16585_v20, %v16584_v52  ;;  %v1603_v14 = vadd.f32 %v16586_v30, %v1433_v33  ;;  %v1806_v61 = vadd.f32 %v11788_v6, %v1770_v59  ;;  %v12266_v5 = vpop.f32.mrf.mxu1  ;;  %v16587_v52 = vld [vmem:[#allocation53_spill] sm:$0xff]  ;;  %v16588_v30 = vld [vmem:[#allocation52_spill] sm:$0xff] }
 0x19d   : > { %vm2004_vm6 = vcmp.ne.s32.totalorder %v12197_v46, 0  ;;  %v4509_v49 = vcombine.high %v12230_v24, %v12230_v24  ;;  %v2115_v28 = vsel %vm12098_vm9, %v2103_v41, 0.0  ;;  %v2092_v32 = vsel %vm12145_vm8, %v1829_v47, 0.0  ;;  %v1726_v29 = vpop.f32.mrf.mxu0  ;;  %v16591_v47 = vld [vmem:[#allocation49_spill] sm:$0xff] }
 0x19e   : > { %v1807_v20 = vadd.f32 %v11767_v50, %v1771_v17  ;;  %v1772_v48 = vadd.f32 %v1722_v55, %v1602_v8  ;;  %v2127_v9 = vmul.f32 %v2114_v42, %v2114_v42  ;;  %v2128_v33 = vmul.f32 %v2115_v28, %v2115_v28  ;;  %2160 = vst.msk [vmem:[#allocation2 + $0x28] sm:$0xff] %vm16427_vm2, %v2092_v32  ;;  %v12278_v8 = vpop.f32.mrf.mxu1  ;;  %v16592_v42 = vld [vmem:[#allocation60_spill] sm:$0xff]  ;;  %v16593_v28 = vld [vmem:[#allocation59_spill] sm:$0xff]  ;;  %vm12366_vm9 = vmand %vm2016_vm11, %vm2004_vm6 }
 0x19f   : > { %v1830_v59 = vmax.f32 %v1806_v61, 0.0  ;;  %v16589_v12 = vpack.c.bf16 %v16587_v52, %v16588_v30  ;;  %v12274_v41 = vsub.s32 %v16590_v2, %v1990_v1  ;;  %v1604_v24 = vadd.f32 %v16591_v47, %v1434_v34  ;;  %v16598_v34 = vld [vmem:[#allocation6_spill] sm:$0xff]  ;;  %v1728_v52 = vpop.f32.mrf.mxu0 }
 0x1a0   : > { %v1831_v17 = vmax.f32 %v1807_v20, 0.0  ;;  %v1808_v21 = vadd.f32 %v11788_v6, %v1772_v48  ;;  %v1773_v55 = vadd.f32 %v1726_v29, %v1603_v14  ;;  %v16594_v61 = vpack.c.bf16 %v16592_v42, %v16593_v28  ;;  %v16599_v14 = vld [vmem:[#allocation31_spill] sm:$0xff]  ;;  %v12304_v42 = vpop.f32.mrf.mxu1  ;;  %v16603_v28 = vld [vmem:[#allocation34_spill] sm:$0xff] }
 0x1a1   : > { %9731 = vmatmul.mubr.msk.bf16.gmra.mxu0 %vm16454_vm1, %v16589_v12  ;;  %v16595_v12 = vsel %vm11993_vm14, %v11964_v45, %v11864_v3  ;;  %v1435_v20 = vadd.f32 %v16599_v14, %v16598_v34  ;;  %v2139_v48 = vadd.f32 %v2128_v33, %v2127_v9  ;;  %v2104_v29 = vsub.f32 %v2092_v32, %v1830_v59  ;;  %v16600_v32 = vld [vmem:[#allocation7_spill] sm:$0xff]  ;;  %v16601_v9 = vld [vmem:[#allocation32_spill] sm:$0xff] }
 0x1a2   : > { %9738 = vmatmul.mubr.msk.bf16.vlgmr.msra.gmra.mxu1 %vm16454_vm1, %v16594_v61  ;;  %vm12289_vm13 = vcmp.lt.s32.totalorder %v16595_v12, 16  ;;  %3419 = vmatprep.mubr.bf16.mxu0 %v16491_v53  ;;  %v12299_v4 = vadd.s32 18, %v12197_v46  ;;  %v2093_v45 = vsel %vm12189_vm4, %v1831_v17, 0.0  ;;  %v1832_v3 = vmax.f32 %v1808_v21, 0.0  ;;  %v16602_v59 = vld [vmem:[#allocation8_spill] sm:$0xff]  ;;  %v16604_v61 = vld [vmem:[#allocation55_spill] sm:$0xff]  ;;  %v1730_v21 = vpop.f32.mrf.mxu0 }
 0x1a3   : > { %3568 = vmatprep.mubr.bf16.mxu1 %v16491_v53  ;;  %4235 = vmatpush1.bf16.msra.mxu1 %v12114_v18  ;;  %v1809_v30 = vadd.f32 %v11767_v50, %v1773_v55  ;;  %v1774_v47 = vadd.f32 %v1728_v52, %v1604_v24  ;;  %v1436_v33 = vadd.f32 %v16601_v9, %v16600_v32  ;;  %v2116_v34 = vsel %vm12145_vm8, %v2104_v29, 0.0  ;;  %v12325_v52 = vpop.f32.mrf.mxu1  ;;  %v16609_v29 = vld [vmem:[#allocation35_spill] sm:$0xff]  ;;  %v16610_v9 = vld [vmem:[#allocation57_spill] sm:$0xff] }
 0x1a4   : > { %9772 = vmatprep.subr.msk.bf16.mxu1 %vm373_vm0, %v4509_v49  ;;  %v1437_v18 = vadd.f32 %v16603_v28, %v16602_v59  ;;  %v1605_v12 = vadd.f32 %v16604_v61, %v1435_v20  ;;  %2161 = vst.msk [vmem:[#allocation2 + $0x30] sm:$0xff] %vm16427_vm2, %v2093_v45  ;;  %v16605_v24 = vsel %vm12018_vm15, %v11967_v0, %v11879_v19  ;;  %v1732_v0 = vpop.f32.mrf.mxu0  ;;  %vm2005_vm8 = vcmp.ne.s32.totalorder %v12274_v41, 0 }
 0x1a5   : > { %vm12320_vm14 = vcmp.lt.s32.totalorder %v16605_v24, 16  ;;  %v2129_v17 = vmul.f32 %v2116_v34, %v2116_v34  ;;  %v2105_v55 = vsub.f32 %v2093_v45, %v1832_v3  ;;  %v1833_v14 = vmax.f32 %v1809_v30, 0.0  ;;  %v12335_v30 = vpop.f32.mrf.mxu1  ;;  %v16613_v34 = vld [vmem:[#allocation37_spill] sm:$0xff] }
 0x1a6   : > { %v1810_v20 = vadd.f32 %v11788_v6, %v1774_v47  ;;  %v1438_v32 = vadd.f32 %v16609_v29, %v16608_v58  ;;  %v1606_v59 = vadd.f32 %v16610_v9, %v1436_v33  ;;  %v1607_v28 = vadd.f32 %v16611_v62, %v1437_v18  ;;  %v16612_v47 = vld [vmem:[#allocation10_spill] sm:$0xff]  ;;  %v16618_v9 = vld [vmem:[#allocation67_spill] sm:$0xff] }
 0x1a7   : > { %v1775_v61 = vadd.f32 %v1730_v21, %v1605_v12  ;;  %v2140_v19 = vadd.f32 %v2139_v48, %v2129_v17  ;;  %v2117_v24 = vsel %vm12189_vm4, %v2105_v55, 0.0  ;;  %v2094_v45 = vsel %vm12241_vm5, %v1833_v14, 0.0  ;;  %v1736_v12 = vpop.f32.mrf.mxu0  ;;  %v16614_v48 = vld [vmem:[#allocation64_spill] sm:$0xff]  ;;  %v16615_v21 = vld [vmem:[#allocation63_spill] sm:$0xff]  ;;  %v12346_v29 = vpop.f32.mrf.mxu1  ;;  %v16619_v62 = vld [vmem:[#allocation66_spill] sm:$0xff] }
 0x1a8   : > { %v1834_v3 = vmax.f32 %v1810_v20, 0.0  ;;  %v1439_v2 = vadd.f32 %v16613_v34, %v16612_v47  ;;  %v2130_v58 = vmul.f32 %v2117_v24, %v2117_v24  ;;  %2162 = vst.msk [vmem:[#allocation2 + $0x38] sm:$0xff] %vm16427_vm2, %v2094_v45  ;;  %v1776_v18 = vadd.f32 %v1732_v0, %v1606_v59  ;;  %v16617_v17 = vld [vmem:[#allocation68_spill] sm:$0xff]  ;;  %v16627_v0 = vld [vmem:[#allocation41_spill] sm:$0xff] }
 0x1a9   : > { %v1811_v33 = vadd.f32 %v11767_v50, %v1775_v61  ;;  %v16616_v51 = vpack.c.bf16 %v16614_v48, %v16615_v21  ;;  %v1608_v55 = vadd.f32 %v16617_v17, %v1438_v32  ;;  %v1777_v20 = vadd.f32 %v1736_v12, %v1607_v28  ;;  %v16626_v28 = vld [vmem:[#allocation11_spill] sm:$0xff]  ;;  %v16628_v47 = vld [vmem:[#allocation73_spill] sm:$0xff]  ;;  %v16661_v32 = vld [vmem:[#allocation74_spill] sm:$0xff] }
 0x1aa   : > { %v2106_v14 = vsub.f32 %v2094_v45, %v1834_v3  ;;  %v16620_v24 = vpack.c.bf16 %v16618_v9, %v16619_v62  ;;  %v16621_v59 = vsel %vm12050_vm7, %v12035_v7, %v11888_v57  ;;  %v1440_v54 = vadd.f32 %v16627_v0, %v16626_v28  ;;  %v1738_v7 = vpop.f32.mrf.mxu0  ;;  %v16634_v28 = vld [vmem:[#allocation44_spill] sm:$0xff] }
 0x1ab   : > { %9732 = vmatmul.mubr.msk.bf16.gmra.mxu0 %vm16454_vm1, %v16616_v51  ;;  %vm12357_vm15 = vcmp.lt.s32.totalorder %v16621_v59, 16  ;;  %v2141_v45 = vadd.f32 %v2140_v19, %v2130_v58  ;;  %v1835_v3 = vmax.f32 %v1811_v33, 0.0  ;;  %v1812_v57 = vadd.f32 %v11788_v6, %v1776_v18  ;;  %v12378_v51 = vpop.f32.mrf.mxu1  ;;  %v16633_v59 = vld [vmem:[#allocation12_spill] sm:$0xff] }
 0x1ac   : > { %9739 = vmatmul.mubr.msk.bf16.gmra.mxu1 %vm16454_vm1, %v16620_v24  ;;  %3429 = vmatprep.mubr.bf16.mxu0 %v16491_v53  ;;  %v1609_v34 = vadd.f32 %v16628_v47, %v1439_v2  ;;  %v2118_v12 = vsel %vm12241_vm5, %v2106_v14, 0.0  ;;  %v1813_v48 = vadd.f32 %v11767_v50, %v1777_v20  ;;  %v1778_v21 = vadd.f32 %v1738_v7, %v1608_v55  ;;  %v1740_v33 = vpop.f32.mrf.mxu0  ;;  %v16629_v2 = vld [vmem:[#allocation75_spill] sm:$0xff]  ;;  %v16662_v24 = vld [vmem:[#allocation72_spill] sm:$0xff] }
 0x1ad   : > { %3578 = vmatprep.mubr.bf16.mxu1 %v16491_v53  ;;  %v2131_v17 = vmul.f32 %v2118_v12, %v2118_v12  ;;  %v2095_v19 = vsel %vm12289_vm13, %v1835_v3, 0.0  ;;  %v1836_v58 = vmax.f32 %v1812_v57, 0.0  ;;  %v2052_v18 = vsel %vm12366_vm9, %v12299_v4, %v12197_v46  ;;  %v12389_v20 = vpop.f32.mrf.mxu1  ;;  %v16636_v12 = vld [vmem:[#allocation48_spill] sm:$0xff]  ;;  %v16660_v4 = vld [vmem:[#allocation25_spill] sm:$0xff] }
 0x1ae   : > { %v1610_v9 = vadd.f32 %v16629_v2, %v1440_v54  ;;  %2163 = vst.msk [vmem:[#allocation2 + $0x40] sm:$0xff] %vm16427_vm2, %v2095_v19  ;;  %v1837_v31 = vmax.f32 %v1813_v48, 0.0  ;;  %v1814_v55 = vadd.f32 %v11788_v6, %v1778_v21  ;;  %v1779_v14 = vadd.f32 %v1740_v33, %v1609_v34  ;;  %v1742_v57 = vpop.f32.mrf.mxu0  ;;  %v16637_v21 = vld [vmem:[#allocation15_spill] sm:$0xff] }
 0x1af   : > { %v16630_v62 = vsel %vm12106_vm10, %v12073_v38, %v11958_v16  ;;  %v1441_v0 = vadd.f32 %v16634_v28, %v16633_v59  ;;  %v2142_v54 = vadd.f32 %v2141_v45, %v2131_v17  ;;  %v2107_v3 = vsub.f32 %v2095_v19, %v1836_v58  ;;  %v12406_v16 = vpop.f32.mrf.mxu1  ;;  %v16635_v38 = vld [vmem:[#allocation13_spill] sm:$0xff]  ;;  %v16638_v33 = vld [vmem:[#allocation51_spill] sm:$0xff]  ;;  %v16639_v58 = vld [vmem:[#allocation70_spill] sm:$0xff] }
 0x1b0   : > { %vm12396_vm7 = vcmp.lt.s32.totalorder %v16630_v62, 16  ;;  %v2096_v7 = vsel %vm12320_vm14, %v1837_v31, 0.0  ;;  %v1838_v47 = vmax.f32 %v1814_v55, 0.0  ;;  %v1815_v10 = vadd.f32 %v11767_v50, %v1779_v14  ;;  %v1746_v19 = vpop.f32.mrf.mxu0  ;;  %v16640_v31 = vld [vmem:[#allocation69_spill] sm:$0xff] }
 0x1b1   : > { %v1780_v34 = vadd.f32 %v1742_v57, %v1610_v9  ;;  %v1442_v48 = vadd.f32 %v16636_v12, %v16635_v38  ;;  %v1443_v2 = vadd.f32 %v16638_v33, %v16637_v21  ;;  %v1611_v45 = vadd.f32 %v12088_v22, %v1441_v0  ;;  %2164 = vst.msk [vmem:[#allocation2 + $0x48] sm:$0xff] %vm16427_vm2, %v2096_v7  ;;  %v12430_v28 = vpop.f32.mrf.mxu1  ;;  %v16648_v21 = vld [vmem:[#allocation18_spill] sm:$0xff]  ;;  %v12510_v46 = vld.sshfl [vmem:[%s16353_s1 + $0x10] sm:$0x33 pattern:$0x76325410] }
 0x1b2   : > { %v2119_v17 = vsel %vm12289_vm13, %v2107_v3, 0.0  ;;  %v16641_v55 = vpack.c.bf16 %v16639_v58, %v16640_v31  ;;  %v16642_v9 = vsel %vm12211_vm3, %v12194_v15, %v12121_v44  ;;  %v2108_v1 = vsub.f32 %v2096_v7, %v1838_v47  ;;  %v16647_v44 = vld [vmem:[#allocation56_spill] sm:$0xff]  ;;  %v1748_v47 = vpop.f32.mrf.mxu0  ;;  %v16651_v58 = vld [vmem:[#allocation65_spill] sm:$0xff] }
 0x1b3   : > { %vm12425_vm10 = vcmp.lt.s32.totalorder %v16642_v9, 16  ;;  %v2132_v22 = vmul.f32 %v2119_v17, %v2119_v17  ;;  %v1839_v62 = vmax.f32 %v1815_v10, 0.0  ;;  %v1816_v59 = vadd.f32 %v11788_v6, %v1780_v34  ;;  %v12446_v38 = vpop.f32.mrf.mxu1 }
 0x1b4   : > { %9733 = vmatmul.mubr.msk.bf16.gmra.mxu0 %vm16454_vm1, %v16641_v55  ;;  %v16645_v0 = vpack.c.bf16 %v12030_v11, %v12027_v25  ;;  %v1444_v15 = vadd.f32 %v16647_v44, %v16646_v13  ;;  %v1612_v3 = vadd.f32 %v12127_v37, %v1442_v48  ;;  %v1613_v57 = vadd.f32 %v12157_v40, %v1443_v2  ;;  %v1750_v48 = vpop.f32.mrf.mxu0 }
 0x1b5   : > { %3439 = vmatprep.mubr.bf16.mxu0 %v16491_v53  ;;  %v1781_v7 = vadd.f32 %v1746_v19, %v1611_v45  ;;  %v2143_v10 = vadd.f32 %v2142_v54, %v2132_v22  ;;  %v2120_v34 = vsel %vm12320_vm14, %v2108_v1, 0.0  ;;  %v2097_v25 = vsel %vm12357_vm15, %v1839_v62, 0.0  ;;  %v16649_v54 = vld [vmem:[#allocation58_spill] sm:$0xff]  ;;  %v12454_v17 = vpop.f32.mrf.mxu1  ;;  %v16650_v19 = vld [vmem:[#allocation20_spill] sm:$0xff] }
 0x1b6   : > { %9740 = vmatmul.mubr.msk.bf16.gmra.mxu1 %vm16454_vm1, %v16645_v0  ;;  %v1840_v11 = vmax.f32 %v1816_v59, 0.0  ;;  %v2133_v12 = vmul.f32 %v2120_v34, %v2120_v34  ;;  %2165 = vst.msk [vmem:[#allocation2 + $0x50] sm:$0xff] %vm16427_vm2, %v2097_v25  ;;  %v1782_v40 = vadd.f32 %v1748_v47, %v1612_v3  ;;  %vm2017_vm12 = vcmp.lt.s32.totalorder %v12274_v41, 0  ;;  %v1752_v1 = vpop.f32.mrf.mxu0 }
 0x1b7   : > { %3588 = vmatprep.mubr.bf16.mxu1 %v16491_v53  ;;  %v1817_v37 = vadd.f32 %v11767_v50, %v1781_v7  ;;  %v1445_v33 = vadd.f32 %v16649_v54, %v16648_v21  ;;  %v1614_v49 = vadd.f32 %v12167_v35, %v1444_v15  ;;  %v1783_v45 = vadd.f32 %v1750_v48, %v1613_v57  ;;  %v12463_v13 = vpop.f32.mrf.mxu1  ;;  %vm12485_vm4 = vmand %vm2017_vm12, %vm2005_vm8 }
 0x1b8   : > { %v2109_v2 = vsub.f32 %v2097_v25, %v1840_v11  ;;  %v1446_v31 = vadd.f32 %v16651_v58, %v16650_v19  ;;  %v2144_v55 = vadd.f32 %v2143_v10, %v2133_v12  ;;  %v1818_v22 = vadd.f32 %v11788_v6, %v1782_v40  ;;  %v1756_v57 = vpop.f32.mrf.mxu0 }
 0x1b9   : > { %v1841_v9 = vmax.f32 %v1817_v37, 0.0  ;;  %v1615_v62 = vadd.f32 %v12200_v60, %v1445_v33  ;;  %v1819_v0 = vadd.f32 %v11767_v50, %v1783_v45  ;;  %v1784_v35 = vadd.f32 %v1752_v1, %v1614_v49  ;;  %v12475_v25 = vpop.f32.mrf.mxu1 }
 0x1ba   : > { %v2121_v59 = vsel %vm12357_vm15, %v2109_v2, 0.0  ;;  %v1842_v3 = vmax.f32 %v1818_v22, 0.0  ;;  %v16652_v7 = vpack.c.bf16 %v12060_v27, %v12057_v63  ;;  %v2041_v60 = vadd.s32 18, %v12274_v41  ;;  %v16656_v27 = vld [vmem:[#allocation22_spill] sm:$0xff]  ;;  %v16667_v63 = vld [vmem:[#allocation76_spill] sm:$0xff] }
 0x1bb   : > { %v2134_v44 = vmul.f32 %v2121_v59, %v2121_v59  ;;  %v2098_v15 = vsel %vm12396_vm7, %v1841_v9, 0.0  ;;  %v1616_v61 = vadd.f32 %v12225_v43, %v1446_v31  ;;  %v1843_v47 = vmax.f32 %v1819_v0, 0.0  ;;  %v16657_v43 = vld [vmem:[#allocation71_spill] sm:$0xff]  ;;  %v12505_v49 = vpop.f32.mrf.mxu1 }
 0x1bc   : > { %9734 = vmatmul.mubr.msk.bf16.gmra.mxu0 %vm16454_vm1, %v16652_v7  ;;  %2166 = vst.msk [vmem:[#allocation2 + $0x58] sm:$0xff] %vm16427_vm2, %v2098_v15  ;;  %v1820_v10 = vadd.f32 %v11788_v6, %v1784_v35  ;;  %v1785_v34 = vadd.f32 %v1756_v57, %v1615_v62  ;;  %v16653_v11 = vpack.c.bf16 %v12082_v56, %v12079_v26  ;;  %vm12497_vm3 = vcmp.lt.s32.totalorder %v2052_v18, 16  ;;  %v1758_v26 = vpop.f32.mrf.mxu0 }
 0x1bd   : > { %4126 = vmatprep.mubr.bf16.mxu0 %v16491_v53  ;;  %v1447_v12 = vadd.f32 %v16657_v43, %v16656_v27  ;;  %v2145_v37 = vadd.f32 %v2144_v55, %v2134_v44  ;;  %v2110_v40 = vsub.f32 %v2098_v15, %v1842_v3  ;;  %v2099_v48 = vsel %vm12425_vm10, %v1843_v47, 0.0  ;;  %v12522_v1 = vpop.f32.mrf.mxu1 }
 0x1be   : > { %9741 = vmatmul.mubr.msk.bf16.gmra.mxu1 %vm16454_vm1, %v16653_v11  ;;  %v1844_v21 = vmax.f32 %v1820_v10, 0.0  ;;  %v1821_v54 = vadd.f32 %v11767_v50, %v1785_v34  ;;  %v1786_v33 = vadd.f32 %v1758_v26, %v1616_v61  ;;  %v1448_v18 = vadd.f32 %v16661_v32, %v16660_v4  ;;  %2167 = vst.msk [vmem:[#allocation2 + $0x60] sm:$0xff] %vm16427_vm2, %v2099_v48  ;;  %v1760_v19 = vpop.f32.mrf.mxu0  ;;  %v3484_v26 = vld [vmem:[%s10787_s10 + $0xd6] sm:$0xff] }
 0x1bf   : > { %3598 = vmatprep.mubr.bf16.mxu1 %v16491_v53  ;;  %v1617_v2 = vadd.f32 %v12251_v39, %v1447_v12  ;;  %v2122_v45 = vsel %vm12396_vm7, %v2110_v40, 0.0  ;;  %v2053_v58 = vsel %vm12485_vm4, %v2041_v60, %v12274_v41  ;;  %v4360_v0 = vsel %vm373_vm0, %v16662_v24, 0  ;;  %v12533_v57 = vpop.f32.mrf.mxu1  ;;  %v4047_v24 = vld [vmem:[%s10787_s10 + $0xe9] sm:$0xff] }
 0x1c0   : > { %v2135_v31 = vmul.f32 %v2122_v45, %v2122_v45  ;;  %v2111_v55 = vsub.f32 %v2099_v48, %v1844_v21  ;;  %v1845_v9 = vmax.f32 %v1821_v54, 0.0  ;;  %v1822_v22 = vadd.f32 %v11788_v6, %v1786_v33  ;;  %v1762_v59 = vpop.f32.mrf.mxu0 }
 0x1c1   : > { %v1618_v62 = vadd.f32 %v12266_v5, %v1448_v18  ;;  %v1787_v39 = vadd.f32 %v1760_v19, %v1617_v2  ;;  %v4678_v35 = vcombine.high %v12510_v46, %v12510_v46  ;;  %v16663_v47 = vpack.c.bf16 %v12173_v23, %v12170_v36  ;;  %v12545_v34 = vpop.f32.mrf.mxu1  ;;  %v4044_v36 = vld [vmem:[%s10787_s10 + $0xd1] sm:$0xff]  ;;  %v4045_v23 = vld [vmem:[%s10787_s10 + $0xd9] sm:$0xff] }
 0x1c2   : > { %v2146_v44 = vadd.f32 %v2145_v37, %v2135_v31  ;;  %v2123_v41 = vsel %vm12425_vm10, %v2111_v55, 0.0  ;;  %v2100_v15 = vsel %vm12497_vm3, %v1845_v9, 0.0  ;;  %v1846_v3 = vmax.f32 %v1822_v22, 0.0  ;;  %v2401_v61 = vpop.f32.mrf.mxu0 }
 0x1c3   : > { %v2136_v5 = vmul.f32 %v2123_v41, %v2123_v41  ;;  %2168 = vst.msk [vmem:[#allocation2 + $0x68] sm:$0xff] %vm16427_vm2, %v2100_v15  ;;  %v1823_v7 = vadd.f32 %v11767_v50, %v1787_v39  ;;  %v1788_v60 = vadd.f32 %v1762_v59, %v1618_v62  ;;  %vm12541_vm5 = vcmp.lt.s32.totalorder %v2053_v58, 16  ;;  %v16666_v50 = vld [vmem:[#allocation77_spill] sm:$0xff]  ;;  %v12563_v21 = vpop.f32.mrf.mxu1 }
 0x1c4   : > { %9747 = vmatmul.mubr.msk.bf16.vlgmr.msra.gmra.mxu0 %vm16454_vm1, %v16663_v47  ;;  %v2112_v14 = vsub.f32 %v2100_v15, %v1846_v3  ;;  %v12548_v11 = vadd.f32 %v2401_v61, %v12278_v8  ;;  %v16668_v27 = vpack.c.bf16 %v16666_v50, %v16667_v63  ;;  %v2403_v40 = vpop.f32.mrf.mxu0  ;;  %v3485_v8 = vld [vmem:[%s10787_s10 + $0xde] sm:$0xff]  ;;  %v4055_v18 = vpack.c.bf16 %v4045_v23, %v4044_v36  ;;  %v16669_v63 = vld [vmem:[#allocation47_spill] sm:$0xff] }
 0x1c5   : > { %4380 = vmatpush1.bf16.msra.mxu0 %v4360_v0  ;;  %v2147_v43 = vadd.f32 %v2146_v44, %v2136_v5  ;;  %v1847_v12 = vmax.f32 %v1823_v7, 0.0  ;;  %v1824_v37 = vadd.f32 %v11788_v6, %v1788_v60  ;;  %4136 = vmatprep.mubr.bf16.mxu0 %v16491_v53  ;;  %v12566_v54 = vadd.f32 %v2403_v40, %v12304_v42  ;;  %v12572_v2 = vpop.f32.mrf.mxu1  ;;  %v4046_v59 = vld [vmem:[%s10787_s10 + $0xe1] sm:$0xff]  ;;  %v12605_v5 = vld.sshfl [vmem:[%s16353_s1 + $0x14] sm:$0x33 pattern:$0x76325410] }
 0x1c6   : > { %9742 = vmatmul.mubr.msk.bf16.gmra.mxu1 %vm16454_vm1, %v16668_v27  ;;  %v2124_v48 = vsel %vm12497_vm3, %v2112_v14, 0.0  ;;  %9781 = vmatprep.subr.msk.bf16.mxu0 %vm373_vm0, %v4678_v35  ;;  %v2405_v32 = vpop.f32.mrf.mxu0  ;;  %v3491_v42 = vpack.c.bf16 %v3485_v8, %v3484_v26  ;;  %v4023_v0 = vld [vmem:[%s10787_s10 + $0xc0] sm:$0xff]  ;;  %v4024_v35 = vld [vmem:[%s10787_s10 + $0xc8] sm:$0xff]  ;;  %v4529_v27 = vsel %vm373_vm0, %v16669_v63, 0  ;;  %v4847_v36 = vcombine.high %v12605_v5, %v12605_v5  ;;  %v4025_v8 = vld [vmem:[%s10787_s10 + $0xd0] sm:$0xff] }
 0x1c7   : > { %3608 = vmatprep.mubr.bf16.mxu1 %v16491_v53  ;;  %v2137_v33 = vmul.f32 %v2124_v48, %v2124_v48  ;;  %v2101_v6 = vsel %vm12541_vm5, %v1847_v12, 0.0  ;;  %v1848_v4 = vmax.f32 %v1824_v37, 0.0  ;;  %v12575_v56 = vadd.f32 %v2405_v32, %v12325_v52  ;;  %v12577_v31 = vpop.f32.mrf.mxu1  ;;  %v4049_v37 = vld [vmem:[%s10787_s10 + $0xf9] sm:$0xff] }
 0x1c8   : > { %2169 = vst.msk [vmem:[#allocation2 + $0x70] sm:$0xff] %vm16427_vm2, %v2101_v6  ;;  %v2407_v58 = vpop.f32.mrf.mxu0  ;;  %v4035_v47 = vpack.c.bf16 %v4024_v35, %v4023_v0  ;;  %v4026_v48 = vld [vmem:[%s10787_s10 + $0xd8] sm:$0xff]  ;;  %v4051_v35 = vld [vmem:[%s10787_s10 + $0x109] sm:$0xff]  ;;  %vm16455_vm6 = vcmask 1043456  }
 0x1c9   : > { %v2148_v45 = vadd.f32 %v2147_v43, %v2137_v33  ;;  %v2113_v19 = vsub.f32 %v2101_v6, %v1848_v4  ;;  %v12580_v55 = vadd.f32 %v2407_v58, %v12335_v30  ;;  %v12585_v62 = vpop.f32.mrf.mxu1  ;;  %v2126_v58 = vld [vmem:[%s11474_s7] sm:$0x1] }
 0x1ca   : > { %v2411_v22 = vpop.f32.mrf.mxu0 }
 0x1cb   : > { %v2125_v9 = vsel %vm12541_vm5, %v2113_v19, 0.0  ;;  %v12588_v39 = vadd.f32 %v2411_v22, %v12346_v29  ;;  %v12597_v41 = vpop.f32.mrf.mxu1  ;;  %v4056_v29 = vpack.c.bf16 %v4047_v24, %v4046_v59  ;;  %v4036_v19 = vpack.c.bf16 %v4026_v48, %v4025_v8 }
 0x1cc   : > { %9748 = vmatmul.mubr.msk.bf16.gmra.mxu0 %vm16454_vm1, %v4055_v18  ;;  %v2138_v52 = vmul.f32 %v2125_v9, %v2125_v9  ;;  %v2413_v30 = vpop.f32.mrf.mxu0 }
 0x1cd   : > { %4146 = vmatprep.mubr.bf16.mxu0 %v16491_v53  ;;  %v12600_v15 = vadd.f32 %v2413_v30, %v12378_v51  ;;  %v12607_v60 = vpop.f32.mrf.mxu1 }
 0x1ce   : > { %9743 = vmatmul.mubr.msk.bf16.gmra.mxu1 %vm16454_vm1, %v3491_v42  ;;  %v2149_v44 = vadd.f32 %v2148_v45, %v2138_v52  ;;  %v2415_v3 = vpop.f32.mrf.mxu0 }
 0x1cf   : > { %4252 = vmatprep.mubr.bf16.mxu1 %v16491_v53  ;;  %v12610_v61 = vadd.f32 %v2415_v3, %v12389_v20  ;;  %v12612_v51 = vpop.f32.mrf.mxu1  ;;  %v4028_v3 = vld [vmem:[%s10787_s10 + $0xe8] sm:$0xff] }
 0x1d0   : > { %v2150_v7 = vrot.slane %v2149_v44, 4  ;;  %v2417_v14 = vpop.f32.mrf.mxu0 }
 0x1d1   : > { %v12615_v50 = vadd.f32 %v2417_v14, %v12406_v16  ;;  %v2546_v12 = vpop.f32.mrf.mxu1  ;;  %v4048_v16 = vld [vmem:[%s10787_s10 + $0xf1] sm:$0xff] }
 0x1d2   : > { %v2151_v10 = vadd.f32 %v2150_v7, %v2149_v44  ;;  %v2421_v23 = vpop.f32.mrf.mxu0  ;;  %v12630_v40 = vadd.f32 %v2546_v12, %v12548_v11  ;;  %v4057_v18 = vpack.c.bf16 %v4049_v37, %v4048_v16  ;;  %v4053_v16 = vld [vmem:[%s10787_s10 + $0x119] sm:$0xff] }
 0x1d3   : > { %v12623_v43 = vadd.f32 %v2421_v23, %v12430_v28  ;;  %v2548_v6 = vpop.f32.mrf.mxu1 }
 0x1d4   : > { %9749 = vmatmul.mubr.msk.bf16.gmra.mxu0 %vm16454_vm1, %v4056_v29  ;;  %v2152_v20 = vrot.slane %v2151_v10, 2  ;;  %v2423_v26 = vpop.f32.mrf.mxu0  ;;  %v12638_v4 = vadd.f32 %v2548_v6, %v12566_v54 }
 0x1d5   : > { %4156 = vmatprep.mubr.bf16.mxu0 %v16491_v53  ;;  %v2424_v28 = vadd.f32 %v2423_v26, %v12446_v38  ;;  %v2550_v45 = vpop.f32.mrf.mxu1  ;;  %v4030_v26 = vld [vmem:[%s10787_s10 + $0xf8] sm:$0xff] }
 0x1d6   : > { %9755 = vmatmul.mubr.msk.bf16.vlgmr.msra.gmra.mxu1 %vm16454_vm1, %v4035_v47  ;;  %v2153_v33 = vadd.f32 %v2152_v20, %v2151_v10  ;;  %v2425_v32 = vpop.f32.mrf.mxu0  ;;  %v12643_v9 = vadd.f32 %v2550_v45, %v12575_v56  ;;  %v4050_v56 = vld [vmem:[%s10787_s10 + $0x101] sm:$0xff] }
 0x1d7   : > { %4262 = vmatprep.mubr.bf16.mxu1 %v16491_v53  ;;  %4549 = vmatpush1.bf16.msra.mxu1 %v4529_v27  ;;  %v2426_v42 = vadd.f32 %v2425_v32, %v12454_v17  ;;  %v2552_v54 = vpop.f32.mrf.mxu1  ;;  %v4058_v14 = vpack.c.bf16 %v4051_v35, %v4050_v56 }
 0x1d8   : > { %9790 = vmatprep.subr.msk.bf16.mxu1 %vm373_vm0, %v4847_v36  ;;  %v2154_v11 = vrot.slane %v2153_v33, 1  ;;  %v2427_v38 = vpop.f32.mrf.mxu0  ;;  %v12647_v59 = vadd.f32 %v2552_v54, %v12580_v55  ;;  %v4027_v55 = vld [vmem:[%s10787_s10 + $0xe0] sm:$0xff] }
 0x1d9   : > { %v2428_v52 = vadd.f32 %v2427_v38, %v12463_v13  ;;  %v2556_v0 = vpop.f32.mrf.mxu1  ;;  %v4037_v63 = vpack.c.bf16 %v4028_v3, %v4027_v55 }
 0x1da   : > { %v2155_v22 = vadd.f32 %v2154_v11, %v2153_v33  ;;  %v2431_v17 = vpop.f32.mrf.mxu0  ;;  %v12656_v13 = vadd.f32 %v2556_v0, %v12588_v39 }
 0x1db   : > { %v2432_v30 = vadd.f32 %v2431_v17, %v12475_v25  ;;  %v2558_v7 = vpop.f32.mrf.mxu1 }
 0x1dc   : > { %9750 = vmatmul.mubr.msk.bf16.gmra.mxu0 %vm16454_vm1, %v4057_v18  ;;  %v2156_v24 = vadd.f32 %v2155_v22, %v2126_v58  ;;  %v2433_v44 = vpop.f32.mrf.mxu0  ;;  %v12664_v25 = vadd.f32 %v2558_v7, %v12600_v15 }
 0x1dd   : > { %4166 = vmatprep.mubr.bf16.mxu0 %v16491_v53  ;;  %v2434_v29 = vadd.f32 %v2433_v44, %v12505_v49  ;;  %v2560_v39 = vpop.f32.mrf.mxu1  ;;  %v12714_v44 = vld.sshfl [vmem:[%s16353_s1 + $0x18] sm:$0x33 pattern:$0x76325410] }
 0x1de   : > { %9756 = vmatmul.mubr.msk.bf16.gmra.mxu1 %vm16454_vm1, %v4036_v19  ;;  %2157 = vst [vmem:[%s11474_s7] sm:$0x1] %v2156_v24  ;;  %v2435_v47 = vpop.f32.mrf.mxu0  ;;  %v12668_v27 = vadd.f32 %v2560_v39, %v12610_v61  ;;  %v4052_v61 = vld [vmem:[%s10787_s10 + $0x111] sm:$0xff]  ;;  %v5016_v39 = vcombine.high %v12714_v44, %v12714_v44 }
 0x1df   : > { %4272 = vmatprep.mubr.bf16.mxu1 %v16491_v53  ;;  %v2436_v10 = vadd.f32 %v2435_v47, %v12522_v1  ;;  %v2562_v23 = vpop.f32.mrf.mxu1  ;;  %v4059_v6 = vpack.c.bf16 %v4053_v16, %v4052_v61 }
 0x1e0   : > { %v2437_v36 = vpop.f32.mrf.mxu0  ;;  %v12672_v15 = vadd.f32 %v2562_v23, %v12615_v50  ;;  %v4029_v50 = vld [vmem:[%s10787_s10 + $0xf0] sm:$0xff]  ;;  %v4316_v23 = vld [vmem:[%s10787_s10 + $0xda] sm:$0xff] }
 0x1e1   : > { %v2438_v49 = vadd.f32 %v2437_v36, %v12533_v57  ;;  %v2566_v1 = vpop.f32.mrf.mxu1  ;;  %v4038_v11 = vpack.c.bf16 %v4030_v26, %v4029_v50 }
 0x1e2   : > { %v2441_v20 = vpop.f32.mrf.mxu0  ;;  %v12681_v37 = vadd.f32 %v2566_v1, %v12623_v43  ;;  %v4034_v1 = vld [vmem:[%s10787_s10 + $0x118] sm:$0xff] }
 0x1e3   : > { %v2442_v12 = vadd.f32 %v2441_v20, %v12545_v34  ;;  %v2568_v48 = vpop.f32.mrf.mxu1 }
 0x1e4   : > { %9751 = vmatmul.mubr.msk.bf16.gmra.mxu0 %vm16454_vm1, %v4058_v14  ;;  %v2443_v57 = vpop.f32.mrf.mxu0  ;;  %v12687_v33 = vadd.f32 %v2568_v48, %v2424_v28 }
 0x1e5   : > { %4176 = vmatprep.mubr.bf16.mxu0 %v16491_v53  ;;  %v2444_v8 = vadd.f32 %v2443_v57, %v12563_v21  ;;  %v2570_v18 = vpop.f32.mrf.mxu1 }
 0x1e6   : > { %9757 = vmatmul.mubr.msk.bf16.gmra.mxu1 %vm16454_vm1, %v4037_v63  ;;  %v2445_v34 = vpop.f32.mrf.mxu0  ;;  %v12690_v43 = vadd.f32 %v2570_v18, %v2426_v42  ;;  %v4314_v42 = vld [vmem:[%s10787_s10 + $0xca] sm:$0xff] }
 0x1e7   : > { %4282 = vmatprep.mubr.bf16.mxu1 %v16491_v53  ;;  %v2446_v32 = vadd.f32 %v2445_v34, %v12572_v2  ;;  %v2572_v58 = vpop.f32.mrf.mxu1  ;;  %v4313_v2 = vld [vmem:[%s10787_s10 + $0xc2] sm:$0xff] }
 0x1e8   : > { %v2447_v45 = vpop.f32.mrf.mxu0  ;;  %v12693_v21 = vadd.f32 %v2572_v58, %v2428_v52  ;;  %v4032_v52 = vld [vmem:[%s10787_s10 + $0x108] sm:$0xff]  ;;  %v4325_v35 = vpack.c.bf16 %v4314_v42, %v4313_v2 }
 0x1e9   : > { %v2448_v19 = vadd.f32 %v2447_v45, %v12577_v31  ;;  %v2576_v22 = vpop.f32.mrf.mxu1  ;;  %v4031_v31 = vld [vmem:[%s10787_s10 + $0x100] sm:$0xff] }
 0x1ea   : > { %v2451_v28 = vpop.f32.mrf.mxu0  ;;  %v12703_v54 = vadd.f32 %v2576_v22, %v2432_v30  ;;  %v4039_v3 = vpack.c.bf16 %v4032_v52, %v4031_v31 }
 0x1eb   : > { %v12697_v38 = vadd.f32 %v2451_v28, %v12585_v62  ;;  %v2578_v0 = vpop.f32.mrf.mxu1  ;;  %v4318_v28 = vld [vmem:[%s10787_s10 + $0xea] sm:$0xff] }
 0x1ec   : > { %9752 = vmatmul.mubr.msk.bf16.gmra.mxu0 %vm16454_vm1, %v4059_v6  ;;  %v2453_v17 = vpop.f32.mrf.mxu0  ;;  %v12709_v56 = vadd.f32 %v2578_v0, %v2434_v29 }
 0x1ed   : > { %4397 = vmatprep.mubr.bf16.mxu0 %v16491_v53  ;;  %v2454_v24 = vadd.f32 %v2453_v17, %v12597_v41  ;;  %v2580_v55 = vpop.f32.mrf.mxu1  ;;  %v4698_v41 = vsel %vm373_vm0, %v12510_v46, 0  ;;  %v4315_v46 = vld [vmem:[%s10787_s10 + $0xd2] sm:$0xff] }
 0x1ee   : > { %9758 = vmatmul.mubr.msk.bf16.gmra.mxu1 %vm16454_vm1, %v4038_v11  ;;  %v2455_v62 = vpop.f32.mrf.mxu0  ;;  %v12717_v7 = vadd.f32 %v2580_v55, %v2436_v10  ;;  %v4326_v50 = vpack.c.bf16 %v4316_v23, %v4315_v46 }
 0x1ef   : > { %4292 = vmatprep.mubr.bf16.mxu1 %v16491_v53  ;;  %v2456_v30 = vadd.f32 %v2455_v62, %v12607_v60  ;;  %v2582_v14 = vpop.f32.mrf.mxu1 }
 0x1f0   : > { %v2457_v47 = vpop.f32.mrf.mxu0  ;;  %v12724_v63 = vadd.f32 %v2582_v14, %v2438_v49  ;;  %v4033_v49 = vld [vmem:[%s10787_s10 + $0x110] sm:$0xff] }
 0x1f1   : > { %v2458_v29 = vadd.f32 %v2457_v47, %v12612_v51  ;;  %v2586_v36 = vpop.f32.mrf.mxu1  ;;  %v4040_v48 = vpack.c.bf16 %v4034_v1, %v4033_v49 }
 0x1f2   : > { %v2715_v60 = vpop.f32.mrf.mxu0  ;;  %v12731_v51 = vadd.f32 %v2586_v36, %v2442_v12 }
 0x1f3   : > { %v2774_v10 = vadd.f32 %v2715_v60, %v12630_v40  ;;  %v2588_v61 = vpop.f32.mrf.mxu1 }
 0x1f4   : > { %9764 = vmatmul.mubr.msk.bf16.vlgmr.msra.gmra.mxu0 %vm16454_vm1, %v4325_v35  ;;  %v2717_v20 = vpop.f32.mrf.mxu0  ;;  %v12739_v40 = vadd.f32 %v2588_v61, %v2444_v8 }
 0x1f5   : > { %4718 = vmatpush1.bf16.msra.mxu0 %v4698_v41  ;;  %4407 = vmatprep.mubr.bf16.mxu0 %v16491_v53  ;;  %v2775_v16 = vadd.f32 %v2717_v20, %v12638_v4  ;;  %v2590_v12 = vpop.f32.mrf.mxu1 }
 0x1f6   : > { %9759 = vmatmul.mubr.msk.bf16.gmra.mxu1 %vm16454_vm1, %v4039_v3  ;;  %9799 = vmatprep.subr.msk.bf16.mxu0 %vm373_vm0, %v5016_v39  ;;  %v2719_v57 = vpop.f32.mrf.mxu0  ;;  %v12742_v34 = vadd.f32 %v2590_v12, %v2446_v32 }
 0x1f7   : > { %4302 = vmatprep.mubr.bf16.mxu1 %v16491_v53  ;;  %v2776_v26 = vadd.f32 %v2719_v57, %v12643_v9  ;;  %v2592_v18 = vpop.f32.mrf.mxu1  ;;  %v4317_v9 = vld [vmem:[%s10787_s10 + $0xe2] sm:$0xff]  ;;  %v4322_v57 = vld [vmem:[%s10787_s10 + $0x10a] sm:$0xff] }
 0x1f8   : > { %v2721_v6 = vpop.f32.mrf.mxu0  ;;  %v12745_v45 = vadd.f32 %v2592_v18, %v2448_v19  ;;  %v4327_v17 = vpack.c.bf16 %v4318_v28, %v4317_v9 }
 0x1f9   : > { %v2777_v11 = vadd.f32 %v2721_v6, %v12647_v59  ;;  %v2596_v8 = vpop.f32.mrf.mxu1 }
 0x1fa   : > { %v2725_v4 = vpop.f32.mrf.mxu0  ;;  %v12754_v32 = vadd.f32 %v2596_v8, %v12697_v38 }
 0x1fb   : > { %v2778_v58 = vadd.f32 %v2725_v4, %v12656_v13  ;;  %v2598_v59 = vpop.f32.mrf.mxu1  ;;  %v12763_v13 = vld.sshfl [vmem:[%s16353_s1 + $0x1c] sm:$0x33 pattern:$0x76325410] }
 0x1fc   : > { %9765 = vmatmul.mubr.msk.bf16.gmra.mxu0 %vm16454_vm1, %v4326_v50  ;;  %v2727_v22 = vpop.f32.mrf.mxu0  ;;  %v12758_v2 = vadd.f32 %v2598_v59, %v2454_v24  ;;  %v4867_v24 = vsel %vm373_vm0, %v12605_v5, 0  ;;  %v5185_v35 = vcombine.high %v12763_v13, %v12763_v13 }
 0x1fd   : > { %4417 = vmatprep.mubr.bf16.mxu0 %v16491_v53  ;;  %v2779_v19 = vadd.f32 %v2727_v22, %v12664_v25  ;;  %v2600_v31 = vpop.f32.mrf.mxu1 }
 0x1fe   : > { %9760 = vmatmul.mubr.msk.bf16.gmra.mxu1 %vm16454_vm1, %v4040_v48  ;;  %v2729_v42 = vpop.f32.mrf.mxu0  ;;  %v12766_v52 = vadd.f32 %v2600_v31, %v2456_v30  ;;  %v4319_v30 = vld [vmem:[%s10787_s10 + $0xf2] sm:$0xff] }
 0x1ff   : > { %4566 = vmatprep.mubr.bf16.mxu1 %v16491_v53  ;;  %v2780_v38 = vadd.f32 %v2729_v42, %v12668_v27  ;;  %v2602_v62 = vpop.f32.mrf.mxu1 }
 0x200   : > { %v2731_v0 = vpop.f32.mrf.mxu0  ;;  %v12773_v55 = vadd.f32 %v2602_v62, %v2458_v29 }
 0x201   : > { %v2781_v25 = vadd.f32 %v2731_v0, %v12672_v15  ;;  %v2884_v27 = vpop.f32.mrf.mxu1  ;;  %v4320_v15 = vld [vmem:[%s10787_s10 + $0xfa] sm:$0xff] }
 0x202   : > { %v2735_v3 = vpop.f32.mrf.mxu0  ;;  %v12781_v41 = vadd.f32 %v2884_v27, %v2774_v10  ;;  %v4328_v60 = vpack.c.bf16 %v4320_v15, %v4319_v30 }
 0x203   : > { %v2782_v47 = vadd.f32 %v2735_v3, %v12681_v37  ;;  %v2886_v14 = vpop.f32.mrf.mxu1 }
 0x204   : > { %9766 = vmatmul.mubr.msk.bf16.gmra.mxu0 %vm16454_vm1, %v4327_v17  ;;  %v2737_v5 = vpop.f32.mrf.mxu0  ;;  %v12786_v39 = vadd.f32 %v2886_v14, %v2775_v16 }
 0x205   : > { %4427 = vmatprep.mubr.bf16.mxu0 %v16491_v53  ;;  %v2783_v29 = vadd.f32 %v2737_v5, %v12687_v33  ;;  %v2888_v46 = vpop.f32.mrf.mxu1  ;;  %v4652_v5 = vld [vmem:[%s10787_s10 + $0xdb] sm:$0xff] }
 0x206   : > { %9773 = vmatmul.mubr.msk.bf16.vlgmr.msra.gmra.mxu1 %vm16454_vm1, %v4326_v50  ;;  %v2739_v37 = vpop.f32.mrf.mxu0  ;;  %v12789_v10 = vadd.f32 %v2888_v46, %v2776_v26 }
 0x207   : > { %4576 = vmatprep.mubr.bf16.mxu1 %v16491_v53  ;;  %4887 = vmatpush1.bf16.msra.mxu1 %v4867_v24  ;;  %v2784_v36 = vadd.f32 %v2739_v37, %v12690_v43  ;;  %v2890_v49 = vpop.f32.mrf.mxu1  ;;  %v4321_v43 = vld [vmem:[%s10787_s10 + $0x102] sm:$0xff] }
 0x208   : > { %9808 = vmatprep.subr.msk.bf16.mxu1 %vm373_vm0, %v5185_v35  ;;  %v2741_v23 = vpop.f32.mrf.mxu0  ;;  %v12792_v1 = vadd.f32 %v2890_v49, %v2777_v11 }
 0x209   : > { %v2785_v20 = vadd.f32 %v2741_v23, %v12693_v21  ;;  %v2894_v16 = vpop.f32.mrf.mxu1 }
 0x20a   : > { %v2745_v33 = vpop.f32.mrf.mxu0  ;;  %v12800_v50 = vadd.f32 %v2894_v16, %v2778_v58 }
 0x20b   : > { %v2786_v61 = vadd.f32 %v2745_v33, %v12703_v54  ;;  %v2896_v26 = vpop.f32.mrf.mxu1  ;;  %v4329_v54 = vpack.c.bf16 %v4322_v57, %v4321_v43 }
 0x20c   : > { %9767 = vmatmul.mubr.msk.bf16.gmra.mxu0 %vm16454_vm1, %v4328_v60  ;;  %v2747_v12 = vpop.f32.mrf.mxu0  ;;  %v12804_v48 = vadd.f32 %v2896_v26, %v2779_v19  ;;  %v4324_v19 = vld [vmem:[%s10787_s10 + $0x11a] sm:$0xff] }
 0x20d   : > { %4437 = vmatprep.mubr.bf16.mxu0 %v16491_v53  ;;  %v2787_v21 = vadd.f32 %v2747_v12, %v12709_v56  ;;  %v2898_v11 = vpop.f32.mrf.mxu1 }
 0x20e   : > { %9774 = vmatmul.mubr.msk.bf16.gmra.mxu1 %vm16454_vm1, %v4327_v17  ;;  %v2749_v6 = vpop.f32.mrf.mxu0  ;;  %v12807_v4 = vadd.f32 %v2898_v11, %v2780_v38 }
 0x20f   : > { %4586 = vmatprep.mubr.bf16.mxu1 %v16491_v53  ;;  %v2788_v18 = vadd.f32 %v2749_v6, %v12717_v7  ;;  %v2900_v9 = vpop.f32.mrf.mxu1  ;;  %v4323_v7 = vld [vmem:[%s10787_s10 + $0x112] sm:$0xff]  ;;  %v4492_v6 = vld [vmem:[%s10787_s10 + $0x122] sm:$0xff] }
 0x210   : > { %v2751_v8 = vpop.f32.mrf.mxu0  ;;  %v12810_v28 = vadd.f32 %v2900_v9, %v2781_v25 }
 0x211   : > { %v2789_v58 = vadd.f32 %v2751_v8, %v12724_v63  ;;  %v2904_v59 = vpop.f32.mrf.mxu1 }
 0x212   : > { %v2755_v22 = vpop.f32.mrf.mxu0  ;;  %v12818_v42 = vadd.f32 %v2904_v59, %v2782_v47 }
 0x213   : > { %v2790_v56 = vadd.f32 %v2755_v22, %v12731_v51  ;;  %v2906_v31 = vpop.f32.mrf.mxu1  ;;  %v4330_v51 = vpack.c.bf16 %v4324_v19, %v4323_v7 }
 0x214   : > { %9768 = vmatmul.mubr.msk.bf16.gmra.mxu0 %vm16454_vm1, %v4329_v54  ;;  %16670 = vst [vmem:[#allocation46_spill] sm:$0xff] %v12818_v42  ;;  %v2757_v17 = vpop.f32.mrf.mxu0  ;;  %v12822_v38 = vadd.f32 %v2906_v31, %v2783_v29  ;;  %v13349_v42 = vld [vmem:[%s10787_s10 + $0x125] sm:$0xff] }
 0x215   : > { %4447 = vmatprep.mubr.bf16.mxu0 %v16491_v53  ;;  %v2791_v63 = vadd.f32 %v2757_v17, %v12739_v40  ;;  %v2908_v25 = vpop.f32.mrf.mxu1  ;;  %16759 = vst [vmem:[#allocation80_spill] sm:$0xff] %v13349_v42 }
 0x216   : > { %9775 = vmatmul.mubr.msk.bf16.gmra.mxu1 %vm16454_vm1, %v4328_v60  ;;  %v2759_v0 = vpop.f32.mrf.mxu0  ;;  %v12825_v24 = vadd.f32 %v2908_v25, %v2784_v36 }
 0x217   : > { %4596 = vmatprep.mubr.bf16.mxu1 %v16491_v53  ;;  %v2792_v62 = vadd.f32 %v2759_v0, %v12742_v34  ;;  %v2910_v47 = vpop.f32.mrf.mxu1  ;;  %v4651_v34 = vld [vmem:[%s10787_s10 + $0xd3] sm:$0xff] }
 0x218   : > { %16671 = vst [vmem:[#allocation3_spill] sm:$0xff] %v12825_v24  ;;  %v2761_v35 = vpop.f32.mrf.mxu0  ;;  %v12828_v27 = vadd.f32 %v2910_v47, %v2785_v20  ;;  %v4663_v46 = vpack.c.bf16 %v4652_v5, %v4651_v34  ;;  %v4655_v0 = vld [vmem:[%s10787_s10 + $0xf3] sm:$0xff] }
 0x219   : > { %v2793_v3 = vadd.f32 %v2761_v35, %v12745_v45  ;;  %v2914_v15 = vpop.f32.mrf.mxu1  ;;  %v4820_v35 = vld [vmem:[%s10787_s10 + $0xd4] sm:$0xff] }
 0x21a   : > { %v2765_v30 = vpop.f32.mrf.mxu0  ;;  %v12836_v29 = vadd.f32 %v2914_v15, %v2786_v61 }
 0x21b   : > { %v2794_v40 = vadd.f32 %v2765_v30, %v12754_v32  ;;  %v2916_v37 = vpop.f32.mrf.mxu1  ;;  %v12845_v32 = vld.sshfl [vmem:[%s16353_s1 + $0x20] sm:$0x33 pattern:$0x76325410] }
 0x21c   : > { %9769 = vmatmul.mubr.msk.bf16.gmra.mxu0 %vm16454_vm1, %v4330_v51  ;;  %16672 = vst [vmem:[#allocation23_spill] sm:$0xff] %v12836_v29  ;;  %v2767_v14 = vpop.f32.mrf.mxu0  ;;  %v12840_v60 = vadd.f32 %v2916_v37, %v2787_v21  ;;  %v5354_v43 = vcombine.high %v12845_v32, %v12845_v32  ;;  %v4653_v21 = vld [vmem:[%s10787_s10 + $0xe3] sm:$0xff]  ;;  %v13154_v29 = vld [vmem:[%s10787_s10 + $0xed] sm:$0xff] }
 0x21d   : > { %4735 = vmatprep.mubr.bf16.mxu0 %v16491_v53  ;;  %v2795_v45 = vadd.f32 %v2767_v14, %v12758_v2  ;;  %v2918_v20 = vpop.f32.mrf.mxu1  ;;  %v5036_v2 = vsel %vm373_vm0, %v12714_v44, 0  ;;  %v4654_v44 = vld [vmem:[%s10787_s10 + $0xeb] sm:$0xff] }
 0x21e   : > { %9776 = vmatmul.mubr.msk.bf16.gmra.mxu1 %vm16454_vm1, %v4329_v54  ;;  %v2769_v36 = vpop.f32.mrf.mxu0  ;;  %v12848_v49 = vadd.f32 %v2918_v20, %v2788_v18  ;;  %v4493_v54 = vld [vmem:[%s10787_s10 + $0x12a] sm:$0xff]  ;;  %v4664_v9 = vpack.c.bf16 %v4654_v44, %v4653_v21 }
 0x21f   : > { %4606 = vmatprep.mubr.bf16.mxu1 %v16491_v53  ;;  %v2796_v23 = vadd.f32 %v2769_v36, %v12766_v52  ;;  %v2920_v16 = vpop.f32.mrf.mxu1 }
 0x220   : > { %16673 = vst [vmem:[#allocation36_spill] sm:$0xff] %v12848_v49  ;;  %v2771_v33 = vpop.f32.mrf.mxu0  ;;  %v12855_v57 = vadd.f32 %v2920_v16, %v2789_v58  ;;  %v4823_v16 = vld [vmem:[%s10787_s10 + $0xec] sm:$0xff] }
 0x221   : > { %v2797_v61 = vadd.f32 %v2771_v33, %v12773_v55  ;;  %v2924_v52 = vpop.f32.mrf.mxu1 }
 0x222   : > { %v12857_v12 = vpop.f32.mrf.mxu0  ;;  %v12863_v26 = vadd.f32 %v2924_v52, %v2790_v56  ;;  %v4499_v56 = vpack.c.bf16 %v4493_v54, %v4492_v6 }
 0x223   : > { %v2926_v18 = vpop.f32.mrf.mxu1 }
 0x224   : > { %9782 = vmatmul.mubr.msk.bf16.vlgmr.msra.gmra.mxu0 %vm16454_vm1, %v4663_v46  ;;  %16674 = vst [vmem:[#allocation39_spill] sm:$0xff] %v12863_v26  ;;  %v3055_v55 = vpop.f32.mrf.mxu0  ;;  %v12871_v8 = vadd.f32 %v2926_v18, %v2791_v63 }
 0x225   : > { %5056 = vmatpush1.bf16.msra.mxu0 %v5036_v2  ;;  %4745 = vmatprep.mubr.bf16.mxu0 %v16491_v53  ;;  %v3113_v11 = vadd.f32 %v3055_v55, %v12786_v39  ;;  %v2928_v22 = vpop.f32.mrf.mxu1 }
 0x226   : > { %9777 = vmatmul.mubr.msk.bf16.gmra.mxu1 %vm16454_vm1, %v4330_v51  ;;  %9817 = vmatprep.subr.msk.bf16.mxu0 %vm373_vm0, %v5354_v43  ;;  %v12873_v58 = vpop.f32.mrf.mxu0  ;;  %v12875_v59 = vadd.f32 %v2928_v22, %v2792_v62  ;;  %v4656_v51 = vld [vmem:[%s10787_s10 + $0xfb] sm:$0xff] }
 0x227   : > { %4616 = vmatprep.mubr.bf16.mxu1 %v16491_v53  ;;  %v2930_v19 = vpop.f32.mrf.mxu1  ;;  %v4665_v34 = vpack.c.bf16 %v4656_v51, %v4655_v0  ;;  %v4659_v51 = vld [vmem:[%s10787_s10 + $0x113] sm:$0xff] }
 0x228   : > { %16675 = vst [vmem:[#allocation4_spill] sm:$0xff] %v12875_v59  ;;  %v3059_v7 = vpop.f32.mrf.mxu0  ;;  %v12878_v39 = vadd.f32 %v2930_v19, %v2793_v3  ;;  %v16687_v19 = vld [vmem:[#allocation16_spill] sm:$0xff] }
 0x229   : > { %v3115_v17 = vadd.f32 %v3059_v7, %v12792_v1  ;;  %v2934_v63 = vpop.f32.mrf.mxu1  ;;  %v4821_v1 = vld [vmem:[%s10787_s10 + $0xdc] sm:$0xff] }
 0x22a   : > { %v12880_v31 = vpop.f32.mrf.mxu0  ;;  %v12887_v62 = vadd.f32 %v2934_v63, %v2794_v40  ;;  %v4832_v14 = vpack.c.bf16 %v4821_v1, %v4820_v35  ;;  %v12950_v63 = vadd.s32 96, %v16687_v19  ;;  %v4824_v1 = vld [vmem:[%s10787_s10 + $0xf4] sm:$0xff] }
 0x22b   : > { %v2936_v3 = vpop.f32.mrf.mxu1 }
 0x22c   : > { %9783 = vmatmul.mubr.msk.bf16.gmra.mxu0 %vm16454_vm1, %v4664_v9  ;;  %16676 = vst [vmem:[#allocation26_spill] sm:$0xff] %v12887_v62  ;;  %v3065_v25 = vpop.f32.mrf.mxu0  ;;  %v12895_v30 = vadd.f32 %v2936_v3, %v2795_v45  ;;  %v16684_v9 = vld [vmem:[#allocation14_spill] sm:$0xff]  ;;  %v4825_v3 = vld [vmem:[%s10787_s10 + $0xfc] sm:$0xff] }
 0x22d   : > { %4755 = vmatprep.mubr.bf16.mxu0 %v16491_v53  ;;  %v12893_v47 = vadd.f32 %v3065_v25, %v12804_v48  ;;  %v2938_v5 = vpop.f32.mrf.mxu1  ;;  %v5205_v48 = vsel %vm373_vm0, %v12763_v13, 0  ;;  %v4658_v13 = vld [vmem:[%s10787_s10 + $0x10b] sm:$0xff] }
 0x22e   : > { %9778 = vmatmul.mubr.msk.bf16.gmra.mxu1 %vm16454_vm1, %v4499_v56  ;;  %16677 = vst [vmem:[#allocation43_spill] sm:$0xff] %v12895_v30  ;;  %v12897_v15 = vpop.f32.mrf.mxu0  ;;  %v12899_v40 = vadd.f32 %v2938_v5, %v2796_v23  ;;  %v12914_v23 = vld [vmem:[%s16355_s3 + $0x4] sm:$0xf]  ;;  %v16688_v25 = vld [vmem:[#allocation19_spill] sm:$0xff]  ;;  %v16701_v62 = vld [vmem:[#allocation30_spill] sm:$0xff] }
 0x22f   : > { %4904 = vmatprep.mubr.bf16.mxu1 %v16491_v53  ;;  %v2940_v36 = vpop.f32.mrf.mxu1  ;;  %v12960_v35 = vadd.s32 96, %v16688_v25  ;;  %v16700_v25 = vld [vmem:[#allocation29_spill] sm:$0xff]  ;;  %v13032_v59 = vadd.s32 96, %v16701_v62 }
 0x230   : > { %16678 = vst [vmem:[#allocation50_spill] sm:$0xff] %v12899_v40  ;;  %v3069_v37 = vpop.f32.mrf.mxu0  ;;  %v12906_v45 = vadd.f32 %v2940_v36, %v2797_v61  ;;  %v4822_v61 = vld [vmem:[%s10787_s10 + $0xe4] sm:$0xff]  ;;  %v13021_v19 = vadd.s32 96, %v16700_v25 }
 0x231   : > { %v12902_v46 = vadd.f32 %v3069_v37, %v12810_v28  ;;  %v12916_v33 = vpop.f32.mrf.mxu1  ;;  %v4657_v28 = vld [vmem:[%s10787_s10 + $0x103] sm:$0xff]  ;;  %v12936_v54 = vpack.c.bf16 %v4823_v16, %v4822_v61 }
 0x232   : > { %16680 = vst [vmem:[#allocation28_spill] sm:$0xff] %v12906_v45  ;;  %v12908_v20 = vpop.f32.mrf.mxu0  ;;  %v4666_v55 = vpack.c.bf16 %v4658_v13, %v4657_v28  ;;  %v12977_v28 = vmul.u32.u64.low 3817748708, %v12950_v63  ;;  %v12978_v13 = vmul.u32.u64.high 3817748708, %v12950_v63, %v12977_v28 }
 0x233   : > { %16679 = vst [vmem:[#allocation5_spill] sm:$0xff] %v12902_v46  ;;  %16681 = vst [vmem:[#allocation45_spill] sm:$0xff] %v12908_v20  ;;  %v3224_v52 = vpop.f32.mrf.mxu1  ;;  %v13048_v62 = vmul.u32.u64.low 3817748708, %v13021_v19  ;;  %v13049_v26 = vmul.u32.u64.high 3817748708, %v13021_v19, %v13048_v62  ;;  %v16742_v46 = vld [vmem:[#allocation61_spill] sm:$0xff] }
 0x234   : > { %9784 = vmatmul.mubr.msk.bf16.gmra.mxu0 %vm16454_vm1, %v4665_v34  ;;  %v3075_v2 = vpop.f32.mrf.mxu0  ;;  %v12930_v21 = vadd.f32 %v3224_v52, %v3113_v11  ;;  %v12985_v52 = vpack.c.bf16 %v4825_v3, %v4824_v1 }
 0x235   : > { %4765 = vmatprep.mubr.bf16.mxu0 %v16491_v53  ;;  %v12926_v43 = vadd.f32 %v3075_v2, %v12822_v38  ;;  %v12934_v6 = vpop.f32.mrf.mxu1  ;;  %v12939_v38 = vadd.s32 96, %v16684_v9  ;;  %v16692_v2 = vld [vmem:[#allocation21_spill] sm:$0xff]  ;;  %v4827_v9 = vld [vmem:[%s10787_s10 + $0x10c] sm:$0xff] }
 0x236   : > { %9791 = vmatmul.mubr.msk.bf16.vlgmr.msra.gmra.mxu1 %vm16454_vm1, %v4832_v14  ;;  %v12932_v44 = vpop.f32.mrf.mxu0  ;;  %v12981_v61 = vadd.s32 96, %v16692_v2 }
 0x237   : > { %4914 = vmatprep.mubr.bf16.mxu1 %v16491_v53  ;;  %5225 = vmatpush1.bf16.msra.mxu1 %v5205_v48  ;;  %16682 = vst [vmem:[#allocation53_spill] sm:$0xff] %v12926_v43  ;;  %16683 = vst [vmem:[#allocation52_spill] sm:$0xff] %v12932_v44  ;;  %v3228_v11 = vpop.f32.mrf.mxu1  ;;  %v12966_v34 = vmul.u32.u64.low 3817748708, %v12939_v38  ;;  %v12967_v5 = vmul.u32.u64.high 3817748708, %v12939_v38, %v12966_v34  ;;  %v13126_v43 = vld [vmem:[#allocation2 + $0x26] sm:$0xff] }
 0x238   : > { %10584 = vmatprep.subr.msk.bf16.mxu1 %vm16455_vm6, %v12914_v23  ;;  %v3079_v18 = vpop.f32.mrf.mxu0  ;;  %v12944_v56 = vadd.f32 %v3228_v11, %v3115_v17  ;;  %16721 = vst [vmem:[#allocation44_spill] sm:$0xff] %v13126_v43 }
 0x239   : > { %v12942_v22 = vadd.f32 %v3079_v18, %v12828_v27  ;;  %v12952_v0 = vpop.f32.mrf.mxu1  ;;  %v4660_v27 = vld [vmem:[%s10787_s10 + $0x11b] sm:$0xff]  ;;  %v3721_v45 = vshrl.u32 %v12967_v5, 4 }
 0x23a   : > { %v12946_v7 = vpop.f32.mrf.mxu0  ;;  %v4667_v48 = vpack.c.bf16 %v4660_v27, %v4659_v51  ;;  %v16694_v18 = vld [vmem:[#allocation24_spill] sm:$0xff]  ;;  %v16695_v27 = vld [vmem:[#allocation27_spill] sm:$0xff] }
 0x23b   : > { %16685 = vst [vmem:[#allocation49_spill] sm:$0xff] %v12942_v22  ;;  %16686 = vst [vmem:[#allocation60_spill] sm:$0xff] %v12946_v7  ;;  %v12972_v37 = vpop.f32.mrf.mxu1  ;;  %v12992_v11 = vadd.s32 96, %v16694_v18  ;;  %v3732_v22 = vshrl.u32 %v12978_v13, 4 }
 0x23c   : > { %9785 = vmatmul.mubr.msk.bf16.gmra.mxu0 %vm16454_vm1, %v4666_v55  ;;  %v3085_v17 = vpop.f32.mrf.mxu0  ;;  %16690 = vst [vmem:[#allocation6_spill] sm:$0xff] %v12972_v37 }
 0x23d   : > { %4775 = vmatprep.mubr.bf16.mxu0 %v16491_v53  ;;  %v12970_v14 = vadd.f32 %v3085_v17, %v12840_v60  ;;  %v12983_v16 = vpop.f32.mrf.mxu1  ;;  %v12988_v60 = vmul.u32.u64.low 3817748708, %v12960_v35  ;;  %v12989_v55 = vmul.u32.u64.high 3817748708, %v12960_v35, %v12988_v60  ;;  %v12995_v17 = vadd.s32 96, %v16695_v27  ;;  %v4661_v27 = vld [vmem:[%s10787_s10 + $0x123] sm:$0xff] }
 0x23e   : > { %9792 = vmatmul.mubr.msk.bf16.gmra.mxu1 %vm16454_vm1, %v12936_v54  ;;  %v12974_v36 = vpop.f32.mrf.mxu0  ;;  %16693 = vst [vmem:[#allocation7_spill] sm:$0xff] %v12983_v16  ;;  %v13006_v3 = vmul.u32.u64.low 3817748708, %v12981_v61  ;;  %v13007_v60 = vmul.u32.u64.high 3817748708, %v12981_v61, %v13006_v3  ;;  %v3733_v62 = vmul.u32 18, %v3732_v22 }
 0x23f   : > { %4924 = vmatprep.mubr.bf16.mxu1 %v16491_v53  ;;  %16689 = vst [vmem:[#allocation59_spill] sm:$0xff] %v12970_v14  ;;  %16691 = vst [vmem:[#allocation31_spill] sm:$0xff] %v12974_v36  ;;  %v13000_v28 = vpop.f32.mrf.mxu1  ;;  %v4826_v3 = vld [vmem:[%s10787_s10 + $0x104] sm:$0xff]  ;;  %v13028_v40 = vmul.u32.u64.low 3817748708, %v12995_v17  ;;  %v13029_v30 = vmul.u32.u64.high 3817748708, %v12995_v17, %v13028_v40 }
 0x240   : > { %v3089_v51 = vpop.f32.mrf.mxu0  ;;  %16697 = vst [vmem:[#allocation8_spill] sm:$0xff] %v13000_v28  ;;  %v13044_v5 = vpack.c.bf16 %v4827_v9, %v4826_v3  ;;  %v3743_v40 = vshrl.u32 %v12989_v55, 4  ;;  %v16709_v55 = vld [vmem:[#allocation42_spill] sm:$0xff] }
 0x241   : > { %v12998_v34 = vadd.f32 %v3089_v51, %v12855_v57  ;;  %v13009_v18 = vpop.f32.mrf.mxu1  ;;  %v4662_v57 = vld [vmem:[%s10787_s10 + $0x12b] sm:$0xff]  ;;  %v13017_v51 = vmul.u32.u64.low 3817748708, %v12992_v11  ;;  %v13018_v2 = vmul.u32.u64.high 3817748708, %v12992_v11, %v13017_v51  ;;  %v13064_v3 = vadd.s32 96, %v16709_v55 }
 0x242   : > { %v13002_v1 = vpop.f32.mrf.mxu0  ;;  %16699 = vst [vmem:[#allocation55_spill] sm:$0xff] %v13009_v18  ;;  %v4668_v14 = vpack.c.bf16 %v4662_v57, %v4661_v27  ;;  %v16706_v27 = vld [vmem:[#allocation33_spill] sm:$0xff] }
 0x243   : > { %16696 = vst [vmem:[#allocation32_spill] sm:$0xff] %v12998_v34  ;;  %16698 = vst [vmem:[#allocation34_spill] sm:$0xff] %v13002_v1  ;;  %v13037_v51 = vpop.f32.mrf.mxu1  ;;  %v13056_v13 = vadd.s32 96, %v16706_v27  ;;  %v3754_v27 = vshrl.u32 %v13007_v60, 4  ;;  %v3765_v55 = vshrl.u32 %v13018_v2, 4 }
 0x244   : > { %9786 = vmatmul.mubr.msk.bf16.gmra.mxu0 %vm16454_vm1, %v4667_v48  ;;  %v3095_v48 = vpop.f32.mrf.mxu0  ;;  %16703 = vst [vmem:[#allocation35_spill] sm:$0xff] %v13037_v51  ;;  %v13092_v60 = vmul.u32.u64.low 3817748708, %v13064_v3  ;;  %v13093_v2 = vmul.u32.u64.high 3817748708, %v13064_v3, %v13092_v60 }
 0x245   : > { %4785 = vmatprep.mubr.bf16.mxu0 %v16491_v53  ;;  %v13035_v34 = vadd.f32 %v3095_v48, %v12871_v8  ;;  %v13042_v1 = vpop.f32.mrf.mxu1  ;;  %v3722_v48 = vmul.u32 18, %v3721_v45  ;;  %v4830_v60 = vld [vmem:[%s10787_s10 + $0x124] sm:$0xff] }
 0x246   : > { %9793 = vmatmul.mubr.msk.bf16.gmra.mxu1 %vm16454_vm1, %v12985_v52  ;;  %v13039_v25 = vpop.f32.mrf.mxu0  ;;  %16705 = vst [vmem:[#allocation62_spill] sm:$0xff] %v13042_v1 }
 0x247   : > { %4934 = vmatprep.mubr.bf16.mxu1 %v16491_v53  ;;  %16702 = vst [vmem:[#allocation9_spill] sm:$0xff] %v13035_v34  ;;  %16704 = vst [vmem:[#allocation57_spill] sm:$0xff] %v13039_v25  ;;  %v13052_v34 = vmul.u32.u64.low 3817748708, %v13032_v59  ;;  %v13053_v25 = vmul.u32.u64.high 3817748708, %v13032_v59, %v13052_v34  ;;  %v13061_v57 = vpop.f32.mrf.mxu1  ;;  %v13082_v22 = vsub.s32 %v12939_v38, %v3722_v48  ;;  %v13105_v38 = vsub.s32 %v12950_v63, %v3733_v62  ;;  %v13109_v48 = vld [vmem:[#allocation2 + $0x2e] sm:$0xff] }
 0x248   : > { %v3099_v8 = vpop.f32.mrf.mxu0  ;;  %16708 = vst [vmem:[#allocation37_spill] sm:$0xff] %v13061_v57  ;;  %v4828_v34 = vld [vmem:[%s10787_s10 + $0x114] sm:$0xff]  ;;  %v16714_v57 = vld [vmem:[#allocation54_spill] sm:$0xff]  ;;  %16717 = vst [vmem:[#allocation41_spill] sm:$0xff] %v13109_v48 }
 0x249   : > { %v13059_v9 = vadd.f32 %v3099_v8, %v12878_v39  ;;  %v13069_v45 = vpop.f32.mrf.mxu1  ;;  %v4829_v39 = vld [vmem:[%s10787_s10 + $0x11c] sm:$0xff]  ;;  %v3744_v8 = vmul.u32 18, %v3743_v40  ;;  %vm3859_vm11 = vcmp.lt.s32.totalorder %v13082_v22, 0  ;;  %v3798_v62 = vshrl.u32 %v13053_v25, 4 }
 0x24a   : > { %v13066_v1 = vpop.f32.mrf.mxu0  ;;  %16711 = vst [vmem:[#allocation63_spill] sm:$0xff] %v13069_v45  ;;  %v13100_v49 = vpack.c.bf16 %v4829_v39, %v4828_v34  ;;  %v3755_v34 = vmul.u32 18, %v3754_v27  ;;  %v3766_v39 = vmul.u32 18, %v3765_v55  ;;  %v13134_v27 = vld [vmem:[%s10787_s10 + $0xe5] sm:$0xff]  ;;  %v13151_v7 = vadd.s32 18, %v13082_v22 }
 0x24b   : > { %16707 = vst [vmem:[#allocation10_spill] sm:$0xff] %v13059_v9  ;;  %16710 = vst [vmem:[#allocation64_spill] sm:$0xff] %v13066_v1  ;;  %v13086_v1 = vmul.u32.u64.low 3817748708, %v13056_v13  ;;  %v13087_v45 = vmul.u32.u64.high 3817748708, %v13056_v13, %v13086_v1  ;;  %v13089_v40 = vpop.f32.mrf.mxu1  ;;  %v13116_v51 = vsub.s32 %v12960_v35, %v3744_v8  ;;  %vm3848_vm13 = vcmp.ne.s32.totalorder %v13105_v38, 0 }
 0x24c   : > { %9787 = vmatmul.mubr.msk.bf16.gmra.mxu0 %vm16454_vm1, %v4668_v14  ;;  %v13078_v9 = vpop.f32.mrf.mxu0  ;;  %v3776_v14 = vshrl.u32 %v13029_v30, 4  ;;  %16713 = vst [vmem:[#allocation67_spill] sm:$0xff] %v13089_v40  ;;  %v5374_v30 = vsel %vm373_vm0, %v12845_v32, 0  ;;  %v13107_v1 = vld [vmem:[#allocation2 + $0x1e] sm:$0xff]  ;;  %vm3847_vm0 = vcmp.ne.s32.totalorder %v13082_v22, 0  ;;  %vm3860_vm14 = vcmp.lt.s32.totalorder %v13105_v38, 0 }
 0x24d   : > { %5073 = vmatprep.mubr.bf16.mxu0 %v16491_v53  ;;  %16712 = vst [vmem:[#allocation68_spill] sm:$0xff] %v13078_v9  ;;  %v13096_v9 = vadd.s32 96, %v16714_v57  ;;  %16716 = vst [vmem:[#allocation11_spill] sm:$0xff] %v13107_v1  ;;  %v13111_v40 = vpop.f32.mrf.mxu1  ;;  %v4831_v57 = vld [vmem:[%s10787_s10 + $0x12c] sm:$0xff]  ;;  %vm3849_vm9 = vcmp.ne.s32.totalorder %v13116_v51, 0  ;;  %v13183_v25 = vsub.s32 %v12981_v61, %v3755_v34  ;;  %v13186_v43 = vsub.s32 %v12992_v11, %v3766_v39  ;;  %v16733_v39 = vld [vmem:[#allocation40_spill] sm:$0xff] }
 0x24e   : > { %9794 = vmatmul.mubr.msk.bf16.gmra.mxu1 %vm16454_vm1, %v13044_v5  ;;  %v13098_v36 = vpop.f32.mrf.mxu0  ;;  %16718 = vst [vmem:[#allocation73_spill] sm:$0xff] %v13111_v40  ;;  %v3777_v63 = vmul.u32 18, %v3776_v14  ;;  %v13124_v40 = vld [vmem:[#allocation2 + $0x16] sm:$0xff]  ;;  %vm13171_vm15 = vmand %vm3859_vm11, %vm3847_vm0  ;;  %vm3861_vm7 = vcmp.lt.s32.totalorder %v13116_v51, 0  ;;  %v3799_v1 = vmul.u32 18, %v3798_v62  ;;  %v16732_v34 = vld [vmem:[#allocation38_spill] sm:$0xff] }
 0x24f   : > { %4944 = vmatprep.mubr.bf16.mxu1 %v16491_v53  ;;  %16715 = vst [vmem:[#allocation66_spill] sm:$0xff] %v13098_v36  ;;  %v3787_v36 = vshrl.u32 %v13049_v26, 4  ;;  %16720 = vst [vmem:[#allocation12_spill] sm:$0xff] %v13124_v40  ;;  %v13128_v35 = vpop.f32.mrf.mxu1  ;;  %v3643_v26 = vld [vmem:[%s16354_s2] sm:$0x3]  ;;  %vm3850_vm12 = vcmp.ne.s32.totalorder %v13183_v25, 0 }
 0x250   : > { %v13119_v32 = vpop.f32.mrf.mxu0  ;;  %16722 = vst [vmem:[#allocation13_spill] sm:$0xff] %v13128_v35  ;;  %v13137_v55 = vmul.u32.u64.low 3817748708, %v13096_v9  ;;  %v13138_v8 = vmul.u32.u64.high 3817748708, %v13096_v9, %v13137_v55  ;;  %v13148_v35 = vpack.c.bf16 %v4831_v57, %v4830_v60  ;;  %v13177_v57 = vld [vmem:[%s10787_s10 + $0xf5] sm:$0xff]  ;;  %v13180_v60 = vld [vmem:[%s10787_s10 + $0xfd] sm:$0xff]  ;;  %v13194_v40 = vsub.s32 %v12995_v17, %v3777_v63  ;;  %vm13220_vm8 = vmand %vm3860_vm14, %vm3848_vm13 }
 0x251   : > { %16719 = vst [vmem:[#allocation75_spill] sm:$0xff] %v13119_v32  ;;  %v13161_v55 = vld [vmem:[%s16355_s3 + $0x8] sm:$0xf]  ;;  %v13163_v14 = vpop.f32.mrf.mxu1  ;;  %16728 = vst [vmem:[#allocation70_spill] sm:$0xff] %v13177_v57  ;;  %v13200_v11 = vrot.slane %v3643_v26, %v16732_v34  ;;  %v13205_v18 = vrot.slane %v3643_v26, %v16733_v39  ;;  %v3820_v17 = vshrl.u32 %v13093_v2, 4  ;;  %v13225_v26 = vadd.s32 18, %v13105_v38 }
 0x252   : > { %v13144_v32 = vpop.f32.mrf.mxu0  ;;  %16723 = vst [vmem:[#allocation48_spill] sm:$0xff] %v13148_v35  ;;  %16724 = vst [vmem:[#allocation15_spill] sm:$0xff] %v13161_v55  ;;  %v13228_v2 = vadd.s32 18, %v13116_v51  ;;  %vm3862_vm4 = vcmp.lt.s32.totalorder %v13183_v25, 0  ;;  %vm3851_vm3 = vcmp.ne.s32.totalorder %v13186_v43, 0  ;;  %vm3863_vm5 = vcmp.lt.s32.totalorder %v13186_v43, 0 }
 0x253   : > { %16725 = vst [vmem:[#allocation51_spill] sm:$0xff] %v13163_v14  ;;  %16729 = vst [vmem:[#allocation69_spill] sm:$0xff] %v13180_v60  ;;  %v3809_v14 = vshrl.u32 %v13087_v45, 4  ;;  %v13197_v61 = vpop.f32.mrf.mxu1  ;;  %v3895_v45 = vsel %vm13171_vm15, %v13151_v7, %v13082_v22  ;;  %v13246_v22 = vld [vmem:[%s10787_s10 + $0x105] sm:$0xff]  ;;  %vm3852_vm0 = vcmp.ne.s32.totalorder %v13194_v40, 0  ;;  %vm3864_vm11 = vcmp.lt.s32.totalorder %v13194_v40, 0 }
 0x254   : > { %9800 = vmatmul.mubr.msk.bf16.vlgmr.msra.gmra.mxu0 %vm16454_vm1, %v12936_v54  ;;  %v13188_v48 = vpop.f32.mrf.mxu0  ;;  %16730 = vst [vmem:[#allocation17_spill] sm:$0xff] %v13194_v40  ;;  %16731 = vst [vmem:[#allocation56_spill] sm:$0xff] %v13197_v61  ;;  %v13249_v54 = vld [vmem:[%s10787_s10 + $0x10d] sm:$0xff]  ;;  %v3821_v24 = vmul.u32 18, %v3820_v17  ;;  %v3831_v28 = vshrl.u32 %v13138_v8, 4 }
 0x255   : > { %5394 = vmatpush1.bf16.msra.mxu0 %v5374_v30  ;;  %v3788_v30 = vmul.u32 18, %v3787_v36  ;;  %5083 = vmatprep.mubr.bf16.mxu0 %v16491_v53  ;;  %v13232_v39 = vpop.f32.mrf.mxu1  ;;  %vm13238_vm10 = vmand %vm3861_vm7, %vm3849_vm9  ;;  %16739 = vst [vmem:[#allocation58_spill] sm:$0xff] %v13246_v22  ;;  %v3810_v61 = vmul.u32 18, %v3809_v14  ;;  %v13311_v14 = vadd.s32 18, %v13186_v43  ;;  %v16753_v22 = vmov 0 }
 0x256   : > { %9795 = vmatmul.mubr.msk.bf16.gmra.mxu1 %vm16454_vm1, %v13100_v49  ;;  %10586 = vmatprep.subr.msk.bf16.mxu0 %vm16455_vm6, %v13161_v55  ;;  %v13210_v63 = vpop.f32.mrf.mxu0  ;;  %16736 = vst [vmem:[#allocation18_spill] sm:$0xff] %v13232_v39  ;;  %16740 = vst [vmem:[#allocation20_spill] sm:$0xff] %v13249_v54  ;;  %v13259_v39 = vsub.s32 %v13032_v59, %v3799_v1  ;;  %v13300_v1 = vsel %vm16455_vm6, %v12914_v23, 0  ;;  %v13318_v23 = vld [vmem:[%s10787_s10 + $0x134] sm:$0xff]  ;;  %v13355_v57 = vsub.s32 %v13064_v3, %v3821_v24  ;;  %v13375_v3 = vld [vmem:[%s10787_s10 + $0xe6] sm:$0xff] }
 0x257   : > { %4954 = vmatprep.mubr.bf16.mxu1 %v16491_v53  ;;  %v13252_v36 = vsub.s32 %v13021_v19, %v3788_v30  ;;  %v13261_v44 = vpop.f32.mrf.mxu1  ;;  %v13266_v19 = vadd.s32 96, %v16742_v46  ;;  %vm13284_vm13 = vmand %vm3862_vm4, %vm3850_vm12  ;;  %v13314_v46 = vadd.s32 18, %v13194_v40  ;;  %16750 = vst [vmem:[#allocation74_spill] sm:$0xff] %v13318_v23  ;;  %v13336_v54 = vld [vmem:[%s10787_s10 + $0x115] sm:$0xff]  ;;  %v13352_v55 = vld [vmem:[%s10787_s10 + $0x12d] sm:$0xff]  ;;  %v3832_v60 = vmul.u32 18, %v3831_v28 }
 0x258   : > { %v13254_v34 = vpop.f32.mrf.mxu0  ;;  %16741 = vst [vmem:[#allocation65_spill] sm:$0xff] %v13261_v44  ;;  %vm13306_vm14 = vmand %vm3863_vm5, %vm3851_vm3  ;;  %vm3854_vm12 = vcmp.ne.s32.totalorder %v13259_v39, 0  ;;  %vm3866_vm4 = vcmp.lt.s32.totalorder %v13259_v39, 0  ;;  %vm13382_vm3 = vcmp.lt.s32.totalorder %v3895_v45, 16  ;;  %v13411_v23 = vld [vmem:[%s10787_s10 + $0x13d] sm:$0xff]  ;;  %v16815_v59 = vld [vmem:[#allocation35_spill] sm:$0xff] }
 0x259   : > { %16743 = vst [vmem:[#allocation22_spill] sm:$0xff] %v13266_v19  ;;  %16749 = vst [vmem:[#allocation25_spill] sm:$0xff] %v13314_v46  ;;  %vm3853_vm15 = vcmp.ne.s32.totalorder %v13252_v36, 0  ;;  %vm3865_vm7 = vcmp.lt.s32.totalorder %v13252_v36, 0  ;;  %v13358_v16 = vmul.u32.u64.low 3817748708, %v13266_v19  ;;  %v13359_v37 = vmul.u32.u64.high 3817748708, %v13266_v19, %v13358_v16 }
 0x25a   : > { %v13268_v30 = vpop.f32.mrf.mxu0  ;;  %v13293_v17 = vpop.f32.mrf.mxu1  ;;  %vm13330_vm9 = vmand %vm3864_vm11, %vm3852_vm0  ;;  %16756 = vst [vmem:[#allocation47_spill] sm:$0xff] %v13336_v54  ;;  %v13370_v24 = vadd.s32 18, %v13252_v36  ;;  %v13378_v16 = vld [vmem:[%s10787_s10 + $0xee] sm:$0xff]  ;;  %v13429_v54 = vld [vmem:[%s10787_s10 + $0xf6] sm:$0xff]  ;;  %v13441_v46 = vsub.s32 %v13096_v9, %v3832_v60  ;;  %v13480_v60 = vadd.s32 18, %v13355_v57  ;;  %v3453_v7 = vadd.f32 %v13254_v34, %v12944_v56 }
 0x25b   : > { %16746 = vst [vmem:[#allocation71_spill] sm:$0xff] %v13293_v17  ;;  %v13321_v17 = vld [vmem:[%s10787_s10 + $0x13c] sm:$0xff]  ;;  %v16754_v22 = vsel %vm13330_vm9, 4294967295, %v16753_v22  ;;  %16760 = vst [vmem:[#allocation81_spill] sm:$0xff] %v13352_v55  ;;  %v16775_v55 = vsel %vm13220_vm8, %v13225_v26, %v13105_v38  ;;  %v13512_v38 = vld [vmem:[#allocation2 + $0xe] sm:$0xff]  ;;  %v3842_v62 = vshrl.u32 %v13359_v37, 4 }
 0x25c   : > { %9801 = vmatmul.mubr.msk.bf16.gmra.mxu0 %vm16454_vm1, %v12985_v52  ;;  %v13289_v52 = vadd.s32 18, %v13183_v25  ;;  %16751 = vst [vmem:[#allocation72_spill] sm:$0xff] %v13321_v17  ;;  %v13323_v44 = vpop.f32.mrf.mxu0  ;;  %16755 = vst [vmem:[#allocation76_spill] sm:$0xff] %v16754_v22  ;;  %v13346_v20 = vpop.f32.mrf.mxu1  ;;  %v3114_v22 = vadd.f32 %v12873_v58, %v12789_v10  ;;  %v13460_v9 = vld [vmem:[%s16355_s3] sm:$0xf]  ;;  %v16772_v58 = vpack.c.bf16 %v13154_v29, %v13134_v27  ;;  %vm3857_vm8 = vcmp.ne.s32.totalorder %v13441_v46, 0 }
 0x25d   : > { %5093 = vmatprep.mubr.bf16.mxu0 %v16491_v53  ;;  %16752 = vst [vmem:[#allocation77_spill] sm:$0xff] %v13323_v44  ;;  %v13344_v44 = vsub.s32 %v13056_v13, %v3810_v61  ;;  %16758 = vst [vmem:[#allocation79_spill] sm:$0xff] %v13346_v20  ;;  %v3112_v13 = vadd.f32 %v12857_v12, %v12781_v41  ;;  %v13408_v12 = vld [vmem:[%s10787_s10 + $0x135] sm:$0xff]  ;;  %vm3869_vm2 = vcmp.lt.s32.totalorder %v13441_v46, 0  ;;  %v3843_v34 = vmul.u32 18, %v3842_v62 }
 0x25e   : > { %9796 = vmatmul.mubr.msk.bf16.gmra.mxu1 %vm16454_vm1, %v13148_v35  ;;  %v13339_v35 = vld [vmem:[%s10787_s10 + $0x11d] sm:$0xff]  ;;  %v13363_v61 = vpop.f32.mrf.mxu0  ;;  %16761 = vst [vmem:[#allocation82_spill] sm:$0xff] %v13375_v3  ;;  %v13380_v19 = vpop.f32.mrf.mxu1  ;;  %vm13398_vm5 = vmand %vm3865_vm7, %vm3853_vm15  ;;  %vm3856_vm7 = vcmp.ne.s32.totalorder %v13355_v57, 0 }
 0x25f   : > { %5242 = vmatprep.mubr.bf16.mxu1 %v16491_v53  ;;  %16757 = vst [vmem:[#allocation78_spill] sm:$0xff] %v13339_v35  ;;  %16762 = vst [vmem:[#allocation83_spill] sm:$0xff] %v13380_v19  ;;  %v13405_v19 = vadd.s32 18, %v13259_v39  ;;  %v3281_v28 = vadd.f32 %v12916_v33, %v3112_v13  ;;  %vm3855_vm11 = vcmp.ne.s32.totalorder %v13344_v44, 0  ;;  %vm3867_vm15 = vcmp.lt.s32.totalorder %v13344_v44, 0  ;;  %v13432_v33 = vld [vmem:[%s10787_s10 + $0xfe] sm:$0xff] }
 0x260   : > { %v13414_v17 = vpop.f32.mrf.mxu0  ;;  %vm13420_vm0 = vmand %vm3866_vm4, %vm3854_vm12  ;;  %v13434_v13 = vpop.f32.mrf.mxu1  ;;  %vm3868_vm12 = vcmp.lt.s32.totalorder %v13355_v57, 0  ;;  %16770 = vst [vmem:[#allocation85_spill] sm:$0xff] %v13441_v46  ;;  %v16852_v40 = vld [vmem:[#allocation32_spill] sm:$0xff] }
 0x261   : > { %16769 = vst [vmem:[#allocation84_spill] sm:$0xff] %v13434_v13  ;;  %v3450_v45 = vadd.f32 %v13144_v32, %v3281_v28  ;;  %v13455_v13 = vadd.s32 18, %v13344_v44  ;;  %16771 = vst [vmem:[#allocation86_spill] sm:$0xff] %v13460_v9  ;;  %v3283_v28 = vadd.f32 %v12934_v6, %v3114_v22  ;;  %v13510_v6 = vld [vmem:[#allocation2 + $0x6] sm:$0xff] }
 0x262   : > { %v13446_v42 = vpop.f32.mrf.mxu0  ;;  %v3560_v10 = vpop.f32.mrf.mxu1  ;;  %vm13475_vm4 = vmand %vm3867_vm15, %vm3855_vm11  ;;  %vm13496_vm11 = vcmp.lt.s32.totalorder %v16775_v55, 16 }
 0x263   : > { %vm13506_vm15 = vmand %vm3868_vm12, %vm3856_vm7  ;;  %v3452_v26 = vadd.f32 %v13210_v63, %v3283_v28  ;;  %v16782_v63 = vsel %vm13238_vm10, %v13228_v2, %v13116_v51 }
 0x264   : > { %9802 = vmatmul.mubr.msk.bf16.gmra.mxu0 %vm16454_vm1, %v13044_v5  ;;  %v3619_v5 = vadd.f32 %v3560_v10, %v3450_v45  ;;  %v13489_v35 = vpop.f32.mrf.mxu0  ;;  %v3562_v55 = vpop.f32.mrf.mxu1  ;;  %v13533_v10 = vld [vmem:[%s10787_s10 + $0x10e] sm:$0xff]  ;;  %vm13541_vm7 = vcmp.lt.s32.totalorder %v16782_v63, 16  ;;  %vm13563_vm10 = vmand %vm3869_vm2, %vm3857_vm8  ;;  %v16786_v63 = vmov 0  ;;  %vm16791_vm2 = vcmask 64512  }
 0x265   : > { %5103 = vmatprep.mubr.bf16.mxu0 %v16491_v53  ;;  %16781 = vst [vmem:[#allocation88_spill] sm:$0xff] %v13533_v10  ;;  %v16787_v63 = vsel %vm13563_vm10, 4294967295, %v16786_v63 }
 0x266   : > { %9809 = vmatmul.mubr.msk.bf16.vlgmr.msra.gmra.mxu1 %vm16454_vm1, %v16772_v58  ;;  %v3451_v58 = vadd.f32 %v13188_v48, %v12930_v21  ;;  %v3116_v48 = vadd.f32 %v12880_v31, %v12800_v50  ;;  %v3655_v22 = vadd.f32 %v13200_v11, %v3619_v5  ;;  %v13523_v45 = vpop.f32.mrf.mxu0  ;;  %v13530_v31 = vld [vmem:[%s10787_s10 + $0x106] sm:$0xff]  ;;  %v3564_v29 = vpop.f32.mrf.mxu1  ;;  %16788 = vst [vmem:[#allocation90_spill] sm:$0xff] %v16787_v63  ;;  %v16839_v5 = vld [vmem:[#allocation59_spill] sm:$0xff] }
 0x267   : > { %5252 = vmatprep.mubr.bf16.mxu1 %v16491_v53  ;;  %10205 = vmatpush3.bf16.msra.mxu1 %v13300_v1  ;;  %16780 = vst [vmem:[#allocation87_spill] sm:$0xff] %v13530_v31  ;;  %v3621_v2 = vadd.f32 %v3564_v29, %v3452_v26  ;;  %v16792_v29 = vld [vmem:[#allocation69_spill] sm:$0xff]  ;;  %v16793_v31 = vld [vmem:[#allocation70_spill] sm:$0xff] }
 0x268   : > { %10585 = vmatprep.subr.msk.bf16.mxu1 %vm16455_vm6, %v13460_v9  ;;  %v3620_v1 = vadd.f32 %v3562_v55, %v3451_v58  ;;  %v3285_v37 = vadd.f32 %v12952_v0, %v3116_v48  ;;  %v13550_v58 = vadd.s32 18, %v13441_v46  ;;  %v3679_v48 = vmax.f32 %v3655_v22, 0.0  ;;  %v13557_v55 = vpop.f32.mrf.mxu0  ;;  %v3566_v56 = vpop.f32.mrf.mxu1  ;;  %v16804_v63 = vld [vmem:[#allocation22_spill] sm:$0xff] }
 0x269   : > { %v3118_v0 = vadd.f32 %v12897_v15, %v12807_v4  ;;  %v3622_v28 = vadd.f32 %v3566_v56, %v3453_v7  ;;  %v16789_v4 = vld [vmem:[#allocation6_spill] sm:$0xff]  ;;  %v16795_v7 = vsel %vm13284_vm13, %v13289_v52, %v13183_v25  ;;  %vm16808_vm13 = vmmov %vm16791_vm2 }
 0x26a   : > { %16785 = vst [vmem:[#allocation89_spill] sm:$0xff] %v13550_v58  ;;  %v3656_v51 = vadd.f32 %v13205_v18, %v3620_v1  ;;  %v3454_v27 = vadd.f32 %v13268_v30, %v3285_v37  ;;  %v3943_v26 = vsel %vm13382_vm3, %v3679_v48, 0.0  ;;  %v3657_v1 = vadd.f32 %v13200_v11, %v3621_v2  ;;  %v16790_v30 = vld [vmem:[#allocation7_spill] sm:$0xff]  ;;  %v16799_v56 = vld [vmem:[#allocation46_spill] sm:$0xff] }
 0x26b   : > { %v13575_v50 = vpop.f32.mrf.mxu0  ;;  %v3286_v15 = vadd.f32 %v16789_v4, %v12893_v47  ;;  %v3287_v62 = vadd.f32 %v16790_v30, %v3118_v0  ;;  %4011 = vst.msk [vmem:[#allocation2 + $0x78] sm:$0xff] %vm16791_vm2, %v3943_v26  ;;  %v16794_v48 = vpack.c.bf16 %v16792_v29, %v16793_v31  ;;  %vm13592_vm12 = vcmp.lt.s32.totalorder %v16795_v7, 16  ;;  %v16798_v47 = vld [vmem:[#allocation15_spill] sm:$0xff]  ;;  %v16800_v29 = vld [vmem:[#allocation45_spill] sm:$0xff] }
 0x26c   : > { %v3680_v22 = vmax.f32 %v3656_v51, 0.0  ;;  %9803 = vmatmul.mubr.msk.bf16.gmra.mxu0 %vm16454_vm1, %v13100_v49  ;;  %v3570_v37 = vpop.f32.mrf.mxu1  ;;  %v13599_v0 = vsel %vm16455_vm6, %v16798_v47, 0  ;;  %v3681_v8 = vmax.f32 %v3657_v1, 0.0  ;;  %v3658_v2 = vadd.f32 %v13205_v18, %v3622_v28  ;;  %v16801_v30 = vld [vmem:[#allocation5_spill] sm:$0xff]  ;;  %v16834_v58 = vld [vmem:[#allocation63_spill] sm:$0xff] }
 0x26d   : > { %5113 = vmatprep.mubr.bf16.mxu0 %v16491_v53  ;;  %v3623_v25 = vadd.f32 %v3570_v37, %v3454_v27  ;;  %v13606_v52 = vpop.f32.mrf.mxu0  ;;  %v3120_v4 = vadd.f32 %v16800_v29, %v16799_v56  ;;  %v16803_v47 = vld [vmem:[#allocation77_spill] sm:$0xff]  ;;  %v13615_v31 = vsub.s32 %v16804_v63, %v3843_v34  ;;  %v16805_v37 = vld [vmem:[#allocation3_spill] sm:$0xff]  ;;  %v16806_v56 = vld [vmem:[#allocation52_spill] sm:$0xff] }
 0x26e   : > { %9810 = vmatmul.mubr.msk.bf16.gmra.mxu1 %vm16454_vm1, %v16794_v48  ;;  %v3955_v51 = vsub.f32 %v3943_v26, %v3680_v22  ;;  %v16802_v48 = vld [vmem:[#allocation8_spill] sm:$0xff]  ;;  %v3455_v10 = vadd.f32 %v16803_v47, %v3286_v15  ;;  %v3572_v9 = vpop.f32.mrf.mxu1  ;;  %v3456_v26 = vadd.f32 %v13363_v61, %v3287_v62  ;;  %v3944_v27 = vsel %vm13496_vm11, %v3681_v8, 0.0  ;;  %v16814_v47 = vld [vmem:[#allocation53_spill] sm:$0xff] }
 0x26f   : > { %5262 = vmatprep.mubr.bf16.mxu1 %v16491_v53  ;;  %v3288_v7 = vadd.f32 %v16802_v48, %v16801_v30  ;;  %v3682_v28 = vmax.f32 %v3658_v2, 0.0  ;;  %v3659_v22 = vadd.f32 %v13200_v11, %v3623_v25  ;;  %v13621_v1 = vpop.f32.mrf.mxu0  ;;  %v3122_v29 = vadd.f32 %v16806_v56, %v16805_v37  ;;  %v16807_v30 = vld [vmem:[#allocation55_spill] sm:$0xff]  ;;  %4012 = vst.msk [vmem:[#allocation2 + $0x80] sm:$0xff] %vm16808_vm13, %v3944_v27 }
 0x270   : > { %v3289_v48 = vadd.f32 %v16807_v30, %v3120_v4  ;;  %v3624_v63 = vadd.f32 %v3572_v9, %v3455_v10  ;;  %v3574_v34 = vpop.f32.mrf.mxu1  ;;  %v16809_v61 = vsel %vm13306_vm14, %v13311_v14, %v13186_v43  ;;  %v3967_v8 = vsel %vm13382_vm3, %v3955_v51, 0.0  ;;  %v16813_v9 = vld [vmem:[#allocation60_spill] sm:$0xff]  ;;  %vm16819_vm14 = vmmov %vm16791_vm2 }
 0x271   : > { %v3457_v15 = vadd.f32 %v13414_v17, %v3288_v7  ;;  %vm13633_vm8 = vcmp.lt.s32.totalorder %v16809_v61, 16  ;;  %v3956_v2 = vsub.f32 %v3944_v27, %v3682_v28  ;;  %v3683_v25 = vmax.f32 %v3659_v22, 0.0  ;;  %v13639_v17 = vpop.f32.mrf.mxu0  ;;  %v16812_v7 = vld [vmem:[#allocation23_spill] sm:$0xff]  ;;  %v16816_v22 = vld [vmem:[#allocation48_spill] sm:$0xff] }
 0x272   : > { %v3625_v4 = vadd.f32 %v3574_v34, %v3456_v26  ;;  %v3124_v10 = vadd.f32 %v16813_v9, %v16812_v7  ;;  %v3290_v37 = vadd.f32 %v16815_v59, %v16814_v47  ;;  %v3458_v43 = vadd.f32 %v13446_v42, %v3289_v48  ;;  %v3576_v56 = vpop.f32.mrf.mxu1  ;;  %v16817_v30 = vld [vmem:[#allocation36_spill] sm:$0xff]  ;;  %v16818_v34 = vld [vmem:[#allocation31_spill] sm:$0xff]  ;;  %v16821_v7 = vld [vmem:[#allocation58_spill] sm:$0xff] }
 0x273   : > { %v3660_v14 = vadd.f32 %v13205_v18, %v3624_v63  ;;  %v3968_v41 = vsel %vm13496_vm11, %v3956_v2, 0.0  ;;  %v3945_v51 = vsel %vm13541_vm7, %v3683_v25, 0.0  ;;  %v3626_v27 = vadd.f32 %v3576_v56, %v3457_v15  ;;  %v16820_v2 = vld [vmem:[#allocation20_spill] sm:$0xff]  ;;  %v16824_v56 = vld [vmem:[#allocation25_spill] sm:$0xff] }
 0x274   : > { %v3661_v26 = vadd.f32 %v13200_v11, %v3625_v4  ;;  %v13652_v28 = vpop.f32.mrf.mxu0  ;;  %9804 = vmatmul.mubr.msk.bf16.gmra.mxu0 %vm16454_vm1, %v16816_v22  ;;  %v3126_v42 = vadd.f32 %v16818_v34, %v16817_v30  ;;  %v3980_v48 = vmul.f32 %v3967_v8, %v3967_v8  ;;  %v3981_v63 = vmul.f32 %v3968_v41, %v3968_v41  ;;  %v16829_v30 = vld [vmem:[#allocation39_spill] sm:$0xff]  ;;  %v16830_v34 = vld [vmem:[#allocation34_spill] sm:$0xff] }
 0x275   : > { %4013 = vst.msk [vmem:[#allocation2 + $0x88] sm:$0xff] %vm16819_vm14, %v3945_v51  ;;  %v3684_v3 = vmax.f32 %v3660_v14, 0.0  ;;  %v16822_v25 = vpack.c.bf16 %v16820_v2, %v16821_v7  ;;  %5123 = vmatprep.mubr.bf16.mxu0 %v16491_v53  ;;  %v3459_v15 = vadd.f32 %v13489_v35, %v3290_v37  ;;  %v3662_v9 = vadd.f32 %v13205_v18, %v3626_v27  ;;  %v16825_v14 = vld [vmem:[#allocation17_spill] sm:$0xff]  ;;  %v16831_v37 = vld [vmem:[#allocation62_spill] sm:$0xff] }
 0x276   : > { %v3580_v61 = vpop.f32.mrf.mxu1  ;;  %v3685_v4 = vmax.f32 %v3661_v26, 0.0  ;;  %v13666_v59 = vpop.f32.mrf.mxu0  ;;  %v16826_v41 = vsel %vm13330_vm9, %v16824_v56, %v16825_v14  ;;  %v13680_v35 = vadd.f32 %v16830_v34, %v16829_v30  ;;  %v3291_v26 = vadd.f32 %v16831_v37, %v3122_v29  ;;  %v16832_v14 = vld [vmem:[#allocation49_spill] sm:$0xff]  ;;  %vm16835_vm9 = vmmov %vm16791_vm2 }
 0x277   : > { %9811 = vmatmul.mubr.msk.bf16.gmra.mxu1 %vm16454_vm1, %v16822_v25  ;;  %v3627_v47 = vadd.f32 %v3580_v61, %v3458_v43  ;;  %vm13673_vm3 = vcmp.lt.s32.totalorder %v16826_v41, 16  ;;  %v3992_v43 = vadd.f32 %v3981_v63, %v3980_v48  ;;  %v3957_v27 = vsub.f32 %v3945_v51, %v3684_v3  ;;  %v16833_v41 = vld [vmem:[#allocation37_spill] sm:$0xff] }
 0x278   : > { %5272 = vmatprep.mubr.bf16.mxu1 %v16491_v53  ;;  %v3582_v61 = vpop.f32.mrf.mxu1  ;;  %v3946_v2 = vsel %vm13592_vm12, %v3685_v4, 0.0  ;;  %v3686_v7 = vmax.f32 %v3662_v9, 0.0  ;;  %v13686_v56 = vpop.f32.mrf.mxu0  ;;  %v3292_v46 = vadd.f32 %v16833_v41, %v16832_v14  ;;  %v3293_v30 = vadd.f32 %v16834_v58, %v3124_v10  ;;  %v16840_v4 = vld [vmem:[#allocation67_spill] sm:$0xff]  ;;  %v16846_v41 = vld [vmem:[#allocation78_spill] sm:$0xff] }
 0x279   : > { %v3663_v25 = vadd.f32 %v13200_v11, %v3627_v47  ;;  %v3628_v8 = vadd.f32 %v3582_v61, %v3459_v15  ;;  %v3460_v34 = vadd.f32 %v13523_v45, %v3291_v26  ;;  %v3969_v29 = vsel %vm13541_vm7, %v3957_v27, 0.0  ;;  %4014 = vst.msk [vmem:[#allocation2 + $0x90] sm:$0xff] %vm16835_vm9, %v3946_v2 }
 0x27a   : > { %v3584_v51 = vpop.f32.mrf.mxu1  ;;  %v16836_v48 = vsel %vm13398_vm5, %v13370_v24, %v13252_v36  ;;  %v3982_v3 = vmul.f32 %v3969_v29, %v3969_v29  ;;  %v3958_v15 = vsub.f32 %v3946_v2, %v3686_v7  ;;  %v13705_v10 = vpop.f32.mrf.mxu0  ;;  %v3294_v9 = vadd.f32 %v16840_v4, %v16839_v5  ;;  %v16841_v7 = vld [vmem:[#allocation72_spill] sm:$0xff]  ;;  %vm16845_vm5 = vmmov %vm16791_vm2 }
 0x27b   : > { %vm13700_vm11 = vcmp.lt.s32.totalorder %v16836_v48, 16  ;;  %v3687_v58 = vmax.f32 %v3663_v25, 0.0  ;;  %v3664_v45 = vadd.f32 %v13205_v18, %v3628_v8  ;;  %v3461_v47 = vadd.f32 %v13557_v55, %v3292_v46  ;;  %v16842_v25 = vld [vmem:[#allocation74_spill] sm:$0xff]  ;;  %v16844_v46 = vld [vmem:[#allocation73_spill] sm:$0xff] }
 0x27c   : > { %v3462_v20 = vadd.f32 %v13575_v50, %v3293_v30  ;;  %v3629_v37 = vadd.f32 %v3584_v51, %v3460_v34  ;;  %v3586_v36 = vpop.f32.mrf.mxu1  ;;  %v3993_v24 = vadd.f32 %v3992_v43, %v3982_v3  ;;  %v3970_v26 = vsel %vm13592_vm12, %v3958_v15, 0.0  ;;  %v13715_v2 = vpop.f32.mrf.mxu0  ;;  %v16847_v30 = vld [vmem:[#allocation47_spill] sm:$0xff] }
 0x27d   : > { %v3947_v27 = vsel %vm13633_vm8, %v3687_v58, 0.0  ;;  %v3688_v61 = vmax.f32 %v3664_v45, 0.0  ;;  %v16843_v8 = vpack.c.bf16 %v16841_v7, %v16842_v25  ;;  %v3295_v55 = vadd.f32 %v16844_v46, %v3126_v42  ;;  %v16853_v45 = vld [vmem:[#allocation13_spill] sm:$0xff] }
 0x27e   : > { %v3983_v50 = vmul.f32 %v3970_v26, %v3970_v26  ;;  %4015 = vst.msk [vmem:[#allocation2 + $0x98] sm:$0xff] %vm16845_vm5, %v3947_v27  ;;  %v3665_v43 = vadd.f32 %v13200_v11, %v3629_v37  ;;  %v3630_v49 = vadd.f32 %v3586_v36, %v3461_v47  ;;  %v3590_v14 = vpop.f32.mrf.mxu1  ;;  %v16848_v34 = vpack.c.bf16 %v16846_v41, %v16847_v30  ;;  %v13738_v15 = vpop.f32.mrf.mxu0  ;;  %v16854_v26 = vld [vmem:[#allocation4_spill] sm:$0xff]  ;;  %v16862_v30 = vld [vmem:[#allocation51_spill] sm:$0xff] }
 0x27f   : > { %9805 = vmatmul.mubr.msk.bf16.gmra.mxu0 %vm16454_vm1, %v16843_v8  ;;  %v16849_v29 = vsel %vm13420_vm0, %v13405_v19, %v13259_v39  ;;  %v3463_v42 = vadd.f32 %v13606_v52, %v3294_v9  ;;  %v3959_v48 = vsub.f32 %v3947_v27, %v3688_v61  ;;  %v3631_v3 = vadd.f32 %v3590_v14, %v3462_v20  ;;  %v16855_v27 = vld [vmem:[#allocation57_spill] sm:$0xff]  ;;  %vm16856_vm0 = vmmov %vm16791_vm2  ;;  %v16860_v14 = vld [vmem:[#allocation26_spill] sm:$0xff] }
 0x280   : > { %9812 = vmatmul.mubr.msk.bf16.gmra.mxu1 %vm16454_vm1, %v16848_v34  ;;  %vm13733_vm7 = vcmp.lt.s32.totalorder %v16849_v29, 16  ;;  %5411 = vmatprep.mubr.bf16.mxu0 %v16491_v53  ;;  %v13743_v58 = vadd.s32 18, %v13615_v31  ;;  %v3296_v39 = vadd.f32 %v16853_v45, %v16852_v40  ;;  %v3994_v19 = vadd.f32 %v3993_v24, %v3983_v50  ;;  %v3592_v47 = vpop.f32.mrf.mxu1  ;;  %v13752_v36 = vpop.f32.mrf.mxu0  ;;  %v16861_v41 = vld [vmem:[#allocation64_spill] sm:$0xff]  ;;  %v16863_v45 = vld [vmem:[#allocation82_spill] sm:$0xff]  ;;  %vm16886_vm14 = vmmov %vm16856_vm0 }
 0x281   : > { %5282 = vmatprep.mubr.bf16.mxu1 %v16491_v53  ;;  %v3689_v5 = vmax.f32 %v3665_v43, 0.0  ;;  %v3666_v4 = vadd.f32 %v13205_v18, %v3630_v49  ;;  %v3464_v52 = vadd.f32 %v13621_v1, %v3295_v55  ;;  %v3971_v9 = vsel %vm13633_vm8, %v3959_v48, 0.0 }
 0x282   : > { %v3667_v20 = vadd.f32 %v13200_v11, %v3631_v3  ;;  %v3632_v37 = vadd.f32 %v3592_v47, %v3463_v42  ;;  %v3130_v61 = vadd.f32 %v16855_v27, %v16854_v26  ;;  %v3984_v7 = vmul.f32 %v3971_v9, %v3971_v9  ;;  %v3594_v8 = vpop.f32.mrf.mxu1  ;;  %v13761_v50 = vpop.f32.mrf.mxu0  ;;  %v16867_v47 = vld [vmem:[#allocation18_spill] sm:$0xff]  ;;  %v16870_v26 = vld [vmem:[#allocation80_spill] sm:$0xff] }
 0x283   : > { %v3948_v24 = vsel %vm13673_vm3, %v3689_v5, 0.0  ;;  %v3690_v25 = vmax.f32 %v3666_v4, 0.0  ;;  %v3465_v46 = vadd.f32 %v13639_v17, %v3296_v39  ;;  %v3633_v55 = vadd.f32 %v3594_v8, %v3464_v52  ;;  %v16866_v5 = vld [vmem:[#allocation56_spill] sm:$0xff] }
 0x284   : > { %4016 = vst.msk [vmem:[#allocation2 + $0xa0] sm:$0xff] %vm16856_vm0, %v3948_v24  ;;  %v3691_v1 = vmax.f32 %v3667_v20, 0.0  ;;  %v3668_v62 = vadd.f32 %v13205_v18, %v3632_v37  ;;  %v16857_v43 = vsel %vm13475_vm4, %v13455_v13, %v13344_v44  ;;  %v3132_v17 = vadd.f32 %v16861_v41, %v16860_v14  ;;  %v3596_v48 = vpop.f32.mrf.mxu1  ;;  %v13779_v13 = vpop.f32.mrf.mxu0  ;;  %vm16868_vm4 = vmmov %vm16856_vm0  ;;  %v16869_v37 = vld [vmem:[#allocation81_spill] sm:$0xff] }
 0x285   : > { %vm13768_vm2 = vcmp.lt.s32.totalorder %v16857_v43, 16  ;;  %v3297_v34 = vadd.f32 %v16862_v30, %v13680_v35  ;;  %v3995_v29 = vadd.f32 %v3994_v19, %v3984_v7  ;;  %v3960_v42 = vsub.f32 %v3948_v24, %v3690_v25  ;;  %v13788_v35 = vld [vmem:[%s16355_s3 + $0x10] sm:$0xf]  ;;  %v16865_v19 = vld [vmem:[#allocation9_spill] sm:$0xff] }
 0x286   : > { %v3949_v3 = vsel %vm13700_vm11, %v3691_v1, 0.0  ;;  %v3692_v32 = vmax.f32 %v3668_v62, 0.0  ;;  %v3669_v40 = vadd.f32 %v13200_v11, %v3633_v55  ;;  %v3634_v44 = vadd.f32 %v3596_v48, %v3465_v46  ;;  %v13814_v8 = vpop.f32.mrf.mxu0 }
 0x287   : > { %v16864_v39 = vpack.c.bf16 %v13378_v16, %v16863_v45  ;;  %v3298_v4 = vadd.f32 %v16866_v5, %v16865_v19  ;;  %v3299_v52 = vadd.f32 %v16867_v47, %v3130_v61  ;;  %v3466_v9 = vadd.f32 %v13652_v28, %v3297_v34  ;;  %4017 = vst.msk [vmem:[#allocation2 + $0xa8] sm:$0xff] %vm16868_vm4, %v3949_v3  ;;  %v3600_v16 = vpop.f32.mrf.mxu1  ;;  %v16877_v34 = vld [vmem:[#allocation43_spill] sm:$0xff] }
 0x288   : > { %v3972_v20 = vsel %vm13673_vm3, %v3960_v42, 0.0  ;;  %v16871_v27 = vpack.c.bf16 %v16869_v37, %v16870_v26  ;;  %v16872_v61 = vsel %vm13506_vm15, %v13480_v60, %v13355_v57  ;;  %vm3858_vm13 = vcmp.ne.s32.totalorder %v13615_v31, 0  ;;  %v16875_v57 = vld [vmem:[#allocation10_spill] sm:$0xff]  ;;  %v16876_v60 = vld [vmem:[#allocation65_spill] sm:$0xff]  ;;  %v13828_v30 = vpop.f32.mrf.mxu0  ;;  %v16878_v42 = vld [vmem:[#allocation68_spill] sm:$0xff] }
 0x289   : > { %9818 = vmatmul.mubr.msk.bf16.vlgmr.msra.gmra.mxu0 %vm16454_vm1, %v16864_v39  ;;  %vm13807_vm12 = vcmp.lt.s32.totalorder %v16872_v61, 16  ;;  %vm3870_vm8 = vcmp.lt.s32.totalorder %v13615_v31, 0  ;;  %v3985_v22 = vmul.f32 %v3972_v20, %v3972_v20  ;;  %v3961_v7 = vsub.f32 %v3949_v3, %v3692_v32  ;;  %v3602_v62 = vpop.f32.mrf.mxu1  ;;  %vm16879_vm15 = vmmov %vm16856_vm0  ;;  %v16881_v19 = vld [vmem:[#allocation79_spill] sm:$0xff]  ;;  %v16884_v61 = vld [vmem:[#allocation66_spill] sm:$0xff] }
 0x28a   : > { %9813 = vmatmul.mubr.msk.bf16.gmra.mxu1 %vm16454_vm1, %v16871_v27  ;;  %10233 = vmatpush3.bf16.msra.mxu0 %v13599_v0  ;;  %v3693_v24 = vmax.f32 %v3669_v40, 0.0  ;;  %v3670_v25 = vadd.f32 %v13205_v18, %v3634_v44  ;;  %v3300_v21 = vadd.f32 %v16876_v60, %v16875_v57  ;;  %v3467_v0 = vadd.f32 %v13666_v59, %v3298_v4  ;;  %v13836_v39 = vpop.f32.mrf.mxu0  ;;  %v16883_v27 = vld [vmem:[#allocation50_spill] sm:$0xff]  ;;  %vm16888_vm3 = vmmov %vm16856_vm0 }
 0x28b   : > { %5292 = vmatprep.mubr.bf16.mxu1 %v16491_v53  ;;  %5421 = vmatprep.mubr.bf16.mxu0 %v16491_v53  ;;  %v3468_v46 = vadd.f32 %v13686_v56, %v3299_v52  ;;  %v3635_v1 = vadd.f32 %v3600_v16, %v3466_v9  ;;  %v3996_v55 = vadd.f32 %v3995_v29, %v3985_v22  ;;  %v3973_v43 = vsel %vm13700_vm11, %v3961_v7, 0.0  ;;  %v3604_v32 = vpop.f32.mrf.mxu1  ;;  %v16880_v29 = vld [vmem:[#allocation71_spill] sm:$0xff]  ;;  %vm13878_vm9 = vmand %vm3870_vm8, %vm3858_vm13 }
 0x28c   : > { %10588 = vmatprep.subr.msk.bf16.mxu0 %vm16455_vm6, %v13788_v35  ;;  %v3950_v14 = vsel %vm13733_vm7, %v3693_v24, 0.0  ;;  %v3694_v41 = vmax.f32 %v3670_v25, 0.0  ;;  %v3133_v59 = vadd.f32 %v16878_v42, %v16877_v34  ;;  %v3986_v48 = vmul.f32 %v3973_v43, %v3973_v43  ;;  %vm16895_vm11 = vmmov %vm16856_vm0 }
 0x28d   : > { %4018 = vst.msk [vmem:[#allocation2 + $0xb0] sm:$0xff] %vm16879_vm15, %v3950_v14  ;;  %v3671_v56 = vadd.f32 %v13200_v11, %v3635_v1  ;;  %v3636_v3 = vadd.f32 %v3602_v62, %v3467_v0  ;;  %v3301_v40 = vadd.f32 %v16880_v29, %v3132_v17  ;;  %v3469_v63 = vadd.f32 %v13705_v10, %v3300_v21  ;;  %v3606_v9 = vpop.f32.mrf.mxu1  ;;  %v13844_v10 = vpop.f32.mrf.mxu0  ;;  %v16891_v1 = vld [vmem:[#allocation83_spill] sm:$0xff]  ;;  %v16897_v29 = vld [vmem:[#allocation89_spill] sm:$0xff] }
 0x28e   : > { %v3962_v44 = vsub.f32 %v3950_v14, %v3694_v41  ;;  %v3637_v45 = vadd.f32 %v3604_v32, %v3468_v46  ;;  %v3302_v5 = vadd.f32 %v16881_v19, %v3133_v59  ;;  %v3997_v4 = vadd.f32 %v3996_v55, %v3986_v48  ;;  %v16894_v59 = vld [vmem:[#allocation84_spill] sm:$0xff] }
 0x28f   : > { %v3695_v47 = vmax.f32 %v3671_v56, 0.0  ;;  %v3672_v52 = vadd.f32 %v13205_v18, %v3636_v3  ;;  %v3470_v20 = vadd.f32 %v13715_v2, %v3301_v40  ;;  %v3638_v37 = vadd.f32 %v3606_v9, %v3469_v63  ;;  %v3610_v51 = vpop.f32.mrf.mxu1  ;;  %v13862_v21 = vpop.f32.mrf.mxu0  ;;  %v16898_v40 = vld [vmem:[#allocation85_spill] sm:$0xff] }
 0x290   : > { %v3974_v16 = vsel %vm13733_vm7, %v3962_v44, 0.0  ;;  %v3673_v17 = vadd.f32 %v13200_v11, %v3637_v45  ;;  %v16882_v26 = vpack.c.bf16 %v13432_v33, %v13429_v54  ;;  %v3134_v22 = vadd.f32 %v16884_v61, %v16883_v27  ;;  %vm16910_vm7 = vmmov %vm16856_vm0 }
 0x291   : > { %v3987_v7 = vmul.f32 %v3974_v16, %v3974_v16  ;;  %v3951_v2 = vsel %vm13768_vm2, %v3695_v47, 0.0  ;;  %v3696_v24 = vmax.f32 %v3672_v52, 0.0  ;;  %v16885_v25 = vpack.c.bf16 %v13411_v23, %v13408_v12  ;;  %v16889_v23 = vld [vmem:[#allocation28_spill] sm:$0xff]  ;;  %v16890_v12 = vld [vmem:[#allocation75_spill] sm:$0xff]  ;;  %v3612_v43 = vpop.f32.mrf.mxu1  ;;  %v16902_v16 = vld [vmem:[#allocation86_spill] sm:$0xff] }
 0x292   : > { %9819 = vmatmul.mubr.msk.bf16.gmra.mxu0 %vm16454_vm1, %v16882_v26  ;;  %v3471_v54 = vadd.f32 %v13738_v15, %v3302_v5  ;;  %4019 = vst.msk [vmem:[#allocation2 + $0xb8] sm:$0xff] %vm16886_vm14, %v3951_v2  ;;  %v3697_v33 = vmax.f32 %v3673_v17, 0.0  ;;  %v3674_v57 = vadd.f32 %v13205_v18, %v3638_v37  ;;  %v3639_v60 = vadd.f32 %v3610_v51, %v3470_v20 }
 0x293   : > { %9814 = vmatmul.mubr.msk.bf16.gmra.mxu1 %vm16454_vm1, %v16885_v25  ;;  %5431 = vmatprep.mubr.bf16.mxu0 %v16491_v53  ;;  %v16887_v0 = vpack.c.bf16 %v13512_v38, %v13510_v6  ;;  %v3135_v46 = vadd.f32 %v16890_v12, %v16889_v23  ;;  %v3303_v62 = vadd.f32 %v16891_v1, %v3134_v22  ;;  %v13882_v38 = vpop.f32.mrf.mxu0  ;;  %v3614_v45 = vpop.f32.mrf.mxu1  ;;  %v6037_v17 = vsel %vm16455_vm6, %v16902_v16, 0  ;;  %v16903_v22 = vld [vmem:[#allocation88_spill] sm:$0xff]  ;;  %v16907_v25 = vld [vmem:[#allocation11_spill] sm:$0xff] }
 0x294   : > { %v3998_v55 = vadd.f32 %v3997_v4, %v3987_v7  ;;  %v3963_v15 = vsub.f32 %v3951_v2, %v3696_v24  ;;  %v3952_v14 = vsel %vm13807_vm12, %v3697_v33, 0.0  ;;  %v3698_v41 = vmax.f32 %v3674_v57, 0.0  ;;  %v16904_v7 = vld [vmem:[#allocation87_spill] sm:$0xff]  ;;  %v5902_v6 = vld [vmem:[#allocation2 + $0x3e] sm:$0xff] }
 0x295   : > { %10206 = vmatprep.mubr.msk.bf16.mxu1 %vm16888_vm3, %v16887_v0  ;;  %v3675_v34 = vadd.f32 %v13200_v11, %v3639_v60  ;;  %v3640_v42 = vadd.f32 %v3612_v43, %v3471_v54  ;;  %v3304_v48 = vadd.f32 %v16894_v59, %v3135_v46  ;;  %v3472_v56 = vadd.f32 %v13752_v36, %v3303_v62  ;;  %v13899_v47 = vpop.f32.mrf.mxu0  ;;  %v3616_v20 = vpop.f32.mrf.mxu1  ;;  %v16908_v54 = vld [vmem:[#allocation12_spill] sm:$0xff] }
 0x296   : > { %v3975_v3 = vsel %vm13768_vm2, %v3963_v15, 0.0  ;;  %4020 = vst.msk [vmem:[#allocation2 + $0xc0] sm:$0xff] %vm16895_vm11, %v3952_v14  ;;  %v16899_v63 = vsel %vm13563_vm10, %v16897_v29, %v16898_v40  ;;  %v3964_v5 = vsub.f32 %v3952_v14, %v3698_v41  ;;  %v3906_v9 = vsel %vm13878_vm9, %v13743_v58, %v13615_v31  ;;  %v13921_v31 = vld [vmem:[%s16355_s3 + $0xc] sm:$0xf]  ;;  %vm16906_vm10 = vmmov %vm16856_vm0  ;;  %v5333_v57 = vld [vmem:[%s10787_s10 + $0x116] sm:$0xff] }
 0x297   : > { %vm13894_vm5 = vcmp.lt.s32.totalorder %v16899_v63, 16  ;;  %v3988_v19 = vmul.f32 %v3975_v3, %v3975_v3  ;;  %v3699_v4 = vmax.f32 %v3675_v34, 0.0  ;;  %v3676_v36 = vadd.f32 %v13205_v18, %v3640_v42  ;;  %v13912_v61 = vpop.f32.mrf.mxu0  ;;  %v4254_v51 = vpop.f32.mrf.mxu1  ;;  %v5334_v60 = vld [vmem:[%s10787_s10 + $0x11e] sm:$0xff]  ;;  %vm16916_vm2 = vmmov %vm16888_vm3  ;;  %v5904_v3 = vld [vmem:[#allocation2 + $0x4e] sm:$0xff] }
 0x298   : > { %v3473_v49 = vadd.f32 %v13761_v50, %v3304_v48  ;;  %v3641_v52 = vadd.f32 %v3614_v45, %v3472_v56  ;;  %v3976_v26 = vsel %vm13807_vm12, %v3964_v5, 0.0  ;;  %v16905_v2 = vpack.c.bf16 %v16903_v22, %v16904_v7  ;;  %v16914_v46 = vld [vmem:[#allocation44_spill] sm:$0xff]  ;;  %vm16917_vm4 = vmmov %vm16916_vm2 }
 0x299   : > { %v3999_v37 = vadd.f32 %v3998_v55, %v3988_v19  ;;  %v3953_v27 = vsel %vm13894_vm5, %v3699_v4, 0.0  ;;  %v3700_v50 = vmax.f32 %v3676_v36, 0.0  ;;  %v3989_v58 = vmul.f32 %v3976_v26, %v3976_v26  ;;  %v13943_v62 = vpop.f32.mrf.mxu0  ;;  %v4256_v14 = vpop.f32.mrf.mxu1  ;;  %v5903_v19 = vld [vmem:[#allocation2 + $0x46] sm:$0xff]  ;;  %vm16918_vm12 = vmmov %vm16916_vm2  ;;  %v5338_v23 = vld [vmem:[%s10787_s10 + $0x13e] sm:$0xff] }
 0x29a   : > { %9820 = vmatmul.mubr.msk.bf16.gmra.mxu0 %vm16454_vm1, %v16905_v2  ;;  %4021 = vst.msk [vmem:[#allocation2 + $0xc8] sm:$0xff] %vm16906_vm10, %v3953_v27  ;;  %v3677_v28 = vadd.f32 %v13200_v11, %v3641_v52  ;;  %v3642_v24 = vadd.f32 %v3616_v20, %v3473_v49  ;;  %v16909_v33 = vpack.c.bf16 %v16907_v25, %v16908_v54  ;;  %vm13932_vm0 = vcmp.lt.s32.totalorder %v3906_v9, 16  ;;  %v16913_v11 = vld [vmem:[#allocation41_spill] sm:$0xff]  ;;  %v5336_v9 = vld [vmem:[%s10787_s10 + $0x12e] sm:$0xff]  ;;  %vm16919_vm13 = vmmov %vm16916_vm2 }
 0x29b   : > { %5441 = vmatprep.mubr.bf16.mxu0 %v16491_v53  ;;  %v3965_v0 = vsub.f32 %v3953_v27, %v3700_v50  ;;  %v13937_v12 = vadd.f32 %v4254_v51, %v13779_v13  ;;  %v16915_v1 = vpack.c.bf16 %v16913_v11, %v16914_v46  ;;  %v4000_v55 = vadd.f32 %v3999_v37, %v3989_v58  ;;  %v13953_v34 = vpop.f32.mrf.mxu0  ;;  %v5335_v52 = vld [vmem:[%s10787_s10 + $0x126] sm:$0xff]  ;;  %v5906_v2 = vld [vmem:[#allocation2 + $0x5e] sm:$0xff]  ;;  %v5905_v51 = vld [vmem:[#allocation2 + $0x56] sm:$0xff] }
 0x29c   : > { %10207 = vmatmul.mubr.msk.bf16.vlgmr.msra.gmra.mxu1 %vm16910_vm7, %v16909_v33  ;;  %v3701_v15 = vmax.f32 %v3677_v28, 0.0  ;;  %v3678_v43 = vadd.f32 %v13205_v18, %v3642_v24  ;;  %v13951_v41 = vadd.f32 %v4256_v14, %v13814_v8  ;;  %v5342_v42 = vpack.c.bf16 %v5334_v60, %v5333_v57  ;;  %v4258_v18 = vpop.f32.mrf.mxu1  ;;  %v5901_v8 = vld [vmem:[#allocation2 + $0x36] sm:$0xff]  ;;  %v5876_v37 = vld [vmem:[#allocation2 + $0x5] sm:$0xff]  ;;  %v5877_v26 = vld [vmem:[#allocation2 + $0xd] sm:$0xff] }
 0x29d   : > { %10210 = vmatprep.mubr.msk.bf16.mxu1 %vm16916_vm2, %v16915_v1  ;;  %10219 = vmatpush3.bf16.msra.mxu1 %v6037_v17  ;;  %v3977_v13 = vsel %vm13894_vm5, %v3965_v0, 0.0  ;;  %v13959_v32 = vadd.f32 %v4258_v18, %v13828_v30  ;;  %v13961_v29 = vpop.f32.mrf.mxu0  ;;  %v5910_v45 = vpack.c.bf16 %v5902_v6, %v5901_v8  ;;  %v5911_v36 = vpack.c.bf16 %v5904_v3, %v5903_v19  ;;  %vm16920_vm8 = vmmov %vm16916_vm2  ;;  %v5878_v3 = vld [vmem:[#allocation2 + $0x15] sm:$0xff] }
 0x29e   : > { %10587 = vmatprep.subr.msk.bf16.mxu1 %vm16455_vm6, %v13921_v31  ;;  %v3990_v59 = vmul.f32 %v3977_v13, %v3977_v13  ;;  %v3954_v48 = vsel %vm13932_vm0, %v3701_v15, 0.0  ;;  %v3702_v56 = vmax.f32 %v3678_v43, 0.0  ;;  %v4260_v44 = vpop.f32.mrf.mxu1  ;;  %v5343_v7 = vpack.c.bf16 %v5336_v9, %v5335_v52  ;;  %vm16921_vm15 = vmmov %vm16916_vm2 }
 0x29f   : > { %4022 = vst.msk [vmem:[#allocation2 + $0xd0] sm:$0xff] %vm16917_vm4, %v3954_v48  ;;  %v13964_v5 = vadd.f32 %v4260_v44, %v13836_v39  ;;  %v13966_v4 = vpop.f32.mrf.mxu0  ;;  %v5888_v25 = vpack.c.bf16 %v5877_v26, %v5876_v37  ;;  %v5912_v33 = vpack.c.bf16 %v5906_v2, %v5905_v51  ;;  %vm16922_vm14 = vmmov %vm16916_vm2  ;;  %v5883_v26 = vld [vmem:[#allocation2 + $0x3d] sm:$0xff]  ;;  %v5885_v2 = vld [vmem:[#allocation2 + $0x4d] sm:$0xff] }
 0x2a0   : > { %v4001_v40 = vadd.f32 %v4000_v55, %v3990_v59  ;;  %v3966_v63 = vsub.f32 %v3954_v48, %v3702_v56  ;;  %v4264_v49 = vpop.f32.mrf.mxu1  ;;  %v6121_v55 = vld [vmem:[#allocation2 + $0xf] sm:$0xff]  ;;  %vm16923_vm3 = vmmov %vm16916_vm2 }
 0x2a1   : > { %v13976_v16 = vadd.f32 %v4264_v49, %v13844_v10  ;;  %v13979_v39 = vpop.f32.mrf.mxu0  ;;  %v5881_v59 = vld [vmem:[#allocation2 + $0x2d] sm:$0xff]  ;;  %vm16924_vm9 = vmmov %vm16916_vm2  ;;  %v5882_v51 = vld [vmem:[#allocation2 + $0x35] sm:$0xff] }
 0x2a2   : > { %9821 = vmatmul.mubr.msk.bf16.gmra.mxu0 %vm16454_vm1, %v5342_v42  ;;  %v3978_v30 = vsel %vm13932_vm0, %v3966_v63, 0.0  ;;  %v4266_v17 = vpop.f32.mrf.mxu1  ;;  %v5879_v42 = vld [vmem:[#allocation2 + $0x1d] sm:$0xff]  ;;  %v5880_v63 = vld [vmem:[#allocation2 + $0x25] sm:$0xff]  ;;  %vm16925_vm11 = vmmov %vm16916_vm2 }
 0x2a3   : > { %5451 = vmatprep.mubr.bf16.mxu0 %v16491_v53  ;;  %v3991_v20 = vmul.f32 %v3978_v30, %v3978_v30  ;;  %v13982_v50 = vadd.f32 %v4266_v17, %v13862_v21  ;;  %v13984_v22 = vpop.f32.mrf.mxu0  ;;  %v3979_v30 = vld [vmem:[%s11474_s7] sm:$0x1]  ;;  %vm16926_vm5 = vmmov %vm16916_vm2 }
 0x2a4   : > { %10211 = vmatmul.mubr.msk.bf16.gmra.mxu1 %vm16918_vm12, %v5910_v45  ;;  %v4268_v58 = vpop.f32.mrf.mxu1  ;;  %vm16927_vm10 = vmmov %vm16916_vm2 }
 0x2a5   : > { %10214 = vmatprep.mubr.msk.bf16.mxu1 %vm16919_vm13, %v5911_v36  ;;  %v4002_v27 = vadd.f32 %v4001_v40, %v3991_v20  ;;  %v13987_v28 = vadd.f32 %v4268_v58, %v13882_v38  ;;  %v13989_v24 = vpop.f32.mrf.mxu0  ;;  %v5337_v38 = vld [vmem:[%s10787_s10 + $0x136] sm:$0xff]  ;;  %v5889_v40 = vpack.c.bf16 %v5879_v42, %v5878_v3  ;;  %v6123_v20 = vld [vmem:[#allocation2 + $0x1f] sm:$0xff]  ;;  %vm16928_vm7 = vmmov %vm16916_vm2 }
 0x2a6   : > { %v4270_v54 = vpop.f32.mrf.mxu1  ;;  %v14028_v36 = vld [vmem:[%s16355_s3 + $0x14] sm:$0xf]  ;;  %v6127_v42 = vld [vmem:[#allocation2 + $0x3f] sm:$0xff]  ;;  %vm16929_vm0 = vmmov %vm16916_vm2 }
 0x2a7   : > { %v4003_v10 = vrot.slane %v4002_v27, 4  ;;  %v13992_v21 = vadd.f32 %v4270_v54, %v13899_v47  ;;  %v13994_v60 = vpop.f32.mrf.mxu0  ;;  %v6120_v47 = vld [vmem:[#allocation2 + $0x7] sm:$0xff]  ;;  %v6126_v3 = vld [vmem:[#allocation2 + $0x37] sm:$0xff]  ;;  %vm16930_vm2 = vmmov %vm16929_vm0 }
 0x2a8   : > { %v4274_v0 = vpop.f32.mrf.mxu1  ;;  %v6124_v54 = vld [vmem:[#allocation2 + $0x27] sm:$0xff]  ;;  %vm16931_vm4 = vmmov %vm16929_vm0 }
 0x2a9   : > { %v4004_v57 = vadd.f32 %v4003_v10, %v4002_v27  ;;  %v14002_v46 = vadd.f32 %v4274_v0, %v13912_v61  ;;  %v14004_v1 = vpop.f32.mrf.mxu0  ;;  %v6132_v61 = vpack.c.bf16 %v6121_v55, %v6120_v47  ;;  %v6125_v27 = vld [vmem:[#allocation2 + $0x2f] sm:$0xff]  ;;  %v5884_v0 = vld [vmem:[#allocation2 + $0x45] sm:$0xff]  ;;  %v14063_v47 = vld [vmem:[%s16355_s3 + $0x18] sm:$0xf] }
 0x2aa   : > { %9822 = vmatmul.mubr.msk.bf16.gmra.mxu0 %vm16454_vm1, %v5343_v7  ;;  %v4276_v15 = vpop.f32.mrf.mxu1  ;;  %v6122_v7 = vld [vmem:[#allocation2 + $0x17] sm:$0xff]  ;;  %vm16932_vm12 = vmmov %vm16929_vm0 }
 0x2ab   : > { %5461 = vmatprep.mubr.bf16.mxu0 %v16491_v53  ;;  %v4005_v11 = vrot.slane %v4004_v57, 2  ;;  %v14008_v14 = vadd.f32 %v4276_v15, %v13943_v62  ;;  %v14010_v13 = vpop.f32.mrf.mxu0  ;;  %v5344_v53 = vpack.c.bf16 %v5338_v23, %v5337_v38  ;;  %v6293_v62 = vsel %vm16455_vm6, %v13921_v31, 0  ;;  %vm16933_vm13 = vmmov %vm16929_vm0 }
 0x2ac   : > { %10215 = vmatmul.mubr.msk.bf16.gmra.mxu1 %vm16920_vm8, %v5912_v33  ;;  %v4278_v6 = vpop.f32.mrf.mxu1  ;;  %v6427_v38 = vsel %vm16455_vm6, %v13788_v35, 0  ;;  %vm16934_vm8 = vmmov %vm16929_vm0 }
 0x2ad   : > { %10220 = vmatprep.mubr.msk.bf16.mxu1 %vm16921_vm15, %v5888_v25  ;;  %v4006_v43 = vadd.f32 %v4005_v11, %v4004_v57  ;;  %v14013_v56 = vadd.f32 %v4278_v6, %v13953_v34  ;;  %v14015_v18 = vpop.f32.mrf.mxu0  ;;  %v5890_v34 = vpack.c.bf16 %v5881_v59, %v5880_v63  ;;  %v6133_v25 = vpack.c.bf16 %v6123_v20, %v6122_v7  ;;  %v5887_v59 = vld [vmem:[#allocation2 + $0x5d] sm:$0xff]  ;;  %v5886_v63 = vld [vmem:[#allocation2 + $0x55] sm:$0xff]  ;;  %vm16935_vm15 = vmmov %vm16929_vm0 }
 0x2ae   : > { %v4280_v8 = vpop.f32.mrf.mxu1  ;;  %v5891_v57 = vpack.c.bf16 %v5883_v26, %v5882_v51  ;;  %v6131_v26 = vld [vmem:[#allocation2 + $0x5f] sm:$0xff]  ;;  %v6130_v51 = vld [vmem:[#allocation2 + $0x57] sm:$0xff] }
 0x2af   : > { %v4007_v48 = vrot.slane %v4006_v43, 1  ;;  %v14020_v45 = vadd.f32 %v4280_v8, %v13961_v29  ;;  %v14022_v19 = vpop.f32.mrf.mxu0 }
 0x2b0   : > { %v4284_v49 = vpop.f32.mrf.mxu1 }
 0x2b1   : > { %v4008_v44 = vadd.f32 %v4007_v48, %v4006_v43  ;;  %v14034_v29 = vadd.f32 %v4284_v49, %v13966_v4  ;;  %v14037_v52 = vpop.f32.mrf.mxu0 }
 0x2b2   : > { %9823 = vmatmul.mubr.msk.bf16.gmra.mxu0 %vm16454_vm1, %v5344_v53  ;;  %v4286_v9 = vpop.f32.mrf.mxu1 }
 0x2b3   : > { %10234 = vmatprep.mubr.msk.bf16.mxu0 %vm16923_vm3, %v6132_v61  ;;  %v4009_v31 = vadd.f32 %v4008_v44, %v3979_v30  ;;  %v14043_v17 = vadd.f32 %v4286_v9, %v13979_v39  ;;  %v14045_v37 = vpop.f32.mrf.mxu0  ;;  %v14052_v39 = vpack.c.bf16 %v6125_v27, %v6124_v54  ;;  %v6129_v61 = vld [vmem:[#allocation2 + $0x4f] sm:$0xff]  ;;  %v5893_v30 = vpack.c.bf16 %v5887_v59, %v5886_v63  ;;  %vm16937_vm3 = vmmov %vm16929_vm0 }
 0x2b4   : > { %10221 = vmatmul.mubr.msk.bf16.vlgmr.msra.gmra.mxu1 %vm16922_vm14, %v5889_v40  ;;  %v4288_v4 = vpop.f32.mrf.mxu1  ;;  %vm16936_vm14 = vmmov %vm16929_vm0 }
 0x2b5   : > { %10224 = vmatprep.mubr.msk.bf16.mxu1 %vm16924_vm9, %v5890_v34  ;;  %10247 = vmatpush3.bf16.msra.mxu1 %v6293_v62  ;;  %4010 = vst [vmem:[%s11474_s7] sm:$0x1] %v4009_v31  ;;  %v14048_v58 = vadd.f32 %v4288_v4, %v13984_v22  ;;  %v14050_v10 = vpop.f32.mrf.mxu0  ;;  %v5892_v22 = vpack.c.bf16 %v5885_v2, %v5884_v0  ;;  %v6128_v62 = vld [vmem:[#allocation2 + $0x47] sm:$0xff]  ;;  %vm16938_vm9 = vmmov %vm16929_vm0 }
 0x2b6   : > { %10589 = vmatprep.subr.msk.bf16.mxu1 %vm16455_vm6, %v14028_v36  ;;  %v4290_v33 = vpop.f32.mrf.mxu1 }
 0x2b7   : > { %v14057_v23 = vadd.f32 %v4290_v33, %v13989_v24  ;;  %v4399_v11 = vpop.f32.mrf.mxu0  ;;  %v6388_v33 = vld [vmem:[#allocation2 + $0x18] sm:$0xff] }
 0x2b8   : > { %v4294_v55 = vpop.f32.mrf.mxu1  ;;  %v4458_v15 = vadd.f32 %v4399_v11, %v13937_v12 }
 0x2b9   : > { %v14070_v35 = vadd.f32 %v4294_v55, %v13994_v60  ;;  %v4401_v24 = vpop.f32.mrf.mxu0 }
 0x2ba   : > { %10235 = vmatmul.mubr.msk.bf16.vlgmr.msra.gmra.mxu0 %vm16925_vm11, %v6133_v25  ;;  %v4296_v43 = vpop.f32.mrf.mxu1  ;;  %v4459_v53 = vadd.f32 %v4401_v24, %v13951_v41  ;;  %v6135_v41 = vpack.c.bf16 %v6127_v42, %v6126_v3  ;;  %v6391_v24 = vld [vmem:[#allocation2 + $0x30] sm:$0xff]  ;;  %vm16939_vm11 = vmmov %vm16929_vm0 }
 0x2bb   : > { %10238 = vmatprep.mubr.msk.bf16.mxu0 %vm16927_vm10, %v14052_v39  ;;  %10261 = vmatpush3.bf16.msra.mxu0 %v6427_v38  ;;  %v14077_v12 = vadd.f32 %v4296_v43, %v14004_v1  ;;  %v4403_v6 = vpop.f32.mrf.mxu0  ;;  %v14084_v1 = vpack.c.bf16 %v6129_v61, %v6128_v62  ;;  %vm16941_vm10 = vmmov %vm16929_vm0 }
 0x2bc   : > { %10225 = vmatmul.mubr.msk.bf16.gmra.mxu1 %vm16926_vm5, %v5891_v57  ;;  %10590 = vmatprep.subr.msk.bf16.mxu0 %vm16455_vm6, %v14063_v47  ;;  %v4298_v48 = vpop.f32.mrf.mxu1  ;;  %v4460_v60 = vadd.f32 %v4403_v6, %v13959_v32  ;;  %v6390_v6 = vld [vmem:[#allocation2 + $0x28] sm:$0xff]  ;;  %vm16940_vm5 = vmmov %vm16929_vm0 }
 0x2bd   : > { %10228 = vmatprep.mubr.msk.bf16.mxu1 %vm16928_vm7, %v5892_v22  ;;  %v14081_v8 = vadd.f32 %v4298_v48, %v14010_v13  ;;  %v4405_v40 = vpop.f32.mrf.mxu0  ;;  %v6401_v48 = vpack.c.bf16 %v6391_v24, %v6390_v6  ;;  %vm16942_vm7 = vmmov %vm16929_vm0  ;;  %v6399_v24 = vld [vmem:[#allocation2 + $0x70] sm:$0xff] }
 0x2be   : > { %v4300_v44 = vpop.f32.mrf.mxu1  ;;  %v4461_v34 = vadd.f32 %v4405_v40, %v13964_v5 }
 0x2bf   : > { %v14087_v49 = vadd.f32 %v4300_v44, %v14015_v18  ;;  %v4409_v31 = vpop.f32.mrf.mxu0 }
 0x2c0   : > { %v4304_v32 = vpop.f32.mrf.mxu1  ;;  %v4462_v13 = vadd.f32 %v4409_v31, %v13976_v16  ;;  %v6389_v16 = vld [vmem:[#allocation2 + $0x20] sm:$0xff]  ;;  %v6395_v31 = vld [vmem:[#allocation2 + $0x50] sm:$0xff] }
 0x2c1   : > { %v14095_v9 = vadd.f32 %v4304_v32, %v14022_v19  ;;  %v4411_v5 = vpop.f32.mrf.mxu0  ;;  %v6400_v0 = vpack.c.bf16 %v6389_v16, %v6388_v33 }
 0x2c2   : > { %10239 = vmatmul.mubr.msk.bf16.gmra.mxu0 %vm16929_vm0, %v6135_v41  ;;  %v4306_v20 = vpop.f32.mrf.mxu1  ;;  %v4463_v18 = vadd.f32 %v4411_v5, %v13982_v50  ;;  %v6397_v5 = vld [vmem:[#allocation2 + $0x60] sm:$0xff] }
 0x2c3   : > { %10242 = vmatprep.mubr.msk.bf16.mxu0 %vm16931_vm4, %v14084_v1  ;;  %v14100_v27 = vadd.f32 %v4306_v20, %v14037_v52  ;;  %v4413_v4 = vpop.f32.mrf.mxu0  ;;  %v6561_v52 = vsel %vm16455_vm6, %v14028_v36, 0  ;;  %vm16944_vm4 = vmmov %vm16929_vm0 }
 0x2c4   : > { %10229 = vmatmul.mubr.msk.bf16.gmra.mxu1 %vm16930_vm2, %v5893_v30  ;;  %v4308_v7 = vpop.f32.mrf.mxu1  ;;  %v14103_v2 = vadd.f32 %v4413_v4, %v13987_v28  ;;  %v6523_v4 = vld [vmem:[#allocation2 + $0x21] sm:$0xff]  ;;  %vm16943_vm2 = vmmov %vm16929_vm0 }
 0x2c5   : > { %10248 = vmatprep.mubr.msk.bf16.mxu1 %vm16932_vm12, %v6133_v25  ;;  %v14106_v19 = vadd.f32 %v4308_v7, %v14045_v37  ;;  %v4415_v54 = vpop.f32.mrf.mxu0  ;;  %v6137_v25 = vpack.c.bf16 %v6131_v26, %v6130_v51  ;;  %v14120_v37 = vld [vmem:[%s16355_s3 + $0x1c] sm:$0xf]  ;;  %v6394_v26 = vld [vmem:[#allocation2 + $0x48] sm:$0xff]  ;;  %vm16945_vm12 = vmmov %vm16929_vm0 }
 0x2c6   : > { %v4310_v57 = vpop.f32.mrf.mxu1  ;;  %v14109_v50 = vadd.f32 %v4415_v54, %v13992_v21  ;;  %v6264_v7 = vld [vmem:[#allocation2 + $0x67] sm:$0xff]  ;;  %v6403_v51 = vpack.c.bf16 %v6395_v31, %v6394_v26  ;;  %v6396_v54 = vld [vmem:[#allocation2 + $0x58] sm:$0xff] }
 0x2c7   : > { %v14114_v38 = vadd.f32 %v4310_v57, %v14050_v10  ;;  %v4419_v28 = vpop.f32.mrf.mxu0  ;;  %v6404_v57 = vpack.c.bf16 %v6397_v5, %v6396_v54 }
 0x2c8   : > { %v14123_v11 = vadd.f32 %v4419_v28, %v14002_v46  ;;  %v4568_v21 = vpop.f32.mrf.mxu1 }
 0x2c9   : > { %v14128_v36 = vadd.f32 %v4568_v21, %v4458_v15  ;;  %v4421_v10 = vpop.f32.mrf.mxu0 }
 0x2ca   : > { %10243 = vmatmul.mubr.msk.bf16.gmra.mxu0 %vm16933_vm13, %v6137_v25  ;;  %v14132_v22 = vadd.f32 %v4421_v10, %v14008_v14  ;;  %v4570_v55 = vpop.f32.mrf.mxu1  ;;  %v6392_v14 = vld [vmem:[#allocation2 + $0x38] sm:$0xff]  ;;  %vm16946_vm13 = vmmov %vm16929_vm0 }
 0x2cb   : > { %10262 = vmatprep.mubr.msk.bf16.mxu0 %vm16935_vm15, %v6400_v0  ;;  %v14136_v46 = vadd.f32 %v4570_v55, %v4459_v53  ;;  %v4423_v43 = vpop.f32.mrf.mxu0  ;;  %v6695_v53 = vsel %vm16455_vm6, %v14063_v47, 0  ;;  %v6522_v0 = vld [vmem:[#allocation2 + $0x19] sm:$0xff]  ;;  %vm16948_vm15 = vmmov %vm16929_vm0 }
 0x2cc   : > { %10249 = vmatmul.mubr.msk.bf16.vlgmr.msra.gmra.mxu1 %vm16934_vm8, %v14052_v39  ;;  %v6393_v39 = vld [vmem:[#allocation2 + $0x40] sm:$0xff]  ;;  %v14139_v42 = vadd.f32 %v4423_v43, %v14013_v56  ;;  %v4572_v15 = vpop.f32.mrf.mxu1  ;;  %vm16947_vm8 = vmmov %vm16929_vm0 }
 0x2cd   : > { %10252 = vmatprep.mubr.msk.bf16.mxu1 %vm16936_vm14, %v6135_v41  ;;  %10275 = vmatpush3.bf16.msra.mxu1 %v6561_v52  ;;  %v14141_v59 = vadd.f32 %v4572_v15, %v4460_v60  ;;  %v4425_v61 = vpop.f32.mrf.mxu0  ;;  %v6402_v63 = vpack.c.bf16 %v6393_v39, %v6392_v14  ;;  %v14154_v56 = vld [vmem:[%s16355_s3 + $0x20] sm:$0xf]  ;;  %v6525_v39 = vld [vmem:[#allocation2 + $0x31] sm:$0xff]  ;;  %vm16949_vm14 = vmmov %vm16929_vm0 }
 0x2ce   : > { %10591 = vmatprep.subr.msk.bf16.mxu1 %vm16455_vm6, %v14120_v37  ;;  %v14144_v3 = vadd.f32 %v4425_v61, %v14020_v45  ;;  %v4574_v40 = vpop.f32.mrf.mxu1  ;;  %v6398_v61 = vld [vmem:[#allocation2 + $0x68] sm:$0xff] }
 0x2cf   : > { %v14148_v41 = vadd.f32 %v4574_v40, %v4461_v34  ;;  %v4429_v62 = vpop.f32.mrf.mxu0  ;;  %v6405_v40 = vpack.c.bf16 %v6399_v24, %v6398_v61  ;;  %v6533_v24 = vld [vmem:[#allocation2 + $0x71] sm:$0xff] }
 0x2d0   : > { %v14157_v60 = vadd.f32 %v4429_v62, %v14034_v29  ;;  %v4578_v45 = vpop.f32.mrf.mxu1  ;;  %v6526_v62 = vld [vmem:[#allocation2 + $0x39] sm:$0xff] }
 0x2d1   : > { %v14162_v47 = vadd.f32 %v4578_v45, %v4462_v13  ;;  %v4431_v44 = vpop.f32.mrf.mxu0  ;;  %v6829_v45 = vsel %vm16455_vm6, %v14120_v37, 0 }
 0x2d2   : > { %10263 = vmatmul.mubr.msk.bf16.vlgmr.msra.gmra.mxu0 %vm16937_vm3, %v6401_v48  ;;  %v14166_v34 = vadd.f32 %v4431_v44, %v14043_v17  ;;  %v4580_v30 = vpop.f32.mrf.mxu1  ;;  %vm16950_vm3 = vmmov %vm16929_vm0 }
 0x2d3   : > { %10266 = vmatprep.mubr.msk.bf16.mxu0 %vm16939_vm11, %v6402_v63  ;;  %10289 = vmatpush3.bf16.msra.mxu0 %v6695_v53  ;;  %v14170_v29 = vadd.f32 %v4580_v30, %v4463_v18  ;;  %v4433_v32 = vpop.f32.mrf.mxu0  ;;  %v14221_v30 = vld [vmem:[%s16355_s3 + $0x4] sm:$0xf]  ;;  %vm16952_vm11 = vmmov %vm16929_vm0 }
 0x2d4   : > { %10253 = vmatmul.mubr.msk.bf16.gmra.mxu1 %vm16938_vm9, %v14084_v1  ;;  %10592 = vmatprep.subr.msk.bf16.mxu0 %vm16455_vm6, %v14154_v56  ;;  %v6265_v1 = vld [vmem:[#allocation2 + $0x6f] sm:$0xff]  ;;  %v14173_v13 = vadd.f32 %v4433_v32, %v14048_v58  ;;  %v4582_v20 = vpop.f32.mrf.mxu1  ;;  %vm16951_vm9 = vmmov %vm16929_vm0 }
 0x2d5   : > { %10256 = vmatprep.mubr.msk.bf16.mxu1 %vm16940_vm5, %v6137_v25  ;;  %v14176_v16 = vadd.f32 %v4582_v20, %v14103_v2  ;;  %v4435_v17 = vpop.f32.mrf.mxu0  ;;  %v14181_v33 = vpack.c.bf16 %v6265_v1, %v6264_v7  ;;  %v6534_v2 = vpack.c.bf16 %v6523_v4, %v6522_v0  ;;  %v6529_v20 = vld [vmem:[#allocation2 + $0x51] sm:$0xff]  ;;  %vm16953_vm5 = vmmov %vm16929_vm0 }
 0x2d6   : > { %v14179_v25 = vadd.f32 %v4435_v17, %v14057_v23  ;;  %v4584_v18 = vpop.f32.mrf.mxu1 }
 0x2d7   : > { %v14184_v58 = vadd.f32 %v4584_v18, %v14109_v50  ;;  %v4439_v52 = vpop.f32.mrf.mxu0 }
 0x2d8   : > { %v14188_v28 = vadd.f32 %v4439_v52, %v14070_v35  ;;  %v4588_v21 = vpop.f32.mrf.mxu1 }
 0x2d9   : > { %v14194_v23 = vadd.f32 %v4588_v21, %v14123_v11  ;;  %v4441_v50 = vpop.f32.mrf.mxu0  ;;  %v6527_v11 = vld [vmem:[#allocation2 + $0x41] sm:$0xff] }
 0x2da   : > { %10267 = vmatmul.mubr.msk.bf16.gmra.mxu0 %vm16941_vm10, %v6403_v51  ;;  %v14198_v10 = vadd.f32 %v4441_v50, %v14077_v12  ;;  %v4590_v55 = vpop.f32.mrf.mxu1  ;;  %v6524_v12 = vld [vmem:[#allocation2 + $0x29] sm:$0xff]  ;;  %vm16954_vm10 = vmmov %vm16929_vm0 }
 0x2db   : > { %10270 = vmatprep.mubr.msk.bf16.mxu0 %vm16929_vm0, %v6404_v57  ;;  %v14201_v35 = vadd.f32 %v4590_v55, %v14132_v22  ;;  %v4443_v43 = vpop.f32.mrf.mxu0  ;;  %v6535_v22 = vpack.c.bf16 %v6525_v39, %v6524_v12  ;;  %v6528_v51 = vld [vmem:[#allocation2 + $0x49] sm:$0xff]  ;;  %v6530_v57 = vld [vmem:[#allocation2 + $0x59] sm:$0xff] }
 0x2dc   : > { %10257 = vmatmul.mubr.msk.bf16.gmra.mxu1 %vm16942_vm7, %v14181_v33  ;;  %v14204_v15 = vadd.f32 %v4443_v43, %v14081_v8  ;;  %v4592_v6 = vpop.f32.mrf.mxu1  ;;  %v6537_v18 = vpack.c.bf16 %v6529_v20, %v6528_v51  ;;  %v6791_v39 = vld [vmem:[#allocation2 + $0x32] sm:$0xff]  ;;  %v6790_v12 = vld [vmem:[#allocation2 + $0x2a] sm:$0xff]  ;;  %vm16955_vm7 = vmmov %vm16929_vm0 }
 0x2dd   : > { %10276 = vmatprep.mubr.msk.bf16.mxu1 %vm16943_vm2, %v6534_v2  ;;  %v14207_v48 = vadd.f32 %v4592_v6, %v14139_v42  ;;  %v4445_v14 = vpop.f32.mrf.mxu0  ;;  %v6536_v42 = vpack.c.bf16 %v6527_v11, %v6526_v62  ;;  %v6532_v11 = vld [vmem:[#allocation2 + $0x69] sm:$0xff]  ;;  %v6666_v20 = vld [vmem:[#allocation2 + $0x79] sm:$0xff]  ;;  %vm16956_vm2 = vmmov %vm16929_vm0 }
 0x2de   : > { %v14210_v63 = vadd.f32 %v4445_v14, %v14087_v49  ;;  %v4594_v53 = vpop.f32.mrf.mxu1  ;;  %v6792_v51 = vld [vmem:[#allocation2 + $0x3a] sm:$0xff] }
 0x2df   : > { %v14215_v8 = vadd.f32 %v4594_v53, %v14144_v3  ;;  %v4449_v44 = vpop.f32.mrf.mxu0 }
 0x2e0   : > { %v4478_v49 = vadd.f32 %v4449_v44, %v14095_v9  ;;  %v4598_v31 = vpop.f32.mrf.mxu1  ;;  %v6667_v44 = vld [vmem:[#allocation2 + $0x81] sm:$0xff] }
 0x2e1   : > { %v14227_v37 = vadd.f32 %v4598_v31, %v14157_v60  ;;  %v4451_v3 = vpop.f32.mrf.mxu0  ;;  %v6531_v60 = vld [vmem:[#allocation2 + $0x61] sm:$0xff] }
 0x2e2   : > { %10271 = vmatmul.mubr.msk.bf16.gmra.mxu0 %vm16944_vm4, %v6405_v40  ;;  %v4479_v32 = vadd.f32 %v4451_v3, %v14100_v27  ;;  %v4600_v1 = vpop.f32.mrf.mxu1  ;;  %v6538_v52 = vpack.c.bf16 %v6531_v60, %v6530_v57  ;;  %v6539_v40 = vpack.c.bf16 %v6533_v24, %v6532_v11  ;;  %v6793_v3 = vld [vmem:[#allocation2 + $0x42] sm:$0xff]  ;;  %v6794_v57 = vld [vmem:[#allocation2 + $0x4a] sm:$0xff]  ;;  %vm16957_vm4 = vmmov %vm16929_vm0 }
 0x2e3   : > { %10290 = vmatprep.mubr.msk.bf16.mxu0 %vm16946_vm13, %v6535_v22  ;;  %v14234_v9 = vadd.f32 %v4600_v1, %v14166_v34  ;;  %v4453_v5 = vpop.f32.mrf.mxu0  ;;  %v6963_v34 = vsel %vm16455_vm6, %v14154_v56, 0  ;;  %v6927_v24 = vld [vmem:[#allocation2 + $0x43] sm:$0xff]  ;;  %vm16959_vm13 = vmmov %vm16929_vm0 }
 0x2e4   : > { %10277 = vmatmul.mubr.msk.bf16.vlgmr.msra.gmra.mxu1 %vm16945_vm12, %v6535_v22  ;;  %v4480_v26 = vadd.f32 %v4453_v5, %v14106_v19  ;;  %v4602_v4 = vpop.f32.mrf.mxu1  ;;  %vm16958_vm12 = vmmov %vm16929_vm0 }
 0x2e5   : > { %10280 = vmatprep.mubr.msk.bf16.mxu1 %vm16947_vm8, %v6536_v42  ;;  %10303 = vmatpush3.bf16.msra.mxu1 %v6829_v45  ;;  %v14238_v17 = vadd.f32 %v4602_v4, %v14173_v13  ;;  %v4455_v7 = vpop.f32.mrf.mxu0  ;;  %v14252_v13 = vld [vmem:[%s16355_s3] sm:$0xf]  ;;  %vm16960_vm8 = vmmov %vm16929_vm0 }
 0x2e6   : > { %10593 = vmatprep.subr.msk.bf16.mxu1 %vm16455_vm6, %v14221_v30  ;;  %v14241_v27 = vadd.f32 %v4455_v7, %v14114_v38  ;;  %v4604_v54 = vpop.f32.mrf.mxu1  ;;  %v14302_v7 = vpack.c.bf16 %v6667_v44, %v6666_v20  ;;  %v6798_v44 = vld [vmem:[#allocation2 + $0x6a] sm:$0xff] }
 0x2e7   : > { %v14246_v0 = vadd.f32 %v4604_v54, %v14179_v25  ;;  %v4737_v19 = vpop.f32.mrf.mxu0 }
 0x2e8   : > { %v4608_v38 = vpop.f32.mrf.mxu1  ;;  %v14255_v2 = vadd.f32 %v4737_v19, %v14128_v36 }
 0x2e9   : > { %v14260_v56 = vadd.f32 %v4608_v38, %v14188_v28  ;;  %v4739_v25 = vpop.f32.mrf.mxu0  ;;  %v14317_v38 = vld [vmem:[%s16355_s3 + $0x8] sm:$0xf] }
 0x2ea   : > { %10291 = vmatmul.mubr.msk.bf16.vlgmr.msra.gmra.mxu0 %vm16948_vm15, %v6536_v42  ;;  %v4610_v21 = vpop.f32.mrf.mxu1  ;;  %v14264_v50 = vadd.f32 %v4739_v25, %v14136_v46  ;;  %vm16961_vm15 = vmmov %vm16929_vm0 }
 0x2eb   : > { %10294 = vmatprep.mubr.msk.bf16.mxu0 %vm16950_vm3, %v6537_v18  ;;  %10317 = vmatpush3.bf16.msra.mxu0 %v6963_v34  ;;  %v14269_v36 = vadd.f32 %v4610_v21, %v14198_v10  ;;  %v4741_v55 = vpop.f32.mrf.mxu0  ;;  %vm16966_vm3 = vmmov %vm16929_vm0 }
 0x2ec   : > { %10281 = vmatmul.mubr.msk.bf16.gmra.mxu1 %vm16949_vm14, %v6537_v18  ;;  %10594 = vmatprep.subr.msk.bf16.mxu0 %vm16455_vm6, %v14252_v13  ;;  %v4612_v43 = vpop.f32.mrf.mxu1  ;;  %v14272_v28 = vadd.f32 %v4741_v55, %v14141_v59  ;;  %v6802_v59 = vpack.c.bf16 %v6791_v39, %v6790_v12  ;;  %v6803_v18 = vpack.c.bf16 %v6793_v3, %v6792_v51  ;;  %v6797_v39 = vld [vmem:[#allocation2 + $0x62] sm:$0xff]  ;;  %vm16962_vm14 = vmmov %vm16929_vm0 }
 0x2ed   : > { %10284 = vmatprep.mubr.msk.bf16.mxu1 %vm16951_vm9, %v6538_v52  ;;  %v14275_v6 = vadd.f32 %v4612_v43, %v14204_v15  ;;  %v4743_v61 = vpop.f32.mrf.mxu0  ;;  %v6931_v51 = vld [vmem:[#allocation2 + $0x63] sm:$0xff]  ;;  %vm16967_vm9 = vmmov %vm16929_vm0 }
 0x2ee   : > { %v4614_v46 = vpop.f32.mrf.mxu1  ;;  %v14278_v14 = vadd.f32 %v4743_v61, %v14148_v41  ;;  %v6929_v61 = vld [vmem:[#allocation2 + $0x53] sm:$0xff] }
 0x2ef   : > { %v14281_v10 = vadd.f32 %v4614_v46, %v14210_v63  ;;  %v4747_v53 = vpop.f32.mrf.mxu0  ;;  %v6926_v46 = vld [vmem:[#allocation2 + $0x3b] sm:$0xff] }
 0x2f0   : > { %v4618_v22 = vpop.f32.mrf.mxu1  ;;  %v14285_v62 = vadd.f32 %v4747_v53, %v14162_v47  ;;  %v6925_v47 = vld [vmem:[#allocation2 + $0x33] sm:$0xff] }
 0x2f1   : > { %v14289_v15 = vadd.f32 %v4618_v22, %v4478_v49  ;;  %v4749_v41 = vpop.f32.mrf.mxu0  ;;  %v6795_v49 = vld [vmem:[#allocation2 + $0x52] sm:$0xff]  ;;  %v6796_v53 = vld [vmem:[#allocation2 + $0x5a] sm:$0xff] }
 0x2f2   : > { %10295 = vmatmul.mubr.msk.bf16.gmra.mxu0 %vm16952_vm11, %v6538_v52  ;;  %v4620_v45 = vpop.f32.mrf.mxu1  ;;  %v14293_v63 = vadd.f32 %v4749_v41, %v14170_v29  ;;  %v6924_v29 = vld [vmem:[#allocation2 + $0x2b] sm:$0xff]  ;;  %v6804_v52 = vpack.c.bf16 %v6795_v49, %v6794_v57  ;;  %vm16968_vm11 = vmmov %vm16929_vm0 }
 0x2f3   : > { %10298 = vmatprep.mubr.msk.bf16.mxu0 %vm16954_vm10, %v6539_v40  ;;  %v14295_v42 = vadd.f32 %v4620_v45, %v4479_v32  ;;  %v4751_v31 = vpop.f32.mrf.mxu0  ;;  %v6936_v34 = vpack.c.bf16 %v6925_v47, %v6924_v29  ;;  %v6928_v22 = vld [vmem:[#allocation2 + $0x4b] sm:$0xff]  ;;  %v6805_v45 = vpack.c.bf16 %v6797_v39, %v6796_v53  ;;  %v6935_v53 = vld [vmem:[#allocation2 + $0x83] sm:$0xff]  ;;  %vm16974_vm10 = vmmov %vm16929_vm0 }
 0x2f4   : > { %10285 = vmatmul.mubr.msk.bf16.gmra.mxu1 %vm16953_vm5, %v6539_v40  ;;  %v4622_v1 = vpop.f32.mrf.mxu1  ;;  %v14298_v5 = vadd.f32 %v4751_v31, %v14176_v16  ;;  %v7146_v16 = vsel %vm16455_vm6, %v14221_v30, 0  ;;  %v6799_v40 = vld [vmem:[#allocation2 + $0x72] sm:$0xff]  ;;  %v6938_v31 = vpack.c.bf16 %v6929_v61, %v6928_v22  ;;  %v7108_v39 = vld [vmem:[#allocation2 + $0x66] sm:$0xff]  ;;  %vm16970_vm5 = vmmov %vm16929_vm0 }
 0x2f5   : > { %10304 = vmatprep.mubr.msk.bf16.mxu1 %vm16955_vm7, %v6802_v59  ;;  %v14300_v4 = vadd.f32 %v4622_v1, %v4480_v26  ;;  %v4753_v60 = vpop.f32.mrf.mxu0  ;;  %v6937_v59 = vpack.c.bf16 %v6927_v24, %v6926_v46  ;;  %v14354_v1 = vld [vmem:[%s16355_s3 + $0xc] sm:$0xf]  ;;  %v7111_v22 = vld [vmem:[#allocation2 + $0x7e] sm:$0xff]  ;;  %vm16975_vm7 = vmmov %vm16929_vm0 }
 0x2f6   : > { %v4624_v54 = vpop.f32.mrf.mxu1  ;;  %v14305_v32 = vadd.f32 %v4753_v60, %v14184_v58 }
 0x2f7   : > { %v14310_v19 = vadd.f32 %v4624_v54, %v14241_v27  ;;  %v4757_v26 = vpop.f32.mrf.mxu0  ;;  %v6801_v54 = vld [vmem:[#allocation2 + $0x82] sm:$0xff] }
 0x2f8   : > { %v14320_v58 = vadd.f32 %v4757_v26, %v14194_v23  ;;  %v4906_v25 = vpop.f32.mrf.mxu1 }
 0x2f9   : > { %v14325_v30 = vadd.f32 %v4906_v25, %v14255_v2  ;;  %v4759_v27 = vpop.f32.mrf.mxu0 }
 0x2fa   : > { %10299 = vmatmul.mubr.msk.bf16.gmra.mxu0 %vm16929_vm0, %v14302_v7  ;;  %v14329_v21 = vadd.f32 %v4759_v27, %v14201_v35  ;;  %v4908_v55 = vpop.f32.mrf.mxu1  ;;  %v6932_v27 = vld [vmem:[#allocation2 + $0x6b] sm:$0xff] }
 0x2fb   : > { %10318 = vmatprep.mubr.msk.bf16.mxu0 %vm16957_vm4, %v6936_v34  ;;  %v14334_v23 = vadd.f32 %v4908_v55, %v14264_v50  ;;  %v4761_v43 = vpop.f32.mrf.mxu0  ;;  %v6930_v34 = vld [vmem:[#allocation2 + $0x5b] sm:$0xff]  ;;  %vm16981_vm4 = vmmov %vm16929_vm0 }
 0x2fc   : > { %10305 = vmatmul.mubr.msk.bf16.vlgmr.msra.gmra.mxu1 %vm16956_vm2, %v6803_v18  ;;  %v14337_v2 = vadd.f32 %v4761_v43, %v14207_v48  ;;  %v4910_v11 = vpop.f32.mrf.mxu1  ;;  %v7248_v48 = vsel %vm16455_vm6, %v14252_v13, 0  ;;  %v6933_v18 = vld [vmem:[#allocation2 + $0x73] sm:$0xff]  ;;  %v6939_v25 = vpack.c.bf16 %v6931_v51, %v6930_v34  ;;  %v7112_v51 = vld [vmem:[#allocation2 + $0x86] sm:$0xff]  ;;  %vm16977_vm2 = vmmov %vm16929_vm0 }
 0x2fd   : > { %10308 = vmatprep.mubr.msk.bf16.mxu1 %vm16958_vm12, %v6804_v52  ;;  %10331 = vmatpush3.bf16.msra.mxu1 %v7146_v16  ;;  %v14340_v35 = vadd.f32 %v4910_v11, %v14272_v28  ;;  %v4763_v12 = vpop.f32.mrf.mxu0  ;;  %v6806_v28 = vpack.c.bf16 %v6799_v40, %v6798_v44  ;;  %v7109_v16 = vld [vmem:[#allocation2 + $0x6e] sm:$0xff]  ;;  %v6800_v52 = vld [vmem:[#allocation2 + $0x7a] sm:$0xff]  ;;  %v6940_v43 = vpack.c.bf16 %v6933_v18, %v6932_v27  ;;  %vm16982_vm12 = vmmov %vm16929_vm0 }
 0x2fe   : > { %10595 = vmatprep.subr.msk.bf16.mxu1 %vm16455_vm6, %v14317_v38  ;;  %v14343_v41 = vadd.f32 %v4763_v12, %v14215_v8  ;;  %v4912_v50 = vpop.f32.mrf.mxu1  ;;  %v6807_v24 = vpack.c.bf16 %v6801_v54, %v6800_v52  ;;  %v7120_v11 = vpack.c.bf16 %v7109_v16, %v7108_v39  ;;  %v7092_v52 = vld [vmem:[#allocation2 + $0x7d] sm:$0xff]  ;;  %v7117_v39 = vld [vmem:[#allocation2 + $0xae] sm:$0xff] }
 0x2ff   : > { %v14348_v3 = vadd.f32 %v4912_v50, %v14278_v14  ;;  %v4767_v47 = vpop.f32.mrf.mxu0  ;;  %v7090_v50 = vld [vmem:[#allocation2 + $0x6d] sm:$0xff]  ;;  %v7115_v27 = vld [vmem:[#allocation2 + $0x9e] sm:$0xff] }
 0x300   : > { %v14357_v8 = vadd.f32 %v4767_v47, %v14227_v37  ;;  %v4916_v20 = vpop.f32.mrf.mxu1 }
 0x301   : > { %v14362_v13 = vadd.f32 %v4916_v20, %v14285_v62  ;;  %v4769_v14 = vpop.f32.mrf.mxu0  ;;  %v7089_v20 = vld [vmem:[#allocation2 + $0x65] sm:$0xff] }
 0x302   : > { %10319 = vmatmul.mubr.msk.bf16.vlgmr.msra.gmra.mxu0 %vm16959_vm13, %v6937_v59  ;;  %v14366_v49 = vadd.f32 %v4769_v14, %v14234_v9  ;;  %v4918_v60 = vpop.f32.mrf.mxu1  ;;  %vm16983_vm13 = vmmov %vm16929_vm0 }
 0x303   : > { %10322 = vmatprep.mubr.msk.bf16.mxu0 %vm16961_vm15, %v6938_v31  ;;  %10345 = vmatpush3.bf16.msra.mxu0 %v7248_v48  ;;  %v14371_v37 = vadd.f32 %v4918_v60, %v14293_v63  ;;  %v4771_v29 = vpop.f32.mrf.mxu0  ;;  %v7113_v31 = vld [vmem:[#allocation2 + $0x8e] sm:$0xff]  ;;  %vm16990_vm15 = vmmov %vm16929_vm0 }
 0x304   : > { %10309 = vmatmul.mubr.msk.bf16.gmra.mxu1 %vm16960_vm8, %v6805_v45  ;;  %10596 = vmatprep.subr.msk.bf16.mxu0 %vm16455_vm6, %v14354_v1  ;;  %v14374_v62 = vadd.f32 %v4771_v29, %v14238_v17  ;;  %v4920_v57 = vpop.f32.mrf.mxu1  ;;  %v7101_v29 = vpack.c.bf16 %v7090_v50, %v7089_v20  ;;  %vm16985_vm8 = vmmov %vm16929_vm0 }
 0x305   : > { %10312 = vmatprep.mubr.msk.bf16.mxu1 %vm16962_vm14, %v6806_v28  ;;  %16963 = vst [vmem:[#allocation6_spill] sm:$0xff] %v14371_v37  ;;  %v14377_v9 = vadd.f32 %v4920_v57, %v14298_v5  ;;  %v4773_v26 = vpop.f32.mrf.mxu0  ;;  %v7110_v28 = vld [vmem:[#allocation2 + $0x76] sm:$0xff]  ;;  %v14419_v57 = vld [vmem:[%s16355_s3 + $0x10] sm:$0xf]  ;;  %vm16991_vm14 = vmmov %vm16929_vm0 }
 0x306   : > { %v14380_v55 = vadd.f32 %v4773_v26, %v14246_v0  ;;  %v4922_v63 = vpop.f32.mrf.mxu1  ;;  %v7121_v60 = vpack.c.bf16 %v7111_v22, %v7110_v28 }
 0x307   : > { %16964 = vst [vmem:[#allocation7_spill] sm:$0xff] %v14377_v9  ;;  %v14383_v17 = vadd.f32 %v4922_v63, %v14305_v32  ;;  %v4777_v61 = vpop.f32.mrf.mxu0  ;;  %v7094_v63 = vld [vmem:[#allocation2 + $0x8d] sm:$0xff] }
 0x308   : > { %v14387_v5 = vadd.f32 %v4777_v61, %v14260_v56  ;;  %v4926_v46 = vpop.f32.mrf.mxu1 }
 0x309   : > { %16965 = vst [vmem:[#allocation69_spill] sm:$0xff] %v14383_v17  ;;  %v14392_v0 = vadd.f32 %v4926_v46, %v14320_v58  ;;  %v4779_v40 = vpop.f32.mrf.mxu0  ;;  %v6934_v58 = vld [vmem:[#allocation2 + $0x7b] sm:$0xff]  ;;  %v14639_v17 = vld [vmem:[#allocation2 + $0xa3] sm:$0xff] }
 0x30a   : > { %10323 = vmatmul.mubr.msk.bf16.gmra.mxu0 %vm16966_vm3, %v6939_v25  ;;  %v14396_v32 = vadd.f32 %v4779_v40, %v14269_v36  ;;  %v4928_v12 = vpop.f32.mrf.mxu1  ;;  %v6941_v36 = vpack.c.bf16 %v6935_v53, %v6934_v58  ;;  %v7093_v40 = vld [vmem:[#allocation2 + $0x85] sm:$0xff]  ;;  %vm16992_vm3 = vmmov %vm16929_vm0  ;;  %17023 = vst [vmem:[#allocation67_spill] sm:$0xff] %v14639_v17 }
 0x30b   : > { %10326 = vmatprep.mubr.msk.bf16.mxu0 %vm16968_vm11, %v6940_v43  ;;  %16969 = vst [vmem:[#allocation70_spill] sm:$0xff] %v14392_v0  ;;  %v14399_v59 = vadd.f32 %v4928_v12, %v14329_v21  ;;  %v4781_v56 = vpop.f32.mrf.mxu0  ;;  %v7091_v43 = vld [vmem:[#allocation2 + $0x75] sm:$0xff]  ;;  %v7103_v22 = vpack.c.bf16 %v7094_v63, %v7093_v40  ;;  %vm17006_vm11 = vmmov %vm16929_vm0 }
 0x30c   : > { %10313 = vmatmul.mubr.msk.bf16.gmra.mxu1 %vm16967_vm9, %v6807_v24  ;;  %v14402_v45 = vadd.f32 %v4781_v56, %v14275_v6  ;;  %v4930_v44 = vpop.f32.mrf.mxu1  ;;  %v7369_v6 = vsel %vm16455_vm6, %v14317_v38, 0  ;;  %v7102_v46 = vpack.c.bf16 %v7092_v52, %v7091_v43  ;;  %v7116_v56 = vld [vmem:[#allocation2 + $0xa6] sm:$0xff]  ;;  %vm16994_vm9 = vmmov %vm16929_vm0  ;;  %v16996_v40 = vld [vmem:[#allocation16_spill] sm:$0xff] }
 0x30d   : > { %10332 = vmatprep.mubr.msk.bf16.mxu1 %vm16970_vm5, %v7120_v11  ;;  %16971 = vst [vmem:[#allocation15_spill] sm:$0xff] %v14399_v59  ;;  %v14405_v48 = vadd.f32 %v4930_v44, %v14337_v2  ;;  %v4783_v47 = vpop.f32.mrf.mxu0  ;;  %v7122_v2 = vpack.c.bf16 %v7113_v31, %v7112_v51  ;;  %v7114_v11 = vld [vmem:[#allocation2 + $0x96] sm:$0xff]  ;;  %v16988_v52 = vld [vmem:[#allocation14_spill] sm:$0xff]  ;;  %vm17008_vm5 = vmmov %vm16929_vm0 }
 0x30e   : > { %v14408_v14 = vadd.f32 %v4783_v47, %v14281_v10  ;;  %v4932_v21 = vpop.f32.mrf.mxu1  ;;  %v7123_v53 = vpack.c.bf16 %v7115_v27, %v7114_v11  ;;  %v7095_v51 = vld [vmem:[#allocation2 + $0x95] sm:$0xff] }
 0x30f   : > { %16972 = vst [vmem:[#allocation46_spill] sm:$0xff] %v14405_v48  ;;  %v14413_v54 = vadd.f32 %v4932_v21, %v14343_v41  ;;  %v4787_v18 = vpop.f32.mrf.mxu0  ;;  %v7119_v21 = vld [vmem:[#allocation2 + $0xbe] sm:$0xff]  ;;  %v7737_v0 = vld [vmem:[#allocation2 + $0xb1] sm:$0xff] }
 0x310   : > { %v14422_v10 = vadd.f32 %v4787_v18, %v14289_v15  ;;  %v4936_v34 = vpop.f32.mrf.mxu1  ;;  %v7118_v18 = vld [vmem:[#allocation2 + $0xb6] sm:$0xff] }
 0x311   : > { %16973 = vst [vmem:[#allocation45_spill] sm:$0xff] %v14413_v54  ;;  %v14427_v38 = vadd.f32 %v4936_v34, %v14357_v8  ;;  %v4789_v41 = vpop.f32.mrf.mxu0  ;;  %v7339_v54 = vld [vmem:[#allocation2 + $0xa7] sm:$0xff] }
 0x312   : > { %10327 = vmatmul.mubr.msk.bf16.gmra.mxu0 %vm16974_vm10, %v6941_v36  ;;  %v14431_v16 = vadd.f32 %v4789_v41, %v14295_v42  ;;  %v4938_v26 = vpop.f32.mrf.mxu1  ;;  %v7096_v36 = vld [vmem:[#allocation2 + $0x9d] sm:$0xff]  ;;  %vm17009_vm10 = vmmov %vm16929_vm0 }
 0x313   : > { %10346 = vmatprep.mubr.msk.bf16.mxu0 %vm16929_vm0, %v7101_v29  ;;  %16976 = vst [vmem:[#allocation5_spill] sm:$0xff] %v14427_v38  ;;  %v14436_v15 = vadd.f32 %v4938_v26, %v14366_v49  ;;  %v4791_v25 = vpop.f32.mrf.mxu0  ;;  %v7125_v26 = vpack.c.bf16 %v7119_v21, %v7118_v18 }
 0x314   : > { %10333 = vmatmul.mubr.msk.bf16.vlgmr.msra.gmra.mxu1 %vm16975_vm7, %v7121_v60  ;;  %v14439_v8 = vadd.f32 %v4791_v25, %v14300_v4  ;;  %v4940_v24 = vpop.f32.mrf.mxu1  ;;  %v7502_v4 = vsel %vm16455_vm6, %v14354_v1, 0  ;;  %v14483_v25 = vadd.s32 192, %v16988_v52  ;;  %v14542_v52 = vld [vmem:[#allocation2 + $0x80] sm:$0xff]  ;;  %vm17011_vm7 = vmmov %vm16929_vm0 }
 0x315   : > { %10336 = vmatprep.mubr.msk.bf16.mxu1 %vm16977_vm2, %v7122_v2  ;;  %10359 = vmatpush3.bf16.msra.mxu1 %v7369_v6  ;;  %16978 = vst [vmem:[#allocation8_spill] sm:$0xff] %v14436_v15  ;;  %v14442_v42 = vadd.f32 %v4940_v24, %v14374_v62  ;;  %v4793_v61 = vpop.f32.mrf.mxu0  ;;  %v7124_v62 = vpack.c.bf16 %v7117_v39, %v7116_v56  ;;  %v7097_v2 = vld [vmem:[#allocation2 + $0xa5] sm:$0xff]  ;;  %v16999_v56 = vld [vmem:[#allocation19_spill] sm:$0xff]  ;;  %vm17029_vm2 = vmmov %vm16929_vm0 }
 0x316   : > { %10597 = vmatprep.subr.msk.bf16.mxu1 %vm16455_vm6, %v14419_v57  ;;  %v14445_v12 = vadd.f32 %v4793_v61, %v14310_v19  ;;  %v4942_v49 = vpop.f32.mrf.mxu1  ;;  %v14458_v19 = vld [vmem:[%s16355_s3 + $0x14] sm:$0xf]  ;;  %v7334_v39 = vld [vmem:[#allocation2 + $0x7f] sm:$0xff] }
 0x317   : > { %16979 = vst [vmem:[#allocation77_spill] sm:$0xff] %v14442_v42  ;;  %v14450_v50 = vadd.f32 %v4942_v49, %v14380_v55  ;;  %v14452_v44 = vpop.f32.mrf.mxu0  ;;  %v7336_v61 = vld [vmem:[#allocation2 + $0x8f] sm:$0xff]  ;;  %v14505_v49 = vadd.s32 192, %v16996_v40 }
 0x318   : > { %v4946_v58 = vpop.f32.mrf.mxu1  ;;  %v7732_v40 = vld [vmem:[#allocation2 + $0x89] sm:$0xff] }
 0x319   : > { %16980 = vst [vmem:[#allocation22_spill] sm:$0xff] %v14450_v50  ;;  %v14463_v1 = vadd.f32 %v4946_v58, %v14387_v5  ;;  %v5077_v55 = vpop.f32.mrf.mxu0  ;;  %v7098_v5 = vld [vmem:[#allocation2 + $0xad] sm:$0xff]  ;;  %v14609_v50 = vld [vmem:[#allocation2 + $0x9a] sm:$0xff] }
 0x31a   : > { %10347 = vmatmul.mubr.msk.bf16.vlgmr.msra.gmra.mxu0 %vm16981_vm4, %v7102_v46  ;;  %v4948_v31 = vpop.f32.mrf.mxu1  ;;  %v14467_v47 = vadd.f32 %v5077_v55, %v14334_v23  ;;  %v7104_v23 = vpack.c.bf16 %v7096_v36, %v7095_v51  ;;  %v14501_v11 = vmul.u32.u64.low 3817748708, %v14483_v25  ;;  %v14502_v46 = vmul.u32.u64.high 3817748708, %v14483_v25, %v14501_v11  ;;  %v7335_v58 = vld [vmem:[#allocation2 + $0x87] sm:$0xff]  ;;  %17018 = vst [vmem:[#allocation62_spill] sm:$0xff] %v14609_v50  ;;  %vm17030_vm4 = vmmov %vm16929_vm0 }
 0x31b   : > { %10350 = vmatprep.mubr.msk.bf16.mxu0 %vm16983_vm13, %v7103_v22  ;;  %16984 = vst [vmem:[#allocation3_spill] sm:$0xff] %v14463_v1  ;;  %10373 = vmatpush3.bf16.msra.mxu0 %v7502_v4  ;;  %v14472_v28 = vadd.f32 %v4948_v31, %v14396_v32  ;;  %v14474_v20 = vpop.f32.mrf.mxu0  ;;  %v7105_v32 = vpack.c.bf16 %v7098_v5, %v7097_v2  ;;  %v7099_v4 = vld [vmem:[#allocation2 + $0xb5] sm:$0xff]  ;;  %v17000_v55 = vld [vmem:[#allocation21_spill] sm:$0xff]  ;;  %v14613_v42 = vld [vmem:[#allocation2 + $0x8b] sm:$0xff] }
 0x31c   : > { %10337 = vmatmul.mubr.msk.bf16.gmra.mxu1 %vm16982_vm12, %v7123_v53  ;;  %10598 = vmatprep.subr.msk.bf16.mxu0 %vm16455_vm6, %v14458_v19  ;;  %v4950_v60 = vpop.f32.mrf.mxu1  ;;  %v14516_v31 = vadd.s32 192, %v17000_v55  ;;  %v17003_v2 = vld [vmem:[#allocation24_spill] sm:$0xff]  ;;  %v14562_v11 = vld [vmem:[#allocation2 + $0x90] sm:$0xff]  ;;  %17020 = vst [vmem:[#allocation37_spill] sm:$0xff] %v14613_v42  ;;  %vm17034_vm12 = vmmov %vm16929_vm0 }
 0x31d   : > { %10340 = vmatprep.mubr.msk.bf16.mxu1 %vm16985_vm8, %v7124_v62  ;;  %16986 = vst [vmem:[#allocation52_spill] sm:$0xff] %v14472_v28  ;;  %v14477_v29 = vadd.f32 %v4950_v60, %v14402_v45  ;;  %v5081_v6 = vpop.f32.mrf.mxu0  ;;  %v7333_v62 = vld [vmem:[#allocation2 + $0x77] sm:$0xff]  ;;  %v14523_v60 = vpack.c.bf16 %v7336_v61, %v7335_v58  ;;  %v14560_v61 = vld [vmem:[#allocation2 + $0x88] sm:$0xff]  ;;  %vm17051_vm13 = vmmov %vm16929_vm0 }
 0x31e   : > { %v4952_v34 = vpop.f32.mrf.mxu1  ;;  %v14480_v41 = vadd.f32 %v5081_v6, %v14348_v3  ;;  %v7635_v6 = vsel %vm16455_vm6, %v14419_v57, 0  ;;  %v14547_v57 = vld [vmem:[%s16355_s3 + $0x18] sm:$0xf]  ;;  %vm17053_vm8 = vmmov %vm16929_vm0 }
 0x31f   : > { %16987 = vst [vmem:[#allocation55_spill] sm:$0xff] %v14477_v29  ;;  %v14486_v27 = vadd.f32 %v4952_v34, %v14408_v14  ;;  %v14488_v63 = vpop.f32.mrf.mxu0  ;;  %v7100_v14 = vld [vmem:[#allocation2 + $0xbd] sm:$0xff]  ;;  %v14532_v34 = vadd.s32 192, %v17003_v2  ;;  %v17013_v2 = vld [vmem:[#allocation30_spill] sm:$0xff] }
 0x320   : > { %v4956_v45 = vpop.f32.mrf.mxu1  ;;  %v7106_v5 = vpack.c.bf16 %v7100_v14, %v7099_v4  ;;  %v17007_v14 = vld [vmem:[#allocation27_spill] sm:$0xff]  ;;  %v7734_v28 = vld [vmem:[#allocation2 + $0x99] sm:$0xff] }
 0x321   : > { %16989 = vst [vmem:[#allocation23_spill] sm:$0xff] %v14486_v27  ;;  %v14494_v3 = vadd.f32 %v4956_v45, %v14422_v10  ;;  %v14498_v24 = vpop.f32.mrf.mxu0 }
 0x322   : > { %10351 = vmatmul.mubr.msk.bf16.gmra.mxu0 %vm16990_vm15, %v7104_v23  ;;  %16995 = vst [vmem:[#allocation53_spill] sm:$0xff] %v14498_v24  ;;  %v4958_v43 = vpop.f32.mrf.mxu1  ;;  %v14528_v18 = vmul.u32.u64.low 3817748708, %v14505_v49  ;;  %v14529_v23 = vmul.u32.u64.high 3817748708, %v14505_v49, %v14528_v18  ;;  %vm17054_vm15 = vmmov %vm16929_vm0 }
 0x323   : > { %10354 = vmatprep.mubr.msk.bf16.mxu0 %vm16992_vm3, %v7105_v32  ;;  %16993 = vst [vmem:[#allocation60_spill] sm:$0xff] %v14494_v3  ;;  %v14508_v53 = vadd.f32 %v4958_v43, %v14431_v16  ;;  %v14510_v10 = vpop.f32.mrf.mxu0  ;;  %v7344_v16 = vpack.c.bf16 %v7334_v39, %v7333_v62  ;;  %v14540_v32 = vld [vmem:[#allocation2 + $0x78] sm:$0xff]  ;;  %v17010_v62 = vld [vmem:[#allocation29_spill] sm:$0xff] }
 0x324   : > { %10341 = vmatmul.mubr.msk.bf16.gmra.mxu1 %vm16991_vm14, %v7125_v26  ;;  %16998 = vst [vmem:[#allocation48_spill] sm:$0xff] %v14510_v10  ;;  %v4960_v22 = vpop.f32.mrf.mxu1  ;;  %v14569_v58 = vadd.s32 192, %v17010_v62  ;;  %v14577_v18 = vld [vmem:[#allocation2 + $0xa0] sm:$0xff]  ;;  %v5574_v62 = vshrl.u32 %v14502_v46, 4  ;;  %v14595_v3 = vld [vmem:[#allocation2 + $0x92] sm:$0xff] }
 0x325   : > { %10360 = vmatprep.mubr.msk.bf16.mxu1 %vm16994_vm9, %v14181_v33  ;;  %16997 = vst [vmem:[#allocation35_spill] sm:$0xff] %v14508_v53  ;;  %v14513_v33 = vadd.s32 192, %v16999_v56  ;;  %v14519_v36 = vadd.f32 %v4960_v22, %v14439_v8  ;;  %v14521_v21 = vpop.f32.mrf.mxu0  ;;  %v7733_v56 = vld [vmem:[#allocation2 + $0x91] sm:$0xff]  ;;  %v14565_v22 = vmul.u32.u64.low 3817748708, %v14516_v31  ;;  %v14566_v4 = vmul.u32.u64.high 3817748708, %v14516_v31, %v14565_v22  ;;  %17015 = vst [vmem:[#allocation17_spill] sm:$0xff] %v14595_v3 }
 0x326   : > { %17002 = vst [vmem:[#allocation31_spill] sm:$0xff] %v14521_v21  ;;  %v4962_v51 = vpop.f32.mrf.mxu1  ;;  %v14593_v53 = vld [vmem:[#allocation2 + $0x8a] sm:$0xff]  ;;  %v14603_v29 = vpack.c.bf16 %v7733_v56, %v7732_v40  ;;  %v14637_v21 = vld [vmem:[#allocation2 + $0x9b] sm:$0xff]  ;;  %vm17056_vm9 = vmmov %vm16929_vm0 }
 0x327   : > { %17001 = vst [vmem:[#allocation36_spill] sm:$0xff] %v14519_v36  ;;  %v14535_v8 = vadd.f32 %v4962_v51, %v14445_v12  ;;  %v14537_v26 = vpop.f32.mrf.mxu0  ;;  %v14550_v45 = vmul.u32.u64.low 3817748708, %v14513_v33  ;;  %v14551_v43 = vmul.u32.u64.high 3817748708, %v14513_v33, %v14550_v45  ;;  %v14554_v12 = vadd.s32 192, %v17007_v14  ;;  %v14575_v51 = vld [vmem:[#allocation2 + $0x98] sm:$0xff]  ;;  %17014 = vst [vmem:[#allocation25_spill] sm:$0xff] %v14593_v53 }
 0x328   : > { %17005 = vst [vmem:[#allocation58_spill] sm:$0xff] %v14537_v26  ;;  %v14556_v39 = vpop.f32.mrf.mxu1  ;;  %v14580_v45 = vadd.s32 192, %v17013_v2  ;;  %v14597_v2 = vld [vmem:[#allocation2 + $0x93] sm:$0xff]  ;;  %v14619_v56 = vld [vmem:[#allocation2 + $0xa8] sm:$0xff]  ;;  %17022 = vst [vmem:[#allocation59_spill] sm:$0xff] %v14637_v21 }
 0x329   : > { %17004 = vst [vmem:[#allocation20_spill] sm:$0xff] %v14535_v8  ;;  %v14573_v55 = vpop.f32.mrf.mxu0  ;;  %v7735_v8 = vld [vmem:[#allocation2 + $0xa1] sm:$0xff]  ;;  %17016 = vst [vmem:[#allocation39_spill] sm:$0xff] %v14597_v2  ;;  %v14606_v46 = vmul.u32.u64.low 3817748708, %v14554_v12  ;;  %v14607_v1 = vmul.u32.u64.high 3817748708, %v14554_v12, %v14606_v46  ;;  %v14621_v22 = vld [vmem:[#allocation2 + $0xb0] sm:$0xff] }
 0x32a   : > { %10355 = vmatmul.mubr.msk.bf16.gmra.mxu0 %vm17006_vm11, %v7106_v5  ;;  %17012 = vst [vmem:[#allocation76_spill] sm:$0xff] %v14573_v55  ;;  %v7337_v5 = vld [vmem:[#allocation2 + $0x97] sm:$0xff]  ;;  %v14582_v14 = vpop.f32.mrf.mxu1  ;;  %v14624_v46 = vmul.u32.u64.low 3817748708, %v14569_v58  ;;  %v14625_v48 = vmul.u32.u64.high 3817748708, %v14569_v58, %v14624_v46  ;;  %v14629_v59 = vpack.c.bf16 %v7735_v8, %v7734_v28  ;;  %v7736_v26 = vld [vmem:[#allocation2 + $0xa9] sm:$0xff]  ;;  %v7342_v28 = vld [vmem:[#allocation2 + $0xbf] sm:$0xff] }
 0x32b   : > { %10374 = vmatprep.mubr.msk.bf16.mxu0 %vm17009_vm10, %v7344_v16  ;;  %v14599_v27 = vpop.f32.mrf.mxu0  ;;  %v7768_v46 = vsel %vm16455_vm6, %v14458_v19, 0  ;;  %v5575_v8 = vmul.u32 18, %v5574_v62  ;;  %v14649_v53 = vld [vmem:[#allocation2 + $0xb2] sm:$0xff]  ;;  %v14662_v62 = vld [vmem:[%s16355_s3 + $0x1c] sm:$0xf]  ;;  %v5596_v50 = vshrl.u32 %v14551_v43, 4 }
 0x32c   : > { %10361 = vmatmul.mubr.msk.bf16.vlgmr.msra.gmra.mxu1 %vm17008_vm5, %v7344_v16  ;;  %v7338_v16 = vld [vmem:[#allocation2 + $0x9f] sm:$0xff]  ;;  %17017 = vst [vmem:[#allocation34_spill] sm:$0xff] %v14599_v27  ;;  %v14615_v15 = vpop.f32.mrf.mxu1  ;;  %v7340_v27 = vld [vmem:[#allocation2 + $0xaf] sm:$0xff]  ;;  %17025 = vst [vmem:[#allocation74_spill] sm:$0xff] %v14649_v53  ;;  %v5607_v19 = vshrl.u32 %v14566_v4, 4  ;;  %v5640_v53 = vshrl.u32 %v14625_v48, 4 }
 0x32d   : > { %10364 = vmatprep.mubr.msk.bf16.mxu1 %vm17011_vm7, %v14523_v60  ;;  %10387 = vmatpush3.bf16.msra.mxu1 %v7635_v6  ;;  %v14590_v6 = vmul.u32.u64.low 3817748708, %v14532_v34  ;;  %v14591_v36 = vmul.u32.u64.high 3817748708, %v14532_v34, %v14590_v6  ;;  %v7346_v38 = vpack.c.bf16 %v7338_v16, %v7337_v5  ;;  %v14627_v55 = vpop.f32.mrf.mxu0  ;;  %v7347_v9 = vpack.c.bf16 %v7340_v27, %v7339_v54  ;;  %v7341_v54 = vld [vmem:[#allocation2 + $0xb7] sm:$0xff]  ;;  %v14677_v2 = vld [vmem:[#allocation2 + $0xaa] sm:$0xff] }
 0x32e   : > { %10599 = vmatprep.subr.msk.bf16.mxu1 %vm16455_vm6, %v14547_v57  ;;  %v14611_v6 = vld [vmem:[#allocation2 + $0xa2] sm:$0xff]  ;;  %17021 = vst [vmem:[#allocation63_spill] sm:$0xff] %v14627_v55  ;;  %v14634_v16 = vmul.u32.u64.low 3817748708, %v14580_v45  ;;  %v14635_v40 = vmul.u32.u64.high 3817748708, %v14580_v45, %v14634_v16  ;;  %v14641_v10 = vpop.f32.mrf.mxu1  ;;  %v5585_v5 = vshrl.u32 %v14529_v23, 4  ;;  %v14672_v27 = vld [vmem:[#allocation2 + $0xb8] sm:$0xff] }
 0x32f   : > { %17019 = vst [vmem:[#allocation49_spill] sm:$0xff] %v14611_v6  ;;  %17024 = vst [vmem:[#allocation72_spill] sm:$0xff] %v14641_v10  ;;  %v14645_v55 = vld [vmem:[#allocation2 + $0xc0] sm:$0xff]  ;;  %v14653_v3 = vpop.f32.mrf.mxu0  ;;  %v14666_v16 = vld [vmem:[#allocation2 + $0xb3] sm:$0xff]  ;;  %v5597_v17 = vmul.u32 18, %v5596_v50 }
 0x330   : > { %17026 = vst [vmem:[#allocation73_spill] sm:$0xff] %v14653_v3  ;;  %v7739_v6 = vld [vmem:[#allocation2 + $0xc1] sm:$0xff]  ;;  %17027 = vst [vmem:[#allocation78_spill] sm:$0xff] %v14666_v16  ;;  %v14668_v42 = vpop.f32.mrf.mxu1  ;;  %v14699_v3 = vsub.s32 %v14483_v25, %v5575_v8  ;;  %v5586_v21 = vmul.u32 18, %v5585_v5  ;;  %v5629_v25 = vshrl.u32 %v14607_v1, 4  ;;  %v5651_v1 = vshrl.u32 %v14635_v40, 4 }
 0x331   : > { %17028 = vst [vmem:[#allocation47_spill] sm:$0xff] %v14668_v42  ;;  %17032 = vst [vmem:[#allocation13_spill] sm:$0xff] %v14677_v2  ;;  %v17033_v23 = vld [vmem:[#allocation33_spill] sm:$0xff]  ;;  %v14685_v24 = vpop.f32.mrf.mxu0  ;;  %v17042_v8 = vld [vmem:[#allocation54_spill] sm:$0xff] }
 0x332   : > { %10375 = vmatmul.mubr.msk.bf16.vlgmr.msra.gmra.mxu0 %vm16929_vm0, %v14523_v60  ;;  %v14674_v60 = vpack.c.bf16 %v7737_v0, %v7736_v26  ;;  %v14680_v43 = vadd.s32 192, %v17033_v23  ;;  %17035 = vst [vmem:[#allocation4_spill] sm:$0xff] %v14685_v24  ;;  %v7738_v26 = vld [vmem:[#allocation2 + $0xb9] sm:$0xff]  ;;  %v14694_v23 = vld [vmem:[#allocation2 + $0xab] sm:$0xff]  ;;  %v14696_v42 = vpop.f32.mrf.mxu1  ;;  %v14716_v2 = vadd.s32 192, %v17042_v8  ;;  %vm5700_vm14 = vcmp.ne.s32.totalorder %v14699_v3, 0 }
 0x333   : > { %10378 = vmatprep.mubr.msk.bf16.mxu0 %vm17030_vm4, %v7346_v38  ;;  %10401 = vmatpush3.bf16.msra.mxu0 %v7768_v46  ;;  %17037 = vst [vmem:[#allocation57_spill] sm:$0xff] %v14694_v23  ;;  %17038 = vst [vmem:[#allocation26_spill] sm:$0xff] %v14696_v42  ;;  %v14703_v46 = vpack.c.bf16 %v7739_v6, %v7738_v26  ;;  %v14710_v4 = vpop.f32.mrf.mxu0  ;;  %v14712_v0 = vld [vmem:[#allocation2 + $0xcf] sm:$0xff]  ;;  %v14718_v6 = vld [vmem:[#allocation2 + $0xc3] sm:$0xff]  ;;  %vm5712_vm3 = vcmp.lt.s32.totalorder %v14699_v3, 0 }
 0x334   : > { %10365 = vmatmul.mubr.msk.bf16.gmra.mxu1 %vm17029_vm2, %v7346_v38  ;;  %17031 = vst [vmem:[#allocation32_spill] sm:$0xff] %v14674_v60  ;;  %v7348_v38 = vpack.c.bf16 %v7342_v28, %v7341_v54  ;;  %v17036_v60 = vld [vmem:[#allocation42_spill] sm:$0xff]  ;;  %10600 = vmatprep.subr.msk.bf16.mxu0 %vm16455_vm6, %v14662_v62  ;;  %v5618_v28 = vshrl.u32 %v14591_v36, 4  ;;  %17041 = vst [vmem:[#allocation82_spill] sm:$0xff] %v14710_v4  ;;  %v14720_v26 = vpop.f32.mrf.mxu1  ;;  %v5608_v36 = vmul.u32 18, %v5607_v19  ;;  %v14727_v16 = vld [vmem:[#allocation2 + $0xba] sm:$0xff] }
 0x335   : > { %10368 = vmatprep.mubr.msk.bf16.mxu1 %vm17034_vm12, %v7347_v9  ;;  %v14692_v37 = vadd.s32 192, %v17036_v60  ;;  %17039 = vst [vmem:[#allocation64_spill] sm:$0xff] %v14703_v46  ;;  %v14706_v54 = vld [vmem:[#allocation2 + $0xc2] sm:$0xff]  ;;  %17043 = vst [vmem:[#allocation9_spill] sm:$0xff] %v14718_v6  ;;  %v14724_v60 = vmul.u32.u64.low 3817748708, %v14680_v43  ;;  %v14725_v23 = vmul.u32.u64.high 3817748708, %v14680_v43, %v14724_v60  ;;  %v14729_v5 = vpop.f32.mrf.mxu0  ;;  %v17069_v6 = vpack.c.bf16 %v14562_v11, %v14560_v61 }
 0x336   : > { %17040 = vst [vmem:[#allocation51_spill] sm:$0xff] %v14706_v54  ;;  %17044 = vst [vmem:[#allocation56_spill] sm:$0xff] %v14720_v26  ;;  %v14731_v50 = vld [vmem:[#allocation2 + $0xc7] sm:$0xff]  ;;  %v14741_v48 = vld [vmem:[#allocation2 + $0xbb] sm:$0xff]  ;;  %v14743_v26 = vpop.f32.mrf.mxu1  ;;  %v5619_v42 = vmul.u32 18, %v5618_v28  ;;  %v14783_v40 = vsub.s32 %v14516_v31, %v5608_v36  ;;  %v17074_v11 = vpack.c.bf16 %v14577_v18, %v14575_v51 }
 0x337   : > { %17045 = vst [vmem:[#allocation18_spill] sm:$0xff] %v14727_v16  ;;  %17046 = vst [vmem:[#allocation81_spill] sm:$0xff] %v14729_v5  ;;  %v14735_v8 = vmul.u32.u64.low 3817748708, %v14692_v37  ;;  %v14736_v4 = vmul.u32.u64.high 3817748708, %v14692_v37, %v14735_v8  ;;  %v17047_v24 = vld [vmem:[#allocation61_spill] sm:$0xff]  ;;  %v7481_v60 = vpack.c.bf16 %v14712_v0, %v14731_v50  ;;  %v14751_v46 = vpop.f32.mrf.mxu0  ;;  %v14763_v28 = vld [vmem:[#allocation2 + $0xce] sm:$0xff] }
 0x338   : > { %v14739_v19 = vadd.s32 192, %v17047_v24  ;;  %17048 = vst [vmem:[#allocation80_spill] sm:$0xff] %v14741_v48  ;;  %17049 = vst [vmem:[#allocation10_spill] sm:$0xff] %v14743_v26  ;;  %v14755_v24 = vsub.s32 %v14505_v49, %v5586_v21  ;;  %v14757_v8 = vld [vmem:[#allocation2 + $0xd0] sm:$0xff]  ;;  %v5630_v26 = vmul.u32 18, %v5629_v25  ;;  %v14765_v50 = vpop.f32.mrf.mxu1  ;;  %v5641_v49 = vmul.u32 18, %v5640_v53 }
 0x339   : > { %17050 = vst [vmem:[#allocation65_spill] sm:$0xff] %v14751_v46  ;;  %v14760_v10 = vmul.u32.u64.low 3817748708, %v14716_v2  ;;  %v14761_v0 = vmul.u32.u64.high 3817748708, %v14716_v2, %v14760_v10  ;;  %17052 = vst [vmem:[#allocation43_spill] sm:$0xff] %v14763_v28  ;;  %v17055_v21 = vpack.c.bf16 %v14542_v52, %v14540_v32  ;;  %v14780_v25 = vld [vmem:[#allocation2 + $0xc8] sm:$0xff]  ;;  %v14799_v52 = vsub.s32 %v14532_v34, %v5619_v42 }
 0x33a   : > { %10379 = vmatmul.mubr.msk.bf16.gmra.mxu0 %vm17051_vm13, %v7347_v9  ;;  %v14772_v9 = vsub.s32 %v14513_v33, %v5597_v17  ;;  %v14778_v10 = vpop.f32.mrf.mxu0  ;;  %v14785_v5 = vld [vmem:[#allocation2 + $0xc6] sm:$0xff]  ;;  %v14788_v48 = vmul.u32.u64.low 3817748708, %v14739_v19  ;;  %v14789_v17 = vmul.u32.u64.high 3817748708, %v14739_v19, %v14788_v48  ;;  %v14791_v53 = vpop.f32.mrf.mxu1  ;;  %v14794_v33 = vadd.s32 18, %v14699_v3  ;;  %vm14809_vm11 = vmand %vm5712_vm3, %vm5700_vm14 }
 0x33b   : > { %10382 = vmatprep.mubr.msk.bf16.mxu0 %vm17054_vm15, %v7348_v38  ;;  %17057 = vst [vmem:[#allocation68_spill] sm:$0xff] %v14778_v10  ;;  %17058 = vst [vmem:[#allocation71_spill] sm:$0xff] %v14785_v5  ;;  %v7901_v48 = vsel %vm16455_vm6, %v14547_v57, 0  ;;  %vm5701_vm5 = vcmp.ne.s32.totalorder %v14755_v24, 0  ;;  %vm5713_vm10 = vcmp.lt.s32.totalorder %v14755_v24, 0  ;;  %v14818_v42 = vsub.s32 %v14554_v12, %v5630_v26 }
 0x33c   : > { %10369 = vmatmul.mubr.msk.bf16.gmra.mxu1 %vm17053_vm8, %v7348_v38  ;;  %v5652_v38 = vmul.u32 18, %v5651_v1  ;;  %v14803_v36 = vpop.f32.mrf.mxu0  ;;  %v14820_v34 = vpop.f32.mrf.mxu1  ;;  %vm5702_vm7 = vcmp.ne.s32.totalorder %v14772_v9, 0  ;;  %vm5714_vm0 = vcmp.lt.s32.totalorder %v14772_v9, 0  ;;  %v5662_v31 = vshrl.u32 %v14725_v23, 4  ;;  %vm14849_vm12 = vmand %vm5713_vm10, %vm5701_vm5  ;;  %v15296_v46 = vld [vmem:[%s16355_s3 + $0x8] sm:$0xf] }
 0x33d   : > { %10388 = vmatprep.mubr.msk.bf16.mxu1 %vm17056_vm9, %v17055_v21  ;;  %17059 = vst [vmem:[#allocation79_spill] sm:$0xff] %v14803_v36  ;;  %v14825_v21 = vsub.s32 %v14569_v58, %v5641_v49  ;;  %vm5703_vm2 = vcmp.ne.s32.totalorder %v14783_v40, 0  ;;  %vm5715_vm4 = vcmp.lt.s32.totalorder %v14783_v40, 0  ;;  %v5673_v12 = vshrl.u32 %v14736_v4, 4  ;;  %v5496_v58 = vld [vmem:[%s16354_s2] sm:$0x3]  ;;  %vm17066_vm15 = vmmov %vm17056_vm9 }
 0x33e   : > { %v14828_v32 = vpop.f32.mrf.mxu0  ;;  %v14833_v57 = vsub.s32 %v14580_v45, %v5652_v38  ;;  %v14836_v26 = vpop.f32.mrf.mxu1  ;;  %v5748_v23 = vsel %vm14809_vm11, %v14794_v33, %v14699_v3  ;;  %v5737_v4 = vadd.s32 18, %v14755_v24  ;;  %vm5704_vm13 = vcmp.ne.s32.totalorder %v14799_v52, 0  ;;  %vm14863_vm14 = vmand %vm5714_vm0, %vm5702_vm7  ;;  %v9942_v33 = vld [vmem:[%s16355_s3 + $0x20] sm:$0xf] }
 0x33f   : > { %17062 = vst [vmem:[#allocation50_spill] sm:$0xff] %v14828_v32  ;;  %vm5716_vm8 = vcmp.lt.s32.totalorder %v14799_v52, 0  ;;  %v14868_v38 = vadd.s32 18, %v14772_v9  ;;  %vm5705_vm3 = vcmp.ne.s32.totalorder %v14818_v42, 0  ;;  %vm5717_vm9 = vcmp.lt.s32.totalorder %v14818_v42, 0  ;;  %vm17070_vm11 = vmmov %vm17066_vm15 }
 0x340   : > { %v14856_v49 = vpop.f32.mrf.mxu0  ;;  %v14876_v1 = vpop.f32.mrf.mxu1  ;;  %vm17071_vm5 = vmmov %vm17070_vm11  ;;  %vm5706_vm7 = vcmp.ne.s32.totalorder %v14825_v21, 0  ;;  %vm5718_vm0 = vcmp.lt.s32.totalorder %v14825_v21, 0  ;;  %v5663_v61 = vmul.u32 18, %v5662_v31  ;;  %v5674_v31 = vmul.u32 18, %v5673_v12 }
 0x341   : > { %17065 = vst [vmem:[#allocation66_spill] sm:$0xff] %v14856_v49  ;;  %vm14888_vm10 = vmand %vm5715_vm4, %vm5703_vm2  ;;  %vm5707_vm4 = vcmp.ne.s32.totalorder %v14833_v57, 0  ;;  %v5695_v51 = vshrl.u32 %v14789_v17, 4  ;;  %v8034_v16 = vsel %vm16455_vm6, %v14662_v62, 0  ;;  %v14925_v54 = vadd.s32 18, %v14799_v52  ;;  %v17161_v17 = vld [vmem:[#allocation73_spill] sm:$0xff] }
 0x342   : > { %10383 = vmatmul.mubr.msk.bf16.gmra.mxu0 %vm17066_vm15, %v7481_v60  ;;  %v5684_v60 = vshrl.u32 %v14761_v0, 4  ;;  %v14893_v0 = vadd.s32 18, %v14783_v40  ;;  %vm17075_vm15 = vmmov %vm17071_vm5  ;;  %v14914_v18 = vpop.f32.mrf.mxu1  ;;  %v5134_v32 = vadd.f32 %v14452_v44, %v14325_v30  ;;  %v14978_v30 = vsub.s32 %v14680_v43, %v5663_v61 }
 0x343   : > { %10402 = vmatprep.mubr.msk.bf16.mxu0 %vm17071_vm5, %v14302_v7  ;;  %v14901_v7 = vpop.f32.mrf.mxu0  ;;  %vm14907_vm2 = vmand %vm5716_vm8, %vm5704_vm13  ;;  %17079 = vst [vmem:[#allocation75_spill] sm:$0xff] %v14914_v18  ;;  %v5749_v18 = vsel %vm14849_vm12, %v5737_v4, %v14755_v24  ;;  %v14991_v45 = vsub.s32 %v14692_v37, %v5674_v31  ;;  %v5696_v4 = vmul.u32 18, %v5695_v51  ;;  %v5136_v51 = vadd.f32 %v14474_v20, %v14340_v35 }
 0x344   : > { %10389 = vmatmul.mubr.msk.bf16.vlgmr.msra.gmra.mxu1 %vm17070_vm11, %v17069_v6  ;;  %17076 = vst [vmem:[#allocation28_spill] sm:$0xff] %v14901_v7  ;;  %vm5719_vm11 = vcmp.lt.s32.totalorder %v14833_v57, 0  ;;  %vm14931_vm13 = vmand %vm5717_vm9, %vm5705_vm3  ;;  %v5685_v49 = vmul.u32 18, %v5684_v60  ;;  %v14960_v36 = vpop.f32.mrf.mxu1  ;;  %vm14962_vm3 = vcmp.lt.s32.totalorder %v5748_v23, 16  ;;  %v5750_v23 = vsel %vm14863_vm14, %v14868_v38, %v14772_v9 }
 0x345   : > { %10392 = vmatprep.mubr.msk.bf16.mxu1 %vm17075_vm15, %v17074_v11  ;;  %10415 = vmatpush3.bf16.msra.mxu1 %v7901_v48  ;;  %v17080_v11 = vld [vmem:[#allocation38_spill] sm:$0xff]  ;;  %v17081_v48 = vld [vmem:[#allocation40_spill] sm:$0xff]  ;;  %v14936_v12 = vpop.f32.mrf.mxu0  ;;  %vm14945_vm8 = vmand %vm5718_vm0, %vm5706_vm7  ;;  %v5751_v24 = vsel %vm14888_vm10, %v14893_v0, %v14783_v40  ;;  %v5303_v60 = vadd.f32 %v14556_v39, %v5134_v32  ;;  %v15001_v9 = vsel %vm16455_vm6, %v9942_v33, 0  ;;  %vm15008_vm14 = vcmp.lt.s32.totalorder %v5749_v18, 16 }
 0x346   : > { %v14917_v28 = vrot.slane %v5496_v58, %v17080_v11  ;;  %v14920_v7 = vrot.slane %v5496_v58, %v17081_v48  ;;  %10601 = vmatprep.subr.msk.bf16.mxu1 %vm16455_vm6, %v9942_v33  ;;  %17084 = vst [vmem:[#allocation83_spill] sm:$0xff] %v14936_v12  ;;  %v14939_v58 = vadd.s32 18, %v14818_v42  ;;  %v14950_v11 = vadd.s32 18, %v14825_v21  ;;  %v9950_v48 = vld [vmem:[%s16355_s3 + $0x4] sm:$0xf]  ;;  %vm14973_vm9 = vmand %vm5719_vm11, %vm5707_vm4  ;;  %v14994_v43 = vpop.f32.mrf.mxu1  ;;  %v17117_v33 = vld [vmem:[#allocation48_spill] sm:$0xff] }
 0x347   : > { %v14956_v12 = vadd.s32 18, %v14833_v57  ;;  %v14980_v44 = vpop.f32.mrf.mxu0  ;;  %v15004_v3 = vsel %vm16455_vm6, %v9950_v48, 0  ;;  %vm17092_vm12 = vmmov %vm17071_vm5  ;;  %v15025_v31 = vsub.s32 %v14716_v2, %v5685_v49  ;;  %v5304_v18 = vadd.f32 %v14582_v14, %v14467_v47  ;;  %v17126_v0 = vld [vmem:[#allocation64_spill] sm:$0xff] }
 0x348   : > { %17091 = vst [vmem:[#allocation84_spill] sm:$0xff] %v14980_v44  ;;  %v17095_v32 = vpack.c.bf16 %v14621_v22, %v14619_v56  ;;  %vm17096_vm7 = vmmov %vm17071_vm5  ;;  %vm5708_vm0 = vcmp.ne.s32.totalorder %v14978_v30, 0  ;;  %v17097_v2 = vpack.c.bf16 %v14645_v55, %v14672_v27  ;;  %vm5720_vm4 = vcmp.lt.s32.totalorder %v14978_v30, 0 }
 0x349   : > { %v5413_v38 = vpop.f32.mrf.mxu0  ;;  %vm17098_vm15 = vmmov %vm17071_vm5  ;;  %v15046_v47 = vadd.s32 18, %v14978_v30  ;;  %vm5709_vm11 = vcmp.ne.s32.totalorder %v14991_v45, 0  ;;  %v15050_v20 = vsub.s32 %v14739_v19, %v5696_v4  ;;  %v5305_v14 = vadd.f32 %v14615_v15, %v5136_v51  ;;  %v17102_v15 = vld [vmem:[#allocation72_spill] sm:$0xff] }
 0x34a   : > { %10403 = vmatmul.mubr.msk.bf16.vlgmr.msra.gmra.mxu0 %vm17092_vm12, %v14603_v29  ;;  %v15031_v39 = vpop.f32.mrf.mxu1  ;;  %v5472_v61 = vadd.f32 %v5413_v38, %v5303_v60  ;;  %vm5721_vm12 = vcmp.lt.s32.totalorder %v14991_v45, 0  ;;  %v15065_v19 = vadd.s32 18, %v14991_v45  ;;  %vm15078_vm1 = vmand %vm5720_vm4, %vm5708_vm0  ;;  %v15092_v51 = vadd.s32 18, %v15025_v31 }
 0x34b   : > { %10406 = vmatprep.mubr.msk.bf16.mxu0 %vm17096_vm7, %v14629_v59  ;;  %v5415_v35 = vpop.f32.mrf.mxu0  ;;  %10429 = vmatpush3.bf16.msra.mxu0 %v8034_v16  ;;  %v5138_v16 = vadd.f32 %v14488_v63, %v14362_v13  ;;  %vm5710_vm7 = vcmp.ne.s32.totalorder %v15025_v31, 0  ;;  %v17104_v63 = vmov 0  ;;  %vm17110_vm4 = vcmp.lt.s32.totalorder %v15025_v31, 0 }
 0x34c   : > { %10393 = vmatmul.mubr.msk.bf16.gmra.mxu1 %vm17071_vm5, %v17095_v32  ;;  %v5508_v22 = vadd.f32 %v14917_v28, %v5472_v61  ;;  %v15054_v56 = vpop.f32.mrf.mxu1  ;;  %v5473_v55 = vadd.f32 %v5415_v35, %v5304_v18  ;;  %10602 = vmatprep.subr.msk.bf16.mxu0 %vm16455_vm6, %v9950_v48  ;;  %vm15060_vm5 = vcmp.lt.s32.totalorder %v5750_v23, 16  ;;  %v5306_v48 = vadd.f32 %v17102_v15, %v14480_v41  ;;  %v17106_v23 = vld [vmem:[#allocation47_spill] sm:$0xff]  ;;  %vm15087_vm6 = vmand %vm5721_vm12, %vm5709_vm11 }
 0x34d   : > { %10396 = vmatprep.mubr.msk.bf16.mxu1 %vm17098_vm15, %v17097_v2  ;;  %17099 = vst [vmem:[#allocation90_spill] sm:$0xff] %v15054_v56  ;;  %v5417_v27 = vpop.f32.mrf.mxu0  ;;  %v17105_v63 = vsel %vm15078_vm1, 4294967295, %v17104_v63  ;;  %v5307_v38 = vadd.f32 %v17106_v23, %v5138_v16  ;;  %vm5711_vm15 = vcmp.ne.s32.totalorder %v15050_v20, 0  ;;  %vm15105_vm11 = vmand %vm17110_vm4, %vm5710_vm7  ;;  %v17114_v16 = vld [vmem:[#allocation6_spill] sm:$0xff]  ;;  %v17116_v23 = vld [vmem:[#allocation7_spill] sm:$0xff]  ;;  %vm17118_vm12 = vcmask 64512  }
 0x34e   : > { %v5532_v4 = vmax.f32 %v5508_v22, 0.0  ;;  %v5509_v60 = vadd.f32 %v14920_v7, %v5473_v55  ;;  %v15072_v61 = vpop.f32.mrf.mxu1  ;;  %v5474_v13 = vadd.f32 %v5417_v27, %v5305_v14  ;;  %v17111_v55 = vmov 0  ;;  %v17115_v27 = vld [vmem:[#allocation53_spill] sm:$0xff]  ;;  %vm17120_vm0 = vmmov %vm17118_vm12 }
 0x34f   : > { %17103 = vst [vmem:[#allocation89_spill] sm:$0xff] %v15072_v61  ;;  %v5419_v32 = vpop.f32.mrf.mxu0  ;;  %v17112_v55 = vsel %vm15105_vm11, 4294967295, %v17111_v55  ;;  %v5139_v15 = vadd.f32 %v17115_v27, %v17114_v16  ;;  %vm15121_vm7 = vcmp.lt.s32.totalorder %v5751_v24, 16  ;;  %v17124_v40 = vpack.c.bf16 %v14757_v8, %v14780_v25  ;;  %vm17125_vm10 = vmmov %vm17120_vm0  ;;  %v17138_v61 = vld [vmem:[#allocation10_spill] sm:$0xff] }
 0x350   : > { %v5796_v18 = vsel %vm14962_vm3, %v5532_v4, 0.0  ;;  %v5533_v2 = vmax.f32 %v5509_v60, 0.0  ;;  %v5510_v35 = vadd.f32 %v14917_v28, %v5474_v13  ;;  %v15099_v14 = vpop.f32.mrf.mxu1  ;;  %v5475_v22 = vadd.f32 %v5419_v32, %v5306_v48  ;;  %17113 = vst [vmem:[#allocation86_spill] sm:$0xff] %v17112_v55  ;;  %v17119_v13 = vld [vmem:[#allocation32_spill] sm:$0xff]  ;;  %vm17134_vm1 = vmmov %vm17120_vm0 }
 0x351   : > { %17109 = vst [vmem:[#allocation85_spill] sm:$0xff] %v15099_v14  ;;  %v5140_v4 = vadd.f32 %v17117_v33, %v17116_v23  ;;  %5864 = vst.msk [vmem:[#allocation2 + $0xd8] sm:$0xff] %vm17118_vm12, %v5796_v18  ;;  %v15130_v32 = vadd.s32 18, %v15050_v20  ;;  %vm17127_vm4 = vcmp.lt.s32.totalorder %v15050_v20, 0  ;;  %v17128_v24 = vmov 0 }
 0x352   : > { %v5423_v60 = vpop.f32.mrf.mxu0  ;;  %10407 = vmatmul.mubr.msk.bf16.gmra.mxu0 %vm17120_vm0, %v17119_v13  ;;  %v5808_v16 = vsub.f32 %v5796_v18, %v5533_v2  ;;  %v5534_v27 = vmax.f32 %v5510_v35, 0.0  ;;  %v5511_v23 = vadd.f32 %v14920_v7, %v5475_v22  ;;  %vm15145_vm12 = vmand %vm17127_vm4, %vm5711_vm15  ;;  %v17131_v18 = vld [vmem:[#allocation69_spill] sm:$0xff]  ;;  %v17132_v2 = vld [vmem:[#allocation31_spill] sm:$0xff]  ;;  %v17174_v48 = vsel %vm14973_vm9, %v14956_v12, %v14833_v57 }
 0x353   : > { %v15133_v5 = vpop.f32.mrf.mxu1  ;;  %v5476_v44 = vadd.f32 %v5423_v60, %v5307_v38  ;;  %10410 = vmatprep.mubr.msk.bf16.mxu0 %vm17120_vm0, %v17126_v0  ;;  %v17129_v24 = vsel %vm15145_vm12, 4294967295, %v17128_v24  ;;  %v5141_v35 = vadd.f32 %v17132_v2, %v17131_v18  ;;  %v17133_v38 = vld [vmem:[#allocation26_spill] sm:$0xff]  ;;  %v17181_v57 = vld [vmem:[#allocation52_spill] sm:$0xff] }
 0x354   : > { %17123 = vst [vmem:[#allocation88_spill] sm:$0xff] %v15133_v5  ;;  %10397 = vmatmul.mubr.msk.bf16.gmra.mxu1 %vm17125_vm10, %v17124_v40  ;;  %17130 = vst [vmem:[#allocation87_spill] sm:$0xff] %v17129_v24  ;;  %v5308_v22 = vadd.f32 %v17133_v38, %v5139_v15  ;;  %v5425_v8 = vpop.f32.mrf.mxu0  ;;  %v17135_v40 = vld [vmem:[#allocation56_spill] sm:$0xff]  ;;  %v5797_v18 = vsel %vm15008_vm14, %v5534_v27, 0.0  ;;  %v5535_v15 = vmax.f32 %v5511_v23, 0.0  ;;  %v17136_v38 = vld [vmem:[#allocation70_spill] sm:$0xff] }
 0x355   : > { %10416 = vmatprep.mubr.msk.bf16.mxu1 %vm17134_vm1, %v14603_v29  ;;  %v5309_v33 = vadd.f32 %v17135_v40, %v5140_v4  ;;  %v5512_v2 = vadd.f32 %v14917_v28, %v5476_v44  ;;  %v15166_v29 = vpop.f32.mrf.mxu1  ;;  %v17137_v5 = vld [vmem:[#allocation58_spill] sm:$0xff]  ;;  %v5310_v25 = vadd.f32 %v17138_v61, %v5141_v35  ;;  %vm17139_vm1 = vmmov %vm17120_vm0  ;;  %v17140_v4 = vsel %vm14907_vm2, %v14925_v54, %v14799_v52  ;;  %v17182_v12 = vld [vmem:[#allocation68_spill] sm:$0xff] }
 0x356   : > { %v5142_v14 = vadd.f32 %v17137_v5, %v17136_v38  ;;  %5865 = vst.msk [vmem:[#allocation2 + $0xe0] sm:$0xff] %vm17139_vm1, %v5797_v18  ;;  %v5477_v56 = vadd.f32 %v5425_v8, %v5308_v22  ;;  %v5427_v55 = vpop.f32.mrf.mxu0  ;;  %vm15177_vm15 = vcmp.lt.s32.totalorder %v17140_v4, 16  ;;  %v5759_v44 = vsel %vm15145_vm12, %v15130_v32, %v15050_v20  ;;  %v17143_v22 = vld [vmem:[#allocation15_spill] sm:$0xff]  ;;  %v17144_v8 = vld [vmem:[#allocation76_spill] sm:$0xff]  ;;  %v17145_v52 = vld [vmem:[#allocation46_spill] sm:$0xff] }
 0x357   : > { %v5820_v61 = vsel %vm14962_vm3, %v5808_v16, 0.0  ;;  %v5809_v23 = vsub.f32 %v5797_v18, %v5535_v15  ;;  %v5536_v5 = vmax.f32 %v5512_v2, 0.0  ;;  %v15187_v35 = vpop.f32.mrf.mxu1  ;;  %v5478_v6 = vadd.f32 %v5427_v55, %v5309_v33  ;;  %v17146_v40 = vld [vmem:[#allocation34_spill] sm:$0xff]  ;;  %vm17147_vm2 = vmmov %vm17120_vm0  ;;  %v17209_v41 = vld [vmem:[#allocation89_spill] sm:$0xff] }
 0x358   : > { %v5143_v54 = vadd.f32 %v17144_v8, %v17143_v22  ;;  %v5144_v38 = vadd.f32 %v17146_v40, %v17145_v52  ;;  %v5311_v4 = vadd.f32 %v14765_v50, %v5142_v14  ;;  %v5513_v60 = vadd.f32 %v14920_v7, %v5477_v56  ;;  %v5429_v24 = vpop.f32.mrf.mxu0  ;;  %v7740_v15 = vld [vmem:[#allocation2 + $0xc9] sm:$0xff]  ;;  %v7741_v2 = vld [vmem:[#allocation2 + $0xd1] sm:$0xff]  ;;  %vm17148_vm3 = vmmov %vm17120_vm0 }
 0x359   : > { %v5821_v10 = vsel %vm15008_vm14, %v5809_v23, 0.0  ;;  %v5798_v16 = vsel %vm15060_vm5, %v5536_v5, 0.0  ;;  %v5514_v18 = vadd.f32 %v14917_v28, %v5478_v6  ;;  %v15200_v55 = vpop.f32.mrf.mxu1  ;;  %v5479_v33 = vadd.f32 %v5429_v24, %v5310_v25  ;;  %v15214_v24 = vld [vmem:[%s16355_s3] sm:$0xf]  ;;  %vm17151_vm14 = vmmov %vm17120_vm0 }
 0x35a   : > { %v5833_v22 = vmul.f32 %v5820_v61, %v5820_v61  ;;  %v5834_v8 = vmul.f32 %v5821_v10, %v5821_v10  ;;  %5866 = vst.msk [vmem:[#allocation2 + $0xe8] sm:$0xff] %vm17147_vm2, %v5798_v16  ;;  %v5537_v50 = vmax.f32 %v5513_v60, 0.0  ;;  %v5433_v56 = vpop.f32.mrf.mxu0  ;;  %v15203_v14 = vpack.c.bf16 %v7741_v2, %v7740_v15  ;;  %v17149_v25 = vld [vmem:[#allocation45_spill] sm:$0xff]  ;;  %v17150_v60 = vld [vmem:[#allocation63_spill] sm:$0xff]  ;;  %vm17152_vm10 = vmmov %vm17120_vm0 }
 0x35b   : > { %v5312_v37 = vadd.f32 %v14791_v53, %v5143_v54  ;;  %v5538_v23 = vmax.f32 %v5514_v18, 0.0  ;;  %v5515_v5 = vadd.f32 %v14920_v7, %v5479_v33  ;;  %v5480_v52 = vadd.f32 %v5433_v56, %v5311_v4  ;;  %v17156_v15 = vld [vmem:[#allocation17_spill] sm:$0xff]  ;;  %vm17159_vm4 = vmmov %vm17139_vm1 }
 0x35c   : > { %v15207_v6 = vpop.f32.mrf.mxu1  ;;  %10417 = vmatmul.mubr.msk.bf16.vlgmr.msra.gmra.mxu1 %vm17148_vm3, %v14629_v59  ;;  %v5145_v61 = vadd.f32 %v17150_v60, %v17149_v25  ;;  %v5845_v40 = vadd.f32 %v5834_v8, %v5833_v22  ;;  %v5810_v10 = vsub.f32 %v5798_v16, %v5537_v50  ;;  %v5435_v53 = vpop.f32.mrf.mxu0  ;;  %10411 = vmatmul.mubr.msk.bf16.gmra.mxu0 %vm17152_vm10, %v15203_v14  ;;  %v17157_v2 = vld [vmem:[#allocation25_spill] sm:$0xff]  ;;  %v17162_v8 = vld [vmem:[#allocation8_spill] sm:$0xff]  ;;  %vm17168_vm2 = vcmask 1043456   ;;  %vm17183_vm9 = vmmov %vm17148_vm3 }
 0x35d   : > { %10420 = vmatprep.mubr.msk.bf16.mxu1 %vm17151_vm14, %v17119_v13  ;;  %v17153_v59 = vsel %vm14931_vm13, %v14939_v58, %v14818_v42  ;;  %v5799_v4 = vsel %vm15121_vm7, %v5538_v23, 0.0  ;;  %v5539_v16 = vmax.f32 %v5515_v5, 0.0  ;;  %v5516_v18 = vadd.f32 %v14917_v28, %v5480_v52  ;;  %10443 = vmatpush3.bf16.msra.mxu1 %v15001_v9  ;;  %v17160_v42 = vld [vmem:[#allocation5_spill] sm:$0xff]  ;;  %v17163_v50 = vld [vmem:[#allocation4_spill] sm:$0xff]  ;;  %vm17164_vm13 = vmmov %vm17139_vm1 }
 0x35e   : > { %vm15227_vm0 = vcmp.lt.s32.totalorder %v17153_v59, 16  ;;  %v5481_v13 = vadd.f32 %v5435_v53, %v5312_v37  ;;  %v15234_v33 = vpop.f32.mrf.mxu1  ;;  %v17158_v22 = vpack.c.bf16 %v17156_v15, %v17157_v2  ;;  %v5146_v58 = vadd.f32 %v17161_v17, %v17160_v42  ;;  %5867 = vst.msk [vmem:[#allocation2 + $0xf0] sm:$0xff] %vm17164_vm13, %v5799_v4  ;;  %v5437_v5 = vpop.f32.mrf.mxu0  ;;  %10603 = vmatprep.subr.msk.bf16.mxu1 %vm17168_vm2, %v15214_v24  ;;  %v17170_v53 = vld [vmem:[#allocation82_spill] sm:$0xff]  ;;  %v17172_v42 = vld [vmem:[#allocation81_spill] sm:$0xff]  ;;  %vm17190_vm14 = vmmov %vm17148_vm3 }
 0x35f   : > { %v5147_v56 = vadd.f32 %v17163_v50, %v17162_v8  ;;  %v5313_v23 = vadd.f32 %v14820_v34, %v5144_v38  ;;  %v5822_v37 = vsel %vm15060_vm5, %v5810_v10, 0.0  ;;  %v17165_v52 = vsel %vm14945_vm8, %v14950_v11, %v14825_v21  ;;  %v17169_v10 = vld [vmem:[#allocation77_spill] sm:$0xff]  ;;  %vm17173_vm8 = vmmov %vm17148_vm3 }
 0x360   : > { %10430 = vmatprep.mubr.msk.bf16.mxu0 %vm17159_vm4, %v17158_v22  ;;  %vm15254_vm1 = vcmp.lt.s32.totalorder %v17165_v52, 16  ;;  %v5835_v25 = vmul.f32 %v5822_v37, %v5822_v37  ;;  %v5811_v34 = vsub.f32 %v5799_v4, %v5539_v16  ;;  %v5540_v38 = vmax.f32 %v5516_v18, 0.0  ;;  %v15261_v60 = vpop.f32.mrf.mxu1  ;;  %v5439_v15 = vpop.f32.mrf.mxu0  ;;  %v17178_v50 = vld [vmem:[#allocation65_spill] sm:$0xff]  ;;  %v17179_v37 = vld [vmem:[#allocation75_spill] sm:$0xff]  ;;  %vm17194_vm10 = vmmov %vm17148_vm3 }
 0x361   : > { %v5517_v49 = vadd.f32 %v14920_v7, %v5481_v13  ;;  %v5148_v62 = vadd.f32 %v17170_v53, %v17169_v10  ;;  %v5314_v59 = vadd.f32 %v14836_v26, %v5145_v61  ;;  %v5315_v21 = vadd.f32 %v14876_v1, %v5146_v58  ;;  %v17171_v13 = vld [vmem:[#allocation22_spill] sm:$0xff]  ;;  %v17177_v58 = vld [vmem:[#allocation3_spill] sm:$0xff] }
 0x362   : > { %v5482_v11 = vadd.f32 %v5437_v5, %v5313_v23  ;;  %v5846_v2 = vadd.f32 %v5845_v40, %v5835_v25  ;;  %v5823_v22 = vsel %vm15121_vm7, %v5811_v34, 0.0  ;;  %v5800_v4 = vsel %vm15177_vm15, %v5540_v38, 0.0  ;;  %v15271_v18 = vpop.f32.mrf.mxu1  ;;  %v5443_v61 = vpop.f32.mrf.mxu0  ;;  %vm17180_vm7 = vmmov %vm17148_vm3 }
 0x363   : > { %v5541_v16 = vmax.f32 %v5517_v49, 0.0  ;;  %v5149_v17 = vadd.f32 %v17172_v42, %v17171_v13  ;;  %v5836_v8 = vmul.f32 %v5823_v22, %v5823_v22  ;;  %5868 = vst.msk [vmem:[#allocation2 + $0xf8] sm:$0xff] %vm17173_vm8, %v5800_v4  ;;  %v5483_v1 = vadd.f32 %v5439_v15, %v5314_v59  ;;  %v17184_v59 = vld [vmem:[#allocation49_spill] sm:$0xff] }
 0x364   : > { %v5518_v26 = vadd.f32 %v14917_v28, %v5482_v11  ;;  %vm15282_vm5 = vcmp.lt.s32.totalorder %v17174_v48, 16  ;;  %v5150_v23 = vadd.f32 %v17178_v50, %v17177_v58  ;;  %v5316_v5 = vadd.f32 %v17179_v37, %v5147_v56  ;;  %v15289_v34 = vpop.f32.mrf.mxu1  ;;  %10421 = vmatmul.mubr.msk.bf16.gmra.mxu1 %vm17180_vm7, %v17126_v0  ;;  %v5445_v56 = vpop.f32.mrf.mxu0  ;;  %v7874_v42 = vld [vmem:[#allocation2 + $0xe1] sm:$0xff] }
 0x365   : > { %v5812_v52 = vsub.f32 %v5800_v4, %v5541_v16  ;;  %v5484_v25 = vadd.f32 %v5443_v61, %v5315_v21  ;;  %v5151_v38 = vadd.f32 %v17182_v12, %v17181_v57  ;;  %v5847_v49 = vadd.f32 %v5846_v2, %v5836_v8  ;;  %10424 = vmatprep.mubr.msk.bf16.mxu1 %vm17183_vm9, %v15203_v14  ;;  %v17185_v21 = vld [vmem:[#allocation62_spill] sm:$0xff]  ;;  %v17188_v14 = vld [vmem:[#allocation13_spill] sm:$0xff]  ;;  %v17191_v8 = vld [vmem:[#allocation55_spill] sm:$0xff] }
 0x366   : > { %v5542_v10 = vmax.f32 %v5518_v26, 0.0  ;;  %v5519_v53 = vadd.f32 %v14920_v7, %v5483_v1  ;;  %v17186_v11 = vpack.c.bf16 %v17184_v59, %v17185_v21  ;;  %v5317_v0 = vadd.f32 %v14960_v36, %v5148_v62  ;;  %v15311_v4 = vpop.f32.mrf.mxu1  ;;  %v17187_v16 = vld [vmem:[#allocation74_spill] sm:$0xff]  ;;  %v17192_v26 = vld [vmem:[#allocation79_spill] sm:$0xff]  ;;  %v5447_v61 = vpop.f32.mrf.mxu0 }
 0x367   : > { %v5824_v15 = vsel %vm15177_vm15, %v5812_v52, 0.0  ;;  %v5520_v22 = vadd.f32 %v14917_v28, %v5484_v25  ;;  %v5485_v2 = vadd.f32 %v5445_v56, %v5316_v5  ;;  %v17189_v13 = vpack.c.bf16 %v17187_v16, %v17188_v14  ;;  %vm17193_vm15 = vmmov %vm17168_vm2  ;;  %v7873_v25 = vld [vmem:[#allocation2 + $0xd9] sm:$0xff] }
 0x368   : > { %10431 = vmatmul.mubr.msk.bf16.vlgmr.msra.gmra.mxu0 %vm17148_vm3, %v17186_v11  ;;  %v5152_v1 = vadd.f32 %v17192_v26, %v17191_v8  ;;  %v5837_v36 = vmul.f32 %v5824_v15, %v5824_v15  ;;  %v5801_v27 = vsel %vm15227_vm0, %v5542_v10, 0.0  ;;  %v5543_v62 = vmax.f32 %v5519_v53, 0.0  ;;  %v15327_v37 = vpop.f32.mrf.mxu1  ;;  %v8005_v57 = vld [vmem:[#allocation2 + $0xd2] sm:$0xff]  ;;  %v5449_v56 = vpop.f32.mrf.mxu0  ;;  %vm17203_vm2 = vmmov %vm17148_vm3 }
 0x369   : > { %10457 = vmatpush3.bf16.msra.mxu0 %v15004_v3  ;;  %10434 = vmatprep.mubr.msk.bf16.mxu0 %vm17190_vm14, %v17189_v13  ;;  %v5318_v3 = vadd.f32 %v14994_v43, %v5149_v17  ;;  %5869 = vst.msk [vmem:[#allocation2 + $0x100] sm:$0xff] %vm17194_vm10, %v5801_v27  ;;  %v5544_v48 = vmax.f32 %v5520_v22, 0.0  ;;  %v5521_v58 = vadd.f32 %v14920_v7, %v5485_v2  ;;  %vm17195_vm4 = vnez %v17105_v63  ;;  %v17199_v43 = vld [vmem:[#allocation23_spill] sm:$0xff]  ;;  %v17200_v17 = vld [vmem:[#allocation50_spill] sm:$0xff]  ;;  %v17201_v15 = vld [vmem:[#allocation60_spill] sm:$0xff] }
 0x36a   : > { %10604 = vmatprep.subr.msk.bf16.mxu0 %vm17193_vm15, %v15296_v46  ;;  %v5486_v50 = vadd.f32 %v5447_v61, %v5317_v0  ;;  %v17196_v5 = vsel %vm17195_vm4, %v15046_v47, %v14978_v30  ;;  %v5153_v12 = vadd.f32 %v17200_v17, %v17199_v43  ;;  %v5848_v10 = vadd.f32 %v5847_v49, %v5837_v36  ;;  %v15345_v11 = vpop.f32.mrf.mxu1  ;;  %v8004_v0 = vld [vmem:[#allocation2 + $0xca] sm:$0xff]  ;;  %v5453_v14 = vpop.f32.mrf.mxu0  ;;  %vm17218_vm9 = vmmov %vm17193_vm15 }
 0x36b   : > { %vm15334_vm13 = vcmp.lt.s32.totalorder %v17196_v5, 16  ;;  %v5813_v53 = vsub.f32 %v5801_v27, %v5543_v62  ;;  %v15340_v59 = vpack.c.bf16 %v7874_v42, %v7873_v25  ;;  %v5802_v63 = vsel %vm15254_vm1, %v5544_v48, 0.0  ;;  %v17202_v22 = vld [vmem:[#allocation66_spill] sm:$0xff]  ;;  %vm17243_vm4 = vmmov %vm17218_vm9 }
 0x36c   : > { %v5545_v21 = vmax.f32 %v5521_v58, 0.0  ;;  %v5522_v30 = vadd.f32 %v14917_v28, %v5486_v50  ;;  %v5487_v47 = vadd.f32 %v5449_v56, %v5318_v3  ;;  %v5154_v2 = vadd.f32 %v17202_v22, %v17201_v15  ;;  %5870 = vst.msk [vmem:[#allocation2 + $0x108] sm:$0xff] %vm17203_vm2, %v5802_v63  ;;  %v15363_v54 = vpop.f32.mrf.mxu1  ;;  %v5455_v58 = vpop.f32.mrf.mxu0  ;;  %v17214_v50 = vld [vmem:[#allocation51_spill] sm:$0xff]  ;;  %v17215_v5 = vld [vmem:[#allocation18_spill] sm:$0xff]  ;;  %v17227_v22 = vld [vmem:[#allocation36_spill] sm:$0xff] }
 0x36d   : > { %v5319_v16 = vadd.f32 %v15031_v39, %v5150_v23  ;;  %v5825_v49 = vsel %vm15227_vm0, %v5813_v53, 0.0  ;;  %v8012_v13 = vpack.c.bf16 %v8005_v57, %v8004_v0  ;;  %v17204_v42 = vsel %vm15087_vm6, %v15065_v19, %v14991_v45  ;;  %vm17207_vm0 = vmmov %vm17203_vm2  ;;  %v17208_v23 = vld [vmem:[#allocation90_spill] sm:$0xff]  ;;  %v17210_v45 = vld [vmem:[#allocation39_spill] sm:$0xff] }
 0x36e   : > { %vm15358_vm8 = vcmp.lt.s32.totalorder %v17204_v42, 16  ;;  %v5838_v26 = vmul.f32 %v5825_v49, %v5825_v49  ;;  %v5814_v36 = vsub.f32 %v5802_v63, %v5545_v21  ;;  %v5546_v27 = vmax.f32 %v5522_v30, 0.0  ;;  %10425 = vmatmul.mubr.msk.bf16.gmra.mxu1 %vm17207_vm0, %v15340_v59  ;;  %v17211_v19 = vld [vmem:[#allocation37_spill] sm:$0xff]  ;;  %vm17213_vm6 = vmmov %vm17207_vm0  ;;  %v15383_v53 = vpop.f32.mrf.mxu1  ;;  %v17220_v56 = vld [vmem:[#allocation35_spill] sm:$0xff] }
 0x36f   : > { %v5523_v39 = vadd.f32 %v14920_v7, %v5487_v47  ;;  %v5320_v62 = vadd.f32 %v17208_v23, %v5151_v38  ;;  %v5321_v61 = vadd.f32 %v17209_v41, %v5152_v1  ;;  %v5488_v3 = vadd.f32 %v5453_v14, %v5319_v16  ;;  %vm17217_vm7 = vmmov %vm17207_vm0  ;;  %v17221_v63 = vld [vmem:[#allocation28_spill] sm:$0xff]  ;;  %v5457_v47 = vpop.f32.mrf.mxu0  ;;  %v17228_v16 = vld [vmem:[#allocation83_spill] sm:$0xff] }
 0x370   : > { %v17212_v48 = vpack.c.bf16 %v17210_v45, %v17211_v19  ;;  %v17216_v25 = vpack.c.bf16 %v17214_v50, %v17215_v5  ;;  %v8452_v57 = vsel %vm17218_vm9, %v15214_v24, 0  ;;  %v5849_v43 = vadd.f32 %v5848_v10, %v5838_v26  ;;  %vm17219_vm3 = vmmov %vm17207_vm0  ;;  %v17229_v14 = vld [vmem:[#allocation85_spill] sm:$0xff]  ;;  %v17231_v23 = vld [vmem:[#allocation84_spill] sm:$0xff] }
 0x371   : > { %v5826_v38 = vsel %vm15254_vm1, %v5814_v36, 0.0  ;;  %v5803_v1 = vsel %vm15282_vm5, %v5546_v27, 0.0  ;;  %v5547_v17 = vmax.f32 %v5523_v39, 0.0  ;;  %v5155_v21 = vadd.f32 %v17221_v63, %v17220_v56  ;;  %vm17222_vm14 = vmmov %vm17207_vm0  ;;  %v15402_v36 = vpop.f32.mrf.mxu1  ;;  %v8007_v27 = vld [vmem:[#allocation2 + $0xe2] sm:$0xff]  ;;  %v17230_v39 = vld [vmem:[#allocation20_spill] sm:$0xff] }
 0x372   : > { %10444 = vmatprep.mubr.msk.bf16.mxu1 %vm17213_vm6, %v17212_v48  ;;  %10435 = vmatmul.mubr.msk.bf16.gmra.mxu0 %vm17217_vm7, %v17216_v25  ;;  %v5839_v30 = vmul.f32 %v5826_v38, %v5826_v38  ;;  %5871 = vst.msk [vmem:[#allocation2 + $0x110] sm:$0xff] %vm17222_vm14, %v5803_v1  ;;  %v5524_v24 = vadd.f32 %v14917_v28, %v5488_v3  ;;  %v17232_v45 = vld [vmem:[#allocation88_spill] sm:$0xff]  ;;  %vm17241_vm15 = vmmov %vm17207_vm0 }
 0x373   : > { %10438 = vmatprep.mubr.msk.bf16.mxu0 %vm17219_vm3, %v8012_v13  ;;  %v5489_v10 = vadd.f32 %v5455_v58, %v5320_v62  ;;  %v17224_v0 = vsel %vm15105_vm11, %v15092_v51, %v15025_v31  ;;  %v5156_v49 = vadd.f32 %v17228_v16, %v17227_v22  ;;  %v5322_v13 = vadd.f32 %v17229_v14, %v5153_v12  ;;  %v5459_v51 = vpop.f32.mrf.mxu0  ;;  %v8006_v50 = vld [vmem:[#allocation2 + $0xda] sm:$0xff]  ;;  %vm17233_vm11 = vmmov %vm17207_vm0 }
 0x374   : > { %vm15395_vm1 = vcmp.lt.s32.totalorder %v17224_v0, 16  ;;  %v5815_v42 = vsub.f32 %v5803_v1, %v5547_v17  ;;  %v5490_v26 = vadd.f32 %v5457_v47, %v5321_v61  ;;  %v5157_v62 = vadd.f32 %v17231_v23, %v17230_v39  ;;  %v15411_v61 = vpop.f32.mrf.mxu1  ;;  %v15425_v47 = vld [vmem:[%s16355_s3 + $0xc] sm:$0xf]  ;;  %v17239_v22 = vld [vmem:[#allocation57_spill] sm:$0xff]  ;;  %vm17242_vm10 = vmmov %vm17207_vm0 }
 0x375   : > { %v5850_v41 = vadd.f32 %v5849_v43, %v5839_v30  ;;  %v5548_v3 = vmax.f32 %v5524_v24, 0.0  ;;  %v5525_v31 = vadd.f32 %v14920_v7, %v5489_v10  ;;  %v5323_v19 = vadd.f32 %v17232_v45, %v5154_v2  ;;  %v5463_v38 = vpop.f32.mrf.mxu0  ;;  %v17234_v30 = vld [vmem:[#allocation67_spill] sm:$0xff]  ;;  %vm17247_vm2 = vmmov %vm17207_vm0 }
 0x376   : > { %v5827_v48 = vsel %vm15282_vm5, %v5815_v42, 0.0  ;;  %v5526_v12 = vadd.f32 %v14917_v28, %v5490_v26  ;;  %v5491_v58 = vadd.f32 %v5459_v51, %v5322_v13  ;;  %v8013_v1 = vpack.c.bf16 %v8007_v27, %v8006_v50  ;;  %v10222_v63 = vpop.f32.mrf.mxu1  ;;  %v17235_v24 = vld [vmem:[#allocation59_spill] sm:$0xff]  ;;  %vm17237_vm5 = vmmov %vm17207_vm0  ;;  %v8315_v51 = vld [vmem:[#allocation2 + $0xde] sm:$0xff] }
 0x377   : > { %v5840_v5 = vmul.f32 %v5827_v48, %v5827_v48  ;;  %v5804_v25 = vsel %vm15334_vm13, %v5548_v3, 0.0  ;;  %v5549_v43 = vmax.f32 %v5525_v31, 0.0  ;;  %v5324_v17 = vadd.f32 %v15166_v29, %v5155_v21  ;;  %v17238_v21 = vld [vmem:[#allocation78_spill] sm:$0xff]  ;;  %v5465_v14 = vpop.f32.mrf.mxu0  ;;  %v17244_v23 = vld [vmem:[#allocation43_spill] sm:$0xff]  ;;  %vm17248_vm6 = vmmov %vm17243_vm4 }
 0x378   : > { %5872 = vst.msk [vmem:[#allocation2 + $0x118] sm:$0xff] %vm17233_vm11, %v5804_v25  ;;  %v5550_v2 = vmax.f32 %v5526_v12, 0.0  ;;  %v5527_v40 = vadd.f32 %v14920_v7, %v5491_v58  ;;  %v5492_v56 = vadd.f32 %v5463_v38, %v5323_v19  ;;  %v17236_v10 = vpack.c.bf16 %v17234_v30, %v17235_v24  ;;  %v8138_v31 = vld [vmem:[#allocation2 + $0xd3] sm:$0xff]  ;;  %vm17256_vm7 = vmmov %vm17207_vm0 }
 0x379   : > { %v5851_v9 = vadd.f32 %v5850_v41, %v5840_v5  ;;  %v5816_v0 = vsub.f32 %v5804_v25, %v5549_v43  ;;  %v15428_v29 = vadd.f32 %v10222_v63, %v15207_v6  ;;  %v17240_v16 = vpack.c.bf16 %v17238_v21, %v17239_v22  ;;  %v6073_v6 = vpop.f32.mrf.mxu1  ;;  %v17245_v41 = vld [vmem:[#allocation71_spill] sm:$0xff]  ;;  %v5467_v12 = vpop.f32.mrf.mxu0  ;;  %vm17257_vm12 = vmmov %vm17207_vm0 }
 0x37a   : > { %10445 = vmatmul.mubr.msk.bf16.vlgmr.msra.gmra.mxu1 %vm17237_vm5, %v17236_v10  ;;  %10439 = vmatmul.mubr.msk.bf16.gmra.mxu0 %vm17242_vm10, %v8013_v1  ;;  %v8573_v13 = vsel %vm17243_vm4, %v15296_v46, 0  ;;  %v5805_v42 = vsel %vm15358_vm8, %v5550_v2, 0.0  ;;  %v5551_v26 = vmax.f32 %v5527_v40, 0.0  ;;  %v5528_v27 = vadd.f32 %v14917_v28, %v5492_v56  ;;  %v8317_v38 = vld [vmem:[#allocation2 + $0xee] sm:$0xff]  ;;  %vm17258_vm9 = vmmov %vm17207_vm0 }
 0x37b   : > { %10448 = vmatprep.mubr.msk.bf16.mxu1 %vm17241_vm15, %v17240_v16  ;;  %v5493_v39 = vadd.f32 %v5465_v14, %v5324_v17  ;;  %v17246_v3 = vpack.c.bf16 %v17244_v23, %v17245_v41  ;;  %10471 = vmatpush3.bf16.msra.mxu1 %v8452_v57  ;;  %v5325_v45 = vadd.f32 %v15187_v35, %v5156_v49  ;;  %v5828_v19 = vsel %vm15334_vm13, %v5816_v0, 0.0  ;;  %v10223_v35 = vpop.f32.mrf.mxu1  ;;  %v8137_v49 = vld [vmem:[#allocation2 + $0xcb] sm:$0xff]  ;;  %v5469_v25 = vpop.f32.mrf.mxu0  ;;  %vm17249_vm13 = vmmov %vm17207_vm0  ;;  %v17253_v16 = vld [vmem:[#allocation9_spill] sm:$0xff] }
 0x37c   : > { %v5326_v46 = vadd.f32 %v15200_v55, %v5157_v62  ;;  %5873 = vst.msk [vmem:[#allocation2 + $0x120] sm:$0xff] %vm17207_vm0, %v5805_v42  ;;  %v15450_v48 = vadd.f32 %v6073_v6, %v15234_v33  ;;  %10605 = vmatprep.subr.msk.bf16.mxu1 %vm17248_vm6, %v15425_v47  ;;  %v5841_v58 = vmul.f32 %v5828_v19, %v5828_v19  ;;  %v5552_v50 = vmax.f32 %v5528_v27, 0.0  ;;  %v8314_v55 = vld [vmem:[#allocation2 + $0xd6] sm:$0xff]  ;;  %vm17259_vm3 = vmmov %vm17207_vm0 }
 0x37d   : > { %10458 = vmatprep.mubr.msk.bf16.mxu0 %vm17247_vm2, %v17246_v3  ;;  %v5817_v57 = vsub.f32 %v5805_v42, %v5551_v26  ;;  %v5529_v5 = vadd.f32 %v14920_v7, %v5493_v39  ;;  %v5494_v62 = vadd.f32 %v5467_v12, %v5325_v45  ;;  %v15456_v52 = vadd.f32 %v10223_v35, %v15261_v60  ;;  %v6076_v56 = vpop.f32.mrf.mxu1  ;;  %v15467_v10 = vpop.f32.mrf.mxu0  ;;  %v15485_v42 = vld [vmem:[%s16355_s3 + $0x10] sm:$0xf]  ;;  %vm17260_vm14 = vmmov %vm17243_vm4  ;;  %v8318_v35 = vld [vmem:[#allocation2 + $0xf6] sm:$0xff] }
 0x37e   : > { %v8145_v43 = vpack.c.bf16 %v8138_v31, %v8137_v49  ;;  %v8325_v33 = vpack.c.bf16 %v8315_v51, %v8314_v55  ;;  %v5852_v1 = vadd.f32 %v5851_v9, %v5841_v58  ;;  %v5806_v2 = vsel %vm15395_vm1, %v5552_v50, 0.0  ;;  %v8316_v9 = vld [vmem:[#allocation2 + $0xe6] sm:$0xff]  ;;  %vm17261_vm11 = vmmov %vm17207_vm0  ;;  %v8319_v51 = vld [vmem:[#allocation2 + $0xfe] sm:$0xff] }
 0x37f   : > { %v5829_v17 = vsel %vm15358_vm8, %v5817_v57, 0.0  ;;  %v5553_v40 = vmax.f32 %v5529_v5, 0.0  ;;  %5874 = vst.msk [vmem:[#allocation2 + $0x128] sm:$0xff] %vm17249_vm13, %v5806_v2  ;;  %v5530_v30 = vadd.f32 %v14917_v28, %v5494_v62  ;;  %v5495_v60 = vadd.f32 %v5469_v25, %v5326_v46  ;;  %v10226_v22 = vpop.f32.mrf.mxu1  ;;  %v17254_v28 = vld [vmem:[#allocation80_spill] sm:$0xff]  ;;  %v8140_v31 = vld [vmem:[#allocation2 + $0xe3] sm:$0xff]  ;;  %v8321_v58 = vld [vmem:[#allocation2 + $0x10e] sm:$0xff] }
 0x380   : > { %v5842_v63 = vmul.f32 %v5829_v17, %v5829_v17  ;;  %v15465_v24 = vadd.f32 %v6076_v56, %v15271_v18  ;;  %vm15474_vm8 = vcmp.lt.s32.totalorder %v5759_v44, 16  ;;  %v17255_v14 = vpack.c.bf16 %v17253_v16, %v17254_v28  ;;  %v15492_v44 = vpop.f32.mrf.mxu0  ;;  %v8293_v5 = vld [vmem:[#allocation2 + $0xc5] sm:$0xff]  ;;  %vm17263_vm5 = vmmov %vm17207_vm0  ;;  %v8536_v16 = vld [vmem:[#allocation2 + $0xcf] sm:$0xff] }
 0x381   : > { %v5818_v0 = vsub.f32 %v5806_v2, %v5553_v40  ;;  %v8326_v18 = vpack.c.bf16 %v8317_v38, %v8316_v9  ;;  %v5554_v27 = vmax.f32 %v5530_v30, 0.0  ;;  %v5531_v20 = vadd.f32 %v14920_v7, %v5495_v60  ;;  %v6089_v6 = vpop.f32.mrf.mxu1  ;;  %vm17264_vm15 = vmmov %vm17207_vm0  ;;  %v8296_v30 = vld [vmem:[#allocation2 + $0xdd] sm:$0xff] }
 0x382   : > { %10449 = vmatmul.mubr.msk.bf16.gmra.mxu1 %vm17256_vm7, %v17255_v14  ;;  %v5853_v26 = vadd.f32 %v5852_v1, %v5842_v63  ;;  %v15489_v32 = vadd.f32 %v10226_v22, %v15289_v34  ;;  %10459 = vmatmul.mubr.msk.bf16.vlgmr.msra.gmra.mxu0 %vm17258_vm9, %v8325_v33  ;;  %v15501_v34 = vadd.f32 %v6089_v6, %v15311_v4  ;;  %v15503_v3 = vpop.f32.mrf.mxu0  ;;  %v8139_v4 = vld [vmem:[#allocation2 + $0xdb] sm:$0xff]  ;;  %vm17265_vm10 = vmmov %vm17207_vm0 }
 0x383   : > { %10452 = vmatprep.mubr.msk.bf16.mxu1 %vm17257_vm12, %v8145_v43  ;;  %v5830_v39 = vsel %vm15395_vm1, %v5818_v0, 0.0  ;;  %10485 = vmatpush3.bf16.msra.mxu0 %v8573_v13  ;;  %v5807_v7 = vsel %vm15474_vm8, %v5554_v27, 0.0  ;;  %v5555_v41 = vmax.f32 %v5531_v20, 0.0  ;;  %v10227_v15 = vpop.f32.mrf.mxu1  ;;  %v8294_v13 = vld [vmem:[#allocation2 + $0xcd] sm:$0xff]  ;;  %v8146_v50 = vpack.c.bf16 %v8140_v31, %v8139_v4  ;;  %vm17262_vm1 = vmmov %vm17207_vm0  ;;  %v8323_v0 = vld [vmem:[#allocation2 + $0x11e] sm:$0xff] }
 0x384   : > { %10462 = vmatprep.mubr.msk.bf16.mxu0 %vm17259_vm3, %v8326_v18  ;;  %v5843_v23 = vmul.f32 %v5830_v39, %v5830_v39  ;;  %10606 = vmatprep.subr.msk.bf16.mxu0 %vm17260_vm14, %v15485_v42  ;;  %5875 = vst.msk [vmem:[#allocation2 + $0x130] sm:$0xff] %vm17261_vm11, %v5807_v7  ;;  %v15509_v19 = vadd.f32 %v10227_v15, %v15327_v37  ;;  %v15511_v12 = vpop.f32.mrf.mxu0  ;;  %v8320_v37 = vld [vmem:[#allocation2 + $0x106] sm:$0xff]  ;;  %v8295_v22 = vld [vmem:[#allocation2 + $0xd5] sm:$0xff]  ;;  %vm17267_vm2 = vmmov %vm17207_vm0 }
 0x385   : > { %v5819_v46 = vsub.f32 %v5807_v7, %v5555_v41  ;;  %v6092_v57 = vpop.f32.mrf.mxu1  ;;  %v8305_v25 = vpack.c.bf16 %v8294_v13, %v8293_v5  ;;  %v8327_v43 = vpack.c.bf16 %v8319_v51, %v8318_v35  ;;  %v8328_v1 = vpack.c.bf16 %v8321_v58, %v8320_v37  ;;  %v15552_v15 = vld [vmem:[%s16355_s3 + $0x14] sm:$0xf]  ;;  %vm17268_vm6 = vmmov %vm17207_vm0  ;;  %v8301_v37 = vld [vmem:[#allocation2 + $0x105] sm:$0xff] }
 0x386   : > { %v5854_v45 = vadd.f32 %v5853_v26, %v5843_v23  ;;  %v15516_v55 = vadd.f32 %v6092_v57, %v15345_v11  ;;  %v15518_v62 = vpop.f32.mrf.mxu0  ;;  %v8306_v18 = vpack.c.bf16 %v8296_v30, %v8295_v22  ;;  %v8297_v26 = vld [vmem:[#allocation2 + $0xe5] sm:$0xff]  ;;  %vm17269_vm13 = vmmov %vm17207_vm0  ;;  %v8302_v58 = vld [vmem:[#allocation2 + $0x10d] sm:$0xff] }
 0x387   : > { %v5831_v49 = vsel %vm15474_vm8, %v5819_v46, 0.0  ;;  %v10230_v38 = vpop.f32.mrf.mxu1  ;;  %v8535_v23 = vld [vmem:[#allocation2 + $0xc7] sm:$0xff]  ;;  %vm17270_vm8 = vmmov %vm17243_vm4  ;;  %v8538_v57 = vld [vmem:[#allocation2 + $0xdf] sm:$0xff] }
 0x388   : > { %v5844_v33 = vmul.f32 %v5831_v49, %v5831_v49  ;;  %v15522_v17 = vadd.f32 %v10230_v38, %v15363_v54  ;;  %v15525_v2 = vpop.f32.mrf.mxu0  ;;  %v8298_v54 = vld [vmem:[#allocation2 + $0xed] sm:$0xff]  ;;  %v8547_v31 = vpack.c.bf16 %v8536_v16, %v8535_v23  ;;  %v8299_v5 = vld [vmem:[#allocation2 + $0xf5] sm:$0xff]  ;;  %v5832_v38 = vld [vmem:[%s11474_s7] sm:$0x1] }
 0x389   : > { %v6105_v40 = vpop.f32.mrf.mxu1  ;;  %v8307_v39 = vpack.c.bf16 %v8298_v54, %v8297_v26  ;;  %v8540_v35 = vld [vmem:[#allocation2 + $0xef] sm:$0xff]  ;;  %vm17272_vm7 = vmmov %vm17243_vm4  ;;  %v9991_v22 = vld [vmem:[%s16355_s3 + $0x18] sm:$0xf] }
 0x38a   : > { %10453 = vmatmul.mubr.msk.bf16.gmra.mxu1 %vm17262_vm1, %v8146_v50  ;;  %10463 = vmatmul.mubr.msk.bf16.gmra.mxu0 %vm17264_vm15, %v8327_v43  ;;  %v5855_v11 = vadd.f32 %v5854_v45, %v5844_v33  ;;  %v15530_v56 = vadd.f32 %v6105_v40, %v15383_v53  ;;  %v15532_v63 = vpop.f32.mrf.mxu0  ;;  %v8322_v53 = vld [vmem:[#allocation2 + $0x116] sm:$0xff]  ;;  %v8839_v30 = vsel %vm17272_vm7, %v15485_v42, 0  ;;  %vm17273_vm12 = vmmov %vm17207_vm0  ;;  %v8542_v26 = vld [vmem:[#allocation2 + $0xff] sm:$0xff] }
 0x38b   : > { %10472 = vmatprep.mubr.msk.bf16.mxu1 %vm17263_vm5, %v8305_v25  ;;  %10466 = vmatprep.mubr.msk.bf16.mxu0 %vm17265_vm10, %v8328_v1  ;;  %v10231_v9 = vpop.f32.mrf.mxu1  ;;  %v8329_v6 = vpack.c.bf16 %v8323_v0, %v8322_v53  ;;  %v8300_v45 = vld [vmem:[#allocation2 + $0xfd] sm:$0xff]  ;;  %vm17274_vm9 = vmmov %vm17207_vm0 }
 0x38c   : > { %v5856_v60 = vrot.slane %v5855_v11, 4  ;;  %v15535_v8 = vadd.f32 %v10231_v9, %v15402_v36  ;;  %v15537_v21 = vpop.f32.mrf.mxu0  ;;  %v8706_v36 = vsel %vm17243_vm4, %v15425_v47, 0  ;;  %v8308_v43 = vpack.c.bf16 %v8300_v45, %v8299_v5  ;;  %v8537_v33 = vld [vmem:[#allocation2 + $0xd7] sm:$0xff]  ;;  %vm17275_vm3 = vmmov %vm17207_vm0  ;;  %v8543_v45 = vld [vmem:[#allocation2 + $0x107] sm:$0xff] }
 0x38d   : > { %v6108_v14 = vpop.f32.mrf.mxu1  ;;  %v8548_v40 = vpack.c.bf16 %v8538_v57, %v8537_v33  ;;  %vm17276_vm14 = vmmov %vm17207_vm0  ;;  %v8802_v33 = vld [vmem:[#allocation2 + $0xe0] sm:$0xff] }
 0x38e   : > { %v5857_v28 = vadd.f32 %v5856_v60, %v5855_v11  ;;  %v15540_v27 = vadd.f32 %v6108_v14, %v15411_v61  ;;  %v15542_v20 = vpop.f32.mrf.mxu0  ;;  %v8309_v11 = vpack.c.bf16 %v8302_v58, %v8301_v37  ;;  %v8539_v60 = vld [vmem:[#allocation2 + $0xe7] sm:$0xff]  ;;  %v8304_v14 = vld [vmem:[#allocation2 + $0x11d] sm:$0xff]  ;;  %vm17277_vm11 = vmmov %vm17243_vm4 }
 0x38f   : > { %v15546_v41 = vpop.f32.mrf.mxu1  ;;  %v8549_v0 = vpack.c.bf16 %v8540_v35, %v8539_v60  ;;  %vm17279_vm1 = vmmov %vm17207_vm0  ;;  %v8801_v60 = vld [vmem:[#allocation2 + $0xd8] sm:$0xff] }
 0x390   : > { %17266 = vst [vmem:[#allocation11_spill] sm:$0xff] %v15540_v27  ;;  %v5858_v7 = vrot.slane %v5857_v28, 2  ;;  %v15555_v61 = vpop.f32.mrf.mxu0  ;;  %vm17280_vm5 = vmmov %vm17207_vm0 }
 0x391   : > { %v15558_v51 = vpop.f32.mrf.mxu1  ;;  %vm17281_vm15 = vmmov %vm17207_vm0 }
 0x392   : > { %10473 = vmatmul.mubr.msk.bf16.vlgmr.msra.gmra.mxu1 %vm17267_vm2, %v8306_v18  ;;  %10467 = vmatmul.mubr.msk.bf16.gmra.mxu0 %vm17268_vm6, %v8329_v6  ;;  %v5859_v13 = vadd.f32 %v5858_v7, %v5857_v28  ;;  %v15561_v47 = vpop.f32.mrf.mxu0  ;;  %v8544_v6 = vld [vmem:[#allocation2 + $0x10f] sm:$0xff]  ;;  %v8541_v7 = vld [vmem:[#allocation2 + $0xf7] sm:$0xff]  ;;  %vm17283_vm10 = vmmov %vm17207_vm0 }
 0x393   : > { %10476 = vmatprep.mubr.msk.bf16.mxu1 %vm17207_vm0, %v8307_v39  ;;  %10486 = vmatprep.mubr.msk.bf16.mxu0 %vm17269_vm13, %v8547_v31  ;;  %v15565_v4 = vpop.f32.mrf.mxu1  ;;  %v8303_v39 = vld [vmem:[#allocation2 + $0x115] sm:$0xff]  ;;  %v8551_v58 = vpack.c.bf16 %v8544_v6, %v8543_v45  ;;  %vm17288_vm2 = vmmov %vm17207_vm0 }
 0x394   : > { %10499 = vmatpush3.bf16.msra.mxu1 %v8706_v36  ;;  %v5860_v46 = vrot.slane %v5859_v13, 1  ;;  %v15567_v50 = vpop.f32.mrf.mxu0  ;;  %v8310_v36 = vpack.c.bf16 %v8304_v14, %v8303_v39  ;;  %v15629_v39 = vld [vmem:[%s16355_s3 + $0x1c] sm:$0xf]  ;;  %vm17290_vm6 = vmmov %vm17207_vm0 }
 0x395   : > { %10607 = vmatprep.subr.msk.bf16.mxu1 %vm17270_vm8, %v15552_v15  ;;  %17271 = vst [vmem:[#allocation12_spill] sm:$0xff] %v15567_v50  ;;  %v15569_v25 = vpop.f32.mrf.mxu1  ;;  %vm17291_vm13 = vmmov %vm17207_vm0  ;;  %v8809_v50 = vld [vmem:[#allocation2 + $0x118] sm:$0xff] }
 0x396   : > { %v5861_v49 = vadd.f32 %v5860_v46, %v5859_v13  ;;  %v15572_v1 = vpop.f32.mrf.mxu0  ;;  %v8550_v13 = vpack.c.bf16 %v8542_v26, %v8541_v7  ;;  %v8813_v26 = vpack.c.bf16 %v8802_v33, %v8801_v60  ;;  %vm17293_vm8 = vmmov %vm17243_vm4  ;;  %v8804_v7 = vld [vmem:[#allocation2 + $0xf0] sm:$0xff]  ;;  %v8803_v33 = vld [vmem:[#allocation2 + $0xe8] sm:$0xff] }
 0x397   : > { %v15576_v54 = vpop.f32.mrf.mxu1  ;;  %v8814_v60 = vpack.c.bf16 %v8804_v7, %v8803_v33  ;;  %vm17295_vm7 = vmmov %vm17243_vm4  ;;  %v8808_v33 = vld [vmem:[#allocation2 + $0x110] sm:$0xff] }
 0x398   : > { %v5862_v9 = vadd.f32 %v5861_v49, %v5832_v38  ;;  %v15583_v16 = vpop.f32.mrf.mxu0 }
 0x399   : > { %v15587_v28 = vpop.f32.mrf.mxu1 }
 0x39a   : > { %10477 = vmatmul.mubr.msk.bf16.gmra.mxu1 %vm17273_vm12, %v8308_v43  ;;  %10487 = vmatmul.mubr.msk.bf16.vlgmr.msra.gmra.mxu0 %vm17275_vm3, %v8548_v40  ;;  %5863 = vst [vmem:[%s11474_s7] sm:$0x1] %v5862_v9  ;;  %v15590_v42 = vpop.f32.mrf.mxu0  ;;  %v8546_v43 = vld [vmem:[#allocation2 + $0x11f] sm:$0xff]  ;;  %v8972_v9 = vsel %vm17243_vm4, %v15552_v15, 0  ;;  %vm17296_vm12 = vmmov %vm17207_vm0 }
 0x39b   : > { %10480 = vmatprep.mubr.msk.bf16.mxu1 %vm17274_vm9, %v8309_v11  ;;  %10513 = vmatpush3.bf16.msra.mxu0 %v8839_v30  ;;  %v15593_v18 = vpop.f32.mrf.mxu1  ;;  %v8545_v11 = vld [vmem:[#allocation2 + $0x117] sm:$0xff]  ;;  %vm17297_vm9 = vmmov %vm17207_vm0 }
 0x39c   : > { %10490 = vmatprep.mubr.msk.bf16.mxu0 %vm17276_vm14, %v8549_v0  ;;  %10608 = vmatprep.subr.msk.bf16.mxu0 %vm17277_vm11, %v9991_v22  ;;  %v15595_v53 = vpop.f32.mrf.mxu0  ;;  %v8552_v30 = vpack.c.bf16 %v8546_v43, %v8545_v11  ;;  %vm17298_vm3 = vmmov %vm17207_vm0 }
 0x39d   : > { %v15597_v23 = vpop.f32.mrf.mxu1  ;;  %vm17299_vm14 = vmmov %vm17207_vm0 }
 0x39e   : > { %v15599_v31 = vpop.f32.mrf.mxu0  ;;  %vm17300_vm11 = vmmov %vm17243_vm4 }
 0x39f   : > { %v15601_v46 = vpop.f32.mrf.mxu1 }
 0x3a0   : > { %17278 = vst [vmem:[#allocation41_spill] sm:$0xff] %v15601_v46  ;;  %v15605_v57 = vpop.f32.mrf.mxu0 }
 0x3a1   : > { %v15608_v5 = vpop.f32.mrf.mxu1 }
 0x3a2   : > { %10481 = vmatmul.mubr.msk.bf16.gmra.mxu1 %vm17279_vm1, %v8310_v36  ;;  %10491 = vmatmul.mubr.msk.bf16.gmra.mxu0 %vm17281_vm15, %v8550_v13  ;;  %17282 = vst [vmem:[#allocation44_spill] sm:$0xff] %v15608_v5  ;;  %v15611_v35 = vpop.f32.mrf.mxu0  ;;  %v8807_v5 = vld [vmem:[#allocation2 + $0x108] sm:$0xff]  ;;  %vm17304_vm1 = vmmov %vm17207_vm0 }
 0x3a3   : > { %10500 = vmatprep.mubr.msk.bf16.mxu1 %vm17280_vm5, %v8548_v40  ;;  %10494 = vmatprep.mubr.msk.bf16.mxu0 %vm17283_vm10, %v8551_v58  ;;  %v15613_v49 = vpop.f32.mrf.mxu1  ;;  %vm17305_vm5 = vmmov %vm17207_vm0 }
 0x3a4   : > { %17284 = vst [vmem:[#allocation14_spill] sm:$0xff] %v15613_v49  ;;  %v15615_v37 = vpop.f32.mrf.mxu0  ;;  %v8810_v49 = vld [vmem:[#allocation2 + $0x120] sm:$0xff]  ;;  %vm17307_vm15 = vmmov %vm17207_vm0 }
 0x3a5   : > { %17285 = vst [vmem:[#allocation16_spill] sm:$0xff] %v15615_v37  ;;  %v15617_v38 = vpop.f32.mrf.mxu1  ;;  %v8817_v37 = vpack.c.bf16 %v8810_v49, %v8809_v50  ;;  %vm17309_vm10 = vmmov %vm17207_vm0  ;;  %v8939_v50 = vld [vmem:[#allocation2 + $0x101] sm:$0xff]  ;;  %v8812_v49 = vld [vmem:[#allocation2 + $0x130] sm:$0xff] }
 0x3a6   : > { %17286 = vst [vmem:[#allocation19_spill] sm:$0xff] %v15617_v38  ;;  %v15619_v40 = vpop.f32.mrf.mxu0 }
 0x3a7   : > { %17287 = vst [vmem:[#allocation21_spill] sm:$0xff] %v15619_v40  ;;  %v15623_v14 = vpop.f32.mrf.mxu1 }
 0x3a8   : > { %v15632_v6 = vpop.f32.mrf.mxu0 }
 0x3a9   : > { %17289 = vst [vmem:[#allocation24_spill] sm:$0xff] %v15632_v6  ;;  %v15635_v36 = vpop.f32.mrf.mxu1  ;;  %v15657_v6 = vld [vmem:[%s16355_s3 + $0x20] sm:$0xf] }
 0x3aa   : > { %10501 = vmatmul.mubr.msk.bf16.vlgmr.msra.gmra.mxu1 %vm17288_vm2, %v8549_v0  ;;  %10495 = vmatmul.mubr.msk.bf16.gmra.mxu0 %vm17290_vm6, %v8552_v30  ;;  %v15638_v15 = vpop.f32.mrf.mxu0  ;;  %vm17314_vm2 = vmmov %vm17207_vm0 }
 0x3ab   : > { %10504 = vmatprep.mubr.msk.bf16.mxu1 %vm17207_vm0, %v8550_v13  ;;  %10514 = vmatprep.mubr.msk.bf16.mxu0 %vm17291_vm13, %v8813_v26  ;;  %17292 = vst [vmem:[#allocation27_spill] sm:$0xff] %v15638_v15  ;;  %v15642_v0 = vpop.f32.mrf.mxu1  ;;  %v8806_v13 = vld [vmem:[#allocation2 + $0x100] sm:$0xff]  ;;  %v9105_v26 = vsel %vm17295_vm7, %v9991_v22, 0  ;;  %vm17315_vm6 = vmmov %vm17207_vm0 }
 0x3ac   : > { %10527 = vmatpush3.bf16.msra.mxu1 %v8972_v9  ;;  %v15644_v45 = vpop.f32.mrf.mxu0  ;;  %v8805_v9 = vld [vmem:[#allocation2 + $0xf8] sm:$0xff]  ;;  %vm17316_vm13 = vmmov %vm17207_vm0 }
 0x3ad   : > { %10609 = vmatprep.subr.msk.bf16.mxu1 %vm17293_vm8, %v15629_v39  ;;  %17294 = vst [vmem:[#allocation29_spill] sm:$0xff] %v15644_v45  ;;  %v15646_v43 = vpop.f32.mrf.mxu1  ;;  %v8815_v15 = vpack.c.bf16 %v8806_v13, %v8805_v9  ;;  %vm17317_vm8 = vmmov %vm17243_vm4 }
 0x3ae   : > { %v15648_v11 = vpop.f32.mrf.mxu0  ;;  %vm17318_vm7 = vmmov %vm17207_vm0 }
 0x3af   : > { %v15651_v38 = vpop.f32.mrf.mxu1 }
 0x3b0   : > { %v15660_v45 = vpop.f32.mrf.mxu0 }
 0x3b1   : > { %v15663_v7 = vpop.f32.mrf.mxu1 }
 0x3b2   : > { %10505 = vmatmul.mubr.msk.bf16.gmra.mxu1 %vm17296_vm12, %v8551_v58  ;;  %10515 = vmatmul.mubr.msk.bf16.vlgmr.msra.gmra.mxu0 %vm17298_vm3, %v8814_v60  ;;  %v15666_v22 = vpop.f32.mrf.mxu0  ;;  %v8679_v58 = vld [vmem:[#allocation2 + $0x12f] sm:$0xff]  ;;  %vm17319_vm12 = vmmov %vm17207_vm0 }
 0x3b3   : > { %10508 = vmatprep.mubr.msk.bf16.mxu1 %vm17297_vm9, %v8552_v30  ;;  %10541 = vmatpush3.bf16.msra.mxu0 %v9105_v26  ;;  %v15670_v13 = vpop.f32.mrf.mxu1  ;;  %v8678_v30 = vld [vmem:[#allocation2 + $0x127] sm:$0xff]  ;;  %vm17320_vm9 = vmmov %vm17207_vm0 }
 0x3b4   : > { %10518 = vmatprep.mubr.msk.bf16.mxu0 %vm17299_vm14, %v8815_v15  ;;  %10610 = vmatprep.subr.msk.bf16.mxu0 %vm17300_vm11, %v15657_v6  ;;  %17301 = vst [vmem:[#allocation30_spill] sm:$0xff] %v15670_v13  ;;  %v15672_v9 = vpop.f32.mrf.mxu0  ;;  %v8685_v60 = vpack.c.bf16 %v8679_v58, %v8678_v30  ;;  %v8816_v15 = vpack.c.bf16 %v8808_v33, %v8807_v5  ;;  %v8937_v5 = vld [vmem:[#allocation2 + $0xf1] sm:$0xff]  ;;  %vm17321_vm3 = vmmov %vm17207_vm0  ;;  %vm17322_vm14 = vcmask 31744  }
 0x3b5   : > { %v15674_v40 = vpop.f32.mrf.mxu1  ;;  %v6244_v33 = vadd.f32 %v15467_v10, %v15428_v29  ;;  %vm17327_vm11 = vmmov %vm17322_vm14 }
 0x3b6   : > { %17302 = vst [vmem:[#allocation33_spill] sm:$0xff] %v15674_v40  ;;  %v15676_v26 = vpop.f32.mrf.mxu0  ;;  %v8811_v40 = vld [vmem:[#allocation2 + $0x128] sm:$0xff] }
 0x3b7   : > { %v15678_v27 = vpop.f32.mrf.mxu1 }
 0x3b8   : > { %17303 = vst [vmem:[#allocation42_spill] sm:$0xff] %v15678_v27  ;;  %v15683_v13 = vpop.f32.mrf.mxu0 }
 0x3b9   : > { %17306 = vst [vmem:[#allocation54_spill] sm:$0xff] %v15683_v13  ;;  %v15686_v46 = vpop.f32.mrf.mxu1  ;;  %v15702_v13 = vld [vmem:[#allocation2 + $0xf2] sm:$0xff] }
 0x3ba   : > { %10509 = vmatmul.mubr.msk.bf16.gmra.mxu1 %vm17304_vm1, %v8685_v60  ;;  %10519 = vmatmul.mubr.msk.bf16.gmra.mxu0 %vm17307_vm15, %v8816_v15  ;;  %17308 = vst [vmem:[#allocation61_spill] sm:$0xff] %v15686_v46  ;;  %v15689_v58 = vpop.f32.mrf.mxu0  ;;  %v6242_v15 = vadd.f32 %v15492_v44, %v15450_v48  ;;  %v6378_v46 = vadd.f32 %v15546_v41, %v6244_v33  ;;  %v8941_v33 = vld [vmem:[#allocation2 + $0x111] sm:$0xff]  ;;  %vm17334_vm1 = vmmov %vm17327_vm11 }
 0x3bb   : > { %10528 = vmatprep.mubr.msk.bf16.mxu1 %vm17305_vm5, %v15340_v59  ;;  %10522 = vmatprep.mubr.msk.bf16.mxu0 %vm17309_vm10, %v8817_v37  ;;  %17310 = vst [vmem:[#allocation38_spill] sm:$0xff] %v15689_v58  ;;  %v15693_v30 = vpop.f32.mrf.mxu1  ;;  %v8936_v59 = vld [vmem:[#allocation2 + $0xe9] sm:$0xff]  ;;  %v8938_v58 = vld [vmem:[#allocation2 + $0xf9] sm:$0xff]  ;;  %v6245_v48 = vadd.f32 %v15503_v3, %v15456_v52  ;;  %vm17335_vm5 = vmmov %vm17207_vm0 }
 0x3bc   : > { %17311 = vst [vmem:[#allocation40_spill] sm:$0xff] %v15693_v30  ;;  %v15695_v60 = vpop.f32.mrf.mxu0  ;;  %v8947_v37 = vpack.c.bf16 %v8937_v5, %v8936_v59  ;;  %v15706_v10 = vpack.c.bf16 %v8939_v50, %v8938_v58  ;;  %v8818_v30 = vpack.c.bf16 %v8812_v49, %v8811_v40  ;;  %v6376_v44 = vadd.f32 %v15558_v51, %v6242_v15  ;;  %v8943_v59 = vld [vmem:[#allocation2 + $0x121] sm:$0xff]  ;;  %v8940_v52 = vld [vmem:[#allocation2 + $0x109] sm:$0xff]  ;;  %vm17339_vm15 = vmmov %vm17207_vm0 }
 0x3bd   : > { %17312 = vst [vmem:[#allocation72_spill] sm:$0xff] %v15695_v60  ;;  %v15700_v27 = vpop.f32.mrf.mxu1  ;;  %v9238_v60 = vsel %vm17243_vm4, %v15629_v39, 0  ;;  %v6512_v41 = vadd.f32 %v15572_v1, %v6378_v46  ;;  %v6243_v40 = vadd.f32 %v15511_v12, %v15465_v24  ;;  %v6379_v51 = vadd.f32 %v15565_v4, %v6245_v48  ;;  %v8942_v24 = vld [vmem:[#allocation2 + $0x119] sm:$0xff]  ;;  %v8944_v50 = vld [vmem:[#allocation2 + $0x129] sm:$0xff]  ;;  %vm17340_vm10 = vmmov %vm17207_vm0 }
 0x3be   : > { %17313 = vst [vmem:[#allocation47_spill] sm:$0xff] %v15700_v27  ;;  %v15704_v29 = vpop.f32.mrf.mxu0  ;;  %v15715_v27 = vld [vmem:[#allocation2 + $0xea] sm:$0xff]  ;;  %v6510_v1 = vadd.f32 %v15583_v16, %v6376_v44  ;;  %v9371_v12 = vsel %vm17317_vm8, %v15657_v6, 0  ;;  %v6248_v49 = vadd.f32 %v15518_v62, %v15489_v32  ;;  %v8949_v16 = vpack.c.bf16 %v8941_v33, %v8940_v52  ;;  %vm17342_vm4 = vmmov %vm17334_vm1 }
 0x3bf   : > { %v10306_v5 = vpop.f32.mrf.mxu1  ;;  %v9212_v3 = vpack.c.bf16 %v15702_v13, %v15715_v27  ;;  %v6646_v46 = vadd.f32 %v15623_v14, %v6512_v41  ;;  %v6377_v4 = vadd.f32 %v15569_v25, %v6243_v40  ;;  %v15737_v14 = vpack.c.bf16 %v8943_v59, %v8942_v24  ;;  %v9203_v27 = vld [vmem:[#allocation2 + $0x102] sm:$0xff]  ;;  %v9077_v13 = vld [vmem:[#allocation2 + $0x139] sm:$0xff] }
 0x3c0   : > { %v15721_v39 = vpop.f32.mrf.mxu0  ;;  %v6644_v6 = vadd.f32 %v15635_v36, %v6510_v1  ;;  %v6249_v32 = vadd.f32 %v15532_v63, %v15509_v19  ;;  %v6382_v62 = vadd.f32 %v15576_v54, %v6248_v49  ;;  %v6252_v19 = vadd.f32 %v15542_v20, %v15522_v17 }
 0x3c1   : > { %v6865_v58 = vpop.f32.mrf.mxu1  ;;  %v6780_v48 = vadd.f32 %v15648_v11, %v6646_v46  ;;  %v6511_v25 = vadd.f32 %v15595_v53, %v6377_v4  ;;  %v17326_v4 = vld [vmem:[#allocation54_spill] sm:$0xff] }
 0x3c2   : > { %10529 = vmatmul.mubr.msk.bf16.vlgmr.msra.gmra.mxu1 %vm17314_vm2, %v8947_v37  ;;  %10523 = vmatmul.mubr.msk.bf16.gmra.mxu0 %vm17315_vm6, %v8818_v30  ;;  %v8945_v30 = vld [vmem:[#allocation2 + $0x131] sm:$0xff]  ;;  %v15735_v15 = vpop.f32.mrf.mxu0  ;;  %v6516_v54 = vadd.f32 %v15599_v31, %v6382_v62  ;;  %v17331_v62 = vld [vmem:[#allocation21_spill] sm:$0xff]  ;;  %vm17343_vm2 = vmmov %vm17207_vm0 }
 0x3c3   : > { %10532 = vmatprep.mubr.msk.bf16.mxu1 %vm17207_vm0, %v15706_v10  ;;  %10542 = vmatprep.mubr.msk.bf16.mxu0 %vm17316_vm13, %v8947_v37  ;;  %v6513_v37 = vadd.f32 %v15590_v42, %v6379_v51  ;;  %v10307_v44 = vpop.f32.mrf.mxu1  ;;  %v15751_v33 = vpack.c.bf16 %v8945_v30, %v8944_v50  ;;  %v6778_v42 = vadd.f32 %v15660_v45, %v6644_v6  ;;  %v17324_v50 = vld [vmem:[#allocation16_spill] sm:$0xff]  ;;  %v17325_v30 = vld [vmem:[#allocation30_spill] sm:$0xff]  ;;  %vm17347_vm0 = vmmov %vm17334_vm1 }
 0x3c4   : > { %10555 = vmatpush3.bf16.msra.mxu1 %v9238_v60  ;;  %v6246_v60 = vadd.f32 %v15525_v2, %v15501_v34  ;;  %v15748_v41 = vpop.f32.mrf.mxu0  ;;  %v6247_v34 = vadd.f32 %v15537_v21, %v15516_v55  ;;  %v6914_v36 = vadd.f32 %v10306_v5, %v6780_v48  ;;  %v6645_v53 = vadd.f32 %v15646_v43, %v6511_v25  ;;  %v15765_v55 = vld [vmem:[%s16356_s4] ss:$0 sm:$0xff]  ;;  %v17328_v48 = vld [vmem:[#allocation11_spill] sm:$0xff]  ;;  %vm17350_vm6 = vmmov %vm17347_vm0 }
 0x3c5   : > { %v6647_v2 = vadd.f32 %v15642_v0, %v6513_v37  ;;  %v6868_v11 = vpop.f32.mrf.mxu1  ;;  %v6383_v21 = vadd.f32 %v15593_v18, %v6249_v32  ;;  %v6912_v45 = vadd.f32 %v6865_v58, %v6778_v42  ;;  %v6650_v20 = vadd.f32 %v15651_v38, %v6516_v54  ;;  %vm17352_vm13 = vmmov %vm17347_vm0 }
 0x3c6   : > { %v6380_v63 = vadd.f32 %v15587_v28, %v6246_v60  ;;  %v10320_v59 = vpop.f32.mrf.mxu0  ;;  %v6779_v28 = vadd.f32 %v15672_v9, %v6645_v53  ;;  %v6381_v9 = vadd.f32 %v15597_v23, %v6247_v34  ;;  %v17332_v34 = vld [vmem:[#allocation33_spill] sm:$0xff]  ;;  %vm17353_vm8 = vmmov %vm17343_vm2 }
 0x3c7   : > { %v6781_v0 = vadd.f32 %v15666_v22, %v6647_v2  ;;  %v10310_v5 = vpop.f32.mrf.mxu1  ;;  %v7048_v40 = vadd.f32 %v10320_v59, %v6914_v36  ;;  %v6250_v22 = vadd.f32 %v15555_v61, %v15530_v56  ;;  %v6517_v52 = vadd.f32 %v15611_v35, %v6383_v21  ;;  %v17323_v61 = vld [vmem:[#allocation41_spill] sm:$0xff]  ;;  %v17333_v36 = vld [vmem:[#allocation38_spill] sm:$0xff] }
 0x3c8   : > { %v6514_v17 = vadd.f32 %v15605_v57, %v6380_v63  ;;  %v6999_v18 = vpop.f32.mrf.mxu0  ;;  %v6913_v46 = vadd.f32 %v6868_v11, %v6779_v28  ;;  %v6253_v56 = vadd.f32 %v15561_v47, %v15535_v8  ;;  %v6386_v23 = vadd.f32 %v17323_v61, %v6252_v19  ;;  %v17330_v47 = vld [vmem:[#allocation44_spill] sm:$0xff]  ;;  %v17336_v59 = vld [vmem:[#allocation14_spill] sm:$0xff] }
 0x3c9   : > { %v6915_v31 = vadd.f32 %v10307_v44, %v6781_v0  ;;  %v7067_v57 = vadd.f32 %v15765_v55, %v7048_v40  ;;  %v6881_v43 = vpop.f32.mrf.mxu1  ;;  %v7046_v38 = vadd.f32 %v6999_v18, %v6912_v45  ;;  %v6515_v35 = vadd.f32 %v17324_v50, %v6381_v9  ;;  %v17329_v44 = vld [vmem:[#allocation12_spill] sm:$0xff]  ;;  %v17345_v9 = vld [vmem:[#allocation27_spill] sm:$0xff] }
 0x3ca   : > { %10533 = vmatmul.mubr.msk.bf16.gmra.mxu1 %vm17318_vm7, %v8949_v16  ;;  %10543 = vmatmul.mubr.msk.bf16.vlgmr.msra.gmra.mxu0 %vm17320_vm9, %v15706_v10  ;;  %v6648_v51 = vadd.f32 %v15663_v7, %v6514_v17  ;;  %v10321_v1 = vpop.f32.mrf.mxu0  ;;  %v6784_v10 = vadd.f32 %v15676_v26, %v6650_v20  ;;  %v6651_v7 = vadd.f32 %v17325_v30, %v6517_v52  ;;  %v17337_v0 = vld [vmem:[#allocation24_spill] sm:$0xff]  ;;  %v17346_v52 = vld [vmem:[#allocation61_spill] sm:$0xff]  ;;  %vm17354_vm7 = vmmov %vm17343_vm2 }
 0x3cb   : > { %10536 = vmatprep.mubr.msk.bf16.mxu1 %vm17319_vm12, %v15737_v14  ;;  %10569 = vmatpush3.bf16.msra.mxu0 %v9371_v12  ;;  %7079 = vst.msk [vmem:[%s15776_s29 + $0x10] sm:$0xff] %vm17322_vm14, %v7067_v57  ;;  %v7065_v58 = vadd.f32 %v15765_v55, %v7046_v38  ;;  %v10311_v24 = vpop.f32.mrf.mxu1  ;;  %v7049_v12 = vadd.f32 %v10321_v1, %v6915_v31  ;;  %v17341_v20 = vld [vmem:[#allocation72_spill] sm:$0xff]  ;;  %v17344_v38 = vld [vmem:[#allocation19_spill] sm:$0xff]  ;;  %vm17355_vm12 = vmmov %vm17343_vm2 }
 0x3cc   : > { %10546 = vmatprep.mubr.msk.bf16.mxu0 %vm17321_vm3, %v8949_v16  ;;  %v7002_v49 = vpop.f32.mrf.mxu0  ;;  %v6782_v26 = vadd.f32 %v17326_v4, %v6648_v51  ;;  %v6918_v16 = vadd.f32 %v10310_v5, %v6784_v10  ;;  %v6251_v8 = vadd.f32 %v17329_v44, %v17328_v48  ;;  %v6384_v32 = vadd.f32 %v17330_v47, %v6250_v22  ;;  %v17338_v5 = vld [vmem:[#allocation42_spill] sm:$0xff]  ;;  %v9334_v61 = vld [vmem:[#allocation2 + $0xf3] sm:$0xff]  ;;  %vm17356_vm9 = vmmov %vm17347_vm0 }
 0x3cd   : > { %7077 = vst.msk [vmem:[%s15776_s29] sm:$0xff] %vm17327_vm11, %v7065_v58  ;;  %v7068_v60 = vadd.f32 %v15765_v55, %v7049_v12  ;;  %v6884_v37 = vpop.f32.mrf.mxu1  ;;  %v7047_v6 = vadd.f32 %v7002_v49, %v6913_v46  ;;  %v6520_v25 = vadd.f32 %v17331_v62, %v6386_v23  ;;  %v6649_v2 = vadd.f32 %v17332_v34, %v6515_v35  ;;  %v9202_v12 = vld [vmem:[#allocation2 + $0xfa] sm:$0xff]  ;;  %v9333_v48 = vld [vmem:[#allocation2 + $0xeb] sm:$0xff]  ;;  %vm17357_vm3 = vmmov %vm17343_vm2 }
 0x3ce   : > { %v10324_v42 = vpop.f32.mrf.mxu0  ;;  %v6785_v11 = vadd.f32 %v17333_v36, %v6651_v7  ;;  %v6916_v19 = vadd.f32 %v6881_v43, %v6782_v26  ;;  %v6387_v21 = vadd.f32 %v17336_v59, %v6253_v56  ;;  %v6518_v45 = vadd.f32 %v17337_v0, %v6384_v32  ;;  %v9205_v56 = vld [vmem:[#allocation2 + $0x112] sm:$0xff]  ;;  %v17348_v23 = vld [vmem:[#allocation29_spill] sm:$0xff]  ;;  %vm17358_vm14 = vmmov %vm17347_vm0 }
 0x3cf   : > { %7080 = vst.msk [vmem:[%s15776_s29 + $0x18] sm:$0xff] %vm17334_vm1, %v7068_v60  ;;  %v7066_v63 = vadd.f32 %v15765_v55, %v7047_v6  ;;  %v10314_v54 = vpop.f32.mrf.mxu1  ;;  %v7052_v53 = vadd.f32 %v10324_v42, %v6918_v16  ;;  %v6654_v40 = vadd.f32 %v17338_v5, %v6520_v25  ;;  %v6783_v28 = vadd.f32 %v17341_v20, %v6649_v2  ;;  %v17349_v35 = vld [vmem:[#allocation40_spill] sm:$0xff]  ;;  %v9204_v6 = vld [vmem:[#allocation2 + $0x10a] sm:$0xff]  ;;  %v9207_v59 = vld [vmem:[#allocation2 + $0x122] sm:$0xff] }
 0x3d0   : > { %v7015_v17 = vpop.f32.mrf.mxu0  ;;  %v6919_v18 = vadd.f32 %v10311_v24, %v6785_v11  ;;  %v6385_v22 = vadd.f32 %v17344_v38, %v6251_v8  ;;  %v6652_v51 = vadd.f32 %v17346_v52, %v6518_v45  ;;  %v9213_v49 = vpack.c.bf16 %v9203_v27, %v9202_v12  ;;  %v17351_v44 = vld [vmem:[#allocation47_spill] sm:$0xff]  ;;  %vm17359_vm11 = vmmov %vm17347_vm0 }
 0x3d1   : > { %7078 = vst.msk [vmem:[%s15776_s29 + $0x8] sm:$0xff] %vm17342_vm4, %v7066_v63  ;;  %v7071_v31 = vadd.f32 %v15765_v55, %v7052_v53  ;;  %v6897_v57 = vpop.f32.mrf.mxu1  ;;  %v7050_v43 = vadd.f32 %v7015_v17, %v6916_v19  ;;  %v6788_v10 = vadd.f32 %v15704_v29, %v6654_v40  ;;  %v6917_v46 = vadd.f32 %v6884_v37, %v6783_v28  ;;  %v9209_v40 = vld [vmem:[#allocation2 + $0x132] sm:$0xff]  ;;  %v9336_v17 = vld [vmem:[#allocation2 + $0x103] sm:$0xff]  ;;  %v9206_v28 = vld [vmem:[#allocation2 + $0x11a] sm:$0xff] }
 0x3d2   : > { %10537 = vmatmul.mubr.msk.bf16.gmra.mxu1 %vm17335_vm5, %v15751_v33  ;;  %10547 = vmatmul.mubr.msk.bf16.gmra.mxu0 %vm17340_vm10, %v15737_v14  ;;  %v6521_v14 = vadd.f32 %v17345_v9, %v6387_v21  ;;  %v10325_v1 = vpop.f32.mrf.mxu0  ;;  %v6519_v50 = vadd.f32 %v17348_v23, %v6385_v22  ;;  %v6786_v29 = vadd.f32 %v15721_v39, %v6652_v51  ;;  %v9337_v9 = vld [vmem:[#allocation2 + $0x10b] sm:$0xff]  ;;  %vm17360_vm1 = vmmov %vm17347_vm0 }
 0x3d3   : > { %10556 = vmatprep.mubr.msk.bf16.mxu1 %vm17339_vm15, %v9212_v3  ;;  %10550 = vmatprep.mubr.msk.bf16.mxu0 %vm17343_vm2, %v15751_v33  ;;  %v9078_v3 = vld [vmem:[#allocation2 + $0x141] sm:$0xff]  ;;  %7083 = vst.msk [vmem:[%s15776_s29 + $0x30] sm:$0xff] %vm17347_vm0, %v7071_v31  ;;  %v7069_v58 = vadd.f32 %v15765_v55, %v7050_v43  ;;  %v10315_v24 = vpop.f32.mrf.mxu1  ;;  %v7053_v33 = vadd.f32 %v10325_v1, %v6919_v18  ;;  %v9338_v18 = vld [vmem:[#allocation2 + $0x113] sm:$0xff]  ;;  %vm17361_vm5 = vmmov %vm17343_vm2 }
 0x3d4   : > { %v6655_v30 = vadd.f32 %v17349_v35, %v6521_v14  ;;  %v7018_v7 = vpop.f32.mrf.mxu0  ;;  %v9084_v4 = vpack.c.bf16 %v9078_v3, %v9077_v13  ;;  %v6922_v26 = vadd.f32 %v10314_v54, %v6788_v10  ;;  %v6653_v8 = vadd.f32 %v17351_v44, %v6519_v50  ;;  %v9335_v13 = vld [vmem:[#allocation2 + $0xfb] sm:$0xff]  ;;  %vm17362_vm15 = vmmov %vm17343_vm2  ;;  %v9340_v50 = vld [vmem:[#allocation2 + $0x123] sm:$0xff] }
 0x3d5   : > { %7081 = vst.msk [vmem:[%s15776_s29 + $0x20] sm:$0xff] %vm17350_vm6, %v7069_v58  ;;  %v7072_v16 = vadd.f32 %v15765_v55, %v7053_v33  ;;  %v6900_v60 = vpop.f32.mrf.mxu1  ;;  %v7051_v37 = vadd.f32 %v7018_v7, %v6917_v46  ;;  %v9214_v32 = vpack.c.bf16 %v9205_v56, %v9204_v6  ;;  %v9345_v62 = vpack.c.bf16 %v9334_v61, %v9333_v48  ;;  %vm17363_vm10 = vmmov %vm17343_vm2  ;;  %v9210_v46 = vld [vmem:[#allocation2 + $0x13a] sm:$0xff]  ;;  %v9211_v58 = vld [vmem:[#allocation2 + $0x142] sm:$0xff] }
 0x3d6   : > { %v10328_v47 = vpop.f32.mrf.mxu0  ;;  %v6789_v25 = vadd.f32 %v15735_v15, %v6655_v30  ;;  %v6920_v34 = vadd.f32 %v6897_v57, %v6786_v29  ;;  %v6787_v11 = vadd.f32 %v15748_v41, %v6653_v8  ;;  %v9208_v41 = vld [vmem:[#allocation2 + $0x12a] sm:$0xff]  ;;  %v9215_v27 = vpack.c.bf16 %v9207_v59, %v9206_v28  ;;  %vm17364_vm4 = vmmov %vm17347_vm0  ;;  %v9342_v7 = vld [vmem:[#allocation2 + $0x133] sm:$0xff] }
 0x3d7   : > { %7084 = vst.msk [vmem:[%s15776_s29 + $0x38] sm:$0xff] %vm17352_vm13, %v7072_v16  ;;  %v7070_v39 = vadd.f32 %v15765_v55, %v7051_v37  ;;  %v7056_v2 = vadd.f32 %v10328_v47, %v6922_v26  ;;  %v10334_v42 = vpop.f32.mrf.mxu1  ;;  %v9216_v38 = vpack.c.bf16 %v9209_v40, %v9208_v41  ;;  %v9346_v22 = vpack.c.bf16 %v9336_v17, %v9335_v13  ;;  %v9341_v30 = vld [vmem:[#allocation2 + $0x12b] sm:$0xff]  ;;  %v9339_v29 = vld [vmem:[#allocation2 + $0x11b] sm:$0xff]  ;;  %vm17365_vm0 = vmmov %vm17343_vm2 }
 0x3d8   : > { %v7031_v36 = vpop.f32.mrf.mxu0  ;;  %v6923_v19 = vadd.f32 %v10315_v24, %v6789_v25  ;;  %v6921_v21 = vadd.f32 %v6900_v60, %v6787_v11  ;;  %v9347_v1 = vpack.c.bf16 %v9338_v18, %v9337_v9  ;;  %v9217_v23 = vpack.c.bf16 %v9211_v58, %v9210_v46  ;;  %vm17366_vm6 = vmmov %vm17365_vm0  ;;  %v9343_v47 = vld [vmem:[#allocation2 + $0x13b] sm:$0xff] }
 0x3d9   : > { %7082 = vst.msk [vmem:[%s15776_s29 + $0x28] sm:$0xff] %vm17356_vm9, %v7070_v39  ;;  %v7075_v15 = vadd.f32 %v15765_v55, %v7056_v2  ;;  %v7054_v63 = vadd.f32 %v7031_v36, %v6920_v34  ;;  %v7182_v54 = vpop.f32.mrf.mxu1  ;;  %v9348_v16 = vpack.c.bf16 %v9340_v50, %v9339_v29  ;;  %v9349_v6 = vpack.c.bf16 %v9342_v7, %v9341_v30  ;;  %vm17367_vm13 = vmmov %vm17365_vm0 }
 0x3da   : > { %10557 = vmatmul.mubr.msk.bf16.vlgmr.msra.gmra.mxu1 %vm17353_vm8, %v9213_v49  ;;  %10551 = vmatmul.mubr.msk.bf16.gmra.mxu0 %vm17355_vm12, %v9084_v4  ;;  %v10329_v53 = vpop.f32.mrf.mxu0  ;;  %vm17368_vm8 = vmmov %vm17365_vm0 }
 0x3db   : > { %10560 = vmatprep.mubr.msk.bf16.mxu1 %vm17354_vm7, %v9214_v32  ;;  %10570 = vmatprep.mubr.msk.bf16.mxu0 %vm17357_vm3, %v9345_v62  ;;  %7087 = vst.msk [vmem:[%s15776_s29 + $0x50] sm:$0xff] %vm17358_vm14, %v7075_v15  ;;  %v7073_v0 = vadd.f32 %v15765_v55, %v7054_v63  ;;  %v7057_v45 = vadd.f32 %v10329_v53, %v6923_v19  ;;  %v10335_v5 = vpop.f32.mrf.mxu1  ;;  %v9344_v32 = vld [vmem:[#allocation2 + $0x143] sm:$0xff]  ;;  %vm17390_vm7 = vmmov %vm17360_vm1 }
 0x3dc   : > { %v7034_v20 = vpop.f32.mrf.mxu0  ;;  %v9350_v2 = vpack.c.bf16 %v9344_v32, %v9343_v47  ;;  %vm17394_vm12 = vmmov %vm17360_vm1 }
 0x3dd   : > { %7085 = vst.msk [vmem:[%s15776_s29 + $0x40] sm:$0xff] %vm17359_vm11, %v7073_v0  ;;  %v7076_v31 = vadd.f32 %v15765_v55, %v7057_v45  ;;  %v7055_v57 = vadd.f32 %v7034_v20, %v6921_v21  ;;  %v7185_v43 = vpop.f32.mrf.mxu1  ;;  %vm17401_vm9 = vmmov %vm17360_vm1 }
 0x3de   : > { %v10348_v3 = vpop.f32.mrf.mxu0  ;;  %vm17408_vm3 = vmmov %vm17360_vm1 }
 0x3df   : > { %7088 = vst.msk [vmem:[%s15776_s29 + $0x58] sm:$0xff] %vm17360_vm1, %v7076_v31  ;;  %v7074_v14 = vadd.f32 %v15765_v55, %v7055_v57  ;;  %v10338_v52 = vpop.f32.mrf.mxu1  ;;  %v15863_v51 = vadd.f32 %v10348_v3, %v10334_v42  ;;  %vm17412_vm14 = vmmov %vm17360_vm1 }
 0x3e0   : > { %v7284_v10 = vpop.f32.mrf.mxu0  ;;  %vm17415_vm11 = vmmov %vm17360_vm1 }
 0x3e1   : > { %7086 = vst.msk [vmem:[%s15776_s29 + $0x48] sm:$0xff] %vm17364_vm4, %v7074_v14  ;;  %v7198_v24 = vpop.f32.mrf.mxu1  ;;  %v15870_v33 = vadd.f32 %v7284_v10, %v7182_v54  ;;  %vm17420_vm4 = vmmov %vm17360_vm1 }
 0x3e2   : > { %10561 = vmatmul.mubr.msk.bf16.gmra.mxu1 %vm17361_vm5, %v9215_v27  ;;  %10571 = vmatmul.mubr.msk.bf16.vlgmr.msra.gmra.mxu0 %vm17363_vm10, %v9346_v22  ;;  %v10349_v12 = vpop.f32.mrf.mxu0  ;;  %vm17417_vm5 = vmmov %vm17360_vm1 }
 0x3e3   : > { %10564 = vmatprep.mubr.msk.bf16.mxu1 %vm17362_vm15, %v9216_v38  ;;  %10574 = vmatprep.mubr.msk.bf16.mxu0 %vm17343_vm2, %v9347_v1  ;;  %v10339_v56 = vpop.f32.mrf.mxu1  ;;  %v15873_v61 = vadd.f32 %v10349_v12, %v10335_v5  ;;  %vm17418_vm15 = vmmov %vm17360_vm1 }
 0x3e4   : > { %v7287_v35 = vpop.f32.mrf.mxu0  ;;  %vm17419_vm10 = vmmov %vm17360_vm1 }
 0x3e5   : > { %v7201_v49 = vpop.f32.mrf.mxu1  ;;  %v15875_v4 = vadd.f32 %v7287_v35, %v7185_v43  ;;  %vm17421_vm2 = vmmov %vm17360_vm1 }
 0x3e6   : > { %v10352_v26 = vpop.f32.mrf.mxu0 }
 0x3e7   : > { %v10342_v60 = vpop.f32.mrf.mxu1  ;;  %v15877_v37 = vadd.f32 %v10352_v26, %v10338_v52 }
 0x3e8   : > { %v7300_v48 = vpop.f32.mrf.mxu0 }
 0x3e9   : > { %v7214_v44 = vpop.f32.mrf.mxu1  ;;  %v15881_v8 = vadd.f32 %v7300_v48, %v7198_v24 }
 0x3ea   : > { %10565 = vmatmul.mubr.msk.bf16.gmra.mxu1 %vm17365_vm0, %v9217_v23  ;;  %10575 = vmatmul.mubr.msk.bf16.gmra.mxu0 %vm17366_vm6, %v9348_v16  ;;  %v10353_v62 = vpop.f32.mrf.mxu0  ;;  %vm17452_vm0 = vmmov %vm17360_vm1 }
 0x3eb   : > { %10578 = vmatprep.mubr.msk.bf16.mxu0 %vm17367_vm13, %v9349_v6  ;;  %v10343_v25 = vpop.f32.mrf.mxu1  ;;  %v15884_v34 = vadd.f32 %v10353_v62, %v10339_v56  ;;  %vm17458_vm6 = vmmov %vm17452_vm0 }
 0x3ec   : > { %v7303_v39 = vpop.f32.mrf.mxu0  ;;  %vm17463_vm13 = vmmov %vm17452_vm0 }
 0x3ed   : > { %v7217_v42 = vpop.f32.mrf.mxu1  ;;  %v15886_v36 = vadd.f32 %v7303_v39, %v7201_v49 }
 0x3ee   : > { %v10356_v11 = vpop.f32.mrf.mxu0 }
 0x3ef   : > { %v15888_v19 = vadd.f32 %v10356_v11, %v10342_v60  ;;  %v15890_v15 = vpop.f32.mrf.mxu1 }
 0x3f0   : > { %v7316_v63 = vpop.f32.mrf.mxu0 }
 0x3f1   : > { %v15893_v54 = vadd.f32 %v7316_v63, %v7214_v44  ;;  %v15895_v53 = vpop.f32.mrf.mxu1 }
 0x3f2   : > { %10579 = vmatmul.mubr.msk.bf16.gmra.mxu0 %vm17368_vm8, %v9350_v2  ;;  %v10357_v59 = vpop.f32.mrf.mxu0  ;;  %vm17468_vm8 = vmmov %vm17452_vm0 }
 0x3f3   : > { %v15897_v21 = vadd.f32 %v10357_v59, %v10343_v25  ;;  %v15899_v0 = vpop.f32.mrf.mxu1 }
 0x3f4   : > { %v7319_v45 = vpop.f32.mrf.mxu0 }
 0x3f5   : > { %17369 = vst [vmem:[#allocation6_spill] sm:$0xff] %v15897_v21  ;;  %v15901_v5 = vadd.f32 %v7319_v45, %v7217_v42  ;;  %v15903_v41 = vpop.f32.mrf.mxu1 }
 0x3f6   : > { %v10376_v40 = vpop.f32.mrf.mxu0 }
 0x3f7   : > { %17370 = vst [vmem:[#allocation53_spill] sm:$0xff] %v15901_v5  ;;  %v15905_v17 = vpop.f32.mrf.mxu1  ;;  %v7454_v5 = vadd.f32 %v15890_v15, %v15863_v51  ;;  %v7453_v51 = vadd.f32 %v15903_v41, %v15875_v4 }
 0x3f8   : > { %v7538_v20 = vpop.f32.mrf.mxu0 }
 0x3f9   : > { %v15907_v28 = vpop.f32.mrf.mxu1 }
 0x3fa   : > { %v10377_v18 = vpop.f32.mrf.mxu0  ;;  %v7456_v4 = vadd.f32 %v15907_v28, %v15881_v8 }
 0x3fb   : > { %v15909_v31 = vpop.f32.mrf.mxu1 }
 0x3fc   : > { %v15911_v57 = vpop.f32.mrf.mxu0 }
 0x3fd   : > { %v15913_v43 = vpop.f32.mrf.mxu1 }
 0x3fe   : > { %v15915_v27 = vpop.f32.mrf.mxu0 }
 0x3ff   : > { %v15917_v13 = vpop.f32.mrf.mxu1 }
 0x400   : > { %v15919_v3 = vpop.f32.mrf.mxu0 }
 0x401   : > { %v15921_v38 = vpop.f32.mrf.mxu1 }
 0x402   : > { %v15923_v22 = vpop.f32.mrf.mxu0 }
 0x403   : > { %v15925_v9 = vpop.f32.mrf.mxu1 }
 0x404   : > { %17371 = vst [vmem:[#allocation7_spill] sm:$0xff] %v15925_v9  ;;  %v15927_v14 = vpop.f32.mrf.mxu0 }
 0x405   : > { %v15929_v52 = vpop.f32.mrf.mxu1 }
 0x406   : > { %17372 = vst [vmem:[#allocation48_spill] sm:$0xff] %v15929_v52  ;;  %v15931_v1 = vpop.f32.mrf.mxu0 }
 0x407   : > { %v10390_v10 = vpop.f32.mrf.mxu1 }
 0x408   : > { %v15933_v46 = vpop.f32.mrf.mxu0 }
 0x409   : > { %17373 = vst [vmem:[#allocation32_spill] sm:$0xff] %v15933_v46  ;;  %v7671_v58 = vpop.f32.mrf.mxu1 }
 0x40a   : > { %v15935_v24 = vpop.f32.mrf.mxu0 }
 0x40b   : > { %17374 = vst [vmem:[#allocation64_spill] sm:$0xff] %v15935_v24  ;;  %v10391_v12 = vpop.f32.mrf.mxu1 }
 0x40c   : > { %v15937_v56 = vpop.f32.mrf.mxu0 }
 0x40d   : > { %17375 = vst [vmem:[#allocation69_spill] sm:$0xff] %v15937_v56  ;;  %v7674_v23 = vpop.f32.mrf.mxu1 }
 0x40e   : > { %v10404_v50 = vpop.f32.mrf.mxu0 }
 0x40f   : > { %v10394_v35 = vpop.f32.mrf.mxu1 }
 0x410   : > { %v7804_v30 = vpop.f32.mrf.mxu0 }
 0x411   : > { %v15939_v7 = vpop.f32.mrf.mxu1 }
 0x412   : > { %v10405_v49 = vpop.f32.mrf.mxu0 }
 0x413   : > { %v15941_v29 = vpop.f32.mrf.mxu1 }
 0x414   : > { %v7807_v26 = vpop.f32.mrf.mxu0 }
 0x415   : > { %v15943_v16 = vpop.f32.mrf.mxu1 }
 0x416   : > { %17376 = vst [vmem:[#allocation31_spill] sm:$0xff] %v15943_v16  ;;  %v15945_v60 = vpop.f32.mrf.mxu0 }
 0x417   : > { %v15947_v6 = vpop.f32.mrf.mxu1 }
 0x418   : > { %17377 = vst [vmem:[#allocation26_spill] sm:$0xff] %v15947_v6  ;;  %v15949_v48 = vpop.f32.mrf.mxu0 }
 0x419   : > { %v15951_v44 = vpop.f32.mrf.mxu1 }
 0x41a   : > { %17378 = vst [vmem:[#allocation56_spill] sm:$0xff] %v15951_v44  ;;  %v15953_v47 = vpop.f32.mrf.mxu0 }
 0x41b   : > { %17379 = vst [vmem:[#allocation70_spill] sm:$0xff] %v15953_v47  ;;  %v15955_v32 = vpop.f32.mrf.mxu1 }
 0x41c   : > { %17380 = vst [vmem:[#allocation58_spill] sm:$0xff] %v15955_v32  ;;  %v15959_v25 = vpop.f32.mrf.mxu0 }
 0x41d   : > { %v15957_v62 = vpop.f32.mrf.mxu1  ;;  %17382 = vst [vmem:[#allocation15_spill] sm:$0xff] %v15959_v25 }
 0x41e   : > { %17381 = vst [vmem:[#allocation10_spill] sm:$0xff] %v15957_v62  ;;  %v15961_v2 = vpop.f32.mrf.mxu0 }
 0x41f   : > { %v10418_v39 = vpop.f32.mrf.mxu1  ;;  %17383 = vst [vmem:[#allocation76_spill] sm:$0xff] %v15961_v2 }
 0x420   : > { %v15963_v11 = vpop.f32.mrf.mxu0 }
 0x421   : > { %v7937_v42 = vpop.f32.mrf.mxu1  ;;  %17384 = vst [vmem:[#allocation46_spill] sm:$0xff] %v15963_v11  ;;  %v7452_v11 = vadd.f32 %v15895_v53, %v15870_v33  ;;  %v7458_v33 = vadd.f32 %v15905_v17, %v15877_v37 }
 0x422   : > { %v15965_v59 = vpop.f32.mrf.mxu0 }
 0x423   : > { %v10419_v63 = vpop.f32.mrf.mxu1  ;;  %17385 = vst [vmem:[#allocation34_spill] sm:$0xff] %v15965_v59  ;;  %v7587_v59 = vadd.f32 %v10376_v40, %v7454_v5  ;;  %v7585_v9 = vadd.f32 %v7538_v20, %v7452_v11  ;;  %v7591_v41 = vadd.f32 %v15915_v27, %v7458_v33 }
 0x424   : > { %v15967_v56 = vpop.f32.mrf.mxu0 }
 0x425   : > { %v7940_v45 = vpop.f32.mrf.mxu1  ;;  %17386 = vst [vmem:[#allocation45_spill] sm:$0xff] %v15967_v56  ;;  %v7455_v56 = vadd.f32 %v15899_v0, %v15873_v61  ;;  %v7720_v21 = vadd.f32 %v10390_v10, %v7587_v59  ;;  %v7586_v61 = vadd.f32 %v15911_v57, %v7453_v51  ;;  %v7459_v57 = vadd.f32 %v15909_v31, %v15884_v34 }
 0x427   : > { %v10422_v44 = vpop.f32.mrf.mxu1  ;;  %v7588_v15 = vadd.f32 %v10377_v18, %v7455_v56  ;;  %v7853_v47 = vadd.f32 %v10404_v50, %v7720_v21  ;;  %v7719_v18 = vadd.f32 %v7674_v23, %v7586_v61  ;;  %v7457_v23 = vadd.f32 %v15913_v43, %v15886_v36  ;;  %v17395_v61 = vld [vmem:[#allocation6_spill] sm:$0xff] }
 0x428   : > { %v10432_v24 = vpop.f32.mrf.mxu0 }
 0x429   : > { %v15969_v52 = vpop.f32.mrf.mxu1  ;;  %v7721_v0 = vadd.f32 %v10391_v12, %v7588_v15  ;;  %v7986_v40 = vadd.f32 %v10418_v39, %v7853_v47  ;;  %v7724_v12 = vadd.f32 %v10394_v35, %v7591_v41  ;;  %v7852_v50 = vadd.f32 %v7807_v26, %v7719_v18 }
 0x42a   : > { %17387 = vst [vmem:[#allocation63_spill] sm:$0xff] %v15969_v52  ;;  %v8070_v32 = vpop.f32.mrf.mxu0  ;;  %v7590_v36 = vadd.f32 %v15927_v14, %v7457_v23  ;;  %v17391_v14 = vld [vmem:[#allocation31_spill] sm:$0xff] }
 0x42b   : > { %v15971_v62 = vpop.f32.mrf.mxu1  ;;  %v8119_v37 = vadd.f32 %v10432_v24, %v7986_v40  ;;  %v7592_v24 = vadd.f32 %v15923_v22, %v7459_v57  ;;  %v7857_v34 = vadd.f32 %v15945_v60, %v7724_v12  ;;  %v17402_v12 = vld [vmem:[#allocation53_spill] sm:$0xff] }
 0x42c   : > { %17388 = vst [vmem:[#allocation17_spill] sm:$0xff] %v15971_v62  ;;  %v10433_v2 = vpop.f32.mrf.mxu0 }
 0x42d   : > { %v15975_v25 = vpop.f32.mrf.mxu1  ;;  %v7725_v43 = vadd.f32 %v15941_v29, %v7592_v24  ;;  %v7990_v60 = vadd.f32 %v10422_v44, %v7857_v34  ;;  %v7723_v29 = vadd.f32 %v17391_v14, %v7590_v36  ;;  %v17406_v24 = vld [vmem:[#allocation76_spill] sm:$0xff]  ;;  %v17413_v14 = vld [vmem:[#allocation10_spill] sm:$0xff] }
 0x42e   : > { %17389 = vst [vmem:[#allocation25_spill] sm:$0xff] %v15975_v25  ;;  %v8073_v6 = vpop.f32.mrf.mxu0  ;;  %v7718_v25 = vadd.f32 %v7671_v58, %v7585_v9  ;;  %v7854_v9 = vadd.f32 %v10405_v49, %v7721_v0  ;;  %v7589_v58 = vadd.f32 %v15919_v3, %v7456_v4  ;;  %v7985_v3 = vadd.f32 %v7940_v45, %v7852_v50  ;;  %v17396_v0 = vld [vmem:[#allocation7_spill] sm:$0xff] }
 0x42f   : > { %v15979_v46 = vpop.f32.mrf.mxu1  ;;  %v17399_v4 = vld [vmem:[#allocation15_spill] sm:$0xff] }
 0x430   : > { %v7851_v5 = vadd.f32 %v7804_v30, %v7718_v25  ;;  %v7987_v30 = vadd.f32 %v10419_v63, %v7854_v9  ;;  %v7722_v49 = vadd.f32 %v15939_v7, %v7589_v58  ;;  %v7462_v25 = vadd.f32 %v15917_v13, %v15888_v19  ;;  %v17392_v63 = vld [vmem:[#allocation70_spill] sm:$0xff] }
 0x431   : > { %v15983_v62 = vpop.f32.mrf.mxu1  ;;  %v8118_v39 = vadd.f32 %v8073_v6, %v7985_v3  ;;  %v7460_v19 = vadd.f32 %v15921_v38, %v15893_v54  ;;  %v17393_v44 = vld [vmem:[#allocation63_spill] sm:$0xff]  ;;  %v7463_v54 = vadd.f32 %v17396_v0, %v17395_v61  ;;  %v17397_v38 = vld [vmem:[#allocation32_spill] sm:$0xff]  ;;  %v7856_v41 = vadd.f32 %v17399_v4, %v7723_v29 }
 0x432   : > { %v10436_v52 = vpop.f32.mrf.mxu0  ;;  %v7984_v10 = vadd.f32 %v7937_v42, %v7851_v5  ;;  %v8120_v35 = vadd.f32 %v10433_v2, %v7987_v30  ;;  %v7855_v22 = vadd.f32 %v15949_v48, %v7722_v49  ;;  %v7595_v13 = vadd.f32 %v15931_v1, %v7462_v25  ;;  %v17398_v5 = vld [vmem:[#allocation26_spill] sm:$0xff]  ;;  %v17404_v30 = vld [vmem:[#allocation64_spill] sm:$0xff]  ;;  %v17409_v25 = vld [vmem:[#allocation69_spill] sm:$0xff] }
 0x433   : > { %v15991_v53 = vpop.f32.mrf.mxu1  ;;  %v7858_v48 = vadd.f32 %v17392_v63, %v7725_v43  ;;  %v8123_v45 = vadd.f32 %v10436_v52, %v7990_v60  ;;  %v7593_v1 = vadd.f32 %v17397_v38, %v7460_v19  ;;  %v17400_v9 = vld [vmem:[#allocation17_spill] sm:$0xff]  ;;  %v17410_v43 = vld [vmem:[#allocation58_spill] sm:$0xff] }
 0x434   : > { %v15987_v16 = vpop.f32.mrf.mxu0  ;;  %v8117_v8 = vadd.f32 %v8070_v32, %v7984_v10  ;;  %v7988_v6 = vadd.f32 %v17393_v44, %v7855_v22  ;;  %v7728_v40 = vadd.f32 %v17398_v5, %v7595_v13  ;;  %v17414_v63 = vld [vmem:[#allocation34_spill] sm:$0xff] }
 0x435   : > { %v15999_v21 = vpop.f32.mrf.mxu1  ;;  %v7991_v10 = vadd.f32 %v17400_v9, %v7858_v48 }
 0x436   : > { %v15994_v20 = vpop.f32.mrf.mxu0  ;;  %v8121_v52 = vadd.f32 %v15987_v16, %v7988_v6  ;;  %v7861_v49 = vadd.f32 %v17406_v24, %v7728_v40 }
 0x437   : > { %v8124_v3 = vadd.f32 %v15994_v20, %v7991_v10 }
 0x438   : > { %v16001_v17 = vpop.f32.mrf.mxu0 }
 0x43a   : > { %v10446_v56 = vpop.f32.mrf.mxu1  ;;  %v16006_v27 = vpop.f32.mrf.mxu0 }
 0x43b   : > { %v8252_v28 = vadd.f32 %v10446_v56, %v8119_v37  ;;  %v17403_v56 = vld [vmem:[#allocation48_spill] sm:$0xff] }
 0x43c   : > { %v8203_v31 = vpop.f32.mrf.mxu1  ;;  %v16014_v32 = vpop.f32.mrf.mxu0  ;;  %v7461_v50 = vadd.f32 %v17403_v56, %v17402_v12 }
 0x43d   : > { %v8271_v26 = vadd.f32 %v15765_v55, %v8252_v28  ;;  %v8250_v47 = vadd.f32 %v8203_v31, %v8117_v8  ;;  %v7596_v8 = vadd.f32 %v17404_v30, %v7463_v54  ;;  %v17405_v28 = vld [vmem:[#allocation56_spill] sm:$0xff]  ;;  %v17407_v31 = vld [vmem:[#allocation25_spill] sm:$0xff] }
 0x43e   : > { %v10447_v7 = vpop.f32.mrf.mxu1  ;;  %v16024_v11 = vpop.f32.mrf.mxu0  ;;  %v7726_v23 = vadd.f32 %v17405_v28, %v7593_v1  ;;  %v7989_v16 = vadd.f32 %v17407_v31, %v7856_v41  ;;  %v7594_v36 = vadd.f32 %v17409_v25, %v7461_v50 }
 0x43f   : > { %8283 = vst.msk [vmem:[%s15776_s29 + $0x70] sm:$0xff] %vm17390_vm7, %v8271_v26  ;;  %v8269_v2 = vadd.f32 %v15765_v55, %v8250_v47  ;;  %v8253_v42 = vadd.f32 %v10447_v7, %v8120_v35  ;;  %v7729_v22 = vadd.f32 %v17410_v43, %v7596_v8  ;;  %v17411_v7 = vld [vmem:[#allocation46_spill] sm:$0xff]  ;;  %vm17473_vm7 = vmmov %vm17452_vm0 }
 0x440   : > { %v8206_v59 = vpop.f32.mrf.mxu1  ;;  %v8105_v33 = vpop.f32.mrf.mxu0  ;;  %v7859_v60 = vadd.f32 %v17411_v7, %v7726_v23  ;;  %v7727_v29 = vadd.f32 %v17413_v14, %v7594_v36 }
 0x441   : > { %8281 = vst.msk [vmem:[%s15776_s29 + $0x60] sm:$0xff] %vm17394_vm12, %v8269_v2  ;;  %v8272_v51 = vadd.f32 %v15765_v55, %v8253_v42  ;;  %v8251_v15 = vadd.f32 %v8206_v59, %v8118_v39  ;;  %v7994_v2 = vadd.f32 %v15979_v46, %v7861_v49  ;;  %v8122_v42 = vadd.f32 %v16001_v17, %v7989_v16  ;;  %vm17476_vm12 = vmmov %vm17452_vm0 }
 0x442   : > { %v10450_v18 = vpop.f32.mrf.mxu1  ;;  %v16045_v58 = vpop.f32.mrf.mxu0  ;;  %v7862_v48 = vadd.f32 %v17414_v63, %v7729_v22  ;;  %v7992_v44 = vadd.f32 %v15983_v62, %v7859_v60 }
 0x443   : > { %8284 = vst.msk [vmem:[%s15776_s29 + $0x78] sm:$0xff] %vm17401_vm9, %v8272_v51  ;;  %v8270_v37 = vadd.f32 %v15765_v55, %v8251_v15  ;;  %v8256_v57 = vadd.f32 %v10450_v18, %v8123_v45  ;;  %v8127_v6 = vadd.f32 %v16006_v27, %v7994_v2  ;;  %v17416_v51 = vld [vmem:[#allocation45_spill] sm:$0xff]  ;;  %vm17478_vm9 = vmmov %vm17452_vm0 }
 0x444   : > { %v8219_v34 = vpop.f32.mrf.mxu1  ;;  %v16057_v47 = vpop.f32.mrf.mxu0  ;;  %v7860_v15 = vadd.f32 %v17416_v51, %v7727_v29  ;;  %v7995_v0 = vadd.f32 %v15991_v53, %v7862_v48  ;;  %v8125_v54 = vadd.f32 %v16014_v32, %v7992_v44 }
 0x445   : > { %8282 = vst.msk [vmem:[%s15776_s29 + $0x68] sm:$0xff] %vm17408_vm3, %v8270_v37  ;;  %v8275_v35 = vadd.f32 %v15765_v55, %v8256_v57  ;;  %v8254_v26 = vadd.f32 %v8219_v34, %v8121_v52  ;;  %vm17479_vm3 = vmmov %vm17452_vm0 }
 0x446   : > { %v10451_v39 = vpop.f32.mrf.mxu1  ;;  %v16067_v13 = vpop.f32.mrf.mxu0  ;;  %v7993_v5 = vadd.f32 %v15999_v21, %v7860_v15  ;;  %v8128_v40 = vadd.f32 %v16024_v11, %v7995_v0 }
 0x447   : > { %8287 = vst.msk [vmem:[%s15776_s29 + $0x90] sm:$0xff] %vm17412_vm14, %v8275_v35  ;;  %v8273_v20 = vadd.f32 %v15765_v55, %v8254_v26  ;;  %v8257_v19 = vadd.f32 %v10451_v39, %v8124_v3  ;;  %vm17480_vm14 = vmmov %vm17452_vm0 }
 0x448   : > { %v8222_v59 = vpop.f32.mrf.mxu1  ;;  %v16076_v45 = vpop.f32.mrf.mxu0  ;;  %v8126_v18 = vadd.f32 %v8105_v33, %v7993_v5 }
 0x449   : > { %8285 = vst.msk [vmem:[%s15776_s29 + $0x80] sm:$0xff] %vm17415_vm11, %v8273_v20  ;;  %v8276_v46 = vadd.f32 %v15765_v55, %v8257_v19  ;;  %v8255_v17 = vadd.f32 %v8222_v59, %v8122_v42  ;;  %vm17481_vm11 = vmmov %vm17452_vm0 }
 0x44a   : > { %v10454_v61 = vpop.f32.mrf.mxu1  ;;  %v16084_v38 = vpop.f32.mrf.mxu0 }
 0x44b   : > { %8288 = vst.msk [vmem:[%s15776_s29 + $0x98] sm:$0xff] %vm17360_vm1, %v8276_v46  ;;  %v8274_v62 = vadd.f32 %v15765_v55, %v8255_v17  ;;  %v8260_v27 = vadd.f32 %v10454_v61, %v8127_v6  ;;  %vm17482_vm1 = vmmov %vm17452_vm0 }
 0x44c   : > { %v8235_v1 = vpop.f32.mrf.mxu1  ;;  %v16091_v32 = vpop.f32.mrf.mxu0 }
 0x44d   : > { %8286 = vst.msk [vmem:[%s15776_s29 + $0x88] sm:$0xff] %vm17417_vm5, %v8274_v62  ;;  %v8279_v53 = vadd.f32 %v15765_v55, %v8260_v27  ;;  %v8258_v4 = vadd.f32 %v8235_v1, %v8125_v54  ;;  %vm17483_vm5 = vmmov %vm17452_vm0 }
 0x44e   : > { %v10455_v41 = vpop.f32.mrf.mxu1  ;;  %v16096_v52 = vpop.f32.mrf.mxu0 }
 0x44f   : > { %8291 = vst.msk [vmem:[%s15776_s29 + $0xb0] sm:$0xff] %vm17418_vm15, %v8279_v53  ;;  %v8277_v9 = vadd.f32 %v15765_v55, %v8258_v4  ;;  %v8261_v10 = vadd.f32 %v10455_v41, %v8128_v40 }
 0x450   : > { %v8238_v21 = vpop.f32.mrf.mxu1  ;;  %v16101_v57 = vpop.f32.mrf.mxu0 }
 0x451   : > { %8289 = vst.msk [vmem:[%s15776_s29 + $0xa0] sm:$0xff] %vm17419_vm10, %v8277_v9  ;;  %v8280_v11 = vadd.f32 %v15765_v55, %v8261_v10  ;;  %v8259_v37 = vadd.f32 %v8238_v21, %v8126_v18 }
 0x452   : > { %v16103_v12 = vpop.f32.mrf.mxu1  ;;  %v16108_v56 = vpop.f32.mrf.mxu0 }
 0x453   : > { %8292 = vst.msk [vmem:[%s15776_s29 + $0xb8] sm:$0xff] %vm17420_vm4, %v8280_v11  ;;  %v8278_v33 = vadd.f32 %v15765_v55, %v8259_v37 }
 0x454   : > { %v16110_v50 = vpop.f32.mrf.mxu1  ;;  %v16114_v30 = vpop.f32.mrf.mxu0 }
 0x455   : > { %8290 = vst.msk [vmem:[%s15776_s29 + $0xa8] sm:$0xff] %vm17421_vm2, %v8278_v33 }
 0x456   : > { %v16116_v8 = vpop.f32.mrf.mxu1  ;;  %v16118_v28 = vpop.f32.mrf.mxu0 }
 0x458   : > { %v16120_v23 = vpop.f32.mrf.mxu1  ;;  %v16122_v24 = vpop.f32.mrf.mxu0 }
 0x45a   : > { %v16124_v49 = vpop.f32.mrf.mxu1  ;;  %v16126_v34 = vpop.f32.mrf.mxu0 }
 0x45c   : > { %v16128_v55 = vpop.f32.mrf.mxu1  ;;  %v16130_v31 = vpop.f32.mrf.mxu0 }
 0x45e   : > { %v16132_v16 = vpop.f32.mrf.mxu1  ;;  %v16134_v3 = vpop.f32.mrf.mxu0 }
 0x460   : > { %v16136_v35 = vpop.f32.mrf.mxu1  ;;  %v16138_v26 = vpop.f32.mrf.mxu0 }
 0x462   : > { %v16140_v25 = vpop.f32.mrf.mxu1  ;;  %v16142_v36 = vpop.f32.mrf.mxu0 }
 0x464   : > { %v16144_v43 = vpop.f32.mrf.mxu1  ;;  %v16146_v22 = vpop.f32.mrf.mxu0 }
 0x466   : > { %v16148_v7 = vpop.f32.mrf.mxu1  ;;  %v16150_v60 = vpop.f32.mrf.mxu0 }
 0x468   : > { %v16152_v39 = vpop.f32.mrf.mxu1  ;;  %v16154_v2 = vpop.f32.mrf.mxu0 }
 0x46a   : > { %v10502_v42 = vpop.f32.mrf.mxu1  ;;  %v16156_v20 = vpop.f32.mrf.mxu0 }
 0x46b   : > { %17422 = vst [vmem:[#allocation5_spill] sm:$0xff] %v16156_v20 }
 0x46c   : > { %v8742_v19 = vpop.f32.mrf.mxu1  ;;  %v16158_v14 = vpop.f32.mrf.mxu0 }
 0x46d   : > { %17423 = vst [vmem:[#allocation73_spill] sm:$0xff] %v16158_v14 }
 0x46e   : > { %v10503_v29 = vpop.f32.mrf.mxu1  ;;  %v16160_v63 = vpop.f32.mrf.mxu0 }
 0x46f   : > { %17424 = vst [vmem:[#allocation8_spill] sm:$0xff] %v16160_v63 }
 0x470   : > { %v16162_v48 = vpop.f32.mrf.mxu1  ;;  %v16164_v59 = vpop.f32.mrf.mxu0 }
 0x471   : > { %17425 = vst [vmem:[#allocation4_spill] sm:$0xff] %v16164_v59 }
 0x472   : > { %v16166_v44 = vpop.f32.mrf.mxu1  ;;  %v10516_v6 = vpop.f32.mrf.mxu0 }
 0x474   : > { %v16168_v46 = vpop.f32.mrf.mxu1  ;;  %v8875_v17 = vpop.f32.mrf.mxu0 }
 0x476   : > { %v16170_v51 = vpop.f32.mrf.mxu1  ;;  %v10517_v15 = vpop.f32.mrf.mxu0 }
 0x478   : > { %v16172_v61 = vpop.f32.mrf.mxu1  ;;  %v16174_v0 = vpop.f32.mrf.mxu0 }
 0x479   : > { %17426 = vst [vmem:[#allocation77_spill] sm:$0xff] %v16172_v61 }
 0x47a   : > { %v16176_v54 = vpop.f32.mrf.mxu1  ;;  %v16178_v62 = vpop.f32.mrf.mxu0 }
 0x47b   : > { %17427 = vst [vmem:[#allocation82_spill] sm:$0xff] %v16176_v54 }
 0x47c   : > { %v16180_v27 = vpop.f32.mrf.mxu1  ;;  %v16182_v1 = vpop.f32.mrf.mxu0 }
 0x47d   : > { %17428 = vst [vmem:[#allocation22_spill] sm:$0xff] %v16180_v27 }
 0x47e   : > { %v16184_v5 = vpop.f32.mrf.mxu1  ;;  %v16186_v40 = vpop.f32.mrf.mxu0 }
 0x47f   : > { %17429 = vst [vmem:[#allocation81_spill] sm:$0xff] %v16184_v5  ;;  %17430 = vst [vmem:[#allocation3_spill] sm:$0xff] %v16186_v40  ;;  %v8497_v40 = vadd.f32 %v16103_v12, %v16045_v58 }
 0x480   : > { %v16188_v53 = vpop.f32.mrf.mxu1  ;;  %v16190_v4 = vpop.f32.mrf.mxu0 }
 0x481   : > { %17431 = vst [vmem:[#allocation65_spill] sm:$0xff] %v16188_v53  ;;  %17432 = vst [vmem:[#allocation75_spill] sm:$0xff] %v16190_v4 }
 0x482   : > { %v10530_v41 = vpop.f32.mrf.mxu1  ;;  %v16192_v18 = vpop.f32.mrf.mxu0 }
 0x483   : > { %17433 = vst [vmem:[#allocation52_spill] sm:$0xff] %v16192_v18 }
 0x484   : > { %v9008_v9 = vpop.f32.mrf.mxu1  ;;  %v16194_v10 = vpop.f32.mrf.mxu0 }
 0x485   : > { %17434 = vst [vmem:[#allocation68_spill] sm:$0xff] %v16194_v10 }
 0x486   : > { %v10531_v21 = vpop.f32.mrf.mxu1  ;;  %v16196_v11 = vpop.f32.mrf.mxu0 }
 0x487   : > { %17435 = vst [vmem:[#allocation49_spill] sm:$0xff] %v16196_v11 }
 0x488   : > { %v16198_v37 = vpop.f32.mrf.mxu1  ;;  %v16200_v33 = vpop.f32.mrf.mxu0 }
 0x489   : > { %17436 = vst [vmem:[#allocation62_spill] sm:$0xff] %v16200_v33 }
 0x48a   : > { %v16202_v5 = vpop.f32.mrf.mxu1  ;;  %v10544_v59 = vpop.f32.mrf.mxu0 }
 0x48c   : > { %v16204_v27 = vpop.f32.mrf.mxu1  ;;  %v9141_v53 = vpop.f32.mrf.mxu0 }
 0x48d   : > { %17437 = vst [vmem:[#allocation74_spill] sm:$0xff] %v16204_v27 }
 0x48e   : > { %v16206_v63 = vpop.f32.mrf.mxu1  ;;  %v10545_v4 = vpop.f32.mrf.mxu0 }
 0x48f   : > { %17438 = vst [vmem:[#allocation13_spill] sm:$0xff] %v16206_v63  ;;  %v8658_v63 = vadd.f32 %v16126_v34, %v8497_v40 }
 0x490   : > { %v16208_v18 = vpop.f32.mrf.mxu1  ;;  %v16210_v54 = vpop.f32.mrf.mxu0 }
 0x491   : > { %17439 = vst [vmem:[#allocation55_spill] sm:$0xff] %v16208_v18  ;;  %v8489_v18 = vadd.f32 %v16110_v50, %v16057_v47 }
 0x492   : > { %v16212_v10 = vpop.f32.mrf.mxu1  ;;  %v16214_v11 = vpop.f32.mrf.mxu0 }
 0x493   : > { %17440 = vst [vmem:[#allocation79_spill] sm:$0xff] %v16212_v10  ;;  %17441 = vst [vmem:[#allocation23_spill] sm:$0xff] %v16214_v11  ;;  %v8791_v11 = vadd.f32 %v10502_v42, %v8658_v63 }
 0x494   : > { %v16216_v14 = vpop.f32.mrf.mxu1  ;;  %v16218_v33 = vpop.f32.mrf.mxu0 }
 0x495   : > { %17442 = vst [vmem:[#allocation50_spill] sm:$0xff] %v16216_v14  ;;  %17443 = vst [vmem:[#allocation60_spill] sm:$0xff] %v16218_v33  ;;  %v8500_v14 = vadd.f32 %v16116_v8, %v16067_v13  ;;  %v8656_v33 = vadd.f32 %v16130_v31, %v8489_v18  ;;  %v8924_v34 = vadd.f32 %v10516_v6, %v8791_v11 }
 0x496   : > { %v16222_v27 = vpop.f32.mrf.mxu1  ;;  %v16224_v61 = vpop.f32.mrf.mxu0  ;;  %v8505_v13 = vadd.f32 %v16128_v55, %v16091_v32 }
 0x497   : > { %17444 = vst [vmem:[#allocation66_spill] sm:$0xff] %v16222_v27  ;;  %v8492_v27 = vadd.f32 %v16120_v23, %v16076_v45  ;;  %v8659_v47 = vadd.f32 %v16134_v3, %v8500_v14  ;;  %v8789_v50 = vadd.f32 %v8742_v19, %v8656_v33  ;;  %v9057_v18 = vadd.f32 %v10530_v41, %v8924_v34 }
 0x498   : > { %v16229_v20 = vpop.f32.mrf.mxu1  ;;  %v16231_v10 = vpop.f32.mrf.mxu0  ;;  %v8516_v45 = vadd.f32 %v16132_v16, %v16096_v52  ;;  %v8508_v23 = vadd.f32 %v16136_v35, %v16101_v57  ;;  %v8532_v52 = vadd.f32 %v16148_v7, %v16118_v28  ;;  %v8660_v57 = vadd.f32 %v16146_v22, %v8505_v13  ;;  %v16275_v7 = vld [vmem:[%s16356_s4] ss:$0 sm:$0xff] }
 0x499   : > { %17445 = vst [vmem:[#allocation90_spill] sm:$0xff] %v16229_v20  ;;  %v8513_v20 = vadd.f32 %v16124_v49, %v16084_v38  ;;  %v8657_v31 = vadd.f32 %v16138_v26, %v8492_v27  ;;  %v8792_v42 = vadd.f32 %v10503_v29, %v8659_v47  ;;  %v8922_v63 = vadd.f32 %v8875_v17, %v8789_v50  ;;  %v17453_v13 = vld [vmem:[#allocation73_spill] sm:$0xff] }
 0x49a   : > { %v10558_v58 = vpop.f32.mrf.mxu1  ;;  %v16236_v12 = vpop.f32.mrf.mxu0  ;;  %v8529_v38 = vadd.f32 %v16140_v25, %v16108_v56  ;;  %v9190_v19 = vadd.f32 %v10544_v59, %v9057_v18  ;;  %v8521_v29 = vadd.f32 %v16144_v43, %v16114_v30  ;;  %v8524_v59 = vadd.f32 %v16152_v39, %v16122_v24  ;;  %v17451_v50 = vld [vmem:[#allocation23_spill] sm:$0xff] }
 0x49b   : > { %17446 = vst [vmem:[#allocation89_spill] sm:$0xff] %v16236_v12  ;;  %v8662_v49 = vadd.f32 %v16142_v36, %v8513_v20  ;;  %v8790_v55 = vadd.f32 %v16162_v48, %v8657_v31  ;;  %v8925_v3 = vadd.f32 %v10517_v15, %v8792_v42  ;;  %v9055_v26 = vadd.f32 %v9008_v9, %v8922_v63  ;;  %v17454_v42 = vld [vmem:[#allocation82_spill] sm:$0xff]  ;;  %v17455_v18 = vld [vmem:[#allocation75_spill] sm:$0xff] }
 0x49c   : > { %v9274_v40 = vpop.f32.mrf.mxu1  ;;  %v16245_v8 = vpop.f32.mrf.mxu0  ;;  %v9323_v20 = vadd.f32 %v10558_v58, %v9190_v19  ;;  %v8663_v30 = vadd.f32 %v16150_v60, %v8516_v45  ;;  %v8793_v43 = vadd.f32 %v16168_v46, %v8660_v57  ;;  %v8661_v24 = vadd.f32 %v16154_v2, %v8508_v23  ;;  %v17449_v2 = vld [vmem:[#allocation3_spill] sm:$0xff]  ;;  %v17456_v23 = vld [vmem:[#allocation13_spill] sm:$0xff] }
 0x49d   : > { %v8795_v56 = vadd.f32 %v16166_v44, %v8662_v49  ;;  %v8923_v35 = vadd.f32 %v16174_v0, %v8790_v55  ;;  %v9058_v25 = vadd.f32 %v10531_v21, %v8925_v3  ;;  %v9188_v36 = vadd.f32 %v9141_v53, %v9055_v26  ;;  %v17447_v21 = vld [vmem:[#allocation5_spill] sm:$0xff]  ;;  %v17457_v55 = vld [vmem:[#allocation60_spill] sm:$0xff] }
 0x49e   : > { %v10559_v12 = vpop.f32.mrf.mxu1  ;;  %v16255_v32 = vpop.f32.mrf.mxu0  ;;  %v8796_v60 = vadd.f32 %v16170_v51, %v8663_v30  ;;  %v8926_v39 = vadd.f32 %v16182_v1, %v8793_v43  ;;  %v8666_v11 = vadd.f32 %v17447_v21, %v8529_v38  ;;  %v17450_v51 = vld [vmem:[#allocation74_spill] sm:$0xff]  ;;  %v8664_v31 = vadd.f32 %v17453_v13, %v8521_v29  ;;  %v17462_v30 = vld [vmem:[#allocation55_spill] sm:$0xff]  ;;  %v17469_v21 = vld [vmem:[#allocation65_spill] sm:$0xff] }
 0x49f   : > { %v8928_v28 = vadd.f32 %v16178_v62, %v8795_v56  ;;  %v9056_v44 = vadd.f32 %v16198_v37, %v8923_v35  ;;  %v9191_v6 = vadd.f32 %v10545_v4, %v9058_v25  ;;  %v9321_v17 = vadd.f32 %v9274_v40, %v9188_v36  ;;  %v17448_v37 = vld [vmem:[#allocation77_spill] sm:$0xff]  ;;  %v17459_v56 = vld [vmem:[#allocation8_spill] sm:$0xff]  ;;  %v17460_v29 = vld [vmem:[#allocation22_spill] sm:$0xff] }
 0x4a0   : > { %v9277_v14 = vpop.f32.mrf.mxu1  ;;  %v16264_v16 = vpop.f32.mrf.mxu0  ;;  %v8794_v33 = vadd.f32 %v17448_v37, %v8661_v24  ;;  %v8929_v58 = vadd.f32 %v17449_v2, %v8796_v60  ;;  %v9059_v47 = vadd.f32 %v17450_v51, %v8926_v39  ;;  %v8799_v63 = vadd.f32 %v17454_v42, %v8666_v11  ;;  %v17461_v36 = vld [vmem:[#allocation52_spill] sm:$0xff]  ;;  %v17465_v24 = vld [vmem:[#allocation81_spill] sm:$0xff] }
 0x4a1   : > { %v9061_v46 = vadd.f32 %v16202_v5, %v8928_v28  ;;  %v9189_v27 = vadd.f32 %v16210_v54, %v9056_v44  ;;  %v9324_v53 = vadd.f32 %v10559_v12, %v9191_v6  ;;  %v8667_v35 = vadd.f32 %v17459_v56, %v8532_v52  ;;  %v17466_v60 = vld [vmem:[#allocation68_spill] sm:$0xff]  ;;  %v17470_v11 = vld [vmem:[#allocation49_spill] sm:$0xff] }
 0x4a2   : > { %v10562_v48 = vpop.f32.mrf.mxu1  ;;  %v10572_v22 = vpop.f32.mrf.mxu0  ;;  %v8927_v45 = vadd.f32 %v17455_v18, %v8794_v33  ;;  %v9062_v38 = vadd.f32 %v17456_v23, %v8929_v58  ;;  %v9192_v3 = vadd.f32 %v17457_v55, %v9059_v47  ;;  %v8797_v25 = vadd.f32 %v17460_v29, %v8664_v31  ;;  %v17471_v33 = vld [vmem:[#allocation50_spill] sm:$0xff]  ;;  %v17472_v51 = vld [vmem:[#allocation89_spill] sm:$0xff] }
 0x4a3   : > { %v9456_v0 = vadd.f32 %v10572_v22, %v9323_v20  ;;  %v9194_v5 = vadd.f32 %v17451_v50, %v9061_v46  ;;  %v9322_v34 = vadd.f32 %v9277_v14, %v9189_v27  ;;  %v8932_v20 = vadd.f32 %v17461_v36, %v8799_v63  ;;  %v17467_v46 = vld [vmem:[#allocation79_spill] sm:$0xff]  ;;  %v17474_v50 = vld [vmem:[#allocation62_spill] sm:$0xff] }
 0x4a4   : > { %v9290_v15 = vpop.f32.mrf.mxu1  ;;  %v9407_v62 = vpop.f32.mrf.mxu0  ;;  %v9060_v43 = vadd.f32 %v17462_v30, %v8927_v45  ;;  %v9195_v22 = vadd.f32 %v16224_v61, %v9062_v38  ;;  %v8800_v52 = vadd.f32 %v17465_v24, %v8667_v35  ;;  %v8930_v39 = vadd.f32 %v17466_v60, %v8797_v25  ;;  %v17477_v18 = vld [vmem:[#allocation90_spill] sm:$0xff] }
 0x4a5   : > { %v9475_v41 = vadd.f32 %v16275_v7, %v9456_v0  ;;  %v9454_v4 = vadd.f32 %v9407_v62, %v9321_v17  ;;  %v9327_v26 = vadd.f32 %v10562_v48, %v9194_v5  ;;  %v9325_v44 = vadd.f32 %v9290_v15, %v9192_v3  ;;  %v17464_v17 = vld [vmem:[#allocation4_spill] sm:$0xff] }
 0x4a6   : > { %v10563_v9 = vpop.f32.mrf.mxu1  ;;  %v10573_v1 = vpop.f32.mrf.mxu0  ;;  %v8665_v0 = vadd.f32 %v17464_v17, %v8524_v59  ;;  %v9065_v62 = vadd.f32 %v17467_v46, %v8932_v20  ;;  %v8933_v37 = vadd.f32 %v17470_v11, %v8800_v52  ;;  %v9063_v2 = vadd.f32 %v17471_v33, %v8930_v39 }
 0x4a7   : > { %9487 = vst.msk [vmem:[%s15776_s29 + $0xd0] sm:$0xff] %vm17452_vm0, %v9475_v41  ;;  %v9473_v54 = vadd.f32 %v16275_v7, %v9454_v4  ;;  %v9457_v40 = vadd.f32 %v10573_v1, %v9324_v53  ;;  %v9193_v41 = vadd.f32 %v16231_v10, %v9060_v43  ;;  %v9328_v61 = vadd.f32 %v10563_v9, %v9195_v22 }
 0x4a8   : > { %v9293_v12 = vpop.f32.mrf.mxu1  ;;  %v9410_v49 = vpop.f32.mrf.mxu0  ;;  %v8798_v59 = vadd.f32 %v17469_v21, %v8665_v0  ;;  %v9198_v47 = vadd.f32 %v17472_v51, %v9065_v62  ;;  %v9196_v31 = vadd.f32 %v16245_v8, %v9063_v2 }
 0x4a9   : > { %9485 = vst.msk [vmem:[%s15776_s29 + $0xc0] sm:$0xff] %vm17458_vm6, %v9473_v54  ;;  %v9476_v19 = vadd.f32 %v16275_v7, %v9457_v40  ;;  %v9455_v57 = vadd.f32 %v9410_v49, %v9322_v34  ;;  %v9326_v1 = vadd.f32 %v9293_v12, %v9193_v41  ;;  %v17475_v34 = vld [vmem:[#allocation66_spill] sm:$0xff] }
 0x4aa   : > { %v10566_v14 = vpop.f32.mrf.mxu1  ;;  %v10576_v28 = vpop.f32.mrf.mxu0  ;;  %v8931_v5 = vadd.f32 %v17474_v50, %v8798_v59  ;;  %v9066_v54 = vadd.f32 %v17475_v34, %v8933_v37 }
 0x4ab   : > { %9488 = vst.msk [vmem:[%s15776_s29 + $0xd8] sm:$0xff] %vm17463_vm13, %v9476_v19  ;;  %v9474_v48 = vadd.f32 %v16275_v7, %v9455_v57  ;;  %v9460_v6 = vadd.f32 %v10576_v28, %v9327_v26  ;;  %v9331_v42 = vadd.f32 %v10566_v14, %v9198_v47 }
 0x4ac   : > { %v9306_v27 = vpop.f32.mrf.mxu1  ;;  %v9423_v53 = vpop.f32.mrf.mxu0  ;;  %v9064_v45 = vadd.f32 %v17477_v18, %v8931_v5  ;;  %v9199_v38 = vadd.f32 %v16255_v32, %v9066_v54 }
 0x4ad   : > { %9486 = vst.msk [vmem:[%s15776_s29 + $0xc8] sm:$0xff] %vm17468_vm8, %v9474_v48  ;;  %v9479_v15 = vadd.f32 %v16275_v7, %v9460_v6  ;;  %v9458_v4 = vadd.f32 %v9423_v53, %v9325_v44  ;;  %v9329_v49 = vadd.f32 %v9306_v27, %v9196_v31 }
 0x4ae   : > { %v10577_v58 = vpop.f32.mrf.mxu0  ;;  %v10567_v40 = vpop.f32.mrf.mxu1  ;;  %v9197_v19 = vadd.f32 %v16264_v16, %v9064_v45 }
 0x4af   : > { %9491 = vst.msk [vmem:[%s15776_s29 + $0xf0] sm:$0xff] %vm17473_vm7, %v9479_v15  ;;  %v9477_v10 = vadd.f32 %v16275_v7, %v9458_v4  ;;  %v9461_v9 = vadd.f32 %v10577_v58, %v9328_v61  ;;  %v9332_v14 = vadd.f32 %v10567_v40, %v9199_v38 }
 0x4b0   : > { %v9426_v13 = vpop.f32.mrf.mxu0  ;;  %v9309_v3 = vpop.f32.mrf.mxu1 }
 0x4b1   : > { %9489 = vst.msk [vmem:[%s15776_s29 + $0xe0] sm:$0xff] %vm17476_vm12, %v9477_v10  ;;  %v9480_v12 = vadd.f32 %v16275_v7, %v9461_v9  ;;  %v9459_v63 = vadd.f32 %v9426_v13, %v9326_v1  ;;  %v9330_v35 = vadd.f32 %v9309_v3, %v9197_v19 }
 0x4b2   : > { %v10580_v23 = vpop.f32.mrf.mxu0 }
 0x4b3   : > { %9492 = vst.msk [vmem:[%s15776_s29 + $0xf8] sm:$0xff] %vm17478_vm9, %v9480_v12  ;;  %v9478_v55 = vadd.f32 %v16275_v7, %v9459_v63  ;;  %v9464_v8 = vadd.f32 %v10580_v23, %v9331_v42 }
 0x4b4   : > { %v9439_v26 = vpop.f32.mrf.mxu0 }
 0x4b5   : > { %9490 = vst.msk [vmem:[%s15776_s29 + $0xe8] sm:$0xff] %vm17479_vm3, %v9478_v55  ;;  %v9483_v57 = vadd.f32 %v16275_v7, %v9464_v8  ;;  %v9462_v56 = vadd.f32 %v9439_v26, %v9329_v49 }
 0x4b6   : > { %v10581_v32 = vpop.f32.mrf.mxu0 }
 0x4b7   : > { %9495 = vst.msk [vmem:[%s15776_s29 + $0x110] sm:$0xff] %vm17480_vm14, %v9483_v57  ;;  %v9481_v29 = vadd.f32 %v16275_v7, %v9462_v56  ;;  %v9465_v25 = vadd.f32 %v10581_v32, %v9332_v14 }
 0x4b8   : > { %v9442_v36 = vpop.f32.mrf.mxu0 }
 0x4b9   : > { %9493 = vst.msk [vmem:[%s15776_s29 + $0x100] sm:$0xff] %vm17481_vm11, %v9481_v29  ;;  %v9484_v20 = vadd.f32 %v16275_v7, %v9465_v25  ;;  %v9463_v16 = vadd.f32 %v9442_v36, %v9330_v35 }
 0x4bb   : > { %9496 = vst.msk [vmem:[%s15776_s29 + $0x118] sm:$0xff] %vm17482_vm1, %v9484_v20  ;;  %v9482_v30 = vadd.f32 %v16275_v7, %v9463_v16 }
 0x4bd   : > { %9494 = vst.msk [vmem:[%s15776_s29 + $0x108] sm:$0xff] %vm17483_vm5, %v9482_v30 }
 0x4be PF: > { %s17_s21 = sadd.s32 1, %s10701_s21  }
 0x4bf   : > { %p14_p4 = scmp.ge.s32.totalorder %s17_s21, 4  }
 0x4c1   :  { %16 = sbr.rel (!%p14_p4) target bundleno = 1 (0x1), region = 98 }

</bundles_post_ra>
